<compile_context>
chip_gen: v7x
topology: tpu7x:2x2x1
jax: 0.10.0
libtpu: 0.0.40
codegen_flags: <defaults>
</compile_context>

<pallas_src>
import functools
from dataclasses import dataclass

import numpy as np
import jax
import jax.numpy as jnp
from jax.experimental import pallas as pl
from jax.experimental.pallas import tpu as pltpu


# ----------------------------- config ---------------------------------------

@dataclass
class SegFormerConfig:
    in_channels: int = 3
    image_size: int = 32
    stage_channels_out: tuple = (16, 32, 64)
    stage_mlp_hidden: tuple = (32, 64, 128)
    stage_attn_head_dim: tuple = (16, 16, 16)
    attn_reduction: tuple = (2, 2, 1)
    overlap_patch_sizes: tuple = (3, 3, 3)
    overlap_stride_sizes: tuple = (4, 2, 2)
    stage_num_blocks: tuple = (1, 1, 1)
    # stage_drop_paths are all 0.0 -> StochasticDepth is the identity.
    decoder_out_channels: int = 32
    num_classes: int = 10


def _pick_tile(M, max_tile=512):
    """Largest multiple-of-8 tile that divides M; prefer >=2 tiles (megacore)."""
    if M % 8 != 0:
        return M
    tm = min(M, max_tile)
    while M % tm != 0:
        tm -= 8
    if tm == M and M >= 16 and (M // 2) % 8 == 0:
        tm = M // 2
    return tm


def stage_geometry(cfg):
    H = W = cfg.image_size
    geoms = []
    for s in range(len(cfg.stage_channels_out)):
        k, st = cfg.overlap_patch_sizes[s], cfg.overlap_stride_sizes[s]
        pad = k // 2
        H = (H + 2 * pad - k) // st + 1
        W = (W + 2 * pad - k) // st + 1
        geoms.append((H, W))
    return geoms


# ----------------------------- in-kernel helpers ------------------------------

def _ln(x, g, b, eps):
    m = jnp.mean(x, axis=-1, keepdims=True)
    v = jnp.mean(jnp.square(x - m), axis=-1, keepdims=True)
    return (x - m) * jax.lax.rsqrt(v + eps) * g + b


def _gelu(x):
    # TODO(synk): exact-erf nn.GELU replaced by the tanh approximation (EUP
    # tanh, ~1e-3 abs deviation) per the performance review.
    c = 0.7978845608028654
    return 0.5 * x * (1.0 + jnp.tanh(c * (x + 0.044715 * x * x * x)))


def _shift_rows(x, s):
    """shifted[t] = x[t+s] with zero fill outside [0, L)."""
    if s == 0:
        return x
    L, C = x.shape
    if abs(s) >= L:
        return jnp.zeros_like(x)
    z = jnp.zeros((abs(s), C), dtype=x.dtype)
    if s > 0:
        return jnp.concatenate([x[s:, :], z], axis=0)
    return jnp.concatenate([z, x[:s, :]], axis=0)


# ----------------------------- fused transformer-block kernel -----------------

def _block_kernel(x_ref, ln1g_ref, ln1b_ref, wq_ref, rw_ref, rlg_ref, rlb_ref,
                  wkv_ref, wo_ref, bo_ref, ln2g_ref, ln2b_ref, w1_ref, b1_ref,
                  dwv_ref, bdw_ref, w3_ref, b3_ref, *rest,
                  nh, hd, C, rr, Lr, W, mult, has_sel, final_ln, eps):
    f32, bf16 = jnp.float32, jnp.bfloat16
    idx = 0
    sel_ref = None
    if has_sel:
        sel_ref = rest[idx]
        idx += 1
    if final_ln:
        fg_ref, fb_ref = rest[idx], rest[idx + 1]
        idx += 2
    o_ref = rest[idx]

    x = x_ref[0].astype(f32)                                   # (L, C)
    L = x.shape[0]

    # -------- attention branch: x + Attn(LN1(x)) --------------------------
    xn = _ln(x, ln1g_ref[...], ln1b_ref[...], eps)
    xnb = xn.astype(bf16)
    q = jnp.dot(xnb, wq_ref[...], preferred_element_type=f32)  # qk scale folded

    # spatial-reduction conv (kernel == stride): gather the r*r strided token
    # sets with 0/1 selection matmuls (MXU), conv == rr stacked matmuls.
    if has_sel:
        red = jnp.zeros((Lr, C), f32)
        for p in range(rr):
            xp_p = jnp.dot(sel_ref[p], xnb, preferred_element_type=f32)
            red = red + jnp.dot(xp_p.astype(bf16),
                                rw_ref[p * C:(p + 1) * C, :],
                                preferred_element_type=f32)
    else:
        red = jnp.dot(xnb, rw_ref[...], preferred_element_type=f32)
    red = _ln(red, rlg_ref[...], rlb_ref[...], eps)
    kv = jnp.dot(red.astype(bf16), wkv_ref[...], preferred_element_type=f32)

    # per-head attention; output projection folded per head (no concatenate)
    attn = jnp.zeros((L, C), f32)
    for h in range(nh):
        qh = q[:, h * hd:(h + 1) * hd].astype(bf16)
        kh = kv[:, h * hd:(h + 1) * hd].astype(bf16)
        vh = kv[:, C + h * hd:C + (h + 1) * hd].astype(bf16)
        s = jax.lax.dot_general(qh, kh, (((1,), (1,)), ((), ())),
                                preferred_element_type=f32)     # (L, Lr)
        s = s - jnp.max(s, axis=-1, keepdims=True)
        e = jnp.exp(s)
        pattn = e * pl.reciprocal(jnp.sum(e, axis=-1, keepdims=True), approx=True)
        oh = jnp.dot(pattn.astype(bf16), vh, preferred_element_type=f32)
        attn = attn + jnp.dot(oh.astype(bf16),
                              wo_ref[h * hd:(h + 1) * hd, :],
                              preferred_element_type=f32)
    x = x + attn + bo_ref[...]                                  # residual 1

    # -------- MixMLP branch: x + MLP(LN2(x)) -------------------------------
    xm = _ln(x, ln2g_ref[...], ln2b_ref[...], eps)
    h1 = (jnp.dot(xm.astype(bf16), w1_ref[...], preferred_element_type=f32)
          + b1_ref[...])

    # depthwise 3x3 (groups=C): taps in outer loop, only `mult` accumulators
    # live; column-validity mask built in-kernel (zero-fill handles rows).
    col = jax.lax.broadcasted_iota(jnp.int32, (L, 1), 0) % W
    accs = [jnp.zeros((L, C), f32) for _ in range(mult)]
    k = 0
    for dh in (-1, 0, 1):
        for dw in (-1, 0, 1):
            tap = _shift_rows(h1, dh * W + dw)
            if dw != 0:
                cmask = ((col + dw >= 0) & (col + dw < W)).astype(f32)
                tap = tap * cmask
            for m in range(mult):
                accs[m] = accs[m] + tap * dwv_ref[m * 9 + k:m * 9 + k + 1, :]
            k += 1

    # GELU + 1x1 conv done per hidden-group block (no (L, mult*C) concatenate)
    y = jnp.zeros((L, C), f32)
    for m in range(mult):
        g = _gelu(accs[m] + bdw_ref[m:m + 1, :])
        y = y + jnp.dot(g.astype(bf16), w3_ref[m * C:(m + 1) * C, :],
                        preferred_element_type=f32)
    y = x + y + b3_ref[...]                                     # residual 2
    if final_ln:
        y = _ln(y, fg_ref[...], fb_ref[...], eps)
    o_ref[0] = y.astype(o_ref.dtype)


def transformer_block(x_tok, bp, sel, H, W, *, head_dim, reduction, final_ln):
    B, L, C = x_tok.shape
    nh = C // head_dim
    rr = reduction * reduction
    Lr = L // rr
    mult = bp["dwv"].shape[0] // 9
    has_sel = sel is not None

    def full(a):
        shp = a.shape
        return pl.BlockSpec(shp, lambda b: tuple(0 for _ in shp))

    inputs = [x_tok,
              bp["ln1_g"], bp["ln1_b"], bp["wq"], bp["rw"], bp["rlg"], bp["rlb"],
              bp["wkv"], bp["wo"], bp["bo"], bp["ln2_g"], bp["ln2_b"],
              bp["w1"], bp["b1"], bp["dwv"], bp["bdw"], bp["w3"], bp["b3"]]
    in_specs = [pl.BlockSpec((1, L, C), lambda b: (b, 0, 0))]
    in_specs += [full(a) for a in inputs[1:]]
    if has_sel:
        inputs.append(sel)
        in_specs.append(full(sel))
    if final_ln is not None:
        fg, fb = final_ln
        inputs += [fg, fb]
        in_specs += [full(fg), full(fb)]

    kern = functools.partial(_block_kernel, nh=nh, hd=head_dim, C=C, rr=rr,
                             Lr=Lr, W=W, mult=mult, has_sel=has_sel,
                             final_ln=final_ln is not None, eps=1e-5)
    return pl.pallas_call(
        kern,
        out_shape=jax.ShapeDtypeStruct((B, L, C), x_tok.dtype),
        grid=(B,),
        in_specs=in_specs,
        out_specs=pl.BlockSpec((1, L, C), lambda b: (b, 0, 0)),
        compiler_params=pltpu.CompilerParams(dimension_semantics=("parallel",)),
    )(*inputs)


# ----------------------------- overlap patch embedding ------------------------

def im2col(x, k, stride, pad):
    """x:(B,H,W,C) -> (B,Ho,Wo,C*k*k), feature order (c, ki, kj)."""
    # TODO(synk): overlapping patch extraction stays as plain-JAX glue.
    B, H, W, C = x.shape
    if pad:
        x = jnp.pad(x, ((0, 0), (pad, pad), (pad, pad), (0, 0)))
    Ho = (H + 2 * pad - k) // stride + 1
    Wo = (W + 2 * pad - k) // stride + 1
    cols = []
    for i in range(k):
        for j in range(k):
            cols.append(x[:, i:i + stride * Ho:stride, j:j + stride * Wo:stride, :])
    patches = jnp.stack(cols, axis=-1)                          # (B,Ho,Wo,C,k*k)
    return patches.reshape(B, Ho, Wo, C * k * k), Ho, Wo


def _patch_embed_kernel(p_ref, w_ref, g_ref, b_ref, o_ref, *, eps):
    acc = jnp.dot(p_ref[...], w_ref[...], preferred_element_type=jnp.float32)
    o_ref[...] = _ln(acc, g_ref[...], b_ref[...], eps).astype(o_ref.dtype)


def patch_embed(x, sp, k, stride):
    B = x.shape[0]
    Kf, Cout = sp["pe_w"].shape
    patches, Ho, Wo = im2col(x, k, stride, k // 2)
    M = B * Ho * Wo
    pm = patches.reshape(M, Kf).astype(jnp.bfloat16)
    tm = _pick_tile(M)
    out = pl.pallas_call(
        functools.partial(_patch_embed_kernel, eps=1e-5),
        out_shape=jax.ShapeDtypeStruct((M, Cout), jnp.float32),
        grid=(M // tm,),
        in_specs=[pl.BlockSpec((tm, Kf), lambda i: (i, 0)),
                  pl.BlockSpec((Kf, Cout), lambda i: (0, 0)),
                  pl.BlockSpec((1, Cout), lambda i: (0, 0)),
                  pl.BlockSpec((1, Cout), lambda i: (0, 0))],
        out_specs=pl.BlockSpec((tm, Cout), lambda i: (i, 0)),
        compiler_params=pltpu.CompilerParams(dimension_semantics=("parallel",)),
    )(pm, sp["pe_w"], sp["pe_ln_g"], sp["pe_ln_b"])
    return out.reshape(B, Ho, Wo, Cout)


# ----------------------------- decoder + head ---------------------------------

def _dec_head1_kernel(u_ref, wd_ref, bd_ref, w1_ref, h_ref, st_ref):
    f32 = jnp.float32
    y = jnp.dot(u_ref[...], wd_ref[...], preferred_element_type=f32) + bd_ref[...]
    h = jnp.maximum(jnp.dot(y.astype(jnp.bfloat16), w1_ref[...],
                            preferred_element_type=f32), 0.0)
    h_ref[...] = h.astype(h_ref.dtype)
    st_ref[0] = jnp.concatenate(
        [jnp.sum(h, axis=0, keepdims=True),
         jnp.sum(h * h, axis=0, keepdims=True)], axis=0)


def _head2_kernel(h_ref, st_ref, g_ref, b_ref, w2_ref, b2_ref, o_ref, *, count, eps):
    f32 = jnp.float32
    h = h_ref[...].astype(f32)
    mean = st_ref[0:1, :] * (1.0 / count)
    var = st_ref[1:2, :] * (1.0 / count) - mean * mean
    xn = (h - mean) * jax.lax.rsqrt(var + eps) * g_ref[...] + b_ref[...]
    o_ref[...] = (jnp.dot(xn.astype(jnp.bfloat16), w2_ref[...],
                          preferred_element_type=f32) + b2_ref[...]
                  ).astype(o_ref.dtype)


def decoder_head(ups, dec_prep, cfg):
    B, H0, W0, _ = ups[0].shape
    dec = cfg.decoder_out_channels
    ncls = cfg.num_classes
    nstages = len(ups)
    u = jnp.concatenate(ups, axis=-1)
    Ct = u.shape[-1]
    M = B * H0 * W0
    u2 = u.reshape(M, Ct).astype(jnp.bfloat16)

    tm = _pick_tile(M)
    G = M // tm
    h, pstats = pl.pallas_call(
        _dec_head1_kernel,
        out_shape=(jax.ShapeDtypeStruct((M, dec), jnp.bfloat16),
                   jax.ShapeDtypeStruct((G, 2, dec), jnp.float32)),
        grid=(G,),
        in_specs=[pl.BlockSpec((tm, Ct), lambda i: (i, 0)),
                  pl.BlockSpec((Ct, nstages * dec), lambda i: (0, 0)),
                  pl.BlockSpec((1, nstages * dec), lambda i: (0, 0)),
                  pl.BlockSpec((nstages * dec, dec), lambda i: (0, 0))],
        out_specs=(pl.BlockSpec((tm, dec), lambda i: (i, 0)),
                   pl.BlockSpec((1, 2, dec), lambda i: (i, 0, 0))),
        compiler_params=pltpu.CompilerParams(dimension_semantics=("parallel",)),
    )(u2, dec_prep["wd"], dec_prep["bd"], dec_prep["w1"])

    stats = jnp.sum(pstats, axis=0)                             # (2, dec) glue reduce

    out = pl.pallas_call(
        functools.partial(_head2_kernel, count=float(M), eps=1e-5),
        out_shape=jax.ShapeDtypeStruct((M, ncls), jnp.float32),
        grid=(G,),
        in_specs=[pl.BlockSpec((tm, dec), lambda i: (i, 0)),
                  pl.BlockSpec((2, dec), lambda i: (0, 0)),
                  pl.BlockSpec((1, dec), lambda i: (0, 0)),
                  pl.BlockSpec((1, dec), lambda i: (0, 0)),
                  pl.BlockSpec((dec, ncls), lambda i: (0, 0)),
                  pl.BlockSpec((1, ncls), lambda i: (0, 0))],
        out_specs=pl.BlockSpec((tm, ncls), lambda i: (i, 0)),
        compiler_params=pltpu.CompilerParams(dimension_semantics=("parallel",)),
    )(h, stats, dec_prep["bn_g"], dec_prep["bn_b"], dec_prep["w2"], dec_prep["b2"])
    return out.reshape(B, H0, W0, ncls)


# ----------------------------- glue: bilinear upsample ------------------------

def upsample_bilinear(x, scale):
    """nn.UpsamplingBilinear2d(scale_factor=scale): align_corners=True."""
    # TODO(synk): gather-heavy bilinear upsample stays in plain JAX.
    if scale == 1:
        return x
    B, H, W, C = x.shape
    Ho, Wo = H * scale, W * scale

    def coords(out_n, in_n):
        if out_n == 1 or in_n == 1:
            return jnp.zeros((out_n,), jnp.float32)
        return jnp.arange(out_n, dtype=jnp.float32) * ((in_n - 1) / (out_n - 1))

    sy, sx = coords(Ho, H), coords(Wo, W)
    y0 = jnp.clip(jnp.floor(sy).astype(jnp.int32), 0, H - 1)
    y1 = jnp.clip(y0 + 1, 0, H - 1)
    x0 = jnp.clip(jnp.floor(sx).astype(jnp.int32), 0, W - 1)
    x1 = jnp.clip(x0 + 1, 0, W - 1)
    wy = (sy - y0.astype(jnp.float32))[None, :, None, None]
    wx = (sx - x0.astype(jnp.float32))[None, None, :, None]
    a = x[:, y0][:, :, x0]
    bq = x[:, y0][:, :, x1]
    c = x[:, y1][:, :, x0]
    d = x[:, y1][:, :, x1]
    top = a * (1 - wx) + bq * wx
    bot = c * (1 - wx) + d * wx
    return top * (1 - wy) + bot * wy


# ----------------------------- model forward ----------------------------------

def segformer_forward(x_nchw, prepped, cfg):
    x = jnp.transpose(x_nchw, (0, 2, 3, 1))                     # NCHW -> NHWC
    B = x.shape[0]
    stage_maps = []
    for s, sp in enumerate(prepped["stages"]):
        x = patch_embed(x, sp, cfg.overlap_patch_sizes[s], cfg.overlap_stride_sizes[s])
        _, H, W, C = x.shape
        L = H * W
        r = cfg.attn_reduction[s]
        hd = cfg.stage_attn_head_dim[s]
        xt = x.reshape(B, L, C)
        nb = len(sp["blocks"])
        for bi, bp in enumerate(sp["blocks"]):
            fl = (sp["ln_g"], sp["ln_b"]) if bi == nb - 1 else None
            xt = transformer_block(xt, bp, sp["sel"], H, W,
                                   head_dim=hd, reduction=r, final_ln=fl)
        x = xt.reshape(B, H, W, C)
        stage_maps.append(x)

    scales, acc = [], 1
    for st in cfg.overlap_stride_sizes:
        acc *= st
        scales.append(acc // 4)
    ups = [upsample_bilinear(stage_maps[s], scales[s]) for s in range(len(stage_maps))]
    y = decoder_head(ups, prepped["decoder"], cfg)
    return jnp.transpose(y, (0, 3, 1, 2))                       # back to NCHW


# ----------------------------- parameter init + prepare -----------------------

def init_params(key, cfg):
    keys = iter(jax.random.split(key, 512))

    def nrm(shape, scale=0.02):
        return (scale * jax.random.normal(next(keys), shape)).astype(jnp.float32)

    stages = []
    in_c = cfg.in_channels
    for s, C in enumerate(cfg.stage_channels_out):
        k = cfg.overlap_patch_sizes[s]
        r = cfg.attn_reduction[s]
        hidden = cfg.stage_mlp_hidden[s]
        blocks = []
        for _ in range(cfg.stage_num_blocks[s]):
            blocks.append({
                "ln1_g": jnp.ones((C,)), "ln1_b": jnp.zeros((C,)),
                "ln2_g": jnp.ones((C,)), "ln2_b": jnp.zeros((C,)),
                "attn": {
                    "wq": nrm((C, C)),
                    "red_w": nrm((C, C, r, r)),
                    "red_ln_g": jnp.ones((C,)), "red_ln_b": jnp.zeros((C,)),
                    "wkv": nrm((C, 2 * C)),
                    "wo": nrm((C, C)), "bo": jnp.zeros((C,)),
                },
                "mlp": {
                    "w1": nrm((C, C)), "b1": jnp.zeros((C,)),
                    "w2": nrm((hidden, 1, 3, 3)), "b2": jnp.zeros((hidden,)),
                    "w3": nrm((hidden, C)), "b3": jnp.zeros((C,)),
                },
            })
        stages.append({
            "pe_w": nrm((C, in_c, k, k)),
            "pe_ln_g": jnp.ones((C,)), "pe_ln_b": jnp.zeros((C,)),
            "blocks": blocks,
            "ln_g": jnp.ones((C,)), "ln_b": jnp.zeros((C,)),
        })
        in_c = C

    dec = cfg.decoder_out_channels
    decoder = [{"w": nrm((C, dec)), "b": jnp.zeros((dec,))}
               for C in cfg.stage_channels_out]
    head = {
        "w1": nrm((len(cfg.stage_channels_out) * dec, dec)),
        "bn_g": jnp.ones((dec,)), "bn_b": jnp.zeros((dec,)),
        "w2": nrm((dec, cfg.num_classes)), "b2": jnp.zeros((cfg.num_classes,)),
    }
    return {"stages": stages, "decoder": decoder, "head": head}


def make_selection(H, W, r):
    """0/1 matrix sel[p, lr, t]: patch element p=(di*r+dj) of reduced token lr."""
    Hr, Wr = H // r, W // r
    L, Lr, rr = H * W, Hr * Wr, r * r
    sel = np.zeros((rr, Lr, L), np.float32)
    for di in range(r):
        for dj in range(r):
            p = di * r + dj
            for hr in range(Hr):
                for wr in range(Wr):
                    sel[p, hr * Wr + wr, (hr * r + di) * W + (wr * r + dj)] = 1.0
    return jnp.asarray(sel, jnp.bfloat16)


def prepare_params(params, cfg):
    """One-time weight re-layouts / folds / bf16 casts (hoisted out of forward)."""
    bf16 = jnp.bfloat16
    geoms = stage_geometry(cfg)
    stages = []
    in_c = cfg.in_channels
    for s, sp in enumerate(params["stages"]):
        C = cfg.stage_channels_out[s]
        k = cfg.overlap_patch_sizes[s]
        r = cfg.attn_reduction[s]
        hd = cfg.stage_attn_head_dim[s]
        hidden = cfg.stage_mlp_hidden[s]
        mult = hidden // C
        H, W = geoms[s]
        assert H % r == 0 and W % r == 0 and C % hd == 0
        rr = r * r
        Kf = in_c * k * k
        scale = hd ** (-0.5)

        blocks = []
        for bp in sp["blocks"]:
            ap, mp = bp["attn"], bp["mlp"]
            blocks.append(dict(
                ln1_g=bp["ln1_g"].reshape(1, C), ln1_b=bp["ln1_b"].reshape(1, C),
                wq=(ap["wq"] * scale).astype(bf16),
                rw=jnp.transpose(ap["red_w"], (2, 3, 1, 0)).reshape(rr * C, C).astype(bf16),
                rlg=ap["red_ln_g"].reshape(1, C), rlb=ap["red_ln_b"].reshape(1, C),
                wkv=ap["wkv"].astype(bf16),
                wo=ap["wo"].astype(bf16), bo=ap["bo"].reshape(1, C),
                ln2_g=bp["ln2_g"].reshape(1, C), ln2_b=bp["ln2_b"].reshape(1, C),
                w1=mp["w1"].astype(bf16), b1=mp["b1"].reshape(1, C),
                dwv=jnp.transpose(mp["w2"].reshape(C, mult, 9), (1, 2, 0)).reshape(mult * 9, C),
                bdw=mp["b2"].reshape(C, mult).T,
                w3=mp["w3"].reshape(C, mult, C).transpose(1, 0, 2).reshape(mult * C, C).astype(bf16),
                b3=mp["b3"].reshape(1, C),
            ))
        stages.append(dict(
            pe_w=sp["pe_w"].reshape(C, Kf).T.astype(bf16),
            pe_ln_g=sp["pe_ln_g"].reshape(1, C), pe_ln_b=sp["pe_ln_b"].reshape(1, C),
            sel=(make_selection(H, W, r) if rr > 1 else None),
            blocks=blocks,
            ln_g=sp["ln_g"].reshape(1, C), ln_b=sp["ln_b"].reshape(1, C),
        ))
        in_c = C

    dec = cfg.decoder_out_channels
    nstages = len(cfg.stage_channels_out)
    Ct = sum(cfg.stage_channels_out)
    wd = jnp.zeros((Ct, nstages * dec), jnp.float32)
    ofs = 0
    for s, dp in enumerate(params["decoder"]):
        cs = dp["w"].shape[0]
        wd = wd.at[ofs:ofs + cs, s * dec:(s + 1) * dec].set(dp["w"])
        ofs += cs
    hp = params["head"]
    dec_prep = dict(
        wd=wd.astype(bf16),
        bd=jnp.concatenate([dp["b"] for dp in params["decoder"]]).reshape(1, nstages * dec),
        w1=hp["w1"].astype(bf16),
        bn_g=hp["bn_g"].reshape(1, dec), bn_b=hp["bn_b"].reshape(1, dec),
        w2=hp["w2"].astype(bf16), b2=hp["b2"].reshape(1, cfg.num_classes),
    )
    return {"stages": stages, "decoder": dec_prep}


# ----------------------------- main --------------------------------------------

if __name__ == "__main__":
    cfg = SegFormerConfig()
    root = jax.random.PRNGKey(0)
    params = init_params(jax.random.fold_in(root, 1), cfg)
    prepped = prepare_params(params, cfg)                       # one-time re-layouts
    x = jax.random.normal(jax.random.fold_in(root, 2),
                          (2, cfg.in_channels, cfg.image_size, cfg.image_size),
                          dtype=jnp.float32)

    @jax.jit
    def run(prepped, x):
        return segformer_forward(x, prepped, cfg)

    out = jax.block_until_ready(run(prepped, x))

    expected = (2, cfg.num_classes, cfg.image_size // 4, cfg.image_size // 4)
    assert out.shape == expected, (out.shape, expected)
    assert bool(jnp.all(jnp.isfinite(out)))
    print("KERNEL_OK")
</pallas_src>

<mosaic_0001>
module attributes {stable_mosaic.version = 11 : i64} {
  func.func @_patch_embed_kernel(%arg0: i32, %arg1: memref<64x27xbf16, #tpu.memory_space<vmem>>, %arg2: memref<27x16xbf16, #tpu.memory_space<vmem>>, %arg3: memref<1x16xf32, #tpu.memory_space<vmem>>, %arg4: memref<1x16xf32, #tpu.memory_space<vmem>>, %arg5: memref<64x16xf32, #tpu.memory_space<vmem>>) attributes {dimension_semantics = [#tpu.dimension_semantics<parallel>], iteration_bounds = array<i64: 2>, scalar_prefetch = 0 : i64, scratch_operands = 0 : i64, tpu.core_type = #tpu.core_type<tc>, window_params = [{transform_indices = @transform_0, window_bounds = array<i64: 64, 27>}, {pipeline_mode = #tpu.pipeline_mode<synchronous>, transform_indices = @transform_1, window_bounds = array<i64: 27, 16>}, {pipeline_mode = #tpu.pipeline_mode<synchronous>, transform_indices = @transform_2, window_bounds = array<i64: 1, 16>}, {pipeline_mode = #tpu.pipeline_mode<synchronous>, transform_indices = @transform_3, window_bounds = array<i64: 1, 16>}, {transform_indices = @transform_4, window_bounds = array<i64: 64, 16>}]} {
    %c0 = arith.constant 0 : index
    %c0_0 = arith.constant 0 : index
    %0 = vector.load %arg1[%c0, %c0_0] : memref<64x27xbf16, #tpu.memory_space<vmem>>, vector<64x27xbf16>
    %c0_1 = arith.constant 0 : index
    %c0_2 = arith.constant 0 : index
    %1 = vector.load %arg2[%c0_1, %c0_2] : memref<27x16xbf16, #tpu.memory_space<vmem>>, vector<27x16xbf16>
    %cst = arith.constant dense<0.000000e+00> : vector<64x16xf32>
    %2 = tpu.matmul %0, %1, %cst {dimension_numbers = #tpu.dot_dimension_numbers<[1], [0], [0], [1], [0, 0, 1, 1], [], []>} : vector<64x27xbf16>, vector<27x16xbf16>, vector<64x16xf32> -> vector<64x16xf32>
    %c0_3 = arith.constant 0 : index
    %c0_4 = arith.constant 0 : index
    %3 = vector.load %arg3[%c0_3, %c0_4] : memref<1x16xf32, #tpu.memory_space<vmem>>, vector<1x16xf32>
    %c0_5 = arith.constant 0 : index
    %c0_6 = arith.constant 0 : index
    %4 = vector.load %arg4[%c0_5, %c0_6] : memref<1x16xf32, #tpu.memory_space<vmem>>, vector<1x16xf32>
    %cst_7 = arith.constant dense<0.000000e+00> : vector<64xf32>
    %5 = vector.multi_reduction <add>, %2, %cst_7 [1] : vector<64x16xf32> to vector<64xf32>
    %6 = vector.shape_cast %5 : vector<64xf32> to vector<64x1xf32>
    %cst_8 = arith.constant 1.600000e+01 : f32
    %7 = vector.broadcast %cst_8 : f32 to vector<64x1xf32>
    %8 = arith.divf %6, %7 : vector<64x1xf32>
    %9 = vector.broadcast %8 : vector<64x1xf32> to vector<64x16xf32>
    %10 = arith.subf %2, %9 : vector<64x16xf32>
    %11 = arith.mulf %10, %10 : vector<64x16xf32>
    %cst_9 = arith.constant dense<0.000000e+00> : vector<64xf32>
    %12 = vector.multi_reduction <add>, %11, %cst_9 [1] : vector<64x16xf32> to vector<64xf32>
    %13 = vector.shape_cast %12 : vector<64xf32> to vector<64x1xf32>
    %cst_10 = arith.constant 1.600000e+01 : f32
    %14 = vector.broadcast %cst_10 : f32 to vector<64x1xf32>
    %15 = arith.divf %13, %14 : vector<64x1xf32>
    %16 = vector.broadcast %8 : vector<64x1xf32> to vector<64x16xf32>
    %17 = arith.subf %2, %16 : vector<64x16xf32>
    %cst_11 = arith.constant 9.99999974E-6 : f32
    %18 = vector.broadcast %cst_11 : f32 to vector<64x1xf32>
    %19 = arith.addf %15, %18 : vector<64x1xf32>
    %20 = math.rsqrt %19 : vector<64x1xf32>
    %21 = vector.broadcast %20 : vector<64x1xf32> to vector<64x16xf32>
    %22 = arith.mulf %17, %21 : vector<64x16xf32>
    %23 = vector.broadcast %3 : vector<1x16xf32> to vector<64x16xf32>
    %24 = arith.mulf %22, %23 : vector<64x16xf32>
    %25 = vector.broadcast %4 : vector<1x16xf32> to vector<64x16xf32>
    %26 = arith.addf %24, %25 : vector<64x16xf32>
    %c0_12 = arith.constant 0 : index
    %c0_13 = arith.constant 0 : index
    %27 = vector.load %arg5[%c0_12, %c0_13] : memref<64x16xf32, #tpu.memory_space<vmem>>, vector<64x16xf32>
    tpu.vector_store %arg5[%c0_12, %c0_13], %26 {strides = array<i32>} : memref<64x16xf32, #tpu.memory_space<vmem>>, vector<64x16xf32>,
    return
  }
  func.func @transform_0(%arg0: i32) -> (i32, i32) {
    %c0_i32 = arith.constant 0 : i32
    %c0_i32_0 = arith.constant 0 : i32
    return %arg0, %c0_i32 : i32, i32
  }
  func.func @transform_1(%arg0: i32) -> (i32, i32) {
    %c0_i32 = arith.constant 0 : i32
    %c0_i32_0 = arith.constant 0 : i32
    %c0_i32_1 = arith.constant 0 : i32
    return %c0_i32, %c0_i32_0 : i32, i32
  }
  func.func @transform_2(%arg0: i32) -> (i32, i32) {
    %c0_i32 = arith.constant 0 : i32
    %c0_i32_0 = arith.constant 0 : i32
    %c0_i32_1 = arith.constant 0 : i32
    return %c0_i32, %c0_i32_0 : i32, i32
  }
  func.func @transform_3(%arg0: i32) -> (i32, i32) {
    %c0_i32 = arith.constant 0 : i32
    %c0_i32_0 = arith.constant 0 : i32
    %c0_i32_1 = arith.constant 0 : i32
    return %c0_i32, %c0_i32_0 : i32, i32
  }
  func.func @transform_4(%arg0: i32) -> (i32, i32) {
    %c0_i32 = arith.constant 0 : i32
    %c0_i32_0 = arith.constant 0 : i32
    return %arg0, %c0_i32 : i32, i32
  }
}

module attributes {stable_mosaic.version = 11 : i64} {
  func.func @_block_kernel(%arg0: i32, %arg1: memref<1x64x16xf32, #tpu.memory_space<vmem>>, %arg2: memref<1x16xf32, #tpu.memory_space<vmem>>, %arg3: memref<1x16xf32, #tpu.memory_space<vmem>>, %arg4: memref<16x16xbf16, #tpu.memory_space<vmem>>, %arg5: memref<64x16xbf16, #tpu.memory_space<vmem>>, %arg6: memref<1x16xf32, #tpu.memory_space<vmem>>, %arg7: memref<1x16xf32, #tpu.memory_space<vmem>>, %arg8: memref<16x32xbf16, #tpu.memory_space<vmem>>, %arg9: memref<16x16xbf16, #tpu.memory_space<vmem>>, %arg10: memref<1x16xf32, #tpu.memory_space<vmem>>, %arg11: memref<1x16xf32, #tpu.memory_space<vmem>>, %arg12: memref<1x16xf32, #tpu.memory_space<vmem>>, %arg13: memref<16x16xbf16, #tpu.memory_space<vmem>>, %arg14: memref<1x16xf32, #tpu.memory_space<vmem>>, %arg15: memref<18x16xf32, #tpu.memory_space<vmem>>, %arg16: memref<2x16xf32, #tpu.memory_space<vmem>>, %arg17: memref<32x16xbf16, #tpu.memory_space<vmem>>, %arg18: memref<1x16xf32, #tpu.memory_space<vmem>>, %arg19: memref<4x16x64xbf16, #tpu.memory_space<vmem>>, %arg20: memref<1x16xf32, #tpu.memory_space<vmem>>, %arg21: memref<1x16xf32, #tpu.memory_space<vmem>>, %arg22: memref<1x64x16xf32, #tpu.memory_space<vmem>>) attributes {dimension_semantics = [#tpu.dimension_semantics<parallel>], iteration_bounds = array<i64: 2>, scalar_prefetch = 0 : i64, scratch_operands = 0 : i64, tpu.core_type = #tpu.core_type<tc>, window_params = [{transform_indices = @transform_0, window_bounds = array<i64: 1, 64, 16>}, {pipeline_mode = #tpu.pipeline_mode<synchronous>, transform_indices = @transform_1, window_bounds = array<i64: 1, 16>}, {pipeline_mode = #tpu.pipeline_mode<synchronous>, transform_indices = @transform_2, window_bounds = array<i64: 1, 16>}, {pipeline_mode = #tpu.pipeline_mode<synchronous>, transform_indices = @transform_3, window_bounds = array<i64: 16, 16>}, {pipeline_mode = #tpu.pipeline_mode<synchronous>, transform_indices = @transform_4, window_bounds = array<i64: 64, 16>}, {pipeline_mode = #tpu.pipeline_mode<synchronous>, transform_indices = @transform_5, window_bounds = array<i64: 1, 16>}, {pipeline_mode = #tpu.pipeline_mode<synchronous>, transform_indices = @transform_6, window_bounds = array<i64: 1, 16>}, {pipeline_mode = #tpu.pipeline_mode<synchronous>, transform_indices = @transform_7, window_bounds = array<i64: 16, 32>}, {pipeline_mode = #tpu.pipeline_mode<synchronous>, transform_indices = @transform_8, window_bounds = array<i64: 16, 16>}, {pipeline_mode = #tpu.pipeline_mode<synchronous>, transform_indices = @transform_9, window_bounds = array<i64: 1, 16>}, {pipeline_mode = #tpu.pipeline_mode<synchronous>, transform_indices = @transform_10, window_bounds = array<i64: 1, 16>}, {pipeline_mode = #tpu.pipeline_mode<synchronous>, transform_indices = @transform_11, window_bounds = array<i64: 1, 16>}, {pipeline_mode = #tpu.pipeline_mode<synchronous>, transform_indices = @transform_12, window_bounds = array<i64: 16, 16>}, {pipeline_mode = #tpu.pipeline_mode<synchronous>, transform_indices = @transform_13, window_bounds = array<i64: 1, 16>}, {pipeline_mode = #tpu.pipeline_mode<synchronous>, transform_indices = @transform_14, window_bounds = array<i64: 18, 16>}, {pipeline_mode = #tpu.pipeline_mode<synchronous>, transform_indices = @transform_15, window_bounds = array<i64: 2, 16>}, {pipeline_mode = #tpu.pipeline_mode<synchronous>, transform_indices = @transform_16, window_bounds = array<i64: 32, 16>}, {pipeline_mode = #tpu.pipeline_mode<synchronous>, transform_indices = @transform_17, window_bounds = array<i64: 1, 16>}, {pipeline_mode = #tpu.pipeline_mode<synchronous>, transform_indices = @transform_18, window_bounds = array<i64: 4, 16, 64>}, {pipeline_mode = #tpu.pipeline_mode<synchronous>, transform_indices = @transform_19, window_bounds = array<i64: 1, 16>}, {pipeline_mode = #tpu.pipeline_mode<synchronous>, transform_indices = @transform_20, window_bounds = array<i64: 1, 16>}, {transform_indices = @transform_21, window_bounds = array<i64: 1, 64, 16>}]} {
    %c0 = arith.constant 0 : index
    %c0_0 = arith.constant 0 : index
    %c0_1 = arith.constant 0 : index
    %0 = vector.load %arg1[%c0, %c0_0, %c0_1] : memref<1x64x16xf32, #tpu.memory_space<vmem>>, vector<1x64x16xf32>
    %1 = vector.shape_cast %0 : vector<1x64x16xf32> to vector<64x16xf32>
    %c0_2 = arith.constant 0 : index
    %c0_3 = arith.constant 0 : index
    %2 = vector.load %arg2[%c0_2, %c0_3] : memref<1x16xf32, #tpu.memory_space<vmem>>, vector<1x16xf32>
    %c0_4 = arith.constant 0 : index
    %c0_5 = arith.constant 0 : index
    %3 = vector.load %arg3[%c0_4, %c0_5] : memref<1x16xf32, #tpu.memory_space<vmem>>, vector<1x16xf32>
    %cst = arith.constant dense<0.000000e+00> : vector<64xf32>
    %4 = vector.multi_reduction <add>, %1, %cst [1] : vector<64x16xf32> to vector<64xf32>
    %5 = vector.shape_cast %4 : vector<64xf32> to vector<64x1xf32>
    %cst_6 = arith.constant 1.600000e+01 : f32
    %6 = vector.broadcast %cst_6 : f32 to vector<64x1xf32>
    %7 = arith.divf %5, %6 : vector<64x1xf32>
    %8 = vector.broadcast %7 : vector<64x1xf32> to vector<64x16xf32>
    %9 = arith.subf %1, %8 : vector<64x16xf32>
    %10 = arith.mulf %9, %9 : vector<64x16xf32>
    %cst_7 = arith.constant dense<0.000000e+00> : vector<64xf32>
    %11 = vector.multi_reduction <add>, %10, %cst_7 [1] : vector<64x16xf32> to vector<64xf32>
    %12 = vector.shape_cast %11 : vector<64xf32> to vector<64x1xf32>
    %cst_8 = arith.constant 1.600000e+01 : f32
    %13 = vector.broadcast %cst_8 : f32 to vector<64x1xf32>
    %14 = arith.divf %12, %13 : vector<64x1xf32>
    %15 = vector.broadcast %7 : vector<64x1xf32> to vector<64x16xf32>
    %16 = arith.subf %1, %15 : vector<64x16xf32>
    %cst_9 = arith.constant 9.99999974E-6 : f32
    %17 = vector.broadcast %cst_9 : f32 to vector<64x1xf32>
    %18 = arith.addf %14, %17 : vector<64x1xf32>
    %19 = math.rsqrt %18 : vector<64x1xf32>
    %20 = vector.broadcast %19 : vector<64x1xf32> to vector<64x16xf32>
    %21 = arith.mulf %16, %20 : vector<64x16xf32>
    %22 = vector.broadcast %2 : vector<1x16xf32> to vector<64x16xf32>
    %23 = arith.mulf %21, %22 : vector<64x16xf32>
    %24 = vector.broadcast %3 : vector<1x16xf32> to vector<64x16xf32>
    %25 = arith.addf %23, %24 : vector<64x16xf32>
    %26 = arith.truncf %25 : vector<64x16xf32> to vector<64x16xbf16>
    %c0_10 = arith.constant 0 : index
    %c0_11 = arith.constant 0 : index
    %27 = vector.load %arg4[%c0_10, %c0_11] : memref<16x16xbf16, #tpu.memory_space<vmem>>, vector<16x16xbf16>
    %cst_12 = arith.constant dense<0.000000e+00> : vector<64x16xf32>
    %28 = tpu.matmul %26, %27, %cst_12 {dimension_numbers = #tpu.dot_dimension_numbers<[1], [0], [0], [1], [0, 0, 1, 1], [], []>} : vector<64x16xbf16>, vector<16x16xbf16>, vector<64x16xf32> -> vector<64x16xf32>
    %cst_13 = arith.constant 0.000000e+00 : f32
    %29 = vector.broadcast %cst_13 : f32 to vector<16x16xf32>
    %c0_14 = arith.constant 0 : index
    %c0_15 = arith.constant 0 : index
    %c0_16 = arith.constant 0 : index
    %30 = vector.load %arg19[%c0_14, %c0_15, %c0_16] : memref<4x16x64xbf16, #tpu.memory_space<vmem>>, vector<1x16x64xbf16>
    %31 = vector.shape_cast %30 : vector<1x16x64xbf16> to vector<16x64xbf16>
    %cst_17 = arith.constant dense<0.000000e+00> : vector<16x16xf32>
    %32 = tpu.matmul %31, %26, %cst_17 {dimension_numbers = #tpu.dot_dimension_numbers<[1], [0], [0], [1], [0, 0, 1, 1], [], []>} : vector<16x64xbf16>, vector<64x16xbf16>, vector<16x16xf32> -> vector<16x16xf32>
    %33 = arith.truncf %32 : vector<16x16xf32> to vector<16x16xbf16>
    %c0_18 = arith.constant 0 : index
    %c0_19 = arith.constant 0 : index
    %34 = vector.load %arg5[%c0_18, %c0_19] : memref<64x16xbf16, #tpu.memory_space<vmem>>, vector<16x16xbf16>
    %cst_20 = arith.constant dense<0.000000e+00> : vector<16x16xf32>
    %35 = tpu.matmul %33, %34, %cst_20 {dimension_numbers = #tpu.dot_dimension_numbers<[1], [0], [0], [1], [0, 0, 1, 1], [], []>} : vector<16x16xbf16>, vector<16x16xbf16>, vector<16x16xf32> -> vector<16x16xf32>
    %36 = arith.addf %29, %35 : vector<16x16xf32>
    %c1 = arith.constant 1 : index
    %c0_21 = arith.constant 0 : index
    %c0_22 = arith.constant 0 : index
    %37 = vector.load %arg19[%c1, %c0_21, %c0_22] : memref<4x16x64xbf16, #tpu.memory_space<vmem>>, vector<1x16x64xbf16>
    %38 = vector.shape_cast %37 : vector<1x16x64xbf16> to vector<16x64xbf16>
    %cst_23 = arith.constant dense<0.000000e+00> : vector<16x16xf32>
    %39 = tpu.matmul %38, %26, %cst_23 {dimension_numbers = #tpu.dot_dimension_numbers<[1], [0], [0], [1], [0, 0, 1, 1], [], []>} : vector<16x64xbf16>, vector<64x16xbf16>, vector<16x16xf32> -> vector<16x16xf32>
    %40 = arith.truncf %39 : vector<16x16xf32> to vector<16x16xbf16>
    %c16 = arith.constant 16 : index
    %c0_24 = arith.constant 0 : index
    %41 = vector.load %arg5[%c16, %c0_24] : memref<64x16xbf16, #tpu.memory_space<vmem>>, vector<16x16xbf16>
    %cst_25 = arith.constant dense<0.000000e+00> : vector<16x16xf32>
    %42 = tpu.matmul %40, %41, %cst_25 {dimension_numbers = #tpu.dot_dimension_numbers<[1], [0], [0], [1], [0, 0, 1, 1], [], []>} : vector<16x16xbf16>, vector<16x16xbf16>, vector<16x16xf32> -> vector<16x16xf32>
    %43 = arith.addf %36, %42 : vector<16x16xf32>
    %c2 = arith.constant 2 : index
    %c0_26 = arith.constant 0 : index
    %c0_27 = arith.constant 0 : index
    %44 = vector.load %arg19[%c2, %c0_26, %c0_27] : memref<4x16x64xbf16, #tpu.memory_space<vmem>>, vector<1x16x64xbf16>
    %45 = vector.shape_cast %44 : vector<1x16x64xbf16> to vector<16x64xbf16>
    %cst_28 = arith.constant dense<0.000000e+00> : vector<16x16xf32>
    %46 = tpu.matmul %45, %26, %cst_28 {dimension_numbers = #tpu.dot_dimension_numbers<[1], [0], [0], [1], [0, 0, 1, 1], [], []>} : vector<16x64xbf16>, vector<64x16xbf16>, vector<16x16xf32> -> vector<16x16xf32>
    %47 = arith.truncf %46 : vector<16x16xf32> to vector<16x16xbf16>
    %c32 = arith.constant 32 : index
    %c0_29 = arith.constant 0 : index
    %48 = vector.load %arg5[%c32, %c0_29] : memref<64x16xbf16, #tpu.memory_space<vmem>>, vector<16x16xbf16>
    %cst_30 = arith.constant dense<0.000000e+00> : vector<16x16xf32>
    %49 = tpu.matmul %47, %48, %cst_30 {dimension_numbers = #tpu.dot_dimension_numbers<[1], [0], [0], [1], [0, 0, 1, 1], [], []>} : vector<16x16xbf16>, vector<16x16xbf16>, vector<16x16xf32> -> vector<16x16xf32>
    %50 = arith.addf %43, %49 : vector<16x16xf32>
    %c3 = arith.constant 3 : index
    %c0_31 = arith.constant 0 : index
    %c0_32 = arith.constant 0 : index
    %51 = vector.load %arg19[%c3, %c0_31, %c0_32] : memref<4x16x64xbf16, #tpu.memory_space<vmem>>, vector<1x16x64xbf16>
    %52 = vector.shape_cast %51 : vector<1x16x64xbf16> to vector<16x64xbf16>
    %cst_33 = arith.constant dense<0.000000e+00> : vector<16x16xf32>
    %53 = tpu.matmul %52, %26, %cst_33 {dimension_numbers = #tpu.dot_dimension_numbers<[1], [0], [0], [1], [0, 0, 1, 1], [], []>} : vector<16x64xbf16>, vector<64x16xbf16>, vector<16x16xf32> -> vector<16x16xf32>
    %54 = arith.truncf %53 : vector<16x16xf32> to vector<16x16xbf16>
    %c48 = arith.constant 48 : index
    %c0_34 = arith.constant 0 : index
    %55 = vector.load %arg5[%c48, %c0_34] : memref<64x16xbf16, #tpu.memory_space<vmem>>, vector<16x16xbf16>
    %cst_35 = arith.constant dense<0.000000e+00> : vector<16x16xf32>
    %56 = tpu.matmul %54, %55, %cst_35 {dimension_numbers = #tpu.dot_dimension_numbers<[1], [0], [0], [1], [0, 0, 1, 1], [], []>} : vector<16x16xbf16>, vector<16x16xbf16>, vector<16x16xf32> -> vector<16x16xf32>
    %57 = arith.addf %50, %56 : vector<16x16xf32>
    %c0_36 = arith.constant 0 : index
    %c0_37 = arith.constant 0 : index
    %58 = vector.load %arg6[%c0_36, %c0_37] : memref<1x16xf32, #tpu.memory_space<vmem>>, vector<1x16xf32>
    %c0_38 = arith.constant 0 : index
    %c0_39 = arith.constant 0 : index
    %59 = vector.load %arg7[%c0_38, %c0_39] : memref<1x16xf32, #tpu.memory_space<vmem>>, vector<1x16xf32>
    %cst_40 = arith.constant dense<0.000000e+00> : vector<16xf32>
    %60 = vector.multi_reduction <add>, %57, %cst_40 [1] : vector<16x16xf32> to vector<16xf32>
    %61 = vector.shape_cast %60 : vector<16xf32> to vector<16x1xf32>
    %cst_41 = arith.constant 1.600000e+01 : f32
    %62 = vector.broadcast %cst_41 : f32 to vector<16x1xf32>
    %63 = arith.divf %61, %62 : vector<16x1xf32>
    %64 = vector.broadcast %63 : vector<16x1xf32> to vector<16x16xf32>
    %65 = arith.subf %57, %64 : vector<16x16xf32>
    %66 = arith.mulf %65, %65 : vector<16x16xf32>
    %cst_42 = arith.constant dense<0.000000e+00> : vector<16xf32>
    %67 = vector.multi_reduction <add>, %66, %cst_42 [1] : vector<16x16xf32> to vector<16xf32>
    %68 = vector.shape_cast %67 : vector<16xf32> to vector<16x1xf32>
    %cst_43 = arith.constant 1.600000e+01 : f32
    %69 = vector.broadcast %cst_43 : f32 to vector<16x1xf32>
    %70 = arith.divf %68, %69 : vector<16x1xf32>
    %71 = vector.broadcast %63 : vector<16x1xf32> to vector<16x16xf32>
    %72 = arith.subf %57, %71 : vector<16x16xf32>
    %cst_44 = arith.constant 9.99999974E-6 : f32
    %73 = vector.broadcast %cst_44 : f32 to vector<16x1xf32>
    %74 = arith.addf %70, %73 : vector<16x1xf32>
    %75 = math.rsqrt %74 : vector<16x1xf32>
    %76 = vector.broadcast %75 : vector<16x1xf32> to vector<16x16xf32>
    %77 = arith.mulf %72, %76 : vector<16x16xf32>
    %78 = vector.broadcast %58 : vector<1x16xf32> to vector<16x16xf32>
    %79 = arith.mulf %77, %78 : vector<16x16xf32>
    %80 = vector.broadcast %59 : vector<1x16xf32> to vector<16x16xf32>
    %81 = arith.addf %79, %80 : vector<16x16xf32>
    %82 = arith.truncf %81 : vector<16x16xf32> to vector<16x16xbf16>
    %c0_45 = arith.constant 0 : index
    %c0_46 = arith.constant 0 : index
    %83 = vector.load %arg8[%c0_45, %c0_46] : memref<16x32xbf16, #tpu.memory_space<vmem>>, vector<16x32xbf16>
    %cst_47 = arith.constant dense<0.000000e+00> : vector<16x32xf32>
    %84 = tpu.matmul %82, %83, %cst_47 {dimension_numbers = #tpu.dot_dimension_numbers<[1], [0], [0], [1], [0, 0, 1, 1], [], []>} : vector<16x16xbf16>, vector<16x32xbf16>, vector<16x32xf32> -> vector<16x32xf32>
    %cst_48 = arith.constant 0.000000e+00 : f32
    %85 = vector.broadcast %cst_48 : f32 to vector<64x16xf32>
    %86 = arith.truncf %28 : vector<64x16xf32> to vector<64x16xbf16>
    %87 = vector.extract_strided_slice %84 {offsets = [0, 0], sizes = [16, 16], strides = [1, 1]} : vector<16x32xf32> to vector<16x16xf32>
    %88 = arith.truncf %87 : vector<16x16xf32> to vector<16x16xbf16>
    %89 = vector.extract_strided_slice %84 {offsets = [0, 16], sizes = [16, 16], strides = [1, 1]} : vector<16x32xf32> to vector<16x16xf32>
    %90 = arith.truncf %89 : vector<16x16xf32> to vector<16x16xbf16>
    %cst_49 = arith.constant dense<0.000000e+00> : vector<64x16xf32>
    %91 = tpu.matmul %86, %88, %cst_49 {dimension_numbers = #tpu.dot_dimension_numbers<[1], [1], [0], [0], [0, 0, 1, 0], [], []>} : vector<64x16xbf16>, vector<16x16xbf16>, vector<64x16xf32> -> vector<64x16xf32>
    %cst_50 = arith.constant dense<0xFF800000> : vector<64xf32>
    %92 = vector.multi_reduction <maximumf>, %91, %cst_50 [1] : vector<64x16xf32> to vector<64xf32>
    %93 = vector.shape_cast %92 : vector<64xf32> to vector<64x1xf32>
    %94 = vector.broadcast %93 : vector<64x1xf32> to vector<64x16xf32>
    %95 = arith.subf %91, %94 : vector<64x16xf32>
    %96 = math.exp %95 : vector<64x16xf32>
    %cst_51 = arith.constant dense<0.000000e+00> : vector<64xf32>
    %97 = vector.multi_reduction <add>, %96, %cst_51 [1] : vector<64x16xf32> to vector<64xf32>
    %98 = vector.shape_cast %97 : vector<64xf32> to vector<64x1xf32>
    %99 = tpu.reciprocal %98 {approx = true} : vector<64x1xf32> -> vector<64x1xf32>
    %100 = vector.broadcast %99 : vector<64x1xf32> to vector<64x16xf32>
    %101 = arith.mulf %96, %100 : vector<64x16xf32>
    %102 = arith.truncf %101 : vector<64x16xf32> to vector<64x16xbf16>
    %cst_52 = arith.constant dense<0.000000e+00> : vector<64x16xf32>
    %103 = tpu.matmul %102, %90, %cst_52 {dimension_numbers = #tpu.dot_dimension_numbers<[1], [0], [0], [1], [0, 0, 1, 1], [], []>} : vector<64x16xbf16>, vector<16x16xbf16>, vector<64x16xf32> -> vector<64x16xf32>
    %104 = arith.truncf %103 : vector<64x16xf32> to vector<64x16xbf16>
    %c0_53 = arith.constant 0 : index
    %c0_54 = arith.constant 0 : index
    %105 = vector.load %arg9[%c0_53, %c0_54] : memref<16x16xbf16, #tpu.memory_space<vmem>>, vector<16x16xbf16>
    %cst_55 = arith.constant dense<0.000000e+00> : vector<64x16xf32>
    %106 = tpu.matmul %104, %105, %cst_55 {dimension_numbers = #tpu.dot_dimension_numbers<[1], [0], [0], [1], [0, 0, 1, 1], [], []>} : vector<64x16xbf16>, vector<16x16xbf16>, vector<64x16xf32> -> vector<64x16xf32>
    %107 = arith.addf %85, %106 : vector<64x16xf32>
    %108 = arith.addf %1, %107 : vector<64x16xf32>
    %c0_56 = arith.constant 0 : index
    %c0_57 = arith.constant 0 : index
    %109 = vector.load %arg10[%c0_56, %c0_57] : memref<1x16xf32, #tpu.memory_space<vmem>>, vector<1x16xf32>
    %110 = vector.broadcast %109 : vector<1x16xf32> to vector<64x16xf32>
    %111 = arith.addf %108, %110 : vector<64x16xf32>
    %c0_58 = arith.constant 0 : index
    %c0_59 = arith.constant 0 : index
    %112 = vector.load %arg11[%c0_58, %c0_59] : memref<1x16xf32, #tpu.memory_space<vmem>>, vector<1x16xf32>
    %c0_60 = arith.constant 0 : index
    %c0_61 = arith.constant 0 : index
    %113 = vector.load %arg12[%c0_60, %c0_61] : memref<1x16xf32, #tpu.memory_space<vmem>>, vector<1x16xf32>
    %cst_62 = arith.constant dense<0.000000e+00> : vector<64xf32>
    %114 = vector.multi_reduction <add>, %111, %cst_62 [1] : vector<64x16xf32> to vector<64xf32>
    %115 = vector.shape_cast %114 : vector<64xf32> to vector<64x1xf32>
    %cst_63 = arith.constant 1.600000e+01 : f32
    %116 = vector.broadcast %cst_63 : f32 to vector<64x1xf32>
    %117 = arith.divf %115, %116 : vector<64x1xf32>
    %118 = vector.broadcast %117 : vector<64x1xf32> to vector<64x16xf32>
    %119 = arith.subf %111, %118 : vector<64x16xf32>
    %120 = arith.mulf %119, %119 : vector<64x16xf32>
    %cst_64 = arith.constant dense<0.000000e+00> : vector<64xf32>
    %121 = vector.multi_reduction <add>, %120, %cst_64 [1] : vector<64x16xf32> to vector<64xf32>
    %122 = vector.shape_cast %121 : vector<64xf32> to vector<64x1xf32>
    %cst_65 = arith.constant 1.600000e+01 : f32
    %123 = vector.broadcast %cst_65 : f32 to vector<64x1xf32>
    %124 = arith.divf %122, %123 : vector<64x1xf32>
    %125 = vector.broadcast %117 : vector<64x1xf32> to vector<64x16xf32>
    %126 = arith.subf %111, %125 : vector<64x16xf32>
    %cst_66 = arith.constant 9.99999974E-6 : f32
    %127 = vector.broadcast %cst_66 : f32 to vector<64x1xf32>
    %128 = arith.addf %124, %127 : vector<64x1xf32>
    %129 = math.rsqrt %128 : vector<64x1xf32>
    %130 = vector.broadcast %129 : vector<64x1xf32> to vector<64x16xf32>
    %131 = arith.mulf %126, %130 : vector<64x16xf32>
    %132 = vector.broadcast %112 : vector<1x16xf32> to vector<64x16xf32>
    %133 = arith.mulf %131, %132 : vector<64x16xf32>
    %134 = vector.broadcast %113 : vector<1x16xf32> to vector<64x16xf32>
    %135 = arith.addf %133, %134 : vector<64x16xf32>
    %136 = arith.truncf %135 : vector<64x16xf32> to vector<64x16xbf16>
    %c0_67 = arith.constant 0 : index
    %c0_68 = arith.constant 0 : index
    %137 = vector.load %arg13[%c0_67, %c0_68] : memref<16x16xbf16, #tpu.memory_space<vmem>>, vector<16x16xbf16>
    %cst_69 = arith.constant dense<0.000000e+00> : vector<64x16xf32>
    %138 = tpu.matmul %136, %137, %cst_69 {dimension_numbers = #tpu.dot_dimension_numbers<[1], [0], [0], [1], [0, 0, 1, 1], [], []>} : vector<64x16xbf16>, vector<16x16xbf16>, vector<64x16xf32> -> vector<64x16xf32>
    %c0_70 = arith.constant 0 : index
    %c0_71 = arith.constant 0 : index
    %139 = vector.load %arg14[%c0_70, %c0_71] : memref<1x16xf32, #tpu.memory_space<vmem>>, vector<1x16xf32>
    %140 = vector.broadcast %139 : vector<1x16xf32> to vector<64x16xf32>
    %141 = arith.addf %138, %140 : vector<64x16xf32>
    %142 = tpu.iota {dimensions = array<i32: 0>} : vector<64x1xi32>
    %c8_i32 = arith.constant 8 : i32
    %c0_i32 = arith.constant 0 : i32
    %143 = arith.cmpi eq, %c8_i32, %c0_i32 : i32
    %c1_i32 = arith.constant 1 : i32
    %144 = arith.select %143, %c1_i32, %c8_i32 : i32
    %145 = vector.broadcast %144 : i32 to vector<64x1xi32>
    %146 = arith.remsi %142, %145 : vector<64x1xi32>
    %c0_i32_72 = arith.constant 0 : i32
    %147 = vector.broadcast %c0_i32_72 : i32 to vector<64x1xi32>
    %148 = arith.cmpi ne, %146, %147 : vector<64x1xi32>
    %c0_i32_73 = arith.constant 0 : i32
    %149 = vector.broadcast %c0_i32_73 : i32 to vector<64x1xi32>
    %150 = arith.cmpi slt, %146, %149 : vector<64x1xi32>
    %c0_i32_74 = arith.constant 0 : i32
    %151 = arith.cmpi slt, %144, %c0_i32_74 : i32
    %152 = vector.broadcast %151 : i1 to vector<64x1xi1>
    %153 = vector.broadcast %152 : vector<64x1xi1> to vector<64x1xi1>
    %154 = arith.xori %150, %153 : vector<64x1xi1>
    %155 = arith.andi %154, %148 : vector<64x1xi1>
    %156 = vector.broadcast %144 : i32 to vector<64x1xi32>
    %157 = arith.addi %146, %156 : vector<64x1xi32>
    %158 = arith.select %155, %157, %146 : vector<64x1xi1>, vector<64x1xi32>
    %cst_75 = arith.constant 0.000000e+00 : f32
    %159 = vector.broadcast %cst_75 : f32 to vector<64x16xf32>
    %cst_76 = arith.constant 0.000000e+00 : f32
    %160 = vector.broadcast %cst_76 : f32 to vector<64x16xf32>
    %cst_77 = arith.constant 0.000000e+00 : f32
    %161 = vector.broadcast %cst_77 : f32 to vector<9x16xf32>
    %162 = vector.extract_strided_slice %141 {offsets = [0, 0], sizes = [55, 16], strides = [1, 1]} : vector<64x16xf32> to vector<55x16xf32>
    %163 = tpu.concatenate %161, %162 in 0 : vector<9x16xf32>, vector<55x16xf32> -> vector<64x16xf32>
    %c-1_i32 = arith.constant -1 : i32
    %164 = vector.broadcast %c-1_i32 : i32 to vector<64x1xi32>
    %165 = arith.addi %158, %164 : vector<64x1xi32>
    %c0_i32_78 = arith.constant 0 : i32
    %166 = vector.broadcast %c0_i32_78 : i32 to vector<64x1xi32>
    %167 = arith.cmpi sge, %165, %166 : vector<64x1xi32>
    %c-1_i32_79 = arith.constant -1 : i32
    %168 = vector.broadcast %c-1_i32_79 : i32 to vector<64x1xi32>
    %169 = arith.addi %158, %168 : vector<64x1xi32>
    %c8_i32_80 = arith.constant 8 : i32
    %170 = vector.broadcast %c8_i32_80 : i32 to vector<64x1xi32>
    %171 = arith.cmpi slt, %169, %170 : vector<64x1xi32>
    %172 = arith.andi %167, %171 : vector<64x1xi1>
    %173 = arith.extui %172 : vector<64x1xi1> to vector<64x1xi32>
    %174 = arith.sitofp %173 : vector<64x1xi32> to vector<64x1xf32>
    %175 = vector.broadcast %174 : vector<64x1xf32> to vector<64x16xf32>
    %176 = arith.mulf %163, %175 : vector<64x16xf32>
    %c0_81 = arith.constant 0 : index
    %c0_82 = arith.constant 0 : index
    %177 = vector.load %arg15[%c0_81, %c0_82] : memref<18x16xf32, #tpu.memory_space<vmem>>, vector<1x16xf32>
    %178 = vector.broadcast %177 : vector<1x16xf32> to vector<64x16xf32>
    %179 = arith.mulf %176, %178 : vector<64x16xf32>
    %180 = arith.addf %159, %179 : vector<64x16xf32>
    %c9 = arith.constant 9 : index
    %c0_83 = arith.constant 0 : index
    %181 = vector.load %arg15[%c9, %c0_83] : memref<18x16xf32, #tpu.memory_space<vmem>>, vector<1x16xf32>
    %182 = vector.broadcast %181 : vector<1x16xf32> to vector<64x16xf32>
    %183 = arith.mulf %176, %182 : vector<64x16xf32>
    %184 = arith.addf %160, %183 : vector<64x16xf32>
    %cst_84 = arith.constant 0.000000e+00 : f32
    %185 = vector.broadcast %cst_84 : f32 to vector<8x16xf32>
    %186 = vector.extract_strided_slice %141 {offsets = [0, 0], sizes = [56, 16], strides = [1, 1]} : vector<64x16xf32> to vector<56x16xf32>
    %187 = tpu.concatenate %185, %186 in 0 : vector<8x16xf32>, vector<56x16xf32> -> vector<64x16xf32>
    %c1_85 = arith.constant 1 : index
    %c0_86 = arith.constant 0 : index
    %188 = vector.load %arg15[%c1_85, %c0_86] : memref<18x16xf32, #tpu.memory_space<vmem>>, vector<1x16xf32>
    %189 = vector.broadcast %188 : vector<1x16xf32> to vector<64x16xf32>
    %190 = arith.mulf %187, %189 : vector<64x16xf32>
    %191 = arith.addf %180, %190 : vector<64x16xf32>
    %c10 = arith.constant 10 : index
    %c0_87 = arith.constant 0 : index
    %192 = vector.load %arg15[%c10, %c0_87] : memref<18x16xf32, #tpu.memory_space<vmem>>, vector<1x16xf32>
    %193 = vector.broadcast %192 : vector<1x16xf32> to vector<64x16xf32>
    %194 = arith.mulf %187, %193 : vector<64x16xf32>
    %195 = arith.addf %184, %194 : vector<64x16xf32>
    %cst_88 = arith.constant 0.000000e+00 : f32
    %196 = vector.broadcast %cst_88 : f32 to vector<7x16xf32>
    %197 = vector.extract_strided_slice %141 {offsets = [0, 0], sizes = [57, 16], strides = [1, 1]} : vector<64x16xf32> to vector<57x16xf32>
    %198 = tpu.concatenate %196, %197 in 0 : vector<7x16xf32>, vector<57x16xf32> -> vector<64x16xf32>
    %c1_i32_89 = arith.constant 1 : i32
    %199 = vector.broadcast %c1_i32_89 : i32 to vector<64x1xi32>
    %200 = arith.addi %158, %199 : vector<64x1xi32>
    %c0_i32_90 = arith.constant 0 : i32
    %201 = vector.broadcast %c0_i32_90 : i32 to vector<64x1xi32>
    %202 = arith.cmpi sge, %200, %201 : vector<64x1xi32>
    %c1_i32_91 = arith.constant 1 : i32
    %203 = vector.broadcast %c1_i32_91 : i32 to vector<64x1xi32>
    %204 = arith.addi %158, %203 : vector<64x1xi32>
    %c8_i32_92 = arith.constant 8 : i32
    %205 = vector.broadcast %c8_i32_92 : i32 to vector<64x1xi32>
    %206 = arith.cmpi slt, %204, %205 : vector<64x1xi32>
    %207 = arith.andi %202, %206 : vector<64x1xi1>
    %208 = arith.extui %207 : vector<64x1xi1> to vector<64x1xi32>
    %209 = arith.sitofp %208 : vector<64x1xi32> to vector<64x1xf32>
    %210 = vector.broadcast %209 : vector<64x1xf32> to vector<64x16xf32>
    %211 = arith.mulf %198, %210 : vector<64x16xf32>
    %c2_93 = arith.constant 2 : index
    %c0_94 = arith.constant 0 : index
    %212 = vector.load %arg15[%c2_93, %c0_94] : memref<18x16xf32, #tpu.memory_space<vmem>>, vector<1x16xf32>
    %213 = vector.broadcast %212 : vector<1x16xf32> to vector<64x16xf32>
    %214 = arith.mulf %211, %213 : vector<64x16xf32>
    %215 = arith.addf %191, %214 : vector<64x16xf32>
    %c11 = arith.constant 11 : index
    %c0_95 = arith.constant 0 : index
    %216 = vector.load %arg15[%c11, %c0_95] : memref<18x16xf32, #tpu.memory_space<vmem>>, vector<1x16xf32>
    %217 = vector.broadcast %216 : vector<1x16xf32> to vector<64x16xf32>
    %218 = arith.mulf %211, %217 : vector<64x16xf32>
    %219 = arith.addf %195, %218 : vector<64x16xf32>
    %cst_96 = arith.constant 0.000000e+00 : f32
    %220 = vector.broadcast %cst_96 : f32 to vector<1x16xf32>
    %221 = vector.extract_strided_slice %141 {offsets = [0, 0], sizes = [63, 16], strides = [1, 1]} : vector<64x16xf32> to vector<63x16xf32>
    %222 = tpu.concatenate %220, %221 in 0 : vector<1x16xf32>, vector<63x16xf32> -> vector<64x16xf32>
    %c-1_i32_97 = arith.constant -1 : i32
    %223 = vector.broadcast %c-1_i32_97 : i32 to vector<64x1xi32>
    %224 = arith.addi %158, %223 : vector<64x1xi32>
    %c0_i32_98 = arith.constant 0 : i32
    %225 = vector.broadcast %c0_i32_98 : i32 to vector<64x1xi32>
    %226 = arith.cmpi sge, %224, %225 : vector<64x1xi32>
    %c-1_i32_99 = arith.constant -1 : i32
    %227 = vector.broadcast %c-1_i32_99 : i32 to vector<64x1xi32>
    %228 = arith.addi %158, %227 : vector<64x1xi32>
    %c8_i32_100 = arith.constant 8 : i32
    %229 = vector.broadcast %c8_i32_100 : i32 to vector<64x1xi32>
    %230 = arith.cmpi slt, %228, %229 : vector<64x1xi32>
    %231 = arith.andi %226, %230 : vector<64x1xi1>
    %232 = arith.extui %231 : vector<64x1xi1> to vector<64x1xi32>
    %233 = arith.sitofp %232 : vector<64x1xi32> to vector<64x1xf32>
    %234 = vector.broadcast %233 : vector<64x1xf32> to vector<64x16xf32>
    %235 = arith.mulf %222, %234 : vector<64x16xf32>
    %c3_101 = arith.constant 3 : index
    %c0_102 = arith.constant 0 : index
    %236 = vector.load %arg15[%c3_101, %c0_102] : memref<18x16xf32, #tpu.memory_space<vmem>>, vector<1x16xf32>
    %237 = vector.broadcast %236 : vector<1x16xf32> to vector<64x16xf32>
    %238 = arith.mulf %235, %237 : vector<64x16xf32>
    %239 = arith.addf %215, %238 : vector<64x16xf32>
    %c12 = arith.constant 12 : index
    %c0_103 = arith.constant 0 : index
    %240 = vector.load %arg15[%c12, %c0_103] : memref<18x16xf32, #tpu.memory_space<vmem>>, vector<1x16xf32>
    %241 = vector.broadcast %240 : vector<1x16xf32> to vector<64x16xf32>
    %242 = arith.mulf %235, %241 : vector<64x16xf32>
    %243 = arith.addf %219, %242 : vector<64x16xf32>
    %c4 = arith.constant 4 : index
    %c0_104 = arith.constant 0 : index
    %244 = vector.load %arg15[%c4, %c0_104] : memref<18x16xf32, #tpu.memory_space<vmem>>, vector<1x16xf32>
    %245 = vector.broadcast %244 : vector<1x16xf32> to vector<64x16xf32>
    %246 = arith.mulf %141, %245 : vector<64x16xf32>
    %247 = arith.addf %239, %246 : vector<64x16xf32>
    %c13 = arith.constant 13 : index
    %c0_105 = arith.constant 0 : index
    %248 = vector.load %arg15[%c13, %c0_105] : memref<18x16xf32, #tpu.memory_space<vmem>>, vector<1x16xf32>
    %249 = vector.broadcast %248 : vector<1x16xf32> to vector<64x16xf32>
    %250 = arith.mulf %141, %249 : vector<64x16xf32>
    %251 = arith.addf %243, %250 : vector<64x16xf32>
    %cst_106 = arith.constant 0.000000e+00 : f32
    %252 = vector.broadcast %cst_106 : f32 to vector<1x16xf32>
    %253 = vector.extract_strided_slice %141 {offsets = [1, 0], sizes = [63, 16], strides = [1, 1]} : vector<64x16xf32> to vector<63x16xf32>
    %254 = tpu.concatenate %253, %252 in 0 : vector<63x16xf32>, vector<1x16xf32> -> vector<64x16xf32>
    %c1_i32_107 = arith.constant 1 : i32
    %255 = vector.broadcast %c1_i32_107 : i32 to vector<64x1xi32>
    %256 = arith.addi %158, %255 : vector<64x1xi32>
    %c0_i32_108 = arith.constant 0 : i32
    %257 = vector.broadcast %c0_i32_108 : i32 to vector<64x1xi32>
    %258 = arith.cmpi sge, %256, %257 : vector<64x1xi32>
    %c1_i32_109 = arith.constant 1 : i32
    %259 = vector.broadcast %c1_i32_109 : i32 to vector<64x1xi32>
    %260 = arith.addi %158, %259 : vector<64x1xi32>
    %c8_i32_110 = arith.constant 8 : i32
    %261 = vector.broadcast %c8_i32_110 : i32 to vector<64x1xi32>
    %262 = arith.cmpi slt, %260, %261 : vector<64x1xi32>
    %263 = arith.andi %258, %262 : vector<64x1xi1>
    %264 = arith.extui %263 : vector<64x1xi1> to vector<64x1xi32>
    %265 = arith.sitofp %264 : vector<64x1xi32> to vector<64x1xf32>
    %266 = vector.broadcast %265 : vector<64x1xf32> to vector<64x16xf32>
    %267 = arith.mulf %254, %266 : vector<64x16xf32>
    %c5 = arith.constant 5 : index
    %c0_111 = arith.constant 0 : index
    %268 = vector.load %arg15[%c5, %c0_111] : memref<18x16xf32, #tpu.memory_space<vmem>>, vector<1x16xf32>
    %269 = vector.broadcast %268 : vector<1x16xf32> to vector<64x16xf32>
    %270 = arith.mulf %267, %269 : vector<64x16xf32>
    %271 = arith.addf %247, %270 : vector<64x16xf32>
    %c14 = arith.constant 14 : index
    %c0_112 = arith.constant 0 : index
    %272 = vector.load %arg15[%c14, %c0_112] : memref<18x16xf32, #tpu.memory_space<vmem>>, vector<1x16xf32>
    %273 = vector.broadcast %272 : vector<1x16xf32> to vector<64x16xf32>
    %274 = arith.mulf %267, %273 : vector<64x16xf32>
    %275 = arith.addf %251, %274 : vector<64x16xf32>
    %cst_113 = arith.constant 0.000000e+00 : f32
    %276 = vector.broadcast %cst_113 : f32 to vector<7x16xf32>
    %277 = vector.extract_strided_slice %141 {offsets = [7, 0], sizes = [57, 16], strides = [1, 1]} : vector<64x16xf32> to vector<57x16xf32>
    %278 = tpu.concatenate %277, %276 in 0 : vector<57x16xf32>, vector<7x16xf32> -> vector<64x16xf32>
    %c-1_i32_114 = arith.constant -1 : i32
    %279 = vector.broadcast %c-1_i32_114 : i32 to vector<64x1xi32>
    %280 = arith.addi %158, %279 : vector<64x1xi32>
    %c0_i32_115 = arith.constant 0 : i32
    %281 = vector.broadcast %c0_i32_115 : i32 to vector<64x1xi32>
    %282 = arith.cmpi sge, %280, %281 : vector<64x1xi32>
    %c-1_i32_116 = arith.constant -1 : i32
    %283 = vector.broadcast %c-1_i32_116 : i32 to vector<64x1xi32>
    %284 = arith.addi %158, %283 : vector<64x1xi32>
    %c8_i32_117 = arith.constant 8 : i32
    %285 = vector.broadcast %c8_i32_117 : i32 to vector<64x1xi32>
    %286 = arith.cmpi slt, %284, %285 : vector<64x1xi32>
    %287 = arith.andi %282, %286 : vector<64x1xi1>
    %288 = arith.extui %287 : vector<64x1xi1> to vector<64x1xi32>
    %289 = arith.sitofp %288 : vector<64x1xi32> to vector<64x1xf32>
    %290 = vector.broadcast %289 : vector<64x1xf32> to vector<64x16xf32>
    %291 = arith.mulf %278, %290 : vector<64x16xf32>
    %c6 = arith.constant 6 : index
    %c0_118 = arith.constant 0 : index
    %292 = vector.load %arg15[%c6, %c0_118] : memref<18x16xf32, #tpu.memory_space<vmem>>, vector<1x16xf32>
    %293 = vector.broadcast %292 : vector<1x16xf32> to vector<64x16xf32>
    %294 = arith.mulf %291, %293 : vector<64x16xf32>
    %295 = arith.addf %271, %294 : vector<64x16xf32>
    %c15 = arith.constant 15 : index
    %c0_119 = arith.constant 0 : index
    %296 = vector.load %arg15[%c15, %c0_119] : memref<18x16xf32, #tpu.memory_space<vmem>>, vector<1x16xf32>
    %297 = vector.broadcast %296 : vector<1x16xf32> to vector<64x16xf32>
    %298 = arith.mulf %291, %297 : vector<64x16xf32>
    %299 = arith.addf %275, %298 : vector<64x16xf32>
    %cst_120 = arith.constant 0.000000e+00 : f32
    %300 = vector.broadcast %cst_120 : f32 to vector<8x16xf32>
    %301 = vector.extract_strided_slice %141 {offsets = [8, 0], sizes = [56, 16], strides = [1, 1]} : vector<64x16xf32> to vector<56x16xf32>
    %302 = tpu.concatenate %301, %300 in 0 : vector<56x16xf32>, vector<8x16xf32> -> vector<64x16xf32>
    %c7 = arith.constant 7 : index
    %c0_121 = arith.constant 0 : index
    %303 = vector.load %arg15[%c7, %c0_121] : memref<18x16xf32, #tpu.memory_space<vmem>>, vector<1x16xf32>
    %304 = vector.broadcast %303 : vector<1x16xf32> to vector<64x16xf32>
    %305 = arith.mulf %302, %304 : vector<64x16xf32>
    %306 = arith.addf %295, %305 : vector<64x16xf32>
    %c16_122 = arith.constant 16 : index
    %c0_123 = arith.constant 0 : index
    %307 = vector.load %arg15[%c16_122, %c0_123] : memref<18x16xf32, #tpu.memory_space<vmem>>, vector<1x16xf32>
    %308 = vector.broadcast %307 : vector<1x16xf32> to vector<64x16xf32>
    %309 = arith.mulf %302, %308 : vector<64x16xf32>
    %310 = arith.addf %299, %309 : vector<64x16xf32>
    %cst_124 = arith.constant 0.000000e+00 : f32
    %311 = vector.broadcast %cst_124 : f32 to vector<9x16xf32>
    %312 = vector.extract_strided_slice %141 {offsets = [9, 0], sizes = [55, 16], strides = [1, 1]} : vector<64x16xf32> to vector<55x16xf32>
    %313 = tpu.concatenate %312, %311 in 0 : vector<55x16xf32>, vector<9x16xf32> -> vector<64x16xf32>
    %c1_i32_125 = arith.constant 1 : i32
    %314 = vector.broadcast %c1_i32_125 : i32 to vector<64x1xi32>
    %315 = arith.addi %158, %314 : vector<64x1xi32>
    %c0_i32_126 = arith.constant 0 : i32
    %316 = vector.broadcast %c0_i32_126 : i32 to vector<64x1xi32>
    %317 = arith.cmpi sge, %315, %316 : vector<64x1xi32>
    %c1_i32_127 = arith.constant 1 : i32
    %318 = vector.broadcast %c1_i32_127 : i32 to vector<64x1xi32>
    %319 = arith.addi %158, %318 : vector<64x1xi32>
    %c8_i32_128 = arith.constant 8 : i32
    %320 = vector.broadcast %c8_i32_128 : i32 to vector<64x1xi32>
    %321 = arith.cmpi slt, %319, %320 : vector<64x1xi32>
    %322 = arith.andi %317, %321 : vector<64x1xi1>
    %323 = arith.extui %322 : vector<64x1xi1> to vector<64x1xi32>
    %324 = arith.sitofp %323 : vector<64x1xi32> to vector<64x1xf32>
    %325 = vector.broadcast %324 : vector<64x1xf32> to vector<64x16xf32>
    %326 = arith.mulf %313, %325 : vector<64x16xf32>
    %c8 = arith.constant 8 : index
    %c0_129 = arith.constant 0 : index
    %327 = vector.load %arg15[%c8, %c0_129] : memref<18x16xf32, #tpu.memory_space<vmem>>, vector<1x16xf32>
    %328 = vector.broadcast %327 : vector<1x16xf32> to vector<64x16xf32>
    %329 = arith.mulf %326, %328 : vector<64x16xf32>
    %330 = arith.addf %306, %329 : vector<64x16xf32>
    %c17 = arith.constant 17 : index
    %c0_130 = arith.constant 0 : index
    %331 = vector.load %arg15[%c17, %c0_130] : memref<18x16xf32, #tpu.memory_space<vmem>>, vector<1x16xf32>
    %332 = vector.broadcast %331 : vector<1x16xf32> to vector<64x16xf32>
    %333 = arith.mulf %326, %332 : vector<64x16xf32>
    %334 = arith.addf %310, %333 : vector<64x16xf32>
    %cst_131 = arith.constant 0.000000e+00 : f32
    %335 = vector.broadcast %cst_131 : f32 to vector<64x16xf32>
    %c0_132 = arith.constant 0 : index
    %c0_133 = arith.constant 0 : index
    %336 = vector.load %arg16[%c0_132, %c0_133] : memref<2x16xf32, #tpu.memory_space<vmem>>, vector<1x16xf32>
    %337 = vector.broadcast %336 : vector<1x16xf32> to vector<64x16xf32>
    %338 = arith.addf %330, %337 : vector<64x16xf32>
    %cst_134 = arith.constant 5.000000e-01 : f32
    %339 = vector.broadcast %cst_134 : f32 to vector<64x16xf32>
    %340 = arith.mulf %339, %338 : vector<64x16xf32>
    %cst_135 = arith.constant 4.471500e-02 : f32
    %341 = vector.broadcast %cst_135 : f32 to vector<64x16xf32>
    %342 = arith.mulf %341, %338 : vector<64x16xf32>
    %343 = arith.mulf %342, %338 : vector<64x16xf32>
    %344 = arith.mulf %343, %338 : vector<64x16xf32>
    %345 = arith.addf %338, %344 : vector<64x16xf32>
    %cst_136 = arith.constant 0.797884583 : f32
    %346 = vector.broadcast %cst_136 : f32 to vector<64x16xf32>
    %347 = arith.mulf %346, %345 : vector<64x16xf32>
    %348 = math.tanh %347 : vector<64x16xf32>
    %cst_137 = arith.constant 1.000000e+00 : f32
    %349 = vector.broadcast %cst_137 : f32 to vector<64x16xf32>
    %350 = arith.addf %349, %348 : vector<64x16xf32>
    %351 = arith.mulf %340, %350 : vector<64x16xf32>
    %352 = arith.truncf %351 : vector<64x16xf32> to vector<64x16xbf16>
    %c0_138 = arith.constant 0 : index
    %c0_139 = arith.constant 0 : index
    %353 = vector.load %arg17[%c0_138, %c0_139] : memref<32x16xbf16, #tpu.memory_space<vmem>>, vector<16x16xbf16>
    %cst_140 = arith.constant dense<0.000000e+00> : vector<64x16xf32>
    %354 = tpu.matmul %352, %353, %cst_140 {dimension_numbers = #tpu.dot_dimension_numbers<[1], [0], [0], [1], [0, 0, 1, 1], [], []>} : vector<64x16xbf16>, vector<16x16xbf16>, vector<64x16xf32> -> vector<64x16xf32>
    %355 = arith.addf %335, %354 : vector<64x16xf32>
    %c1_141 = arith.constant 1 : index
    %c0_142 = arith.constant 0 : index
    %356 = vector.load %arg16[%c1_141, %c0_142] : memref<2x16xf32, #tpu.memory_space<vmem>>, vector<1x16xf32>
    %357 = vector.broadcast %356 : vector<1x16xf32> to vector<64x16xf32>
    %358 = arith.addf %334, %357 : vector<64x16xf32>
    %cst_143 = arith.constant 5.000000e-01 : f32
    %359 = vector.broadcast %cst_143 : f32 to vector<64x16xf32>
    %360 = arith.mulf %359, %358 : vector<64x16xf32>
    %cst_144 = arith.constant 4.471500e-02 : f32
    %361 = vector.broadcast %cst_144 : f32 to vector<64x16xf32>
    %362 = arith.mulf %361, %358 : vector<64x16xf32>
    %363 = arith.mulf %362, %358 : vector<64x16xf32>
    %364 = arith.mulf %363, %358 : vector<64x16xf32>
    %365 = arith.addf %358, %364 : vector<64x16xf32>
    %cst_145 = arith.constant 0.797884583 : f32
    %366 = vector.broadcast %cst_145 : f32 to vector<64x16xf32>
    %367 = arith.mulf %366, %365 : vector<64x16xf32>
    %368 = math.tanh %367 : vector<64x16xf32>
    %cst_146 = arith.constant 1.000000e+00 : f32
    %369 = vector.broadcast %cst_146 : f32 to vector<64x16xf32>
    %370 = arith.addf %369, %368 : vector<64x16xf32>
    %371 = arith.mulf %360, %370 : vector<64x16xf32>
    %372 = arith.truncf %371 : vector<64x16xf32> to vector<64x16xbf16>
    %c16_147 = arith.constant 16 : index
    %c0_148 = arith.constant 0 : index
    %373 = vector.load %arg17[%c16_147, %c0_148] : memref<32x16xbf16, #tpu.memory_space<vmem>>, vector<16x16xbf16>
    %cst_149 = arith.constant dense<0.000000e+00> : vector<64x16xf32>
    %374 = tpu.matmul %372, %373, %cst_149 {dimension_numbers = #tpu.dot_dimension_numbers<[1], [0], [0], [1], [0, 0, 1, 1], [], []>} : vector<64x16xbf16>, vector<16x16xbf16>, vector<64x16xf32> -> vector<64x16xf32>
    %375 = arith.addf %355, %374 : vector<64x16xf32>
    %376 = arith.addf %111, %375 : vector<64x16xf32>
    %c0_150 = arith.constant 0 : index
    %c0_151 = arith.constant 0 : index
    %377 = vector.load %arg18[%c0_150, %c0_151] : memref<1x16xf32, #tpu.memory_space<vmem>>, vector<1x16xf32>
    %378 = vector.broadcast %377 : vector<1x16xf32> to vector<64x16xf32>
    %379 = arith.addf %376, %378 : vector<64x16xf32>
    %c0_152 = arith.constant 0 : index
    %c0_153 = arith.constant 0 : index
    %380 = vector.load %arg20[%c0_152, %c0_153] : memref<1x16xf32, #tpu.memory_space<vmem>>, vector<1x16xf32>
    %c0_154 = arith.constant 0 : index
    %c0_155 = arith.constant 0 : index
    %381 = vector.load %arg21[%c0_154, %c0_155] : memref<1x16xf32, #tpu.memory_space<vmem>>, vector<1x16xf32>
    %cst_156 = arith.constant dense<0.000000e+00> : vector<64xf32>
    %382 = vector.multi_reduction <add>, %379, %cst_156 [1] : vector<64x16xf32> to vector<64xf32>
    %383 = vector.shape_cast %382 : vector<64xf32> to vector<64x1xf32>
    %cst_157 = arith.constant 1.600000e+01 : f32
    %384 = vector.broadcast %cst_157 : f32 to vector<64x1xf32>
    %385 = arith.divf %383, %384 : vector<64x1xf32>
    %386 = vector.broadcast %385 : vector<64x1xf32> to vector<64x16xf32>
    %387 = arith.subf %379, %386 : vector<64x16xf32>
    %388 = arith.mulf %387, %387 : vector<64x16xf32>
    %cst_158 = arith.constant dense<0.000000e+00> : vector<64xf32>
    %389 = vector.multi_reduction <add>, %388, %cst_158 [1] : vector<64x16xf32> to vector<64xf32>
    %390 = vector.shape_cast %389 : vector<64xf32> to vector<64x1xf32>
    %cst_159 = arith.constant 1.600000e+01 : f32
    %391 = vector.broadcast %cst_159 : f32 to vector<64x1xf32>
    %392 = arith.divf %390, %391 : vector<64x1xf32>
    %393 = vector.broadcast %385 : vector<64x1xf32> to vector<64x16xf32>
    %394 = arith.subf %379, %393 : vector<64x16xf32>
    %cst_160 = arith.constant 9.99999974E-6 : f32
    %395 = vector.broadcast %cst_160 : f32 to vector<64x1xf32>
    %396 = arith.addf %392, %395 : vector<64x1xf32>
    %397 = math.rsqrt %396 : vector<64x1xf32>
    %398 = vector.broadcast %397 : vector<64x1xf32> to vector<64x16xf32>
    %399 = arith.mulf %394, %398 : vector<64x16xf32>
    %400 = vector.broadcast %380 : vector<1x16xf32> to vector<64x16xf32>
    %401 = arith.mulf %399, %400 : vector<64x16xf32>
    %402 = vector.broadcast %381 : vector<1x16xf32> to vector<64x16xf32>
    %403 = arith.addf %401, %402 : vector<64x16xf32>
    %c0_161 = arith.constant 0 : index
    %c0_162 = arith.constant 0 : index
    %c0_163 = arith.constant 0 : index
    %404 = vector.load %arg22[%c0_161, %c0_162, %c0_163] : memref<1x64x16xf32, #tpu.memory_space<vmem>>, vector<1x64x16xf32>
    %405 = vector.shape_cast %404 : vector<1x64x16xf32> to vector<64x16xf32>
    %406 = vector.shape_cast %403 : vector<64x16xf32> to vector<1x64x16xf32>
    tpu.vector_store %arg22[%c0_161, %c0_162, %c0_163], %406 {strides = array<i32>} : memref<1x64x16xf32, #tpu.memory_space<vmem>>, vector<1x64x16xf32>,
    return
  }
  func.func @transform_0(%arg0: i32) -> (i32, i32, i32) {
    %c0_i32 = arith.constant 0 : i32
    %c0_i32_0 = arith.constant 0 : i32
    %c0_i32_1 = arith.constant 0 : i32
    return %arg0, %c0_i32, %c0_i32_0 : i32, i32, i32
  }
  func.func @transform_1(%arg0: i32) -> (i32, i32) {
    %c0_i32 = arith.constant 0 : i32
    %c0_i32_0 = arith.constant 0 : i32
    %c0_i32_1 = arith.constant 0 : i32
    return %c0_i32, %c0_i32_0 : i32, i32
  }
  func.func @transform_2(%arg0: i32) -> (i32, i32) {
    %c0_i32 = arith.constant 0 : i32
    %c0_i32_0 = arith.constant 0 : i32
    %c0_i32_1 = arith.constant 0 : i32
    return %c0_i32, %c0_i32_0 : i32, i32
  }
  func.func @transform_3(%arg0: i32) -> (i32, i32) {
    %c0_i32 = arith.constant 0 : i32
    %c0_i32_0 = arith.constant 0 : i32
    %c0_i32_1 = arith.constant 0 : i32
    return %c0_i32, %c0_i32_0 : i32, i32
  }
  func.func @transform_4(%arg0: i32) -> (i32, i32) {
    %c0_i32 = arith.constant 0 : i32
    %c0_i32_0 = arith.constant 0 : i32
    %c0_i32_1 = arith.constant 0 : i32
    return %c0_i32, %c0_i32_0 : i32, i32
  }
  func.func @transform_5(%arg0: i32) -> (i32, i32) {
    %c0_i32 = arith.constant 0 : i32
    %c0_i32_0 = arith.constant 0 : i32
    %c0_i32_1 = arith.constant 0 : i32
    return %c0_i32, %c0_i32_0 : i32, i32
  }
  func.func @transform_6(%arg0: i32) -> (i32, i32) {
    %c0_i32 = arith.constant 0 : i32
    %c0_i32_0 = arith.constant 0 : i32
    %c0_i32_1 = arith.constant 0 : i32
    return %c0_i32, %c0_i32_0 : i32, i32
  }
  func.func @transform_7(%arg0: i32) -> (i32, i32) {
    %c0_i32 = arith.constant 0 : i32
    %c0_i32_0 = arith.constant 0 : i32
    %c0_i32_1 = arith.constant 0 : i32
    return %c0_i32, %c0_i32_0 : i32, i32
  }
  func.func @transform_8(%arg0: i32) -> (i32, i32) {
    %c0_i32 = arith.constant 0 : i32
    %c0_i32_0 = arith.constant 0 : i32
    %c0_i32_1 = arith.constant 0 : i32
    return %c0_i32, %c0_i32_0 : i32, i32
  }
  func.func @transform_9(%arg0: i32) -> (i32, i32) {
    %c0_i32 = arith.constant 0 : i32
    %c0_i32_0 = arith.constant 0 : i32
    %c0_i32_1 = arith.constant 0 : i32
    return %c0_i32, %c0_i32_0 : i32, i32
  }
  func.func @transform_10(%arg0: i32) -> (i32, i32) {
    %c0_i32 = arith.constant 0 : i32
    %c0_i32_0 = arith.constant 0 : i32
    %c0_i32_1 = arith.constant 0 : i32
    return %c0_i32, %c0_i32_0 : i32, i32
  }
  func.func @transform_11(%arg0: i32) -> (i32, i32) {
    %c0_i32 = arith.constant 0 : i32
    %c0_i32_0 = arith.constant 0 : i32
    %c0_i32_1 = arith.constant 0 : i32
    return %c0_i32, %c0_i32_0 : i32, i32
  }
  func.func @transform_12(%arg0: i32) -> (i32, i32) {
    %c0_i32 = arith.constant 0 : i32
    %c0_i32_0 = arith.constant 0 : i32
    %c0_i32_1 = arith.constant 0 : i32
    return %c0_i32, %c0_i32_0 : i32, i32
  }
  func.func @transform_13(%arg0: i32) -> (i32, i32) {
    %c0_i32 = arith.constant 0 : i32
    %c0_i32_0 = arith.constant 0 : i32
    %c0_i32_1 = arith.constant 0 : i32
    return %c0_i32, %c0_i32_0 : i32, i32
  }
  func.func @transform_14(%arg0: i32) -> (i32, i32) {
    %c0_i32 = arith.constant 0 : i32
    %c0_i32_0 = arith.constant 0 : i32
    %c0_i32_1 = arith.constant 0 : i32
    return %c0_i32, %c0_i32_0 : i32, i32
  }
  func.func @transform_15(%arg0: i32) -> (i32, i32) {
    %c0_i32 = arith.constant 0 : i32
    %c0_i32_0 = arith.constant 0 : i32
    %c0_i32_1 = arith.constant 0 : i32
    return %c0_i32, %c0_i32_0 : i32, i32
  }
  func.func @transform_16(%arg0: i32) -> (i32, i32) {
    %c0_i32 = arith.constant 0 : i32
    %c0_i32_0 = arith.constant 0 : i32
    %c0_i32_1 = arith.constant 0 : i32
    return %c0_i32, %c0_i32_0 : i32, i32
  }
  func.func @transform_17(%arg0: i32) -> (i32, i32) {
    %c0_i32 = arith.constant 0 : i32
    %c0_i32_0 = arith.constant 0 : i32
    %c0_i32_1 = arith.constant 0 : i32
    return %c0_i32, %c0_i32_0 : i32, i32
  }
  func.func @transform_18(%arg0: i32) -> (i32, i32, i32) {
    %c0_i32 = arith.constant 0 : i32
    %c0_i32_0 = arith.constant 0 : i32
    %c0_i32_1 = arith.constant 0 : i32
    %c0_i32_2 = arith.constant 0 : i32
    return %c0_i32, %c0_i32_0, %c0_i32_1 : i32, i32, i32
  }
  func.func @transform_19(%arg0: i32) -> (i32, i32) {
    %c0_i32 = arith.constant 0 : i32
    %c0_i32_0 = arith.constant 0 : i32
    %c0_i32_1 = arith.constant 0 : i32
    return %c0_i32, %c0_i32_0 : i32, i32
  }
  func.func @transform_20(%arg0: i32) -> (i32, i32) {
    %c0_i32 = arith.constant 0 : i32
    %c0_i32_0 = arith.constant 0 : i32
    %c0_i32_1 = arith.constant 0 : i32
    return %c0_i32, %c0_i32_0 : i32, i32
  }
  func.func @transform_21(%arg0: i32) -> (i32, i32, i32) {
    %c0_i32 = arith.constant 0 : i32
    %c0_i32_0 = arith.constant 0 : i32
    %c0_i32_1 = arith.constant 0 : i32
    return %arg0, %c0_i32, %c0_i32_0 : i32, i32, i32
  }
}

module attributes {stable_mosaic.version = 11 : i64} {
  func.func @_patch_embed_kernel(%arg0: i32, %arg1: memref<16x144xbf16, #tpu.memory_space<vmem>>, %arg2: memref<144x32xbf16, #tpu.memory_space<vmem>>, %arg3: memref<1x32xf32, #tpu.memory_space<vmem>>, %arg4: memref<1x32xf32, #tpu.memory_space<vmem>>, %arg5: memref<16x32xf32, #tpu.memory_space<vmem>>) attributes {dimension_semantics = [#tpu.dimension_semantics<parallel>], iteration_bounds = array<i64: 2>, scalar_prefetch = 0 : i64, scratch_operands = 0 : i64, tpu.core_type = #tpu.core_type<tc>, window_params = [{transform_indices = @transform_0, window_bounds = array<i64: 16, 144>}, {pipeline_mode = #tpu.pipeline_mode<synchronous>, transform_indices = @transform_1, window_bounds = array<i64: 144, 32>}, {pipeline_mode = #tpu.pipeline_mode<synchronous>, transform_indices = @transform_2, window_bounds = array<i64: 1, 32>}, {pipeline_mode = #tpu.pipeline_mode<synchronous>, transform_indices = @transform_3, window_bounds = array<i64: 1, 32>}, {transform_indices = @transform_4, window_bounds = array<i64: 16, 32>}]} {
    %c0 = arith.constant 0 : index
    %c0_0 = arith.constant 0 : index
    %0 = vector.load %arg1[%c0, %c0_0] : memref<16x144xbf16, #tpu.memory_space<vmem>>, vector<16x144xbf16>
    %c0_1 = arith.constant 0 : index
    %c0_2 = arith.constant 0 : index
    %1 = vector.load %arg2[%c0_1, %c0_2] : memref<144x32xbf16, #tpu.memory_space<vmem>>, vector<144x32xbf16>
    %cst = arith.constant dense<0.000000e+00> : vector<16x32xf32>
    %2 = tpu.matmul %0, %1, %cst {dimension_numbers = #tpu.dot_dimension_numbers<[1], [0], [0], [1], [0, 0, 1, 1], [], []>} : vector<16x144xbf16>, vector<144x32xbf16>, vector<16x32xf32> -> vector<16x32xf32>
    %c0_3 = arith.constant 0 : index
    %c0_4 = arith.constant 0 : index
    %3 = vector.load %arg3[%c0_3, %c0_4] : memref<1x32xf32, #tpu.memory_space<vmem>>, vector<1x32xf32>
    %c0_5 = arith.constant 0 : index
    %c0_6 = arith.constant 0 : index
    %4 = vector.load %arg4[%c0_5, %c0_6] : memref<1x32xf32, #tpu.memory_space<vmem>>, vector<1x32xf32>
    %cst_7 = arith.constant dense<0.000000e+00> : vector<16xf32>
    %5 = vector.multi_reduction <add>, %2, %cst_7 [1] : vector<16x32xf32> to vector<16xf32>
    %6 = vector.shape_cast %5 : vector<16xf32> to vector<16x1xf32>
    %cst_8 = arith.constant 3.200000e+01 : f32
    %7 = vector.broadcast %cst_8 : f32 to vector<16x1xf32>
    %8 = arith.divf %6, %7 : vector<16x1xf32>
    %9 = vector.broadcast %8 : vector<16x1xf32> to vector<16x32xf32>
    %10 = arith.subf %2, %9 : vector<16x32xf32>
    %11 = arith.mulf %10, %10 : vector<16x32xf32>
    %cst_9 = arith.constant dense<0.000000e+00> : vector<16xf32>
    %12 = vector.multi_reduction <add>, %11, %cst_9 [1] : vector<16x32xf32> to vector<16xf32>
    %13 = vector.shape_cast %12 : vector<16xf32> to vector<16x1xf32>
    %cst_10 = arith.constant 3.200000e+01 : f32
    %14 = vector.broadcast %cst_10 : f32 to vector<16x1xf32>
    %15 = arith.divf %13, %14 : vector<16x1xf32>
    %16 = vector.broadcast %8 : vector<16x1xf32> to vector<16x32xf32>
    %17 = arith.subf %2, %16 : vector<16x32xf32>
    %cst_11 = arith.constant 9.99999974E-6 : f32
    %18 = vector.broadcast %cst_11 : f32 to vector<16x1xf32>
    %19 = arith.addf %15, %18 : vector<16x1xf32>
    %20 = math.rsqrt %19 : vector<16x1xf32>
    %21 = vector.broadcast %20 : vector<16x1xf32> to vector<16x32xf32>
    %22 = arith.mulf %17, %21 : vector<16x32xf32>
    %23 = vector.broadcast %3 : vector<1x32xf32> to vector<16x32xf32>
    %24 = arith.mulf %22, %23 : vector<16x32xf32>
    %25 = vector.broadcast %4 : vector<1x32xf32> to vector<16x32xf32>
    %26 = arith.addf %24, %25 : vector<16x32xf32>
    %c0_12 = arith.constant 0 : index
    %c0_13 = arith.constant 0 : index
    %27 = vector.load %arg5[%c0_12, %c0_13] : memref<16x32xf32, #tpu.memory_space<vmem>>, vector<16x32xf32>
    tpu.vector_store %arg5[%c0_12, %c0_13], %26 {strides = array<i32>} : memref<16x32xf32, #tpu.memory_space<vmem>>, vector<16x32xf32>,
    return
  }
  func.func @transform_0(%arg0: i32) -> (i32, i32) {
    %c0_i32 = arith.constant 0 : i32
    %c0_i32_0 = arith.constant 0 : i32
    return %arg0, %c0_i32 : i32, i32
  }
  func.func @transform_1(%arg0: i32) -> (i32, i32) {
    %c0_i32 = arith.constant 0 : i32
    %c0_i32_0 = arith.constant 0 : i32
    %c0_i32_1 = arith.constant 0 : i32
    return %c0_i32, %c0_i32_0 : i32, i32
  }
  func.func @transform_2(%arg0: i32) -> (i32, i32) {
    %c0_i32 = arith.constant 0 : i32
    %c0_i32_0 = arith.constant 0 : i32
    %c0_i32_1 = arith.constant 0 : i32
    return %c0_i32, %c0_i32_0 : i32, i32
  }
  func.func @transform_3(%arg0: i32) -> (i32, i32) {
    %c0_i32 = arith.constant 0 : i32
    %c0_i32_0 = arith.constant 0 : i32
    %c0_i32_1 = arith.constant 0 : i32
    return %c0_i32, %c0_i32_0 : i32, i32
  }
  func.func @transform_4(%arg0: i32) -> (i32, i32) {
    %c0_i32 = arith.constant 0 : i32
    %c0_i32_0 = arith.constant 0 : i32
    return %arg0, %c0_i32 : i32, i32
  }
}

module attributes {stable_mosaic.version = 11 : i64} {
  func.func @_block_kernel(%arg0: i32, %arg1: memref<1x16x32xf32, #tpu.memory_space<vmem>>, %arg2: memref<1x32xf32, #tpu.memory_space<vmem>>, %arg3: memref<1x32xf32, #tpu.memory_space<vmem>>, %arg4: memref<32x32xbf16, #tpu.memory_space<vmem>>, %arg5: memref<128x32xbf16, #tpu.memory_space<vmem>>, %arg6: memref<1x32xf32, #tpu.memory_space<vmem>>, %arg7: memref<1x32xf32, #tpu.memory_space<vmem>>, %arg8: memref<32x64xbf16, #tpu.memory_space<vmem>>, %arg9: memref<32x32xbf16, #tpu.memory_space<vmem>>, %arg10: memref<1x32xf32, #tpu.memory_space<vmem>>, %arg11: memref<1x32xf32, #tpu.memory_space<vmem>>, %arg12: memref<1x32xf32, #tpu.memory_space<vmem>>, %arg13: memref<32x32xbf16, #tpu.memory_space<vmem>>, %arg14: memref<1x32xf32, #tpu.memory_space<vmem>>, %arg15: memref<18x32xf32, #tpu.memory_space<vmem>>, %arg16: memref<2x32xf32, #tpu.memory_space<vmem>>, %arg17: memref<64x32xbf16, #tpu.memory_space<vmem>>, %arg18: memref<1x32xf32, #tpu.memory_space<vmem>>, %arg19: memref<4x4x16xbf16, #tpu.memory_space<vmem>>, %arg20: memref<1x32xf32, #tpu.memory_space<vmem>>, %arg21: memref<1x32xf32, #tpu.memory_space<vmem>>, %arg22: memref<1x16x32xf32, #tpu.memory_space<vmem>>) attributes {dimension_semantics = [#tpu.dimension_semantics<parallel>], iteration_bounds = array<i64: 2>, scalar_prefetch = 0 : i64, scratch_operands = 0 : i64, tpu.core_type = #tpu.core_type<tc>, window_params = [{transform_indices = @transform_0, window_bounds = array<i64: 1, 16, 32>}, {pipeline_mode = #tpu.pipeline_mode<synchronous>, transform_indices = @transform_1, window_bounds = array<i64: 1, 32>}, {pipeline_mode = #tpu.pipeline_mode<synchronous>, transform_indices = @transform_2, window_bounds = array<i64: 1, 32>}, {pipeline_mode = #tpu.pipeline_mode<synchronous>, transform_indices = @transform_3, window_bounds = array<i64: 32, 32>}, {pipeline_mode = #tpu.pipeline_mode<synchronous>, transform_indices = @transform_4, window_bounds = array<i64: 128, 32>}, {pipeline_mode = #tpu.pipeline_mode<synchronous>, transform_indices = @transform_5, window_bounds = array<i64: 1, 32>}, {pipeline_mode = #tpu.pipeline_mode<synchronous>, transform_indices = @transform_6, window_bounds = array<i64: 1, 32>}, {pipeline_mode = #tpu.pipeline_mode<synchronous>, transform_indices = @transform_7, window_bounds = array<i64: 32, 64>}, {pipeline_mode = #tpu.pipeline_mode<synchronous>, transform_indices = @transform_8, window_bounds = array<i64: 32, 32>}, {pipeline_mode = #tpu.pipeline_mode<synchronous>, transform_indices = @transform_9, window_bounds = array<i64: 1, 32>}, {pipeline_mode = #tpu.pipeline_mode<synchronous>, transform_indices = @transform_10, window_bounds = array<i64: 1, 32>}, {pipeline_mode = #tpu.pipeline_mode<synchronous>, transform_indices = @transform_11, window_bounds = array<i64: 1, 32>}, {pipeline_mode = #tpu.pipeline_mode<synchronous>, transform_indices = @transform_12, window_bounds = array<i64: 32, 32>}, {pipeline_mode = #tpu.pipeline_mode<synchronous>, transform_indices = @transform_13, window_bounds = array<i64: 1, 32>}, {pipeline_mode = #tpu.pipeline_mode<synchronous>, transform_indices = @transform_14, window_bounds = array<i64: 18, 32>}, {pipeline_mode = #tpu.pipeline_mode<synchronous>, transform_indices = @transform_15, window_bounds = array<i64: 2, 32>}, {pipeline_mode = #tpu.pipeline_mode<synchronous>, transform_indices = @transform_16, window_bounds = array<i64: 64, 32>}, {pipeline_mode = #tpu.pipeline_mode<synchronous>, transform_indices = @transform_17, window_bounds = array<i64: 1, 32>}, {pipeline_mode = #tpu.pipeline_mode<synchronous>, transform_indices = @transform_18, window_bounds = array<i64: 4, 4, 16>}, {pipeline_mode = #tpu.pipeline_mode<synchronous>, transform_indices = @transform_19, window_bounds = array<i64: 1, 32>}, {pipeline_mode = #tpu.pipeline_mode<synchronous>, transform_indices = @transform_20, window_bounds = array<i64: 1, 32>}, {transform_indices = @transform_21, window_bounds = array<i64: 1, 16, 32>}]} {
    %c0 = arith.constant 0 : index
    %c0_0 = arith.constant 0 : index
    %c0_1 = arith.constant 0 : index
    %0 = vector.load %arg1[%c0, %c0_0, %c0_1] : memref<1x16x32xf32, #tpu.memory_space<vmem>>, vector<1x16x32xf32>
    %1 = vector.shape_cast %0 : vector<1x16x32xf32> to vector<16x32xf32>
    %c0_2 = arith.constant 0 : index
    %c0_3 = arith.constant 0 : index
    %2 = vector.load %arg2[%c0_2, %c0_3] : memref<1x32xf32, #tpu.memory_space<vmem>>, vector<1x32xf32>
    %c0_4 = arith.constant 0 : index
    %c0_5 = arith.constant 0 : index
    %3 = vector.load %arg3[%c0_4, %c0_5] : memref<1x32xf32, #tpu.memory_space<vmem>>, vector<1x32xf32>
    %cst = arith.constant dense<0.000000e+00> : vector<16xf32>
    %4 = vector.multi_reduction <add>, %1, %cst [1] : vector<16x32xf32> to vector<16xf32>
    %5 = vector.shape_cast %4 : vector<16xf32> to vector<16x1xf32>
    %cst_6 = arith.constant 3.200000e+01 : f32
    %6 = vector.broadcast %cst_6 : f32 to vector<16x1xf32>
    %7 = arith.divf %5, %6 : vector<16x1xf32>
    %8 = vector.broadcast %7 : vector<16x1xf32> to vector<16x32xf32>
    %9 = arith.subf %1, %8 : vector<16x32xf32>
    %10 = arith.mulf %9, %9 : vector<16x32xf32>
    %cst_7 = arith.constant dense<0.000000e+00> : vector<16xf32>
    %11 = vector.multi_reduction <add>, %10, %cst_7 [1] : vector<16x32xf32> to vector<16xf32>
    %12 = vector.shape_cast %11 : vector<16xf32> to vector<16x1xf32>
    %cst_8 = arith.constant 3.200000e+01 : f32
    %13 = vector.broadcast %cst_8 : f32 to vector<16x1xf32>
    %14 = arith.divf %12, %13 : vector<16x1xf32>
    %15 = vector.broadcast %7 : vector<16x1xf32> to vector<16x32xf32>
    %16 = arith.subf %1, %15 : vector<16x32xf32>
    %cst_9 = arith.constant 9.99999974E-6 : f32
    %17 = vector.broadcast %cst_9 : f32 to vector<16x1xf32>
    %18 = arith.addf %14, %17 : vector<16x1xf32>
    %19 = math.rsqrt %18 : vector<16x1xf32>
    %20 = vector.broadcast %19 : vector<16x1xf32> to vector<16x32xf32>
    %21 = arith.mulf %16, %20 : vector<16x32xf32>
    %22 = vector.broadcast %2 : vector<1x32xf32> to vector<16x32xf32>
    %23 = arith.mulf %21, %22 : vector<16x32xf32>
    %24 = vector.broadcast %3 : vector<1x32xf32> to vector<16x32xf32>
    %25 = arith.addf %23, %24 : vector<16x32xf32>
    %26 = arith.truncf %25 : vector<16x32xf32> to vector<16x32xbf16>
    %c0_10 = arith.constant 0 : index
    %c0_11 = arith.constant 0 : index
    %27 = vector.load %arg4[%c0_10, %c0_11] : memref<32x32xbf16, #tpu.memory_space<vmem>>, vector<32x32xbf16>
    %cst_12 = arith.constant dense<0.000000e+00> : vector<16x32xf32>
    %28 = tpu.matmul %26, %27, %cst_12 {dimension_numbers = #tpu.dot_dimension_numbers<[1], [0], [0], [1], [0, 0, 1, 1], [], []>} : vector<16x32xbf16>, vector<32x32xbf16>, vector<16x32xf32> -> vector<16x32xf32>
    %cst_13 = arith.constant 0.000000e+00 : f32
    %29 = vector.broadcast %cst_13 : f32 to vector<4x32xf32>
    %c0_14 = arith.constant 0 : index
    %c0_15 = arith.constant 0 : index
    %c0_16 = arith.constant 0 : index
    %30 = vector.load %arg19[%c0_14, %c0_15, %c0_16] : memref<4x4x16xbf16, #tpu.memory_space<vmem>>, vector<1x4x16xbf16>
    %31 = vector.shape_cast %30 : vector<1x4x16xbf16> to vector<4x16xbf16>
    %cst_17 = arith.constant dense<0.000000e+00> : vector<4x32xf32>
    %32 = tpu.matmul %31, %26, %cst_17 {dimension_numbers = #tpu.dot_dimension_numbers<[1], [0], [0], [1], [0, 0, 1, 1], [], []>} : vector<4x16xbf16>, vector<16x32xbf16>, vector<4x32xf32> -> vector<4x32xf32>
    %33 = arith.truncf %32 : vector<4x32xf32> to vector<4x32xbf16>
    %c0_18 = arith.constant 0 : index
    %c0_19 = arith.constant 0 : index
    %34 = vector.load %arg5[%c0_18, %c0_19] : memref<128x32xbf16, #tpu.memory_space<vmem>>, vector<32x32xbf16>
    %cst_20 = arith.constant dense<0.000000e+00> : vector<4x32xf32>
    %35 = tpu.matmul %33, %34, %cst_20 {dimension_numbers = #tpu.dot_dimension_numbers<[1], [0], [0], [1], [0, 0, 1, 1], [], []>} : vector<4x32xbf16>, vector<32x32xbf16>, vector<4x32xf32> -> vector<4x32xf32>
    %36 = arith.addf %29, %35 : vector<4x32xf32>
    %c1 = arith.constant 1 : index
    %c0_21 = arith.constant 0 : index
    %c0_22 = arith.constant 0 : index
    %37 = vector.load %arg19[%c1, %c0_21, %c0_22] : memref<4x4x16xbf16, #tpu.memory_space<vmem>>, vector<1x4x16xbf16>
    %38 = vector.shape_cast %37 : vector<1x4x16xbf16> to vector<4x16xbf16>
    %cst_23 = arith.constant dense<0.000000e+00> : vector<4x32xf32>
    %39 = tpu.matmul %38, %26, %cst_23 {dimension_numbers = #tpu.dot_dimension_numbers<[1], [0], [0], [1], [0, 0, 1, 1], [], []>} : vector<4x16xbf16>, vector<16x32xbf16>, vector<4x32xf32> -> vector<4x32xf32>
    %40 = arith.truncf %39 : vector<4x32xf32> to vector<4x32xbf16>
    %c32 = arith.constant 32 : index
    %c0_24 = arith.constant 0 : index
    %41 = vector.load %arg5[%c32, %c0_24] : memref<128x32xbf16, #tpu.memory_space<vmem>>, vector<32x32xbf16>
    %cst_25 = arith.constant dense<0.000000e+00> : vector<4x32xf32>
    %42 = tpu.matmul %40, %41, %cst_25 {dimension_numbers = #tpu.dot_dimension_numbers<[1], [0], [0], [1], [0, 0, 1, 1], [], []>} : vector<4x32xbf16>, vector<32x32xbf16>, vector<4x32xf32> -> vector<4x32xf32>
    %43 = arith.addf %36, %42 : vector<4x32xf32>
    %c2 = arith.constant 2 : index
    %c0_26 = arith.constant 0 : index
    %c0_27 = arith.constant 0 : index
    %44 = vector.load %arg19[%c2, %c0_26, %c0_27] : memref<4x4x16xbf16, #tpu.memory_space<vmem>>, vector<1x4x16xbf16>
    %45 = vector.shape_cast %44 : vector<1x4x16xbf16> to vector<4x16xbf16>
    %cst_28 = arith.constant dense<0.000000e+00> : vector<4x32xf32>
    %46 = tpu.matmul %45, %26, %cst_28 {dimension_numbers = #tpu.dot_dimension_numbers<[1], [0], [0], [1], [0, 0, 1, 1], [], []>} : vector<4x16xbf16>, vector<16x32xbf16>, vector<4x32xf32> -> vector<4x32xf32>
    %47 = arith.truncf %46 : vector<4x32xf32> to vector<4x32xbf16>
    %c64 = arith.constant 64 : index
    %c0_29 = arith.constant 0 : index
    %48 = vector.load %arg5[%c64, %c0_29] : memref<128x32xbf16, #tpu.memory_space<vmem>>, vector<32x32xbf16>
    %cst_30 = arith.constant dense<0.000000e+00> : vector<4x32xf32>
    %49 = tpu.matmul %47, %48, %cst_30 {dimension_numbers = #tpu.dot_dimension_numbers<[1], [0], [0], [1], [0, 0, 1, 1], [], []>} : vector<4x32xbf16>, vector<32x32xbf16>, vector<4x32xf32> -> vector<4x32xf32>
    %50 = arith.addf %43, %49 : vector<4x32xf32>
    %c3 = arith.constant 3 : index
    %c0_31 = arith.constant 0 : index
    %c0_32 = arith.constant 0 : index
    %51 = vector.load %arg19[%c3, %c0_31, %c0_32] : memref<4x4x16xbf16, #tpu.memory_space<vmem>>, vector<1x4x16xbf16>
    %52 = vector.shape_cast %51 : vector<1x4x16xbf16> to vector<4x16xbf16>
    %cst_33 = arith.constant dense<0.000000e+00> : vector<4x32xf32>
    %53 = tpu.matmul %52, %26, %cst_33 {dimension_numbers = #tpu.dot_dimension_numbers<[1], [0], [0], [1], [0, 0, 1, 1], [], []>} : vector<4x16xbf16>, vector<16x32xbf16>, vector<4x32xf32> -> vector<4x32xf32>
    %54 = arith.truncf %53 : vector<4x32xf32> to vector<4x32xbf16>
    %c96 = arith.constant 96 : index
    %c0_34 = arith.constant 0 : index
    %55 = vector.load %arg5[%c96, %c0_34] : memref<128x32xbf16, #tpu.memory_space<vmem>>, vector<32x32xbf16>
    %cst_35 = arith.constant dense<0.000000e+00> : vector<4x32xf32>
    %56 = tpu.matmul %54, %55, %cst_35 {dimension_numbers = #tpu.dot_dimension_numbers<[1], [0], [0], [1], [0, 0, 1, 1], [], []>} : vector<4x32xbf16>, vector<32x32xbf16>, vector<4x32xf32> -> vector<4x32xf32>
    %57 = arith.addf %50, %56 : vector<4x32xf32>
    %c0_36 = arith.constant 0 : index
    %c0_37 = arith.constant 0 : index
    %58 = vector.load %arg6[%c0_36, %c0_37] : memref<1x32xf32, #tpu.memory_space<vmem>>, vector<1x32xf32>
    %c0_38 = arith.constant 0 : index
    %c0_39 = arith.constant 0 : index
    %59 = vector.load %arg7[%c0_38, %c0_39] : memref<1x32xf32, #tpu.memory_space<vmem>>, vector<1x32xf32>
    %cst_40 = arith.constant dense<0.000000e+00> : vector<4xf32>
    %60 = vector.multi_reduction <add>, %57, %cst_40 [1] : vector<4x32xf32> to vector<4xf32>
    %61 = vector.shape_cast %60 : vector<4xf32> to vector<4x1xf32>
    %cst_41 = arith.constant 3.200000e+01 : f32
    %62 = vector.broadcast %cst_41 : f32 to vector<4x1xf32>
    %63 = arith.divf %61, %62 : vector<4x1xf32>
    %64 = vector.broadcast %63 : vector<4x1xf32> to vector<4x32xf32>
    %65 = arith.subf %57, %64 : vector<4x32xf32>
    %66 = arith.mulf %65, %65 : vector<4x32xf32>
    %cst_42 = arith.constant dense<0.000000e+00> : vector<4xf32>
    %67 = vector.multi_reduction <add>, %66, %cst_42 [1] : vector<4x32xf32> to vector<4xf32>
    %68 = vector.shape_cast %67 : vector<4xf32> to vector<4x1xf32>
    %cst_43 = arith.constant 3.200000e+01 : f32
    %69 = vector.broadcast %cst_43 : f32 to vector<4x1xf32>
    %70 = arith.divf %68, %69 : vector<4x1xf32>
    %71 = vector.broadcast %63 : vector<4x1xf32> to vector<4x32xf32>
    %72 = arith.subf %57, %71 : vector<4x32xf32>
    %cst_44 = arith.constant 9.99999974E-6 : f32
    %73 = vector.broadcast %cst_44 : f32 to vector<4x1xf32>
    %74 = arith.addf %70, %73 : vector<4x1xf32>
    %75 = math.rsqrt %74 : vector<4x1xf32>
    %76 = vector.broadcast %75 : vector<4x1xf32> to vector<4x32xf32>
    %77 = arith.mulf %72, %76 : vector<4x32xf32>
    %78 = vector.broadcast %58 : vector<1x32xf32> to vector<4x32xf32>
    %79 = arith.mulf %77, %78 : vector<4x32xf32>
    %80 = vector.broadcast %59 : vector<1x32xf32> to vector<4x32xf32>
    %81 = arith.addf %79, %80 : vector<4x32xf32>
    %82 = arith.truncf %81 : vector<4x32xf32> to vector<4x32xbf16>
    %c0_45 = arith.constant 0 : index
    %c0_46 = arith.constant 0 : index
    %83 = vector.load %arg8[%c0_45, %c0_46] : memref<32x64xbf16, #tpu.memory_space<vmem>>, vector<32x64xbf16>
    %cst_47 = arith.constant dense<0.000000e+00> : vector<4x64xf32>
    %84 = tpu.matmul %82, %83, %cst_47 {dimension_numbers = #tpu.dot_dimension_numbers<[1], [0], [0], [1], [0, 0, 1, 1], [], []>} : vector<4x32xbf16>, vector<32x64xbf16>, vector<4x64xf32> -> vector<4x64xf32>
    %cst_48 = arith.constant 0.000000e+00 : f32
    %85 = vector.broadcast %cst_48 : f32 to vector<16x32xf32>
    %86 = vector.extract_strided_slice %28 {offsets = [0, 0], sizes = [16, 16], strides = [1, 1]} : vector<16x32xf32> to vector<16x16xf32>
    %87 = arith.truncf %86 : vector<16x16xf32> to vector<16x16xbf16>
    %88 = vector.extract_strided_slice %84 {offsets = [0, 0], sizes = [4, 16], strides = [1, 1]} : vector<4x64xf32> to vector<4x16xf32>
    %89 = arith.truncf %88 : vector<4x16xf32> to vector<4x16xbf16>
    %90 = vector.extract_strided_slice %84 {offsets = [0, 32], sizes = [4, 16], strides = [1, 1]} : vector<4x64xf32> to vector<4x16xf32>
    %91 = arith.truncf %90 : vector<4x16xf32> to vector<4x16xbf16>
    %cst_49 = arith.constant dense<0.000000e+00> : vector<16x4xf32>
    %92 = tpu.matmul %87, %89, %cst_49 {dimension_numbers = #tpu.dot_dimension_numbers<[1], [1], [0], [0], [0, 0, 1, 0], [], []>} : vector<16x16xbf16>, vector<4x16xbf16>, vector<16x4xf32> -> vector<16x4xf32>
    %cst_50 = arith.constant dense<0xFF800000> : vector<16xf32>
    %93 = vector.multi_reduction <maximumf>, %92, %cst_50 [1] : vector<16x4xf32> to vector<16xf32>
    %94 = vector.shape_cast %93 : vector<16xf32> to vector<16x1xf32>
    %95 = vector.broadcast %94 : vector<16x1xf32> to vector<16x4xf32>
    %96 = arith.subf %92, %95 : vector<16x4xf32>
    %97 = math.exp %96 : vector<16x4xf32>
    %cst_51 = arith.constant dense<0.000000e+00> : vector<16xf32>
    %98 = vector.multi_reduction <add>, %97, %cst_51 [1] : vector<16x4xf32> to vector<16xf32>
    %99 = vector.shape_cast %98 : vector<16xf32> to vector<16x1xf32>
    %100 = tpu.reciprocal %99 {approx = true} : vector<16x1xf32> -> vector<16x1xf32>
    %101 = vector.broadcast %100 : vector<16x1xf32> to vector<16x4xf32>
    %102 = arith.mulf %97, %101 : vector<16x4xf32>
    %103 = arith.truncf %102 : vector<16x4xf32> to vector<16x4xbf16>
    %cst_52 = arith.constant dense<0.000000e+00> : vector<16x16xf32>
    %104 = tpu.matmul %103, %91, %cst_52 {dimension_numbers = #tpu.dot_dimension_numbers<[1], [0], [0], [1], [0, 0, 1, 1], [], []>} : vector<16x4xbf16>, vector<4x16xbf16>, vector<16x16xf32> -> vector<16x16xf32>
    %105 = arith.truncf %104 : vector<16x16xf32> to vector<16x16xbf16>
    %c0_53 = arith.constant 0 : index
    %c0_54 = arith.constant 0 : index
    %106 = vector.load %arg9[%c0_53, %c0_54] : memref<32x32xbf16, #tpu.memory_space<vmem>>, vector<16x32xbf16>
    %cst_55 = arith.constant dense<0.000000e+00> : vector<16x32xf32>
    %107 = tpu.matmul %105, %106, %cst_55 {dimension_numbers = #tpu.dot_dimension_numbers<[1], [0], [0], [1], [0, 0, 1, 1], [], []>} : vector<16x16xbf16>, vector<16x32xbf16>, vector<16x32xf32> -> vector<16x32xf32>
    %108 = arith.addf %85, %107 : vector<16x32xf32>
    %109 = vector.extract_strided_slice %28 {offsets = [0, 16], sizes = [16, 16], strides = [1, 1]} : vector<16x32xf32> to vector<16x16xf32>
    %110 = arith.truncf %109 : vector<16x16xf32> to vector<16x16xbf16>
    %111 = vector.extract_strided_slice %84 {offsets = [0, 16], sizes = [4, 16], strides = [1, 1]} : vector<4x64xf32> to vector<4x16xf32>
    %112 = arith.truncf %111 : vector<4x16xf32> to vector<4x16xbf16>
    %113 = vector.extract_strided_slice %84 {offsets = [0, 48], sizes = [4, 16], strides = [1, 1]} : vector<4x64xf32> to vector<4x16xf32>
    %114 = arith.truncf %113 : vector<4x16xf32> to vector<4x16xbf16>
    %cst_56 = arith.constant dense<0.000000e+00> : vector<16x4xf32>
    %115 = tpu.matmul %110, %112, %cst_56 {dimension_numbers = #tpu.dot_dimension_numbers<[1], [1], [0], [0], [0, 0, 1, 0], [], []>} : vector<16x16xbf16>, vector<4x16xbf16>, vector<16x4xf32> -> vector<16x4xf32>
    %cst_57 = arith.constant dense<0xFF800000> : vector<16xf32>
    %116 = vector.multi_reduction <maximumf>, %115, %cst_57 [1] : vector<16x4xf32> to vector<16xf32>
    %117 = vector.shape_cast %116 : vector<16xf32> to vector<16x1xf32>
    %118 = vector.broadcast %117 : vector<16x1xf32> to vector<16x4xf32>
    %119 = arith.subf %115, %118 : vector<16x4xf32>
    %120 = math.exp %119 : vector<16x4xf32>
    %cst_58 = arith.constant dense<0.000000e+00> : vector<16xf32>
    %121 = vector.multi_reduction <add>, %120, %cst_58 [1] : vector<16x4xf32> to vector<16xf32>
    %122 = vector.shape_cast %121 : vector<16xf32> to vector<16x1xf32>
    %123 = tpu.reciprocal %122 {approx = true} : vector<16x1xf32> -> vector<16x1xf32>
    %124 = vector.broadcast %123 : vector<16x1xf32> to vector<16x4xf32>
    %125 = arith.mulf %120, %124 : vector<16x4xf32>
    %126 = arith.truncf %125 : vector<16x4xf32> to vector<16x4xbf16>
    %cst_59 = arith.constant dense<0.000000e+00> : vector<16x16xf32>
    %127 = tpu.matmul %126, %114, %cst_59 {dimension_numbers = #tpu.dot_dimension_numbers<[1], [0], [0], [1], [0, 0, 1, 1], [], []>} : vector<16x4xbf16>, vector<4x16xbf16>, vector<16x16xf32> -> vector<16x16xf32>
    %128 = arith.truncf %127 : vector<16x16xf32> to vector<16x16xbf16>
    %c16 = arith.constant 16 : index
    %c0_60 = arith.constant 0 : index
    %129 = vector.load %arg9[%c16, %c0_60] : memref<32x32xbf16, #tpu.memory_space<vmem>>, vector<16x32xbf16>
    %cst_61 = arith.constant dense<0.000000e+00> : vector<16x32xf32>
    %130 = tpu.matmul %128, %129, %cst_61 {dimension_numbers = #tpu.dot_dimension_numbers<[1], [0], [0], [1], [0, 0, 1, 1], [], []>} : vector<16x16xbf16>, vector<16x32xbf16>, vector<16x32xf32> -> vector<16x32xf32>
    %131 = arith.addf %108, %130 : vector<16x32xf32>
    %132 = arith.addf %1, %131 : vector<16x32xf32>
    %c0_62 = arith.constant 0 : index
    %c0_63 = arith.constant 0 : index
    %133 = vector.load %arg10[%c0_62, %c0_63] : memref<1x32xf32, #tpu.memory_space<vmem>>, vector<1x32xf32>
    %134 = vector.broadcast %133 : vector<1x32xf32> to vector<16x32xf32>
    %135 = arith.addf %132, %134 : vector<16x32xf32>
    %c0_64 = arith.constant 0 : index
    %c0_65 = arith.constant 0 : index
    %136 = vector.load %arg11[%c0_64, %c0_65] : memref<1x32xf32, #tpu.memory_space<vmem>>, vector<1x32xf32>
    %c0_66 = arith.constant 0 : index
    %c0_67 = arith.constant 0 : index
    %137 = vector.load %arg12[%c0_66, %c0_67] : memref<1x32xf32, #tpu.memory_space<vmem>>, vector<1x32xf32>
    %cst_68 = arith.constant dense<0.000000e+00> : vector<16xf32>
    %138 = vector.multi_reduction <add>, %135, %cst_68 [1] : vector<16x32xf32> to vector<16xf32>
    %139 = vector.shape_cast %138 : vector<16xf32> to vector<16x1xf32>
    %cst_69 = arith.constant 3.200000e+01 : f32
    %140 = vector.broadcast %cst_69 : f32 to vector<16x1xf32>
    %141 = arith.divf %139, %140 : vector<16x1xf32>
    %142 = vector.broadcast %141 : vector<16x1xf32> to vector<16x32xf32>
    %143 = arith.subf %135, %142 : vector<16x32xf32>
    %144 = arith.mulf %143, %143 : vector<16x32xf32>
    %cst_70 = arith.constant dense<0.000000e+00> : vector<16xf32>
    %145 = vector.multi_reduction <add>, %144, %cst_70 [1] : vector<16x32xf32> to vector<16xf32>
    %146 = vector.shape_cast %145 : vector<16xf32> to vector<16x1xf32>
    %cst_71 = arith.constant 3.200000e+01 : f32
    %147 = vector.broadcast %cst_71 : f32 to vector<16x1xf32>
    %148 = arith.divf %146, %147 : vector<16x1xf32>
    %149 = vector.broadcast %141 : vector<16x1xf32> to vector<16x32xf32>
    %150 = arith.subf %135, %149 : vector<16x32xf32>
    %cst_72 = arith.constant 9.99999974E-6 : f32
    %151 = vector.broadcast %cst_72 : f32 to vector<16x1xf32>
    %152 = arith.addf %148, %151 : vector<16x1xf32>
    %153 = math.rsqrt %152 : vector<16x1xf32>
    %154 = vector.broadcast %153 : vector<16x1xf32> to vector<16x32xf32>
    %155 = arith.mulf %150, %154 : vector<16x32xf32>
    %156 = vector.broadcast %136 : vector<1x32xf32> to vector<16x32xf32>
    %157 = arith.mulf %155, %156 : vector<16x32xf32>
    %158 = vector.broadcast %137 : vector<1x32xf32> to vector<16x32xf32>
    %159 = arith.addf %157, %158 : vector<16x32xf32>
    %160 = arith.truncf %159 : vector<16x32xf32> to vector<16x32xbf16>
    %c0_73 = arith.constant 0 : index
    %c0_74 = arith.constant 0 : index
    %161 = vector.load %arg13[%c0_73, %c0_74] : memref<32x32xbf16, #tpu.memory_space<vmem>>, vector<32x32xbf16>
    %cst_75 = arith.constant dense<0.000000e+00> : vector<16x32xf32>
    %162 = tpu.matmul %160, %161, %cst_75 {dimension_numbers = #tpu.dot_dimension_numbers<[1], [0], [0], [1], [0, 0, 1, 1], [], []>} : vector<16x32xbf16>, vector<32x32xbf16>, vector<16x32xf32> -> vector<16x32xf32>
    %c0_76 = arith.constant 0 : index
    %c0_77 = arith.constant 0 : index
    %163 = vector.load %arg14[%c0_76, %c0_77] : memref<1x32xf32, #tpu.memory_space<vmem>>, vector<1x32xf32>
    %164 = vector.broadcast %163 : vector<1x32xf32> to vector<16x32xf32>
    %165 = arith.addf %162, %164 : vector<16x32xf32>
    %166 = tpu.iota {dimensions = array<i32: 0>} : vector<16x1xi32>
    %c4_i32 = arith.constant 4 : i32
    %c0_i32 = arith.constant 0 : i32
    %167 = arith.cmpi eq, %c4_i32, %c0_i32 : i32
    %c1_i32 = arith.constant 1 : i32
    %168 = arith.select %167, %c1_i32, %c4_i32 : i32
    %169 = vector.broadcast %168 : i32 to vector<16x1xi32>
    %170 = arith.remsi %166, %169 : vector<16x1xi32>
    %c0_i32_78 = arith.constant 0 : i32
    %171 = vector.broadcast %c0_i32_78 : i32 to vector<16x1xi32>
    %172 = arith.cmpi ne, %170, %171 : vector<16x1xi32>
    %c0_i32_79 = arith.constant 0 : i32
    %173 = vector.broadcast %c0_i32_79 : i32 to vector<16x1xi32>
    %174 = arith.cmpi slt, %170, %173 : vector<16x1xi32>
    %c0_i32_80 = arith.constant 0 : i32
    %175 = arith.cmpi slt, %168, %c0_i32_80 : i32
    %176 = vector.broadcast %175 : i1 to vector<16x1xi1>
    %177 = vector.broadcast %176 : vector<16x1xi1> to vector<16x1xi1>
    %178 = arith.xori %174, %177 : vector<16x1xi1>
    %179 = arith.andi %178, %172 : vector<16x1xi1>
    %180 = vector.broadcast %168 : i32 to vector<16x1xi32>
    %181 = arith.addi %170, %180 : vector<16x1xi32>
    %182 = arith.select %179, %181, %170 : vector<16x1xi1>, vector<16x1xi32>
    %cst_81 = arith.constant 0.000000e+00 : f32
    %183 = vector.broadcast %cst_81 : f32 to vector<16x32xf32>
    %cst_82 = arith.constant 0.000000e+00 : f32
    %184 = vector.broadcast %cst_82 : f32 to vector<16x32xf32>
    %cst_83 = arith.constant 0.000000e+00 : f32
    %185 = vector.broadcast %cst_83 : f32 to vector<5x32xf32>
    %186 = vector.extract_strided_slice %165 {offsets = [0, 0], sizes = [11, 32], strides = [1, 1]} : vector<16x32xf32> to vector<11x32xf32>
    %187 = tpu.concatenate %185, %186 in 0 : vector<5x32xf32>, vector<11x32xf32> -> vector<16x32xf32>
    %c-1_i32 = arith.constant -1 : i32
    %188 = vector.broadcast %c-1_i32 : i32 to vector<16x1xi32>
    %189 = arith.addi %182, %188 : vector<16x1xi32>
    %c0_i32_84 = arith.constant 0 : i32
    %190 = vector.broadcast %c0_i32_84 : i32 to vector<16x1xi32>
    %191 = arith.cmpi sge, %189, %190 : vector<16x1xi32>
    %c-1_i32_85 = arith.constant -1 : i32
    %192 = vector.broadcast %c-1_i32_85 : i32 to vector<16x1xi32>
    %193 = arith.addi %182, %192 : vector<16x1xi32>
    %c4_i32_86 = arith.constant 4 : i32
    %194 = vector.broadcast %c4_i32_86 : i32 to vector<16x1xi32>
    %195 = arith.cmpi slt, %193, %194 : vector<16x1xi32>
    %196 = arith.andi %191, %195 : vector<16x1xi1>
    %197 = arith.extui %196 : vector<16x1xi1> to vector<16x1xi32>
    %198 = arith.sitofp %197 : vector<16x1xi32> to vector<16x1xf32>
    %199 = vector.broadcast %198 : vector<16x1xf32> to vector<16x32xf32>
    %200 = arith.mulf %187, %199 : vector<16x32xf32>
    %c0_87 = arith.constant 0 : index
    %c0_88 = arith.constant 0 : index
    %201 = vector.load %arg15[%c0_87, %c0_88] : memref<18x32xf32, #tpu.memory_space<vmem>>, vector<1x32xf32>
    %202 = vector.broadcast %201 : vector<1x32xf32> to vector<16x32xf32>
    %203 = arith.mulf %200, %202 : vector<16x32xf32>
    %204 = arith.addf %183, %203 : vector<16x32xf32>
    %c9 = arith.constant 9 : index
    %c0_89 = arith.constant 0 : index
    %205 = vector.load %arg15[%c9, %c0_89] : memref<18x32xf32, #tpu.memory_space<vmem>>, vector<1x32xf32>
    %206 = vector.broadcast %205 : vector<1x32xf32> to vector<16x32xf32>
    %207 = arith.mulf %200, %206 : vector<16x32xf32>
    %208 = arith.addf %184, %207 : vector<16x32xf32>
    %cst_90 = arith.constant 0.000000e+00 : f32
    %209 = vector.broadcast %cst_90 : f32 to vector<4x32xf32>
    %210 = vector.extract_strided_slice %165 {offsets = [0, 0], sizes = [12, 32], strides = [1, 1]} : vector<16x32xf32> to vector<12x32xf32>
    %211 = tpu.concatenate %209, %210 in 0 : vector<4x32xf32>, vector<12x32xf32> -> vector<16x32xf32>
    %c1_91 = arith.constant 1 : index
    %c0_92 = arith.constant 0 : index
    %212 = vector.load %arg15[%c1_91, %c0_92] : memref<18x32xf32, #tpu.memory_space<vmem>>, vector<1x32xf32>
    %213 = vector.broadcast %212 : vector<1x32xf32> to vector<16x32xf32>
    %214 = arith.mulf %211, %213 : vector<16x32xf32>
    %215 = arith.addf %204, %214 : vector<16x32xf32>
    %c10 = arith.constant 10 : index
    %c0_93 = arith.constant 0 : index
    %216 = vector.load %arg15[%c10, %c0_93] : memref<18x32xf32, #tpu.memory_space<vmem>>, vector<1x32xf32>
    %217 = vector.broadcast %216 : vector<1x32xf32> to vector<16x32xf32>
    %218 = arith.mulf %211, %217 : vector<16x32xf32>
    %219 = arith.addf %208, %218 : vector<16x32xf32>
    %cst_94 = arith.constant 0.000000e+00 : f32
    %220 = vector.broadcast %cst_94 : f32 to vector<3x32xf32>
    %221 = vector.extract_strided_slice %165 {offsets = [0, 0], sizes = [13, 32], strides = [1, 1]} : vector<16x32xf32> to vector<13x32xf32>
    %222 = tpu.concatenate %220, %221 in 0 : vector<3x32xf32>, vector<13x32xf32> -> vector<16x32xf32>
    %c1_i32_95 = arith.constant 1 : i32
    %223 = vector.broadcast %c1_i32_95 : i32 to vector<16x1xi32>
    %224 = arith.addi %182, %223 : vector<16x1xi32>
    %c0_i32_96 = arith.constant 0 : i32
    %225 = vector.broadcast %c0_i32_96 : i32 to vector<16x1xi32>
    %226 = arith.cmpi sge, %224, %225 : vector<16x1xi32>
    %c1_i32_97 = arith.constant 1 : i32
    %227 = vector.broadcast %c1_i32_97 : i32 to vector<16x1xi32>
    %228 = arith.addi %182, %227 : vector<16x1xi32>
    %c4_i32_98 = arith.constant 4 : i32
    %229 = vector.broadcast %c4_i32_98 : i32 to vector<16x1xi32>
    %230 = arith.cmpi slt, %228, %229 : vector<16x1xi32>
    %231 = arith.andi %226, %230 : vector<16x1xi1>
    %232 = arith.extui %231 : vector<16x1xi1> to vector<16x1xi32>
    %233 = arith.sitofp %232 : vector<16x1xi32> to vector<16x1xf32>
    %234 = vector.broadcast %233 : vector<16x1xf32> to vector<16x32xf32>
    %235 = arith.mulf %222, %234 : vector<16x32xf32>
    %c2_99 = arith.constant 2 : index
    %c0_100 = arith.constant 0 : index
    %236 = vector.load %arg15[%c2_99, %c0_100] : memref<18x32xf32, #tpu.memory_space<vmem>>, vector<1x32xf32>
    %237 = vector.broadcast %236 : vector<1x32xf32> to vector<16x32xf32>
    %238 = arith.mulf %235, %237 : vector<16x32xf32>
    %239 = arith.addf %215, %238 : vector<16x32xf32>
    %c11 = arith.constant 11 : index
    %c0_101 = arith.constant 0 : index
    %240 = vector.load %arg15[%c11, %c0_101] : memref<18x32xf32, #tpu.memory_space<vmem>>, vector<1x32xf32>
    %241 = vector.broadcast %240 : vector<1x32xf32> to vector<16x32xf32>
    %242 = arith.mulf %235, %241 : vector<16x32xf32>
    %243 = arith.addf %219, %242 : vector<16x32xf32>
    %cst_102 = arith.constant 0.000000e+00 : f32
    %244 = vector.broadcast %cst_102 : f32 to vector<1x32xf32>
    %245 = vector.extract_strided_slice %165 {offsets = [0, 0], sizes = [15, 32], strides = [1, 1]} : vector<16x32xf32> to vector<15x32xf32>
    %246 = tpu.concatenate %244, %245 in 0 : vector<1x32xf32>, vector<15x32xf32> -> vector<16x32xf32>
    %c-1_i32_103 = arith.constant -1 : i32
    %247 = vector.broadcast %c-1_i32_103 : i32 to vector<16x1xi32>
    %248 = arith.addi %182, %247 : vector<16x1xi32>
    %c0_i32_104 = arith.constant 0 : i32
    %249 = vector.broadcast %c0_i32_104 : i32 to vector<16x1xi32>
    %250 = arith.cmpi sge, %248, %249 : vector<16x1xi32>
    %c-1_i32_105 = arith.constant -1 : i32
    %251 = vector.broadcast %c-1_i32_105 : i32 to vector<16x1xi32>
    %252 = arith.addi %182, %251 : vector<16x1xi32>
    %c4_i32_106 = arith.constant 4 : i32
    %253 = vector.broadcast %c4_i32_106 : i32 to vector<16x1xi32>
    %254 = arith.cmpi slt, %252, %253 : vector<16x1xi32>
    %255 = arith.andi %250, %254 : vector<16x1xi1>
    %256 = arith.extui %255 : vector<16x1xi1> to vector<16x1xi32>
    %257 = arith.sitofp %256 : vector<16x1xi32> to vector<16x1xf32>
    %258 = vector.broadcast %257 : vector<16x1xf32> to vector<16x32xf32>
    %259 = arith.mulf %246, %258 : vector<16x32xf32>
    %c3_107 = arith.constant 3 : index
    %c0_108 = arith.constant 0 : index
    %260 = vector.load %arg15[%c3_107, %c0_108] : memref<18x32xf32, #tpu.memory_space<vmem>>, vector<1x32xf32>
    %261 = vector.broadcast %260 : vector<1x32xf32> to vector<16x32xf32>
    %262 = arith.mulf %259, %261 : vector<16x32xf32>
    %263 = arith.addf %239, %262 : vector<16x32xf32>
    %c12 = arith.constant 12 : index
    %c0_109 = arith.constant 0 : index
    %264 = vector.load %arg15[%c12, %c0_109] : memref<18x32xf32, #tpu.memory_space<vmem>>, vector<1x32xf32>
    %265 = vector.broadcast %264 : vector<1x32xf32> to vector<16x32xf32>
    %266 = arith.mulf %259, %265 : vector<16x32xf32>
    %267 = arith.addf %243, %266 : vector<16x32xf32>
    %c4 = arith.constant 4 : index
    %c0_110 = arith.constant 0 : index
    %268 = vector.load %arg15[%c4, %c0_110] : memref<18x32xf32, #tpu.memory_space<vmem>>, vector<1x32xf32>
    %269 = vector.broadcast %268 : vector<1x32xf32> to vector<16x32xf32>
    %270 = arith.mulf %165, %269 : vector<16x32xf32>
    %271 = arith.addf %263, %270 : vector<16x32xf32>
    %c13 = arith.constant 13 : index
    %c0_111 = arith.constant 0 : index
    %272 = vector.load %arg15[%c13, %c0_111] : memref<18x32xf32, #tpu.memory_space<vmem>>, vector<1x32xf32>
    %273 = vector.broadcast %272 : vector<1x32xf32> to vector<16x32xf32>
    %274 = arith.mulf %165, %273 : vector<16x32xf32>
    %275 = arith.addf %267, %274 : vector<16x32xf32>
    %cst_112 = arith.constant 0.000000e+00 : f32
    %276 = vector.broadcast %cst_112 : f32 to vector<1x32xf32>
    %277 = vector.extract_strided_slice %165 {offsets = [1, 0], sizes = [15, 32], strides = [1, 1]} : vector<16x32xf32> to vector<15x32xf32>
    %278 = tpu.concatenate %277, %276 in 0 : vector<15x32xf32>, vector<1x32xf32> -> vector<16x32xf32>
    %c1_i32_113 = arith.constant 1 : i32
    %279 = vector.broadcast %c1_i32_113 : i32 to vector<16x1xi32>
    %280 = arith.addi %182, %279 : vector<16x1xi32>
    %c0_i32_114 = arith.constant 0 : i32
    %281 = vector.broadcast %c0_i32_114 : i32 to vector<16x1xi32>
    %282 = arith.cmpi sge, %280, %281 : vector<16x1xi32>
    %c1_i32_115 = arith.constant 1 : i32
    %283 = vector.broadcast %c1_i32_115 : i32 to vector<16x1xi32>
    %284 = arith.addi %182, %283 : vector<16x1xi32>
    %c4_i32_116 = arith.constant 4 : i32
    %285 = vector.broadcast %c4_i32_116 : i32 to vector<16x1xi32>
    %286 = arith.cmpi slt, %284, %285 : vector<16x1xi32>
    %287 = arith.andi %282, %286 : vector<16x1xi1>
    %288 = arith.extui %287 : vector<16x1xi1> to vector<16x1xi32>
    %289 = arith.sitofp %288 : vector<16x1xi32> to vector<16x1xf32>
    %290 = vector.broadcast %289 : vector<16x1xf32> to vector<16x32xf32>
    %291 = arith.mulf %278, %290 : vector<16x32xf32>
    %c5 = arith.constant 5 : index
    %c0_117 = arith.constant 0 : index
    %292 = vector.load %arg15[%c5, %c0_117] : memref<18x32xf32, #tpu.memory_space<vmem>>, vector<1x32xf32>
    %293 = vector.broadcast %292 : vector<1x32xf32> to vector<16x32xf32>
    %294 = arith.mulf %291, %293 : vector<16x32xf32>
    %295 = arith.addf %271, %294 : vector<16x32xf32>
    %c14 = arith.constant 14 : index
    %c0_118 = arith.constant 0 : index
    %296 = vector.load %arg15[%c14, %c0_118] : memref<18x32xf32, #tpu.memory_space<vmem>>, vector<1x32xf32>
    %297 = vector.broadcast %296 : vector<1x32xf32> to vector<16x32xf32>
    %298 = arith.mulf %291, %297 : vector<16x32xf32>
    %299 = arith.addf %275, %298 : vector<16x32xf32>
    %cst_119 = arith.constant 0.000000e+00 : f32
    %300 = vector.broadcast %cst_119 : f32 to vector<3x32xf32>
    %301 = vector.extract_strided_slice %165 {offsets = [3, 0], sizes = [13, 32], strides = [1, 1]} : vector<16x32xf32> to vector<13x32xf32>
    %302 = tpu.concatenate %301, %300 in 0 : vector<13x32xf32>, vector<3x32xf32> -> vector<16x32xf32>
    %c-1_i32_120 = arith.constant -1 : i32
    %303 = vector.broadcast %c-1_i32_120 : i32 to vector<16x1xi32>
    %304 = arith.addi %182, %303 : vector<16x1xi32>
    %c0_i32_121 = arith.constant 0 : i32
    %305 = vector.broadcast %c0_i32_121 : i32 to vector<16x1xi32>
    %306 = arith.cmpi sge, %304, %305 : vector<16x1xi32>
    %c-1_i32_122 = arith.constant -1 : i32
    %307 = vector.broadcast %c-1_i32_122 : i32 to vector<16x1xi32>
    %308 = arith.addi %182, %307 : vector<16x1xi32>
    %c4_i32_123 = arith.constant 4 : i32
    %309 = vector.broadcast %c4_i32_123 : i32 to vector<16x1xi32>
    %310 = arith.cmpi slt, %308, %309 : vector<16x1xi32>
    %311 = arith.andi %306, %310 : vector<16x1xi1>
    %312 = arith.extui %311 : vector<16x1xi1> to vector<16x1xi32>
    %313 = arith.sitofp %312 : vector<16x1xi32> to vector<16x1xf32>
    %314 = vector.broadcast %313 : vector<16x1xf32> to vector<16x32xf32>
    %315 = arith.mulf %302, %314 : vector<16x32xf32>
    %c6 = arith.constant 6 : index
    %c0_124 = arith.constant 0 : index
    %316 = vector.load %arg15[%c6, %c0_124] : memref<18x32xf32, #tpu.memory_space<vmem>>, vector<1x32xf32>
    %317 = vector.broadcast %316 : vector<1x32xf32> to vector<16x32xf32>
    %318 = arith.mulf %315, %317 : vector<16x32xf32>
    %319 = arith.addf %295, %318 : vector<16x32xf32>
    %c15 = arith.constant 15 : index
    %c0_125 = arith.constant 0 : index
    %320 = vector.load %arg15[%c15, %c0_125] : memref<18x32xf32, #tpu.memory_space<vmem>>, vector<1x32xf32>
    %321 = vector.broadcast %320 : vector<1x32xf32> to vector<16x32xf32>
    %322 = arith.mulf %315, %321 : vector<16x32xf32>
    %323 = arith.addf %299, %322 : vector<16x32xf32>
    %cst_126 = arith.constant 0.000000e+00 : f32
    %324 = vector.broadcast %cst_126 : f32 to vector<4x32xf32>
    %325 = vector.extract_strided_slice %165 {offsets = [4, 0], sizes = [12, 32], strides = [1, 1]} : vector<16x32xf32> to vector<12x32xf32>
    %326 = tpu.concatenate %325, %324 in 0 : vector<12x32xf32>, vector<4x32xf32> -> vector<16x32xf32>
    %c7 = arith.constant 7 : index
    %c0_127 = arith.constant 0 : index
    %327 = vector.load %arg15[%c7, %c0_127] : memref<18x32xf32, #tpu.memory_space<vmem>>, vector<1x32xf32>
    %328 = vector.broadcast %327 : vector<1x32xf32> to vector<16x32xf32>
    %329 = arith.mulf %326, %328 : vector<16x32xf32>
    %330 = arith.addf %319, %329 : vector<16x32xf32>
    %c16_128 = arith.constant 16 : index
    %c0_129 = arith.constant 0 : index
    %331 = vector.load %arg15[%c16_128, %c0_129] : memref<18x32xf32, #tpu.memory_space<vmem>>, vector<1x32xf32>
    %332 = vector.broadcast %331 : vector<1x32xf32> to vector<16x32xf32>
    %333 = arith.mulf %326, %332 : vector<16x32xf32>
    %334 = arith.addf %323, %333 : vector<16x32xf32>
    %cst_130 = arith.constant 0.000000e+00 : f32
    %335 = vector.broadcast %cst_130 : f32 to vector<5x32xf32>
    %336 = vector.extract_strided_slice %165 {offsets = [5, 0], sizes = [11, 32], strides = [1, 1]} : vector<16x32xf32> to vector<11x32xf32>
    %337 = tpu.concatenate %336, %335 in 0 : vector<11x32xf32>, vector<5x32xf32> -> vector<16x32xf32>
    %c1_i32_131 = arith.constant 1 : i32
    %338 = vector.broadcast %c1_i32_131 : i32 to vector<16x1xi32>
    %339 = arith.addi %182, %338 : vector<16x1xi32>
    %c0_i32_132 = arith.constant 0 : i32
    %340 = vector.broadcast %c0_i32_132 : i32 to vector<16x1xi32>
    %341 = arith.cmpi sge, %339, %340 : vector<16x1xi32>
    %c1_i32_133 = arith.constant 1 : i32
    %342 = vector.broadcast %c1_i32_133 : i32 to vector<16x1xi32>
    %343 = arith.addi %182, %342 : vector<16x1xi32>
    %c4_i32_134 = arith.constant 4 : i32
    %344 = vector.broadcast %c4_i32_134 : i32 to vector<16x1xi32>
    %345 = arith.cmpi slt, %343, %344 : vector<16x1xi32>
    %346 = arith.andi %341, %345 : vector<16x1xi1>
    %347 = arith.extui %346 : vector<16x1xi1> to vector<16x1xi32>
    %348 = arith.sitofp %347 : vector<16x1xi32> to vector<16x1xf32>
    %349 = vector.broadcast %348 : vector<16x1xf32> to vector<16x32xf32>
    %350 = arith.mulf %337, %349 : vector<16x32xf32>
    %c8 = arith.constant 8 : index
    %c0_135 = arith.constant 0 : index
    %351 = vector.load %arg15[%c8, %c0_135] : memref<18x32xf32, #tpu.memory_space<vmem>>, vector<1x32xf32>
    %352 = vector.broadcast %351 : vector<1x32xf32> to vector<16x32xf32>
    %353 = arith.mulf %350, %352 : vector<16x32xf32>
    %354 = arith.addf %330, %353 : vector<16x32xf32>
    %c17 = arith.constant 17 : index
    %c0_136 = arith.constant 0 : index
    %355 = vector.load %arg15[%c17, %c0_136] : memref<18x32xf32, #tpu.memory_space<vmem>>, vector<1x32xf32>
    %356 = vector.broadcast %355 : vector<1x32xf32> to vector<16x32xf32>
    %357 = arith.mulf %350, %356 : vector<16x32xf32>
    %358 = arith.addf %334, %357 : vector<16x32xf32>
    %cst_137 = arith.constant 0.000000e+00 : f32
    %359 = vector.broadcast %cst_137 : f32 to vector<16x32xf32>
    %c0_138 = arith.constant 0 : index
    %c0_139 = arith.constant 0 : index
    %360 = vector.load %arg16[%c0_138, %c0_139] : memref<2x32xf32, #tpu.memory_space<vmem>>, vector<1x32xf32>
    %361 = vector.broadcast %360 : vector<1x32xf32> to vector<16x32xf32>
    %362 = arith.addf %354, %361 : vector<16x32xf32>
    %cst_140 = arith.constant 5.000000e-01 : f32
    %363 = vector.broadcast %cst_140 : f32 to vector<16x32xf32>
    %364 = arith.mulf %363, %362 : vector<16x32xf32>
    %cst_141 = arith.constant 4.471500e-02 : f32
    %365 = vector.broadcast %cst_141 : f32 to vector<16x32xf32>
    %366 = arith.mulf %365, %362 : vector<16x32xf32>
    %367 = arith.mulf %366, %362 : vector<16x32xf32>
    %368 = arith.mulf %367, %362 : vector<16x32xf32>
    %369 = arith.addf %362, %368 : vector<16x32xf32>
    %cst_142 = arith.constant 0.797884583 : f32
    %370 = vector.broadcast %cst_142 : f32 to vector<16x32xf32>
    %371 = arith.mulf %370, %369 : vector<16x32xf32>
    %372 = math.tanh %371 : vector<16x32xf32>
    %cst_143 = arith.constant 1.000000e+00 : f32
    %373 = vector.broadcast %cst_143 : f32 to vector<16x32xf32>
    %374 = arith.addf %373, %372 : vector<16x32xf32>
    %375 = arith.mulf %364, %374 : vector<16x32xf32>
    %376 = arith.truncf %375 : vector<16x32xf32> to vector<16x32xbf16>
    %c0_144 = arith.constant 0 : index
    %c0_145 = arith.constant 0 : index
    %377 = vector.load %arg17[%c0_144, %c0_145] : memref<64x32xbf16, #tpu.memory_space<vmem>>, vector<32x32xbf16>
    %cst_146 = arith.constant dense<0.000000e+00> : vector<16x32xf32>
    %378 = tpu.matmul %376, %377, %cst_146 {dimension_numbers = #tpu.dot_dimension_numbers<[1], [0], [0], [1], [0, 0, 1, 1], [], []>} : vector<16x32xbf16>, vector<32x32xbf16>, vector<16x32xf32> -> vector<16x32xf32>
    %379 = arith.addf %359, %378 : vector<16x32xf32>
    %c1_147 = arith.constant 1 : index
    %c0_148 = arith.constant 0 : index
    %380 = vector.load %arg16[%c1_147, %c0_148] : memref<2x32xf32, #tpu.memory_space<vmem>>, vector<1x32xf32>
    %381 = vector.broadcast %380 : vector<1x32xf32> to vector<16x32xf32>
    %382 = arith.addf %358, %381 : vector<16x32xf32>
    %cst_149 = arith.constant 5.000000e-01 : f32
    %383 = vector.broadcast %cst_149 : f32 to vector<16x32xf32>
    %384 = arith.mulf %383, %382 : vector<16x32xf32>
    %cst_150 = arith.constant 4.471500e-02 : f32
    %385 = vector.broadcast %cst_150 : f32 to vector<16x32xf32>
    %386 = arith.mulf %385, %382 : vector<16x32xf32>
    %387 = arith.mulf %386, %382 : vector<16x32xf32>
    %388 = arith.mulf %387, %382 : vector<16x32xf32>
    %389 = arith.addf %382, %388 : vector<16x32xf32>
    %cst_151 = arith.constant 0.797884583 : f32
    %390 = vector.broadcast %cst_151 : f32 to vector<16x32xf32>
    %391 = arith.mulf %390, %389 : vector<16x32xf32>
    %392 = math.tanh %391 : vector<16x32xf32>
    %cst_152 = arith.constant 1.000000e+00 : f32
    %393 = vector.broadcast %cst_152 : f32 to vector<16x32xf32>
    %394 = arith.addf %393, %392 : vector<16x32xf32>
    %395 = arith.mulf %384, %394 : vector<16x32xf32>
    %396 = arith.truncf %395 : vector<16x32xf32> to vector<16x32xbf16>
    %c32_153 = arith.constant 32 : index
    %c0_154 = arith.constant 0 : index
    %397 = vector.load %arg17[%c32_153, %c0_154] : memref<64x32xbf16, #tpu.memory_space<vmem>>, vector<32x32xbf16>
    %cst_155 = arith.constant dense<0.000000e+00> : vector<16x32xf32>
    %398 = tpu.matmul %396, %397, %cst_155 {dimension_numbers = #tpu.dot_dimension_numbers<[1], [0], [0], [1], [0, 0, 1, 1], [], []>} : vector<16x32xbf16>, vector<32x32xbf16>, vector<16x32xf32> -> vector<16x32xf32>
    %399 = arith.addf %379, %398 : vector<16x32xf32>
    %400 = arith.addf %135, %399 : vector<16x32xf32>
    %c0_156 = arith.constant 0 : index
    %c0_157 = arith.constant 0 : index
    %401 = vector.load %arg18[%c0_156, %c0_157] : memref<1x32xf32, #tpu.memory_space<vmem>>, vector<1x32xf32>
    %402 = vector.broadcast %401 : vector<1x32xf32> to vector<16x32xf32>
    %403 = arith.addf %400, %402 : vector<16x32xf32>
    %c0_158 = arith.constant 0 : index
    %c0_159 = arith.constant 0 : index
    %404 = vector.load %arg20[%c0_158, %c0_159] : memref<1x32xf32, #tpu.memory_space<vmem>>, vector<1x32xf32>
    %c0_160 = arith.constant 0 : index
    %c0_161 = arith.constant 0 : index
    %405 = vector.load %arg21[%c0_160, %c0_161] : memref<1x32xf32, #tpu.memory_space<vmem>>, vector<1x32xf32>
    %cst_162 = arith.constant dense<0.000000e+00> : vector<16xf32>
    %406 = vector.multi_reduction <add>, %403, %cst_162 [1] : vector<16x32xf32> to vector<16xf32>
    %407 = vector.shape_cast %406 : vector<16xf32> to vector<16x1xf32>
    %cst_163 = arith.constant 3.200000e+01 : f32
    %408 = vector.broadcast %cst_163 : f32 to vector<16x1xf32>
    %409 = arith.divf %407, %408 : vector<16x1xf32>
    %410 = vector.broadcast %409 : vector<16x1xf32> to vector<16x32xf32>
    %411 = arith.subf %403, %410 : vector<16x32xf32>
    %412 = arith.mulf %411, %411 : vector<16x32xf32>
    %cst_164 = arith.constant dense<0.000000e+00> : vector<16xf32>
    %413 = vector.multi_reduction <add>, %412, %cst_164 [1] : vector<16x32xf32> to vector<16xf32>
    %414 = vector.shape_cast %413 : vector<16xf32> to vector<16x1xf32>
    %cst_165 = arith.constant 3.200000e+01 : f32
    %415 = vector.broadcast %cst_165 : f32 to vector<16x1xf32>
    %416 = arith.divf %414, %415 : vector<16x1xf32>
    %417 = vector.broadcast %409 : vector<16x1xf32> to vector<16x32xf32>
    %418 = arith.subf %403, %417 : vector<16x32xf32>
    %cst_166 = arith.constant 9.99999974E-6 : f32
    %419 = vector.broadcast %cst_166 : f32 to vector<16x1xf32>
    %420 = arith.addf %416, %419 : vector<16x1xf32>
    %421 = math.rsqrt %420 : vector<16x1xf32>
    %422 = vector.broadcast %421 : vector<16x1xf32> to vector<16x32xf32>
    %423 = arith.mulf %418, %422 : vector<16x32xf32>
    %424 = vector.broadcast %404 : vector<1x32xf32> to vector<16x32xf32>
    %425 = arith.mulf %423, %424 : vector<16x32xf32>
    %426 = vector.broadcast %405 : vector<1x32xf32> to vector<16x32xf32>
    %427 = arith.addf %425, %426 : vector<16x32xf32>
    %c0_167 = arith.constant 0 : index
    %c0_168 = arith.constant 0 : index
    %c0_169 = arith.constant 0 : index
    %428 = vector.load %arg22[%c0_167, %c0_168, %c0_169] : memref<1x16x32xf32, #tpu.memory_space<vmem>>, vector<1x16x32xf32>
    %429 = vector.shape_cast %428 : vector<1x16x32xf32> to vector<16x32xf32>
    %430 = vector.shape_cast %427 : vector<16x32xf32> to vector<1x16x32xf32>
    tpu.vector_store %arg22[%c0_167, %c0_168, %c0_169], %430 {strides = array<i32>} : memref<1x16x32xf32, #tpu.memory_space<vmem>>, vector<1x16x32xf32>,
    return
  }
  func.func @transform_0(%arg0: i32) -> (i32, i32, i32) {
    %c0_i32 = arith.constant 0 : i32
    %c0_i32_0 = arith.constant 0 : i32
    %c0_i32_1 = arith.constant 0 : i32
    return %arg0, %c0_i32, %c0_i32_0 : i32, i32, i32
  }
  func.func @transform_1(%arg0: i32) -> (i32, i32) {
    %c0_i32 = arith.constant 0 : i32
    %c0_i32_0 = arith.constant 0 : i32
    %c0_i32_1 = arith.constant 0 : i32
    return %c0_i32, %c0_i32_0 : i32, i32
  }
  func.func @transform_2(%arg0: i32) -> (i32, i32) {
    %c0_i32 = arith.constant 0 : i32
    %c0_i32_0 = arith.constant 0 : i32
    %c0_i32_1 = arith.constant 0 : i32
    return %c0_i32, %c0_i32_0 : i32, i32
  }
  func.func @transform_3(%arg0: i32) -> (i32, i32) {
    %c0_i32 = arith.constant 0 : i32
    %c0_i32_0 = arith.constant 0 : i32
    %c0_i32_1 = arith.constant 0 : i32
    return %c0_i32, %c0_i32_0 : i32, i32
  }
  func.func @transform_4(%arg0: i32) -> (i32, i32) {
    %c0_i32 = arith.constant 0 : i32
    %c0_i32_0 = arith.constant 0 : i32
    %c0_i32_1 = arith.constant 0 : i32
    return %c0_i32, %c0_i32_0 : i32, i32
  }
  func.func @transform_5(%arg0: i32) -> (i32, i32) {
    %c0_i32 = arith.constant 0 : i32
    %c0_i32_0 = arith.constant 0 : i32
    %c0_i32_1 = arith.constant 0 : i32
    return %c0_i32, %c0_i32_0 : i32, i32
  }
  func.func @transform_6(%arg0: i32) -> (i32, i32) {
    %c0_i32 = arith.constant 0 : i32
    %c0_i32_0 = arith.constant 0 : i32
    %c0_i32_1 = arith.constant 0 : i32
    return %c0_i32, %c0_i32_0 : i32, i32
  }
  func.func @transform_7(%arg0: i32) -> (i32, i32) {
    %c0_i32 = arith.constant 0 : i32
    %c0_i32_0 = arith.constant 0 : i32
    %c0_i32_1 = arith.constant 0 : i32
    return %c0_i32, %c0_i32_0 : i32, i32
  }
  func.func @transform_8(%arg0: i32) -> (i32, i32) {
    %c0_i32 = arith.constant 0 : i32
    %c0_i32_0 = arith.constant 0 : i32
    %c0_i32_1 = arith.constant 0 : i32
    return %c0_i32, %c0_i32_0 : i32, i32
  }
  func.func @transform_9(%arg0: i32) -> (i32, i32) {
    %c0_i32 = arith.constant 0 : i32
    %c0_i32_0 = arith.constant 0 : i32
    %c0_i32_1 = arith.constant 0 : i32
    return %c0_i32, %c0_i32_0 : i32, i32
  }
  func.func @transform_10(%arg0: i32) -> (i32, i32) {
    %c0_i32 = arith.constant 0 : i32
    %c0_i32_0 = arith.constant 0 : i32
    %c0_i32_1 = arith.constant 0 : i32
    return %c0_i32, %c0_i32_0 : i32, i32
  }
  func.func @transform_11(%arg0: i32) -> (i32, i32) {
    %c0_i32 = arith.constant 0 : i32
    %c0_i32_0 = arith.constant 0 : i32
    %c0_i32_1 = arith.constant 0 : i32
    return %c0_i32, %c0_i32_0 : i32, i32
  }
  func.func @transform_12(%arg0: i32) -> (i32, i32) {
    %c0_i32 = arith.constant 0 : i32
    %c0_i32_0 = arith.constant 0 : i32
    %c0_i32_1 = arith.constant 0 : i32
    return %c0_i32, %c0_i32_0 : i32, i32
  }
  func.func @transform_13(%arg0: i32) -> (i32, i32) {
    %c0_i32 = arith.constant 0 : i32
    %c0_i32_0 = arith.constant 0 : i32
    %c0_i32_1 = arith.constant 0 : i32
    return %c0_i32, %c0_i32_0 : i32, i32
  }
  func.func @transform_14(%arg0: i32) -> (i32, i32) {
    %c0_i32 = arith.constant 0 : i32
    %c0_i32_0 = arith.constant 0 : i32
    %c0_i32_1 = arith.constant 0 : i32
    return %c0_i32, %c0_i32_0 : i32, i32
  }
  func.func @transform_15(%arg0: i32) -> (i32, i32) {
    %c0_i32 = arith.constant 0 : i32
    %c0_i32_0 = arith.constant 0 : i32
    %c0_i32_1 = arith.constant 0 : i32
    return %c0_i32, %c0_i32_0 : i32, i32
  }
  func.func @transform_16(%arg0: i32) -> (i32, i32) {
    %c0_i32 = arith.constant 0 : i32
    %c0_i32_0 = arith.constant 0 : i32
    %c0_i32_1 = arith.constant 0 : i32
    return %c0_i32, %c0_i32_0 : i32, i32
  }
  func.func @transform_17(%arg0: i32) -> (i32, i32) {
    %c0_i32 = arith.constant 0 : i32
    %c0_i32_0 = arith.constant 0 : i32
    %c0_i32_1 = arith.constant 0 : i32
    return %c0_i32, %c0_i32_0 : i32, i32
  }
  func.func @transform_18(%arg0: i32) -> (i32, i32, i32) {
    %c0_i32 = arith.constant 0 : i32
    %c0_i32_0 = arith.constant 0 : i32
    %c0_i32_1 = arith.constant 0 : i32
    %c0_i32_2 = arith.constant 0 : i32
    return %c0_i32, %c0_i32_0, %c0_i32_1 : i32, i32, i32
  }
  func.func @transform_19(%arg0: i32) -> (i32, i32) {
    %c0_i32 = arith.constant 0 : i32
    %c0_i32_0 = arith.constant 0 : i32
    %c0_i32_1 = arith.constant 0 : i32
    return %c0_i32, %c0_i32_0 : i32, i32
  }
  func.func @transform_20(%arg0: i32) -> (i32, i32) {
    %c0_i32 = arith.constant 0 : i32
    %c0_i32_0 = arith.constant 0 : i32
    %c0_i32_1 = arith.constant 0 : i32
    return %c0_i32, %c0_i32_0 : i32, i32
  }
  func.func @transform_21(%arg0: i32) -> (i32, i32, i32) {
    %c0_i32 = arith.constant 0 : i32
    %c0_i32_0 = arith.constant 0 : i32
    %c0_i32_1 = arith.constant 0 : i32
    return %arg0, %c0_i32, %c0_i32_0 : i32, i32, i32
  }
}

module attributes {stable_mosaic.version = 11 : i64} {
  func.func @_patch_embed_kernel(%arg0: i32, %arg1: memref<8x288xbf16, #tpu.memory_space<vmem>>, %arg2: memref<288x64xbf16, #tpu.memory_space<vmem>>, %arg3: memref<1x64xf32, #tpu.memory_space<vmem>>, %arg4: memref<1x64xf32, #tpu.memory_space<vmem>>, %arg5: memref<8x64xf32, #tpu.memory_space<vmem>>) attributes {dimension_semantics = [#tpu.dimension_semantics<parallel>], iteration_bounds = array<i64: 1>, scalar_prefetch = 0 : i64, scratch_operands = 0 : i64, tpu.core_type = #tpu.core_type<tc>, window_params = [{transform_indices = @transform_0, window_bounds = array<i64: 8, 288>}, {pipeline_mode = #tpu.pipeline_mode<synchronous>, transform_indices = @transform_1, window_bounds = array<i64: 288, 64>}, {pipeline_mode = #tpu.pipeline_mode<synchronous>, transform_indices = @transform_2, window_bounds = array<i64: 1, 64>}, {pipeline_mode = #tpu.pipeline_mode<synchronous>, transform_indices = @transform_3, window_bounds = array<i64: 1, 64>}, {transform_indices = @transform_4, window_bounds = array<i64: 8, 64>}]} {
    %c0 = arith.constant 0 : index
    %c0_0 = arith.constant 0 : index
    %0 = vector.load %arg1[%c0, %c0_0] : memref<8x288xbf16, #tpu.memory_space<vmem>>, vector<8x288xbf16>
    %c0_1 = arith.constant 0 : index
    %c0_2 = arith.constant 0 : index
    %1 = vector.load %arg2[%c0_1, %c0_2] : memref<288x64xbf16, #tpu.memory_space<vmem>>, vector<288x64xbf16>
    %cst = arith.constant dense<0.000000e+00> : vector<8x64xf32>
    %2 = tpu.matmul %0, %1, %cst {dimension_numbers = #tpu.dot_dimension_numbers<[1], [0], [0], [1], [0, 0, 1, 1], [], []>} : vector<8x288xbf16>, vector<288x64xbf16>, vector<8x64xf32> -> vector<8x64xf32>
    %c0_3 = arith.constant 0 : index
    %c0_4 = arith.constant 0 : index
    %3 = vector.load %arg3[%c0_3, %c0_4] : memref<1x64xf32, #tpu.memory_space<vmem>>, vector<1x64xf32>
    %c0_5 = arith.constant 0 : index
    %c0_6 = arith.constant 0 : index
    %4 = vector.load %arg4[%c0_5, %c0_6] : memref<1x64xf32, #tpu.memory_space<vmem>>, vector<1x64xf32>
    %cst_7 = arith.constant dense<0.000000e+00> : vector<8xf32>
    %5 = vector.multi_reduction <add>, %2, %cst_7 [1] : vector<8x64xf32> to vector<8xf32>
    %6 = vector.shape_cast %5 : vector<8xf32> to vector<8x1xf32>
    %cst_8 = arith.constant 6.400000e+01 : f32
    %7 = vector.broadcast %cst_8 : f32 to vector<8x1xf32>
    %8 = arith.divf %6, %7 : vector<8x1xf32>
    %9 = vector.broadcast %8 : vector<8x1xf32> to vector<8x64xf32>
    %10 = arith.subf %2, %9 : vector<8x64xf32>
    %11 = arith.mulf %10, %10 : vector<8x64xf32>
    %cst_9 = arith.constant dense<0.000000e+00> : vector<8xf32>
    %12 = vector.multi_reduction <add>, %11, %cst_9 [1] : vector<8x64xf32> to vector<8xf32>
    %13 = vector.shape_cast %12 : vector<8xf32> to vector<8x1xf32>
    %cst_10 = arith.constant 6.400000e+01 : f32
    %14 = vector.broadcast %cst_10 : f32 to vector<8x1xf32>
    %15 = arith.divf %13, %14 : vector<8x1xf32>
    %16 = vector.broadcast %8 : vector<8x1xf32> to vector<8x64xf32>
    %17 = arith.subf %2, %16 : vector<8x64xf32>
    %cst_11 = arith.constant 9.99999974E-6 : f32
    %18 = vector.broadcast %cst_11 : f32 to vector<8x1xf32>
    %19 = arith.addf %15, %18 : vector<8x1xf32>
    %20 = math.rsqrt %19 : vector<8x1xf32>
    %21 = vector.broadcast %20 : vector<8x1xf32> to vector<8x64xf32>
    %22 = arith.mulf %17, %21 : vector<8x64xf32>
    %23 = vector.broadcast %3 : vector<1x64xf32> to vector<8x64xf32>
    %24 = arith.mulf %22, %23 : vector<8x64xf32>
    %25 = vector.broadcast %4 : vector<1x64xf32> to vector<8x64xf32>
    %26 = arith.addf %24, %25 : vector<8x64xf32>
    %c0_12 = arith.constant 0 : index
    %c0_13 = arith.constant 0 : index
    %27 = vector.load %arg5[%c0_12, %c0_13] : memref<8x64xf32, #tpu.memory_space<vmem>>, vector<8x64xf32>
    tpu.vector_store %arg5[%c0_12, %c0_13], %26 {strides = array<i32>} : memref<8x64xf32, #tpu.memory_space<vmem>>, vector<8x64xf32>,
    return
  }
  func.func @transform_0(%arg0: i32) -> (i32, i32) {
    %c0_i32 = arith.constant 0 : i32
    %c0_i32_0 = arith.constant 0 : i32
    return %arg0, %c0_i32 : i32, i32
  }
  func.func @transform_1(%arg0: i32) -> (i32, i32) {
    %c0_i32 = arith.constant 0 : i32
    %c0_i32_0 = arith.constant 0 : i32
    %c0_i32_1 = arith.constant 0 : i32
    return %c0_i32, %c0_i32_0 : i32, i32
  }
  func.func @transform_2(%arg0: i32) -> (i32, i32) {
    %c0_i32 = arith.constant 0 : i32
    %c0_i32_0 = arith.constant 0 : i32
    %c0_i32_1 = arith.constant 0 : i32
    return %c0_i32, %c0_i32_0 : i32, i32
  }
  func.func @transform_3(%arg0: i32) -> (i32, i32) {
    %c0_i32 = arith.constant 0 : i32
    %c0_i32_0 = arith.constant 0 : i32
    %c0_i32_1 = arith.constant 0 : i32
    return %c0_i32, %c0_i32_0 : i32, i32
  }
  func.func @transform_4(%arg0: i32) -> (i32, i32) {
    %c0_i32 = arith.constant 0 : i32
    %c0_i32_0 = arith.constant 0 : i32
    return %arg0, %c0_i32 : i32, i32
  }
}

module attributes {stable_mosaic.version = 11 : i64} {
  func.func @_block_kernel(%arg0: i32, %arg1: memref<1x4x64xf32, #tpu.memory_space<vmem>>, %arg2: memref<1x64xf32, #tpu.memory_space<vmem>>, %arg3: memref<1x64xf32, #tpu.memory_space<vmem>>, %arg4: memref<64x64xbf16, #tpu.memory_space<vmem>>, %arg5: memref<64x64xbf16, #tpu.memory_space<vmem>>, %arg6: memref<1x64xf32, #tpu.memory_space<vmem>>, %arg7: memref<1x64xf32, #tpu.memory_space<vmem>>, %arg8: memref<64x128xbf16, #tpu.memory_space<vmem>>, %arg9: memref<64x64xbf16, #tpu.memory_space<vmem>>, %arg10: memref<1x64xf32, #tpu.memory_space<vmem>>, %arg11: memref<1x64xf32, #tpu.memory_space<vmem>>, %arg12: memref<1x64xf32, #tpu.memory_space<vmem>>, %arg13: memref<64x64xbf16, #tpu.memory_space<vmem>>, %arg14: memref<1x64xf32, #tpu.memory_space<vmem>>, %arg15: memref<18x64xf32, #tpu.memory_space<vmem>>, %arg16: memref<2x64xf32, #tpu.memory_space<vmem>>, %arg17: memref<128x64xbf16, #tpu.memory_space<vmem>>, %arg18: memref<1x64xf32, #tpu.memory_space<vmem>>, %arg19: memref<1x64xf32, #tpu.memory_space<vmem>>, %arg20: memref<1x64xf32, #tpu.memory_space<vmem>>, %arg21: memref<1x4x64xf32, #tpu.memory_space<vmem>>) attributes {dimension_semantics = [#tpu.dimension_semantics<parallel>], iteration_bounds = array<i64: 2>, scalar_prefetch = 0 : i64, scratch_operands = 0 : i64, tpu.core_type = #tpu.core_type<tc>, window_params = [{transform_indices = @transform_0, window_bounds = array<i64: 1, 4, 64>}, {pipeline_mode = #tpu.pipeline_mode<synchronous>, transform_indices = @transform_1, window_bounds = array<i64: 1, 64>}, {pipeline_mode = #tpu.pipeline_mode<synchronous>, transform_indices = @transform_2, window_bounds = array<i64: 1, 64>}, {pipeline_mode = #tpu.pipeline_mode<synchronous>, transform_indices = @transform_3, window_bounds = array<i64: 64, 64>}, {pipeline_mode = #tpu.pipeline_mode<synchronous>, transform_indices = @transform_4, window_bounds = array<i64: 64, 64>}, {pipeline_mode = #tpu.pipeline_mode<synchronous>, transform_indices = @transform_5, window_bounds = array<i64: 1, 64>}, {pipeline_mode = #tpu.pipeline_mode<synchronous>, transform_indices = @transform_6, window_bounds = array<i64: 1, 64>}, {pipeline_mode = #tpu.pipeline_mode<synchronous>, transform_indices = @transform_7, window_bounds = array<i64: 64, 128>}, {pipeline_mode = #tpu.pipeline_mode<synchronous>, transform_indices = @transform_8, window_bounds = array<i64: 64, 64>}, {pipeline_mode = #tpu.pipeline_mode<synchronous>, transform_indices = @transform_9, window_bounds = array<i64: 1, 64>}, {pipeline_mode = #tpu.pipeline_mode<synchronous>, transform_indices = @transform_10, window_bounds = array<i64: 1, 64>}, {pipeline_mode = #tpu.pipeline_mode<synchronous>, transform_indices = @transform_11, window_bounds = array<i64: 1, 64>}, {pipeline_mode = #tpu.pipeline_mode<synchronous>, transform_indices = @transform_12, window_bounds = array<i64: 64, 64>}, {pipeline_mode = #tpu.pipeline_mode<synchronous>, transform_indices = @transform_13, window_bounds = array<i64: 1, 64>}, {pipeline_mode = #tpu.pipeline_mode<synchronous>, transform_indices = @transform_14, window_bounds = array<i64: 18, 64>}, {pipeline_mode = #tpu.pipeline_mode<synchronous>, transform_indices = @transform_15, window_bounds = array<i64: 2, 64>}, {pipeline_mode = #tpu.pipeline_mode<synchronous>, transform_indices = @transform_16, window_bounds = array<i64: 128, 64>}, {pipeline_mode = #tpu.pipeline_mode<synchronous>, transform_indices = @transform_17, window_bounds = array<i64: 1, 64>}, {pipeline_mode = #tpu.pipeline_mode<synchronous>, transform_indices = @transform_18, window_bounds = array<i64: 1, 64>}, {pipeline_mode = #tpu.pipeline_mode<synchronous>, transform_indices = @transform_19, window_bounds = array<i64: 1, 64>}, {transform_indices = @transform_20, window_bounds = array<i64: 1, 4, 64>}]} {
    %c0 = arith.constant 0 : index
    %c0_0 = arith.constant 0 : index
    %c0_1 = arith.constant 0 : index
    %0 = vector.load %arg1[%c0, %c0_0, %c0_1] : memref<1x4x64xf32, #tpu.memory_space<vmem>>, vector<1x4x64xf32>
    %1 = vector.shape_cast %0 : vector<1x4x64xf32> to vector<4x64xf32>
    %c0_2 = arith.constant 0 : index
    %c0_3 = arith.constant 0 : index
    %2 = vector.load %arg2[%c0_2, %c0_3] : memref<1x64xf32, #tpu.memory_space<vmem>>, vector<1x64xf32>
    %c0_4 = arith.constant 0 : index
    %c0_5 = arith.constant 0 : index
    %3 = vector.load %arg3[%c0_4, %c0_5] : memref<1x64xf32, #tpu.memory_space<vmem>>, vector<1x64xf32>
    %cst = arith.constant dense<0.000000e+00> : vector<4xf32>
    %4 = vector.multi_reduction <add>, %1, %cst [1] : vector<4x64xf32> to vector<4xf32>
    %5 = vector.shape_cast %4 : vector<4xf32> to vector<4x1xf32>
    %cst_6 = arith.constant 6.400000e+01 : f32
    %6 = vector.broadcast %cst_6 : f32 to vector<4x1xf32>
    %7 = arith.divf %5, %6 : vector<4x1xf32>
    %8 = vector.broadcast %7 : vector<4x1xf32> to vector<4x64xf32>
    %9 = arith.subf %1, %8 : vector<4x64xf32>
    %10 = arith.mulf %9, %9 : vector<4x64xf32>
    %cst_7 = arith.constant dense<0.000000e+00> : vector<4xf32>
    %11 = vector.multi_reduction <add>, %10, %cst_7 [1] : vector<4x64xf32> to vector<4xf32>
    %12 = vector.shape_cast %11 : vector<4xf32> to vector<4x1xf32>
    %cst_8 = arith.constant 6.400000e+01 : f32
    %13 = vector.broadcast %cst_8 : f32 to vector<4x1xf32>
    %14 = arith.divf %12, %13 : vector<4x1xf32>
    %15 = vector.broadcast %7 : vector<4x1xf32> to vector<4x64xf32>
    %16 = arith.subf %1, %15 : vector<4x64xf32>
    %cst_9 = arith.constant 9.99999974E-6 : f32
    %17 = vector.broadcast %cst_9 : f32 to vector<4x1xf32>
    %18 = arith.addf %14, %17 : vector<4x1xf32>
    %19 = math.rsqrt %18 : vector<4x1xf32>
    %20 = vector.broadcast %19 : vector<4x1xf32> to vector<4x64xf32>
    %21 = arith.mulf %16, %20 : vector<4x64xf32>
    %22 = vector.broadcast %2 : vector<1x64xf32> to vector<4x64xf32>
    %23 = arith.mulf %21, %22 : vector<4x64xf32>
    %24 = vector.broadcast %3 : vector<1x64xf32> to vector<4x64xf32>
    %25 = arith.addf %23, %24 : vector<4x64xf32>
    %26 = arith.truncf %25 : vector<4x64xf32> to vector<4x64xbf16>
    %c0_10 = arith.constant 0 : index
    %c0_11 = arith.constant 0 : index
    %27 = vector.load %arg4[%c0_10, %c0_11] : memref<64x64xbf16, #tpu.memory_space<vmem>>, vector<64x64xbf16>
    %cst_12 = arith.constant dense<0.000000e+00> : vector<4x64xf32>
    %28 = tpu.matmul %26, %27, %cst_12 {dimension_numbers = #tpu.dot_dimension_numbers<[1], [0], [0], [1], [0, 0, 1, 1], [], []>} : vector<4x64xbf16>, vector<64x64xbf16>, vector<4x64xf32> -> vector<4x64xf32>
    %c0_13 = arith.constant 0 : index
    %c0_14 = arith.constant 0 : index
    %29 = vector.load %arg5[%c0_13, %c0_14] : memref<64x64xbf16, #tpu.memory_space<vmem>>, vector<64x64xbf16>
    %cst_15 = arith.constant dense<0.000000e+00> : vector<4x64xf32>
    %30 = tpu.matmul %26, %29, %cst_15 {dimension_numbers = #tpu.dot_dimension_numbers<[1], [0], [0], [1], [0, 0, 1, 1], [], []>} : vector<4x64xbf16>, vector<64x64xbf16>, vector<4x64xf32> -> vector<4x64xf32>
    %c0_16 = arith.constant 0 : index
    %c0_17 = arith.constant 0 : index
    %31 = vector.load %arg6[%c0_16, %c0_17] : memref<1x64xf32, #tpu.memory_space<vmem>>, vector<1x64xf32>
    %c0_18 = arith.constant 0 : index
    %c0_19 = arith.constant 0 : index
    %32 = vector.load %arg7[%c0_18, %c0_19] : memref<1x64xf32, #tpu.memory_space<vmem>>, vector<1x64xf32>
    %cst_20 = arith.constant dense<0.000000e+00> : vector<4xf32>
    %33 = vector.multi_reduction <add>, %30, %cst_20 [1] : vector<4x64xf32> to vector<4xf32>
    %34 = vector.shape_cast %33 : vector<4xf32> to vector<4x1xf32>
    %cst_21 = arith.constant 6.400000e+01 : f32
    %35 = vector.broadcast %cst_21 : f32 to vector<4x1xf32>
    %36 = arith.divf %34, %35 : vector<4x1xf32>
    %37 = vector.broadcast %36 : vector<4x1xf32> to vector<4x64xf32>
    %38 = arith.subf %30, %37 : vector<4x64xf32>
    %39 = arith.mulf %38, %38 : vector<4x64xf32>
    %cst_22 = arith.constant dense<0.000000e+00> : vector<4xf32>
    %40 = vector.multi_reduction <add>, %39, %cst_22 [1] : vector<4x64xf32> to vector<4xf32>
    %41 = vector.shape_cast %40 : vector<4xf32> to vector<4x1xf32>
    %cst_23 = arith.constant 6.400000e+01 : f32
    %42 = vector.broadcast %cst_23 : f32 to vector<4x1xf32>
    %43 = arith.divf %41, %42 : vector<4x1xf32>
    %44 = vector.broadcast %36 : vector<4x1xf32> to vector<4x64xf32>
    %45 = arith.subf %30, %44 : vector<4x64xf32>
    %cst_24 = arith.constant 9.99999974E-6 : f32
    %46 = vector.broadcast %cst_24 : f32 to vector<4x1xf32>
    %47 = arith.addf %43, %46 : vector<4x1xf32>
    %48 = math.rsqrt %47 : vector<4x1xf32>
    %49 = vector.broadcast %48 : vector<4x1xf32> to vector<4x64xf32>
    %50 = arith.mulf %45, %49 : vector<4x64xf32>
    %51 = vector.broadcast %31 : vector<1x64xf32> to vector<4x64xf32>
    %52 = arith.mulf %50, %51 : vector<4x64xf32>
    %53 = vector.broadcast %32 : vector<1x64xf32> to vector<4x64xf32>
    %54 = arith.addf %52, %53 : vector<4x64xf32>
    %55 = arith.truncf %54 : vector<4x64xf32> to vector<4x64xbf16>
    %c0_25 = arith.constant 0 : index
    %c0_26 = arith.constant 0 : index
    %56 = vector.load %arg8[%c0_25, %c0_26] : memref<64x128xbf16, #tpu.memory_space<vmem>>, vector<64x128xbf16>
    %cst_27 = arith.constant dense<0.000000e+00> : vector<4x128xf32>
    %57 = tpu.matmul %55, %56, %cst_27 {dimension_numbers = #tpu.dot_dimension_numbers<[1], [0], [0], [1], [0, 0, 1, 1], [], []>} : vector<4x64xbf16>, vector<64x128xbf16>, vector<4x128xf32> -> vector<4x128xf32>
    %cst_28 = arith.constant 0.000000e+00 : f32
    %58 = vector.broadcast %cst_28 : f32 to vector<4x64xf32>
    %59 = vector.extract_strided_slice %28 {offsets = [0, 0], sizes = [4, 16], strides = [1, 1]} : vector<4x64xf32> to vector<4x16xf32>
    %60 = arith.truncf %59 : vector<4x16xf32> to vector<4x16xbf16>
    %61 = vector.extract_strided_slice %57 {offsets = [0, 0], sizes = [4, 16], strides = [1, 1]} : vector<4x128xf32> to vector<4x16xf32>
    %62 = arith.truncf %61 : vector<4x16xf32> to vector<4x16xbf16>
    %63 = vector.extract_strided_slice %57 {offsets = [0, 64], sizes = [4, 16], strides = [1, 1]} : vector<4x128xf32> to vector<4x16xf32>
    %64 = arith.truncf %63 : vector<4x16xf32> to vector<4x16xbf16>
    %cst_29 = arith.constant dense<0.000000e+00> : vector<4x4xf32>
    %65 = tpu.matmul %60, %62, %cst_29 {dimension_numbers = #tpu.dot_dimension_numbers<[1], [1], [0], [0], [0, 0, 1, 0], [], []>} : vector<4x16xbf16>, vector<4x16xbf16>, vector<4x4xf32> -> vector<4x4xf32>
    %cst_30 = arith.constant dense<0xFF800000> : vector<4xf32>
    %66 = vector.multi_reduction <maximumf>, %65, %cst_30 [1] : vector<4x4xf32> to vector<4xf32>
    %67 = vector.shape_cast %66 : vector<4xf32> to vector<4x1xf32>
    %68 = vector.broadcast %67 : vector<4x1xf32> to vector<4x4xf32>
    %69 = arith.subf %65, %68 : vector<4x4xf32>
    %70 = math.exp %69 : vector<4x4xf32>
    %cst_31 = arith.constant dense<0.000000e+00> : vector<4xf32>
    %71 = vector.multi_reduction <add>, %70, %cst_31 [1] : vector<4x4xf32> to vector<4xf32>
    %72 = vector.shape_cast %71 : vector<4xf32> to vector<4x1xf32>
    %73 = tpu.reciprocal %72 {approx = true} : vector<4x1xf32> -> vector<4x1xf32>
    %74 = vector.broadcast %73 : vector<4x1xf32> to vector<4x4xf32>
    %75 = arith.mulf %70, %74 : vector<4x4xf32>
    %76 = arith.truncf %75 : vector<4x4xf32> to vector<4x4xbf16>
    %cst_32 = arith.constant dense<0.000000e+00> : vector<4x16xf32>
    %77 = tpu.matmul %76, %64, %cst_32 {dimension_numbers = #tpu.dot_dimension_numbers<[1], [0], [0], [1], [0, 0, 1, 1], [], []>} : vector<4x4xbf16>, vector<4x16xbf16>, vector<4x16xf32> -> vector<4x16xf32>
    %78 = arith.truncf %77 : vector<4x16xf32> to vector<4x16xbf16>
    %c0_33 = arith.constant 0 : index
    %c0_34 = arith.constant 0 : index
    %79 = vector.load %arg9[%c0_33, %c0_34] : memref<64x64xbf16, #tpu.memory_space<vmem>>, vector<16x64xbf16>
    %cst_35 = arith.constant dense<0.000000e+00> : vector<4x64xf32>
    %80 = tpu.matmul %78, %79, %cst_35 {dimension_numbers = #tpu.dot_dimension_numbers<[1], [0], [0], [1], [0, 0, 1, 1], [], []>} : vector<4x16xbf16>, vector<16x64xbf16>, vector<4x64xf32> -> vector<4x64xf32>
    %81 = arith.addf %58, %80 : vector<4x64xf32>
    %82 = vector.extract_strided_slice %28 {offsets = [0, 16], sizes = [4, 16], strides = [1, 1]} : vector<4x64xf32> to vector<4x16xf32>
    %83 = arith.truncf %82 : vector<4x16xf32> to vector<4x16xbf16>
    %84 = vector.extract_strided_slice %57 {offsets = [0, 16], sizes = [4, 16], strides = [1, 1]} : vector<4x128xf32> to vector<4x16xf32>
    %85 = arith.truncf %84 : vector<4x16xf32> to vector<4x16xbf16>
    %86 = vector.extract_strided_slice %57 {offsets = [0, 80], sizes = [4, 16], strides = [1, 1]} : vector<4x128xf32> to vector<4x16xf32>
    %87 = arith.truncf %86 : vector<4x16xf32> to vector<4x16xbf16>
    %cst_36 = arith.constant dense<0.000000e+00> : vector<4x4xf32>
    %88 = tpu.matmul %83, %85, %cst_36 {dimension_numbers = #tpu.dot_dimension_numbers<[1], [1], [0], [0], [0, 0, 1, 0], [], []>} : vector<4x16xbf16>, vector<4x16xbf16>, vector<4x4xf32> -> vector<4x4xf32>
    %cst_37 = arith.constant dense<0xFF800000> : vector<4xf32>
    %89 = vector.multi_reduction <maximumf>, %88, %cst_37 [1] : vector<4x4xf32> to vector<4xf32>
    %90 = vector.shape_cast %89 : vector<4xf32> to vector<4x1xf32>
    %91 = vector.broadcast %90 : vector<4x1xf32> to vector<4x4xf32>
    %92 = arith.subf %88, %91 : vector<4x4xf32>
    %93 = math.exp %92 : vector<4x4xf32>
    %cst_38 = arith.constant dense<0.000000e+00> : vector<4xf32>
    %94 = vector.multi_reduction <add>, %93, %cst_38 [1] : vector<4x4xf32> to vector<4xf32>
    %95 = vector.shape_cast %94 : vector<4xf32> to vector<4x1xf32>
    %96 = tpu.reciprocal %95 {approx = true} : vector<4x1xf32> -> vector<4x1xf32>
    %97 = vector.broadcast %96 : vector<4x1xf32> to vector<4x4xf32>
    %98 = arith.mulf %93, %97 : vector<4x4xf32>
    %99 = arith.truncf %98 : vector<4x4xf32> to vector<4x4xbf16>
    %cst_39 = arith.constant dense<0.000000e+00> : vector<4x16xf32>
    %100 = tpu.matmul %99, %87, %cst_39 {dimension_numbers = #tpu.dot_dimension_numbers<[1], [0], [0], [1], [0, 0, 1, 1], [], []>} : vector<4x4xbf16>, vector<4x16xbf16>, vector<4x16xf32> -> vector<4x16xf32>
    %101 = arith.truncf %100 : vector<4x16xf32> to vector<4x16xbf16>
    %c16 = arith.constant 16 : index
    %c0_40 = arith.constant 0 : index
    %102 = vector.load %arg9[%c16, %c0_40] : memref<64x64xbf16, #tpu.memory_space<vmem>>, vector<16x64xbf16>
    %cst_41 = arith.constant dense<0.000000e+00> : vector<4x64xf32>
    %103 = tpu.matmul %101, %102, %cst_41 {dimension_numbers = #tpu.dot_dimension_numbers<[1], [0], [0], [1], [0, 0, 1, 1], [], []>} : vector<4x16xbf16>, vector<16x64xbf16>, vector<4x64xf32> -> vector<4x64xf32>
    %104 = arith.addf %81, %103 : vector<4x64xf32>
    %105 = vector.extract_strided_slice %28 {offsets = [0, 32], sizes = [4, 16], strides = [1, 1]} : vector<4x64xf32> to vector<4x16xf32>
    %106 = arith.truncf %105 : vector<4x16xf32> to vector<4x16xbf16>
    %107 = vector.extract_strided_slice %57 {offsets = [0, 32], sizes = [4, 16], strides = [1, 1]} : vector<4x128xf32> to vector<4x16xf32>
    %108 = arith.truncf %107 : vector<4x16xf32> to vector<4x16xbf16>
    %109 = vector.extract_strided_slice %57 {offsets = [0, 96], sizes = [4, 16], strides = [1, 1]} : vector<4x128xf32> to vector<4x16xf32>
    %110 = arith.truncf %109 : vector<4x16xf32> to vector<4x16xbf16>
    %cst_42 = arith.constant dense<0.000000e+00> : vector<4x4xf32>
    %111 = tpu.matmul %106, %108, %cst_42 {dimension_numbers = #tpu.dot_dimension_numbers<[1], [1], [0], [0], [0, 0, 1, 0], [], []>} : vector<4x16xbf16>, vector<4x16xbf16>, vector<4x4xf32> -> vector<4x4xf32>
    %cst_43 = arith.constant dense<0xFF800000> : vector<4xf32>
    %112 = vector.multi_reduction <maximumf>, %111, %cst_43 [1] : vector<4x4xf32> to vector<4xf32>
    %113 = vector.shape_cast %112 : vector<4xf32> to vector<4x1xf32>
    %114 = vector.broadcast %113 : vector<4x1xf32> to vector<4x4xf32>
    %115 = arith.subf %111, %114 : vector<4x4xf32>
    %116 = math.exp %115 : vector<4x4xf32>
    %cst_44 = arith.constant dense<0.000000e+00> : vector<4xf32>
    %117 = vector.multi_reduction <add>, %116, %cst_44 [1] : vector<4x4xf32> to vector<4xf32>
    %118 = vector.shape_cast %117 : vector<4xf32> to vector<4x1xf32>
    %119 = tpu.reciprocal %118 {approx = true} : vector<4x1xf32> -> vector<4x1xf32>
    %120 = vector.broadcast %119 : vector<4x1xf32> to vector<4x4xf32>
    %121 = arith.mulf %116, %120 : vector<4x4xf32>
    %122 = arith.truncf %121 : vector<4x4xf32> to vector<4x4xbf16>
    %cst_45 = arith.constant dense<0.000000e+00> : vector<4x16xf32>
    %123 = tpu.matmul %122, %110, %cst_45 {dimension_numbers = #tpu.dot_dimension_numbers<[1], [0], [0], [1], [0, 0, 1, 1], [], []>} : vector<4x4xbf16>, vector<4x16xbf16>, vector<4x16xf32> -> vector<4x16xf32>
    %124 = arith.truncf %123 : vector<4x16xf32> to vector<4x16xbf16>
    %c32 = arith.constant 32 : index
    %c0_46 = arith.constant 0 : index
    %125 = vector.load %arg9[%c32, %c0_46] : memref<64x64xbf16, #tpu.memory_space<vmem>>, vector<16x64xbf16>
    %cst_47 = arith.constant dense<0.000000e+00> : vector<4x64xf32>
    %126 = tpu.matmul %124, %125, %cst_47 {dimension_numbers = #tpu.dot_dimension_numbers<[1], [0], [0], [1], [0, 0, 1, 1], [], []>} : vector<4x16xbf16>, vector<16x64xbf16>, vector<4x64xf32> -> vector<4x64xf32>
    %127 = arith.addf %104, %126 : vector<4x64xf32>
    %128 = vector.extract_strided_slice %28 {offsets = [0, 48], sizes = [4, 16], strides = [1, 1]} : vector<4x64xf32> to vector<4x16xf32>
    %129 = arith.truncf %128 : vector<4x16xf32> to vector<4x16xbf16>
    %130 = vector.extract_strided_slice %57 {offsets = [0, 48], sizes = [4, 16], strides = [1, 1]} : vector<4x128xf32> to vector<4x16xf32>
    %131 = arith.truncf %130 : vector<4x16xf32> to vector<4x16xbf16>
    %132 = vector.extract_strided_slice %57 {offsets = [0, 112], sizes = [4, 16], strides = [1, 1]} : vector<4x128xf32> to vector<4x16xf32>
    %133 = arith.truncf %132 : vector<4x16xf32> to vector<4x16xbf16>
    %cst_48 = arith.constant dense<0.000000e+00> : vector<4x4xf32>
    %134 = tpu.matmul %129, %131, %cst_48 {dimension_numbers = #tpu.dot_dimension_numbers<[1], [1], [0], [0], [0, 0, 1, 0], [], []>} : vector<4x16xbf16>, vector<4x16xbf16>, vector<4x4xf32> -> vector<4x4xf32>
    %cst_49 = arith.constant dense<0xFF800000> : vector<4xf32>
    %135 = vector.multi_reduction <maximumf>, %134, %cst_49 [1] : vector<4x4xf32> to vector<4xf32>
    %136 = vector.shape_cast %135 : vector<4xf32> to vector<4x1xf32>
    %137 = vector.broadcast %136 : vector<4x1xf32> to vector<4x4xf32>
    %138 = arith.subf %134, %137 : vector<4x4xf32>
    %139 = math.exp %138 : vector<4x4xf32>
    %cst_50 = arith.constant dense<0.000000e+00> : vector<4xf32>
    %140 = vector.multi_reduction <add>, %139, %cst_50 [1] : vector<4x4xf32> to vector<4xf32>
    %141 = vector.shape_cast %140 : vector<4xf32> to vector<4x1xf32>
    %142 = tpu.reciprocal %141 {approx = true} : vector<4x1xf32> -> vector<4x1xf32>
    %143 = vector.broadcast %142 : vector<4x1xf32> to vector<4x4xf32>
    %144 = arith.mulf %139, %143 : vector<4x4xf32>
    %145 = arith.truncf %144 : vector<4x4xf32> to vector<4x4xbf16>
    %cst_51 = arith.constant dense<0.000000e+00> : vector<4x16xf32>
    %146 = tpu.matmul %145, %133, %cst_51 {dimension_numbers = #tpu.dot_dimension_numbers<[1], [0], [0], [1], [0, 0, 1, 1], [], []>} : vector<4x4xbf16>, vector<4x16xbf16>, vector<4x16xf32> -> vector<4x16xf32>
    %147 = arith.truncf %146 : vector<4x16xf32> to vector<4x16xbf16>
    %c48 = arith.constant 48 : index
    %c0_52 = arith.constant 0 : index
    %148 = vector.load %arg9[%c48, %c0_52] : memref<64x64xbf16, #tpu.memory_space<vmem>>, vector<16x64xbf16>
    %cst_53 = arith.constant dense<0.000000e+00> : vector<4x64xf32>
    %149 = tpu.matmul %147, %148, %cst_53 {dimension_numbers = #tpu.dot_dimension_numbers<[1], [0], [0], [1], [0, 0, 1, 1], [], []>} : vector<4x16xbf16>, vector<16x64xbf16>, vector<4x64xf32> -> vector<4x64xf32>
    %150 = arith.addf %127, %149 : vector<4x64xf32>
    %151 = arith.addf %1, %150 : vector<4x64xf32>
    %c0_54 = arith.constant 0 : index
    %c0_55 = arith.constant 0 : index
    %152 = vector.load %arg10[%c0_54, %c0_55] : memref<1x64xf32, #tpu.memory_space<vmem>>, vector<1x64xf32>
    %153 = vector.broadcast %152 : vector<1x64xf32> to vector<4x64xf32>
    %154 = arith.addf %151, %153 : vector<4x64xf32>
    %c0_56 = arith.constant 0 : index
    %c0_57 = arith.constant 0 : index
    %155 = vector.load %arg11[%c0_56, %c0_57] : memref<1x64xf32, #tpu.memory_space<vmem>>, vector<1x64xf32>
    %c0_58 = arith.constant 0 : index
    %c0_59 = arith.constant 0 : index
    %156 = vector.load %arg12[%c0_58, %c0_59] : memref<1x64xf32, #tpu.memory_space<vmem>>, vector<1x64xf32>
    %cst_60 = arith.constant dense<0.000000e+00> : vector<4xf32>
    %157 = vector.multi_reduction <add>, %154, %cst_60 [1] : vector<4x64xf32> to vector<4xf32>
    %158 = vector.shape_cast %157 : vector<4xf32> to vector<4x1xf32>
    %cst_61 = arith.constant 6.400000e+01 : f32
    %159 = vector.broadcast %cst_61 : f32 to vector<4x1xf32>
    %160 = arith.divf %158, %159 : vector<4x1xf32>
    %161 = vector.broadcast %160 : vector<4x1xf32> to vector<4x64xf32>
    %162 = arith.subf %154, %161 : vector<4x64xf32>
    %163 = arith.mulf %162, %162 : vector<4x64xf32>
    %cst_62 = arith.constant dense<0.000000e+00> : vector<4xf32>
    %164 = vector.multi_reduction <add>, %163, %cst_62 [1] : vector<4x64xf32> to vector<4xf32>
    %165 = vector.shape_cast %164 : vector<4xf32> to vector<4x1xf32>
    %cst_63 = arith.constant 6.400000e+01 : f32
    %166 = vector.broadcast %cst_63 : f32 to vector<4x1xf32>
    %167 = arith.divf %165, %166 : vector<4x1xf32>
    %168 = vector.broadcast %160 : vector<4x1xf32> to vector<4x64xf32>
    %169 = arith.subf %154, %168 : vector<4x64xf32>
    %cst_64 = arith.constant 9.99999974E-6 : f32
    %170 = vector.broadcast %cst_64 : f32 to vector<4x1xf32>
    %171 = arith.addf %167, %170 : vector<4x1xf32>
    %172 = math.rsqrt %171 : vector<4x1xf32>
    %173 = vector.broadcast %172 : vector<4x1xf32> to vector<4x64xf32>
    %174 = arith.mulf %169, %173 : vector<4x64xf32>
    %175 = vector.broadcast %155 : vector<1x64xf32> to vector<4x64xf32>
    %176 = arith.mulf %174, %175 : vector<4x64xf32>
    %177 = vector.broadcast %156 : vector<1x64xf32> to vector<4x64xf32>
    %178 = arith.addf %176, %177 : vector<4x64xf32>
    %179 = arith.truncf %178 : vector<4x64xf32> to vector<4x64xbf16>
    %c0_65 = arith.constant 0 : index
    %c0_66 = arith.constant 0 : index
    %180 = vector.load %arg13[%c0_65, %c0_66] : memref<64x64xbf16, #tpu.memory_space<vmem>>, vector<64x64xbf16>
    %cst_67 = arith.constant dense<0.000000e+00> : vector<4x64xf32>
    %181 = tpu.matmul %179, %180, %cst_67 {dimension_numbers = #tpu.dot_dimension_numbers<[1], [0], [0], [1], [0, 0, 1, 1], [], []>} : vector<4x64xbf16>, vector<64x64xbf16>, vector<4x64xf32> -> vector<4x64xf32>
    %c0_68 = arith.constant 0 : index
    %c0_69 = arith.constant 0 : index
    %182 = vector.load %arg14[%c0_68, %c0_69] : memref<1x64xf32, #tpu.memory_space<vmem>>, vector<1x64xf32>
    %183 = vector.broadcast %182 : vector<1x64xf32> to vector<4x64xf32>
    %184 = arith.addf %181, %183 : vector<4x64xf32>
    %185 = tpu.iota {dimensions = array<i32: 0>} : vector<4x1xi32>
    %c2_i32 = arith.constant 2 : i32
    %c0_i32 = arith.constant 0 : i32
    %186 = arith.cmpi eq, %c2_i32, %c0_i32 : i32
    %c1_i32 = arith.constant 1 : i32
    %187 = arith.select %186, %c1_i32, %c2_i32 : i32
    %188 = vector.broadcast %187 : i32 to vector<4x1xi32>
    %189 = arith.remsi %185, %188 : vector<4x1xi32>
    %c0_i32_70 = arith.constant 0 : i32
    %190 = vector.broadcast %c0_i32_70 : i32 to vector<4x1xi32>
    %191 = arith.cmpi ne, %189, %190 : vector<4x1xi32>
    %c0_i32_71 = arith.constant 0 : i32
    %192 = vector.broadcast %c0_i32_71 : i32 to vector<4x1xi32>
    %193 = arith.cmpi slt, %189, %192 : vector<4x1xi32>
    %c0_i32_72 = arith.constant 0 : i32
    %194 = arith.cmpi slt, %187, %c0_i32_72 : i32
    %195 = vector.broadcast %194 : i1 to vector<4x1xi1>
    %196 = vector.broadcast %195 : vector<4x1xi1> to vector<4x1xi1>
    %197 = arith.xori %193, %196 : vector<4x1xi1>
    %198 = arith.andi %197, %191 : vector<4x1xi1>
    %199 = vector.broadcast %187 : i32 to vector<4x1xi32>
    %200 = arith.addi %189, %199 : vector<4x1xi32>
    %201 = arith.select %198, %200, %189 : vector<4x1xi1>, vector<4x1xi32>
    %cst_73 = arith.constant 0.000000e+00 : f32
    %202 = vector.broadcast %cst_73 : f32 to vector<4x64xf32>
    %cst_74 = arith.constant 0.000000e+00 : f32
    %203 = vector.broadcast %cst_74 : f32 to vector<4x64xf32>
    %cst_75 = arith.constant 0.000000e+00 : f32
    %204 = vector.broadcast %cst_75 : f32 to vector<3x64xf32>
    %205 = vector.extract_strided_slice %184 {offsets = [0, 0], sizes = [1, 64], strides = [1, 1]} : vector<4x64xf32> to vector<1x64xf32>
    %206 = tpu.concatenate %204, %205 in 0 : vector<3x64xf32>, vector<1x64xf32> -> vector<4x64xf32>
    %c-1_i32 = arith.constant -1 : i32
    %207 = vector.broadcast %c-1_i32 : i32 to vector<4x1xi32>
    %208 = arith.addi %201, %207 : vector<4x1xi32>
    %c0_i32_76 = arith.constant 0 : i32
    %209 = vector.broadcast %c0_i32_76 : i32 to vector<4x1xi32>
    %210 = arith.cmpi sge, %208, %209 : vector<4x1xi32>
    %c-1_i32_77 = arith.constant -1 : i32
    %211 = vector.broadcast %c-1_i32_77 : i32 to vector<4x1xi32>
    %212 = arith.addi %201, %211 : vector<4x1xi32>
    %c2_i32_78 = arith.constant 2 : i32
    %213 = vector.broadcast %c2_i32_78 : i32 to vector<4x1xi32>
    %214 = arith.cmpi slt, %212, %213 : vector<4x1xi32>
    %215 = arith.andi %210, %214 : vector<4x1xi1>
    %216 = arith.extui %215 : vector<4x1xi1> to vector<4x1xi32>
    %217 = arith.sitofp %216 : vector<4x1xi32> to vector<4x1xf32>
    %218 = vector.broadcast %217 : vector<4x1xf32> to vector<4x64xf32>
    %219 = arith.mulf %206, %218 : vector<4x64xf32>
    %c0_79 = arith.constant 0 : index
    %c0_80 = arith.constant 0 : index
    %220 = vector.load %arg15[%c0_79, %c0_80] : memref<18x64xf32, #tpu.memory_space<vmem>>, vector<1x64xf32>
    %221 = vector.broadcast %220 : vector<1x64xf32> to vector<4x64xf32>
    %222 = arith.mulf %219, %221 : vector<4x64xf32>
    %223 = arith.addf %202, %222 : vector<4x64xf32>
    %c9 = arith.constant 9 : index
    %c0_81 = arith.constant 0 : index
    %224 = vector.load %arg15[%c9, %c0_81] : memref<18x64xf32, #tpu.memory_space<vmem>>, vector<1x64xf32>
    %225 = vector.broadcast %224 : vector<1x64xf32> to vector<4x64xf32>
    %226 = arith.mulf %219, %225 : vector<4x64xf32>
    %227 = arith.addf %203, %226 : vector<4x64xf32>
    %cst_82 = arith.constant 0.000000e+00 : f32
    %228 = vector.broadcast %cst_82 : f32 to vector<2x64xf32>
    %229 = vector.extract_strided_slice %184 {offsets = [0, 0], sizes = [2, 64], strides = [1, 1]} : vector<4x64xf32> to vector<2x64xf32>
    %230 = tpu.concatenate %228, %229 in 0 : vector<2x64xf32>, vector<2x64xf32> -> vector<4x64xf32>
    %c1 = arith.constant 1 : index
    %c0_83 = arith.constant 0 : index
    %231 = vector.load %arg15[%c1, %c0_83] : memref<18x64xf32, #tpu.memory_space<vmem>>, vector<1x64xf32>
    %232 = vector.broadcast %231 : vector<1x64xf32> to vector<4x64xf32>
    %233 = arith.mulf %230, %232 : vector<4x64xf32>
    %234 = arith.addf %223, %233 : vector<4x64xf32>
    %c10 = arith.constant 10 : index
    %c0_84 = arith.constant 0 : index
    %235 = vector.load %arg15[%c10, %c0_84] : memref<18x64xf32, #tpu.memory_space<vmem>>, vector<1x64xf32>
    %236 = vector.broadcast %235 : vector<1x64xf32> to vector<4x64xf32>
    %237 = arith.mulf %230, %236 : vector<4x64xf32>
    %238 = arith.addf %227, %237 : vector<4x64xf32>
    %cst_85 = arith.constant 0.000000e+00 : f32
    %239 = vector.broadcast %cst_85 : f32 to vector<1x64xf32>
    %240 = vector.extract_strided_slice %184 {offsets = [0, 0], sizes = [3, 64], strides = [1, 1]} : vector<4x64xf32> to vector<3x64xf32>
    %241 = tpu.concatenate %239, %240 in 0 : vector<1x64xf32>, vector<3x64xf32> -> vector<4x64xf32>
    %c1_i32_86 = arith.constant 1 : i32
    %242 = vector.broadcast %c1_i32_86 : i32 to vector<4x1xi32>
    %243 = arith.addi %201, %242 : vector<4x1xi32>
    %c0_i32_87 = arith.constant 0 : i32
    %244 = vector.broadcast %c0_i32_87 : i32 to vector<4x1xi32>
    %245 = arith.cmpi sge, %243, %244 : vector<4x1xi32>
    %c1_i32_88 = arith.constant 1 : i32
    %246 = vector.broadcast %c1_i32_88 : i32 to vector<4x1xi32>
    %247 = arith.addi %201, %246 : vector<4x1xi32>
    %c2_i32_89 = arith.constant 2 : i32
    %248 = vector.broadcast %c2_i32_89 : i32 to vector<4x1xi32>
    %249 = arith.cmpi slt, %247, %248 : vector<4x1xi32>
    %250 = arith.andi %245, %249 : vector<4x1xi1>
    %251 = arith.extui %250 : vector<4x1xi1> to vector<4x1xi32>
    %252 = arith.sitofp %251 : vector<4x1xi32> to vector<4x1xf32>
    %253 = vector.broadcast %252 : vector<4x1xf32> to vector<4x64xf32>
    %254 = arith.mulf %241, %253 : vector<4x64xf32>
    %c2 = arith.constant 2 : index
    %c0_90 = arith.constant 0 : index
    %255 = vector.load %arg15[%c2, %c0_90] : memref<18x64xf32, #tpu.memory_space<vmem>>, vector<1x64xf32>
    %256 = vector.broadcast %255 : vector<1x64xf32> to vector<4x64xf32>
    %257 = arith.mulf %254, %256 : vector<4x64xf32>
    %258 = arith.addf %234, %257 : vector<4x64xf32>
    %c11 = arith.constant 11 : index
    %c0_91 = arith.constant 0 : index
    %259 = vector.load %arg15[%c11, %c0_91] : memref<18x64xf32, #tpu.memory_space<vmem>>, vector<1x64xf32>
    %260 = vector.broadcast %259 : vector<1x64xf32> to vector<4x64xf32>
    %261 = arith.mulf %254, %260 : vector<4x64xf32>
    %262 = arith.addf %238, %261 : vector<4x64xf32>
    %cst_92 = arith.constant 0.000000e+00 : f32
    %263 = vector.broadcast %cst_92 : f32 to vector<1x64xf32>
    %264 = vector.extract_strided_slice %184 {offsets = [0, 0], sizes = [3, 64], strides = [1, 1]} : vector<4x64xf32> to vector<3x64xf32>
    %265 = tpu.concatenate %263, %264 in 0 : vector<1x64xf32>, vector<3x64xf32> -> vector<4x64xf32>
    %c-1_i32_93 = arith.constant -1 : i32
    %266 = vector.broadcast %c-1_i32_93 : i32 to vector<4x1xi32>
    %267 = arith.addi %201, %266 : vector<4x1xi32>
    %c0_i32_94 = arith.constant 0 : i32
    %268 = vector.broadcast %c0_i32_94 : i32 to vector<4x1xi32>
    %269 = arith.cmpi sge, %267, %268 : vector<4x1xi32>
    %c-1_i32_95 = arith.constant -1 : i32
    %270 = vector.broadcast %c-1_i32_95 : i32 to vector<4x1xi32>
    %271 = arith.addi %201, %270 : vector<4x1xi32>
    %c2_i32_96 = arith.constant 2 : i32
    %272 = vector.broadcast %c2_i32_96 : i32 to vector<4x1xi32>
    %273 = arith.cmpi slt, %271, %272 : vector<4x1xi32>
    %274 = arith.andi %269, %273 : vector<4x1xi1>
    %275 = arith.extui %274 : vector<4x1xi1> to vector<4x1xi32>
    %276 = arith.sitofp %275 : vector<4x1xi32> to vector<4x1xf32>
    %277 = vector.broadcast %276 : vector<4x1xf32> to vector<4x64xf32>
    %278 = arith.mulf %265, %277 : vector<4x64xf32>
    %c3 = arith.constant 3 : index
    %c0_97 = arith.constant 0 : index
    %279 = vector.load %arg15[%c3, %c0_97] : memref<18x64xf32, #tpu.memory_space<vmem>>, vector<1x64xf32>
    %280 = vector.broadcast %279 : vector<1x64xf32> to vector<4x64xf32>
    %281 = arith.mulf %278, %280 : vector<4x64xf32>
    %282 = arith.addf %258, %281 : vector<4x64xf32>
    %c12 = arith.constant 12 : index
    %c0_98 = arith.constant 0 : index
    %283 = vector.load %arg15[%c12, %c0_98] : memref<18x64xf32, #tpu.memory_space<vmem>>, vector<1x64xf32>
    %284 = vector.broadcast %283 : vector<1x64xf32> to vector<4x64xf32>
    %285 = arith.mulf %278, %284 : vector<4x64xf32>
    %286 = arith.addf %262, %285 : vector<4x64xf32>
    %c4 = arith.constant 4 : index
    %c0_99 = arith.constant 0 : index
    %287 = vector.load %arg15[%c4, %c0_99] : memref<18x64xf32, #tpu.memory_space<vmem>>, vector<1x64xf32>
    %288 = vector.broadcast %287 : vector<1x64xf32> to vector<4x64xf32>
    %289 = arith.mulf %184, %288 : vector<4x64xf32>
    %290 = arith.addf %282, %289 : vector<4x64xf32>
    %c13 = arith.constant 13 : index
    %c0_100 = arith.constant 0 : index
    %291 = vector.load %arg15[%c13, %c0_100] : memref<18x64xf32, #tpu.memory_space<vmem>>, vector<1x64xf32>
    %292 = vector.broadcast %291 : vector<1x64xf32> to vector<4x64xf32>
    %293 = arith.mulf %184, %292 : vector<4x64xf32>
    %294 = arith.addf %286, %293 : vector<4x64xf32>
    %cst_101 = arith.constant 0.000000e+00 : f32
    %295 = vector.broadcast %cst_101 : f32 to vector<1x64xf32>
    %296 = vector.extract_strided_slice %184 {offsets = [1, 0], sizes = [3, 64], strides = [1, 1]} : vector<4x64xf32> to vector<3x64xf32>
    %297 = tpu.concatenate %296, %295 in 0 : vector<3x64xf32>, vector<1x64xf32> -> vector<4x64xf32>
    %c1_i32_102 = arith.constant 1 : i32
    %298 = vector.broadcast %c1_i32_102 : i32 to vector<4x1xi32>
    %299 = arith.addi %201, %298 : vector<4x1xi32>
    %c0_i32_103 = arith.constant 0 : i32
    %300 = vector.broadcast %c0_i32_103 : i32 to vector<4x1xi32>
    %301 = arith.cmpi sge, %299, %300 : vector<4x1xi32>
    %c1_i32_104 = arith.constant 1 : i32
    %302 = vector.broadcast %c1_i32_104 : i32 to vector<4x1xi32>
    %303 = arith.addi %201, %302 : vector<4x1xi32>
    %c2_i32_105 = arith.constant 2 : i32
    %304 = vector.broadcast %c2_i32_105 : i32 to vector<4x1xi32>
    %305 = arith.cmpi slt, %303, %304 : vector<4x1xi32>
    %306 = arith.andi %301, %305 : vector<4x1xi1>
    %307 = arith.extui %306 : vector<4x1xi1> to vector<4x1xi32>
    %308 = arith.sitofp %307 : vector<4x1xi32> to vector<4x1xf32>
    %309 = vector.broadcast %308 : vector<4x1xf32> to vector<4x64xf32>
    %310 = arith.mulf %297, %309 : vector<4x64xf32>
    %c5 = arith.constant 5 : index
    %c0_106 = arith.constant 0 : index
    %311 = vector.load %arg15[%c5, %c0_106] : memref<18x64xf32, #tpu.memory_space<vmem>>, vector<1x64xf32>
    %312 = vector.broadcast %311 : vector<1x64xf32> to vector<4x64xf32>
    %313 = arith.mulf %310, %312 : vector<4x64xf32>
    %314 = arith.addf %290, %313 : vector<4x64xf32>
    %c14 = arith.constant 14 : index
    %c0_107 = arith.constant 0 : index
    %315 = vector.load %arg15[%c14, %c0_107] : memref<18x64xf32, #tpu.memory_space<vmem>>, vector<1x64xf32>
    %316 = vector.broadcast %315 : vector<1x64xf32> to vector<4x64xf32>
    %317 = arith.mulf %310, %316 : vector<4x64xf32>
    %318 = arith.addf %294, %317 : vector<4x64xf32>
    %cst_108 = arith.constant 0.000000e+00 : f32
    %319 = vector.broadcast %cst_108 : f32 to vector<1x64xf32>
    %320 = vector.extract_strided_slice %184 {offsets = [1, 0], sizes = [3, 64], strides = [1, 1]} : vector<4x64xf32> to vector<3x64xf32>
    %321 = tpu.concatenate %320, %319 in 0 : vector<3x64xf32>, vector<1x64xf32> -> vector<4x64xf32>
    %c-1_i32_109 = arith.constant -1 : i32
    %322 = vector.broadcast %c-1_i32_109 : i32 to vector<4x1xi32>
    %323 = arith.addi %201, %322 : vector<4x1xi32>
    %c0_i32_110 = arith.constant 0 : i32
    %324 = vector.broadcast %c0_i32_110 : i32 to vector<4x1xi32>
    %325 = arith.cmpi sge, %323, %324 : vector<4x1xi32>
    %c-1_i32_111 = arith.constant -1 : i32
    %326 = vector.broadcast %c-1_i32_111 : i32 to vector<4x1xi32>
    %327 = arith.addi %201, %326 : vector<4x1xi32>
    %c2_i32_112 = arith.constant 2 : i32
    %328 = vector.broadcast %c2_i32_112 : i32 to vector<4x1xi32>
    %329 = arith.cmpi slt, %327, %328 : vector<4x1xi32>
    %330 = arith.andi %325, %329 : vector<4x1xi1>
    %331 = arith.extui %330 : vector<4x1xi1> to vector<4x1xi32>
    %332 = arith.sitofp %331 : vector<4x1xi32> to vector<4x1xf32>
    %333 = vector.broadcast %332 : vector<4x1xf32> to vector<4x64xf32>
    %334 = arith.mulf %321, %333 : vector<4x64xf32>
    %c6 = arith.constant 6 : index
    %c0_113 = arith.constant 0 : index
    %335 = vector.load %arg15[%c6, %c0_113] : memref<18x64xf32, #tpu.memory_space<vmem>>, vector<1x64xf32>
    %336 = vector.broadcast %335 : vector<1x64xf32> to vector<4x64xf32>
    %337 = arith.mulf %334, %336 : vector<4x64xf32>
    %338 = arith.addf %314, %337 : vector<4x64xf32>
    %c15 = arith.constant 15 : index
    %c0_114 = arith.constant 0 : index
    %339 = vector.load %arg15[%c15, %c0_114] : memref<18x64xf32, #tpu.memory_space<vmem>>, vector<1x64xf32>
    %340 = vector.broadcast %339 : vector<1x64xf32> to vector<4x64xf32>
    %341 = arith.mulf %334, %340 : vector<4x64xf32>
    %342 = arith.addf %318, %341 : vector<4x64xf32>
    %cst_115 = arith.constant 0.000000e+00 : f32
    %343 = vector.broadcast %cst_115 : f32 to vector<2x64xf32>
    %344 = vector.extract_strided_slice %184 {offsets = [2, 0], sizes = [2, 64], strides = [1, 1]} : vector<4x64xf32> to vector<2x64xf32>
    %345 = tpu.concatenate %344, %343 in 0 : vector<2x64xf32>, vector<2x64xf32> -> vector<4x64xf32>
    %c7 = arith.constant 7 : index
    %c0_116 = arith.constant 0 : index
    %346 = vector.load %arg15[%c7, %c0_116] : memref<18x64xf32, #tpu.memory_space<vmem>>, vector<1x64xf32>
    %347 = vector.broadcast %346 : vector<1x64xf32> to vector<4x64xf32>
    %348 = arith.mulf %345, %347 : vector<4x64xf32>
    %349 = arith.addf %338, %348 : vector<4x64xf32>
    %c16_117 = arith.constant 16 : index
    %c0_118 = arith.constant 0 : index
    %350 = vector.load %arg15[%c16_117, %c0_118] : memref<18x64xf32, #tpu.memory_space<vmem>>, vector<1x64xf32>
    %351 = vector.broadcast %350 : vector<1x64xf32> to vector<4x64xf32>
    %352 = arith.mulf %345, %351 : vector<4x64xf32>
    %353 = arith.addf %342, %352 : vector<4x64xf32>
    %cst_119 = arith.constant 0.000000e+00 : f32
    %354 = vector.broadcast %cst_119 : f32 to vector<3x64xf32>
    %355 = vector.extract_strided_slice %184 {offsets = [3, 0], sizes = [1, 64], strides = [1, 1]} : vector<4x64xf32> to vector<1x64xf32>
    %356 = tpu.concatenate %355, %354 in 0 : vector<1x64xf32>, vector<3x64xf32> -> vector<4x64xf32>
    %c1_i32_120 = arith.constant 1 : i32
    %357 = vector.broadcast %c1_i32_120 : i32 to vector<4x1xi32>
    %358 = arith.addi %201, %357 : vector<4x1xi32>
    %c0_i32_121 = arith.constant 0 : i32
    %359 = vector.broadcast %c0_i32_121 : i32 to vector<4x1xi32>
    %360 = arith.cmpi sge, %358, %359 : vector<4x1xi32>
    %c1_i32_122 = arith.constant 1 : i32
    %361 = vector.broadcast %c1_i32_122 : i32 to vector<4x1xi32>
    %362 = arith.addi %201, %361 : vector<4x1xi32>
    %c2_i32_123 = arith.constant 2 : i32
    %363 = vector.broadcast %c2_i32_123 : i32 to vector<4x1xi32>
    %364 = arith.cmpi slt, %362, %363 : vector<4x1xi32>
    %365 = arith.andi %360, %364 : vector<4x1xi1>
    %366 = arith.extui %365 : vector<4x1xi1> to vector<4x1xi32>
    %367 = arith.sitofp %366 : vector<4x1xi32> to vector<4x1xf32>
    %368 = vector.broadcast %367 : vector<4x1xf32> to vector<4x64xf32>
    %369 = arith.mulf %356, %368 : vector<4x64xf32>
    %c8 = arith.constant 8 : index
    %c0_124 = arith.constant 0 : index
    %370 = vector.load %arg15[%c8, %c0_124] : memref<18x64xf32, #tpu.memory_space<vmem>>, vector<1x64xf32>
    %371 = vector.broadcast %370 : vector<1x64xf32> to vector<4x64xf32>
    %372 = arith.mulf %369, %371 : vector<4x64xf32>
    %373 = arith.addf %349, %372 : vector<4x64xf32>
    %c17 = arith.constant 17 : index
    %c0_125 = arith.constant 0 : index
    %374 = vector.load %arg15[%c17, %c0_125] : memref<18x64xf32, #tpu.memory_space<vmem>>, vector<1x64xf32>
    %375 = vector.broadcast %374 : vector<1x64xf32> to vector<4x64xf32>
    %376 = arith.mulf %369, %375 : vector<4x64xf32>
    %377 = arith.addf %353, %376 : vector<4x64xf32>
    %cst_126 = arith.constant 0.000000e+00 : f32
    %378 = vector.broadcast %cst_126 : f32 to vector<4x64xf32>
    %c0_127 = arith.constant 0 : index
    %c0_128 = arith.constant 0 : index
    %379 = vector.load %arg16[%c0_127, %c0_128] : memref<2x64xf32, #tpu.memory_space<vmem>>, vector<1x64xf32>
    %380 = vector.broadcast %379 : vector<1x64xf32> to vector<4x64xf32>
    %381 = arith.addf %373, %380 : vector<4x64xf32>
    %cst_129 = arith.constant 5.000000e-01 : f32
    %382 = vector.broadcast %cst_129 : f32 to vector<4x64xf32>
    %383 = arith.mulf %382, %381 : vector<4x64xf32>
    %cst_130 = arith.constant 4.471500e-02 : f32
    %384 = vector.broadcast %cst_130 : f32 to vector<4x64xf32>
    %385 = arith.mulf %384, %381 : vector<4x64xf32>
    %386 = arith.mulf %385, %381 : vector<4x64xf32>
    %387 = arith.mulf %386, %381 : vector<4x64xf32>
    %388 = arith.addf %381, %387 : vector<4x64xf32>
    %cst_131 = arith.constant 0.797884583 : f32
    %389 = vector.broadcast %cst_131 : f32 to vector<4x64xf32>
    %390 = arith.mulf %389, %388 : vector<4x64xf32>
    %391 = math.tanh %390 : vector<4x64xf32>
    %cst_132 = arith.constant 1.000000e+00 : f32
    %392 = vector.broadcast %cst_132 : f32 to vector<4x64xf32>
    %393 = arith.addf %392, %391 : vector<4x64xf32>
    %394 = arith.mulf %383, %393 : vector<4x64xf32>
    %395 = arith.truncf %394 : vector<4x64xf32> to vector<4x64xbf16>
    %c0_133 = arith.constant 0 : index
    %c0_134 = arith.constant 0 : index
    %396 = vector.load %arg17[%c0_133, %c0_134] : memref<128x64xbf16, #tpu.memory_space<vmem>>, vector<64x64xbf16>
    %cst_135 = arith.constant dense<0.000000e+00> : vector<4x64xf32>
    %397 = tpu.matmul %395, %396, %cst_135 {dimension_numbers = #tpu.dot_dimension_numbers<[1], [0], [0], [1], [0, 0, 1, 1], [], []>} : vector<4x64xbf16>, vector<64x64xbf16>, vector<4x64xf32> -> vector<4x64xf32>
    %398 = arith.addf %378, %397 : vector<4x64xf32>
    %c1_136 = arith.constant 1 : index
    %c0_137 = arith.constant 0 : index
    %399 = vector.load %arg16[%c1_136, %c0_137] : memref<2x64xf32, #tpu.memory_space<vmem>>, vector<1x64xf32>
    %400 = vector.broadcast %399 : vector<1x64xf32> to vector<4x64xf32>
    %401 = arith.addf %377, %400 : vector<4x64xf32>
    %cst_138 = arith.constant 5.000000e-01 : f32
    %402 = vector.broadcast %cst_138 : f32 to vector<4x64xf32>
    %403 = arith.mulf %402, %401 : vector<4x64xf32>
    %cst_139 = arith.constant 4.471500e-02 : f32
    %404 = vector.broadcast %cst_139 : f32 to vector<4x64xf32>
    %405 = arith.mulf %404, %401 : vector<4x64xf32>
    %406 = arith.mulf %405, %401 : vector<4x64xf32>
    %407 = arith.mulf %406, %401 : vector<4x64xf32>
    %408 = arith.addf %401, %407 : vector<4x64xf32>
    %cst_140 = arith.constant 0.797884583 : f32
    %409 = vector.broadcast %cst_140 : f32 to vector<4x64xf32>
    %410 = arith.mulf %409, %408 : vector<4x64xf32>
    %411 = math.tanh %410 : vector<4x64xf32>
    %cst_141 = arith.constant 1.000000e+00 : f32
    %412 = vector.broadcast %cst_141 : f32 to vector<4x64xf32>
    %413 = arith.addf %412, %411 : vector<4x64xf32>
    %414 = arith.mulf %403, %413 : vector<4x64xf32>
    %415 = arith.truncf %414 : vector<4x64xf32> to vector<4x64xbf16>
    %c64 = arith.constant 64 : index
    %c0_142 = arith.constant 0 : index
    %416 = vector.load %arg17[%c64, %c0_142] : memref<128x64xbf16, #tpu.memory_space<vmem>>, vector<64x64xbf16>
    %cst_143 = arith.constant dense<0.000000e+00> : vector<4x64xf32>
    %417 = tpu.matmul %415, %416, %cst_143 {dimension_numbers = #tpu.dot_dimension_numbers<[1], [0], [0], [1], [0, 0, 1, 1], [], []>} : vector<4x64xbf16>, vector<64x64xbf16>, vector<4x64xf32> -> vector<4x64xf32>
    %418 = arith.addf %398, %417 : vector<4x64xf32>
    %419 = arith.addf %154, %418 : vector<4x64xf32>
    %c0_144 = arith.constant 0 : index
    %c0_145 = arith.constant 0 : index
    %420 = vector.load %arg18[%c0_144, %c0_145] : memref<1x64xf32, #tpu.memory_space<vmem>>, vector<1x64xf32>
    %421 = vector.broadcast %420 : vector<1x64xf32> to vector<4x64xf32>
    %422 = arith.addf %419, %421 : vector<4x64xf32>
    %c0_146 = arith.constant 0 : index
    %c0_147 = arith.constant 0 : index
    %423 = vector.load %arg19[%c0_146, %c0_147] : memref<1x64xf32, #tpu.memory_space<vmem>>, vector<1x64xf32>
    %c0_148 = arith.constant 0 : index
    %c0_149 = arith.constant 0 : index
    %424 = vector.load %arg20[%c0_148, %c0_149] : memref<1x64xf32, #tpu.memory_space<vmem>>, vector<1x64xf32>
    %cst_150 = arith.constant dense<0.000000e+00> : vector<4xf32>
    %425 = vector.multi_reduction <add>, %422, %cst_150 [1] : vector<4x64xf32> to vector<4xf32>
    %426 = vector.shape_cast %425 : vector<4xf32> to vector<4x1xf32>
    %cst_151 = arith.constant 6.400000e+01 : f32
    %427 = vector.broadcast %cst_151 : f32 to vector<4x1xf32>
    %428 = arith.divf %426, %427 : vector<4x1xf32>
    %429 = vector.broadcast %428 : vector<4x1xf32> to vector<4x64xf32>
    %430 = arith.subf %422, %429 : vector<4x64xf32>
    %431 = arith.mulf %430, %430 : vector<4x64xf32>
    %cst_152 = arith.constant dense<0.000000e+00> : vector<4xf32>
    %432 = vector.multi_reduction <add>, %431, %cst_152 [1] : vector<4x64xf32> to vector<4xf32>
    %433 = vector.shape_cast %432 : vector<4xf32> to vector<4x1xf32>
    %cst_153 = arith.constant 6.400000e+01 : f32
    %434 = vector.broadcast %cst_153 : f32 to vector<4x1xf32>
    %435 = arith.divf %433, %434 : vector<4x1xf32>
    %436 = vector.broadcast %428 : vector<4x1xf32> to vector<4x64xf32>
    %437 = arith.subf %422, %436 : vector<4x64xf32>
    %cst_154 = arith.constant 9.99999974E-6 : f32
    %438 = vector.broadcast %cst_154 : f32 to vector<4x1xf32>
    %439 = arith.addf %435, %438 : vector<4x1xf32>
    %440 = math.rsqrt %439 : vector<4x1xf32>
    %441 = vector.broadcast %440 : vector<4x1xf32> to vector<4x64xf32>
    %442 = arith.mulf %437, %441 : vector<4x64xf32>
    %443 = vector.broadcast %423 : vector<1x64xf32> to vector<4x64xf32>
    %444 = arith.mulf %442, %443 : vector<4x64xf32>
    %445 = vector.broadcast %424 : vector<1x64xf32> to vector<4x64xf32>
    %446 = arith.addf %444, %445 : vector<4x64xf32>
    %c0_155 = arith.constant 0 : index
    %c0_156 = arith.constant 0 : index
    %c0_157 = arith.constant 0 : index
    %447 = vector.load %arg21[%c0_155, %c0_156, %c0_157] : memref<1x4x64xf32, #tpu.memory_space<vmem>>, vector<1x4x64xf32>
    %448 = vector.shape_cast %447 : vector<1x4x64xf32> to vector<4x64xf32>
    %449 = vector.shape_cast %446 : vector<4x64xf32> to vector<1x4x64xf32>
    tpu.vector_store %arg21[%c0_155, %c0_156, %c0_157], %449 {strides = array<i32>} : memref<1x4x64xf32, #tpu.memory_space<vmem>>, vector<1x4x64xf32>,
    return
  }
  func.func @transform_0(%arg0: i32) -> (i32, i32, i32) {
    %c0_i32 = arith.constant 0 : i32
    %c0_i32_0 = arith.constant 0 : i32
    %c0_i32_1 = arith.constant 0 : i32
    return %arg0, %c0_i32, %c0_i32_0 : i32, i32, i32
  }
  func.func @transform_1(%arg0: i32) -> (i32, i32) {
    %c0_i32 = arith.constant 0 : i32
    %c0_i32_0 = arith.constant 0 : i32
    %c0_i32_1 = arith.constant 0 : i32
    return %c0_i32, %c0_i32_0 : i32, i32
  }
  func.func @transform_2(%arg0: i32) -> (i32, i32) {
    %c0_i32 = arith.constant 0 : i32
    %c0_i32_0 = arith.constant 0 : i32
    %c0_i32_1 = arith.constant 0 : i32
    return %c0_i32, %c0_i32_0 : i32, i32
  }
  func.func @transform_3(%arg0: i32) -> (i32, i32) {
    %c0_i32 = arith.constant 0 : i32
    %c0_i32_0 = arith.constant 0 : i32
    %c0_i32_1 = arith.constant 0 : i32
    return %c0_i32, %c0_i32_0 : i32, i32
  }
  func.func @transform_4(%arg0: i32) -> (i32, i32) {
    %c0_i32 = arith.constant 0 : i32
    %c0_i32_0 = arith.constant 0 : i32
    %c0_i32_1 = arith.constant 0 : i32
    return %c0_i32, %c0_i32_0 : i32, i32
  }
  func.func @transform_5(%arg0: i32) -> (i32, i32) {
    %c0_i32 = arith.constant 0 : i32
    %c0_i32_0 = arith.constant 0 : i32
    %c0_i32_1 = arith.constant 0 : i32
    return %c0_i32, %c0_i32_0 : i32, i32
  }
  func.func @transform_6(%arg0: i32) -> (i32, i32) {
    %c0_i32 = arith.constant 0 : i32
    %c0_i32_0 = arith.constant 0 : i32
    %c0_i32_1 = arith.constant 0 : i32
    return %c0_i32, %c0_i32_0 : i32, i32
  }
  func.func @transform_7(%arg0: i32) -> (i32, i32) {
    %c0_i32 = arith.constant 0 : i32
    %c0_i32_0 = arith.constant 0 : i32
    %c0_i32_1 = arith.constant 0 : i32
    return %c0_i32, %c0_i32_0 : i32, i32
  }
  func.func @transform_8(%arg0: i32) -> (i32, i32) {
    %c0_i32 = arith.constant 0 : i32
    %c0_i32_0 = arith.constant 0 : i32
    %c0_i32_1 = arith.constant 0 : i32
    return %c0_i32, %c0_i32_0 : i32, i32
  }
  func.func @transform_9(%arg0: i32) -> (i32, i32) {
    %c0_i32 = arith.constant 0 : i32
    %c0_i32_0 = arith.constant 0 : i32
    %c0_i32_1 = arith.constant 0 : i32
    return %c0_i32, %c0_i32_0 : i32, i32
  }
  func.func @transform_10(%arg0: i32) -> (i32, i32) {
    %c0_i32 = arith.constant 0 : i32
    %c0_i32_0 = arith.constant 0 : i32
    %c0_i32_1 = arith.constant 0 : i32
    return %c0_i32, %c0_i32_0 : i32, i32
  }
  func.func @transform_11(%arg0: i32) -> (i32, i32) {
    %c0_i32 = arith.constant 0 : i32
    %c0_i32_0 = arith.constant 0 : i32
    %c0_i32_1 = arith.constant 0 : i32
    return %c0_i32, %c0_i32_0 : i32, i32
  }
  func.func @transform_12(%arg0: i32) -> (i32, i32) {
    %c0_i32 = arith.constant 0 : i32
    %c0_i32_0 = arith.constant 0 : i32
    %c0_i32_1 = arith.constant 0 : i32
    return %c0_i32, %c0_i32_0 : i32, i32
  }
  func.func @transform_13(%arg0: i32) -> (i32, i32) {
    %c0_i32 = arith.constant 0 : i32
    %c0_i32_0 = arith.constant 0 : i32
    %c0_i32_1 = arith.constant 0 : i32
    return %c0_i32, %c0_i32_0 : i32, i32
  }
  func.func @transform_14(%arg0: i32) -> (i32, i32) {
    %c0_i32 = arith.constant 0 : i32
    %c0_i32_0 = arith.constant 0 : i32
    %c0_i32_1 = arith.constant 0 : i32
    return %c0_i32, %c0_i32_0 : i32, i32
  }
  func.func @transform_15(%arg0: i32) -> (i32, i32) {
    %c0_i32 = arith.constant 0 : i32
    %c0_i32_0 = arith.constant 0 : i32
    %c0_i32_1 = arith.constant 0 : i32
    return %c0_i32, %c0_i32_0 : i32, i32
  }
  func.func @transform_16(%arg0: i32) -> (i32, i32) {
    %c0_i32 = arith.constant 0 : i32
    %c0_i32_0 = arith.constant 0 : i32
    %c0_i32_1 = arith.constant 0 : i32
    return %c0_i32, %c0_i32_0 : i32, i32
  }
  func.func @transform_17(%arg0: i32) -> (i32, i32) {
    %c0_i32 = arith.constant 0 : i32
    %c0_i32_0 = arith.constant 0 : i32
    %c0_i32_1 = arith.constant 0 : i32
    return %c0_i32, %c0_i32_0 : i32, i32
  }
  func.func @transform_18(%arg0: i32) -> (i32, i32) {
    %c0_i32 = arith.constant 0 : i32
    %c0_i32_0 = arith.constant 0 : i32
    %c0_i32_1 = arith.constant 0 : i32
    return %c0_i32, %c0_i32_0 : i32, i32
  }
  func.func @transform_19(%arg0: i32) -> (i32, i32) {
    %c0_i32 = arith.constant 0 : i32
    %c0_i32_0 = arith.constant 0 : i32
    %c0_i32_1 = arith.constant 0 : i32
    return %c0_i32, %c0_i32_0 : i32, i32
  }
  func.func @transform_20(%arg0: i32) -> (i32, i32, i32) {
    %c0_i32 = arith.constant 0 : i32
    %c0_i32_0 = arith.constant 0 : i32
    %c0_i32_1 = arith.constant 0 : i32
    return %arg0, %c0_i32, %c0_i32_0 : i32, i32, i32
  }
}

module attributes {stable_mosaic.version = 11 : i64} {
  func.func @_dec_head1_kernel(%arg0: i32, %arg1: memref<64x112xbf16, #tpu.memory_space<vmem>>, %arg2: memref<112x96xbf16, #tpu.memory_space<vmem>>, %arg3: memref<1x96xf32, #tpu.memory_space<vmem>>, %arg4: memref<96x32xbf16, #tpu.memory_space<vmem>>, %arg5: memref<64x32xbf16, #tpu.memory_space<vmem>>, %arg6: memref<1x2x32xf32, #tpu.memory_space<vmem>>) attributes {dimension_semantics = [#tpu.dimension_semantics<parallel>], iteration_bounds = array<i64: 2>, scalar_prefetch = 0 : i64, scratch_operands = 0 : i64, tpu.core_type = #tpu.core_type<tc>, window_params = [{transform_indices = @transform_0, window_bounds = array<i64: 64, 112>}, {pipeline_mode = #tpu.pipeline_mode<synchronous>, transform_indices = @transform_1, window_bounds = array<i64: 112, 96>}, {pipeline_mode = #tpu.pipeline_mode<synchronous>, transform_indices = @transform_2, window_bounds = array<i64: 1, 96>}, {pipeline_mode = #tpu.pipeline_mode<synchronous>, transform_indices = @transform_3, window_bounds = array<i64: 96, 32>}, {transform_indices = @transform_4, window_bounds = array<i64: 64, 32>}, {transform_indices = @transform_5, window_bounds = array<i64: 1, 2, 32>}]} {
    %c0 = arith.constant 0 : index
    %c0_0 = arith.constant 0 : index
    %0 = vector.load %arg1[%c0, %c0_0] : memref<64x112xbf16, #tpu.memory_space<vmem>>, vector<64x112xbf16>
    %c0_1 = arith.constant 0 : index
    %c0_2 = arith.constant 0 : index
    %1 = vector.load %arg2[%c0_1, %c0_2] : memref<112x96xbf16, #tpu.memory_space<vmem>>, vector<112x96xbf16>
    %cst = arith.constant dense<0.000000e+00> : vector<64x96xf32>
    %2 = tpu.matmul %0, %1, %cst {dimension_numbers = #tpu.dot_dimension_numbers<[1], [0], [0], [1], [0, 0, 1, 1], [], []>} : vector<64x112xbf16>, vector<112x96xbf16>, vector<64x96xf32> -> vector<64x96xf32>
    %c0_3 = arith.constant 0 : index
    %c0_4 = arith.constant 0 : index
    %3 = vector.load %arg3[%c0_3, %c0_4] : memref<1x96xf32, #tpu.memory_space<vmem>>, vector<1x96xf32>
    %4 = vector.broadcast %3 : vector<1x96xf32> to vector<64x96xf32>
    %5 = arith.addf %2, %4 : vector<64x96xf32>
    %6 = arith.truncf %5 : vector<64x96xf32> to vector<64x96xbf16>
    %c0_5 = arith.constant 0 : index
    %c0_6 = arith.constant 0 : index
    %7 = vector.load %arg4[%c0_5, %c0_6] : memref<96x32xbf16, #tpu.memory_space<vmem>>, vector<96x32xbf16>
    %cst_7 = arith.constant dense<0.000000e+00> : vector<64x32xf32>
    %8 = tpu.matmul %6, %7, %cst_7 {dimension_numbers = #tpu.dot_dimension_numbers<[1], [0], [0], [1], [0, 0, 1, 1], [], []>} : vector<64x96xbf16>, vector<96x32xbf16>, vector<64x32xf32> -> vector<64x32xf32>
    %cst_8 = arith.constant 0.000000e+00 : f32
    %9 = vector.broadcast %cst_8 : f32 to vector<64x32xf32>
    %10 = arith.maximumf %8, %9 : vector<64x32xf32>
    %11 = arith.truncf %10 : vector<64x32xf32> to vector<64x32xbf16>
    %c0_9 = arith.constant 0 : index
    %c0_10 = arith.constant 0 : index
    %12 = vector.load %arg5[%c0_9, %c0_10] : memref<64x32xbf16, #tpu.memory_space<vmem>>, vector<64x32xbf16>
    tpu.vector_store %arg5[%c0_9, %c0_10], %11 {strides = array<i32>} : memref<64x32xbf16, #tpu.memory_space<vmem>>, vector<64x32xbf16>,
    %cst_11 = arith.constant dense<0.000000e+00> : vector<32xf32>
    %13 = vector.multi_reduction <add>, %10, %cst_11 [0] : vector<64x32xf32> to vector<32xf32>
    %14 = vector.shape_cast %13 : vector<32xf32> to vector<1x32xf32>
    %15 = arith.mulf %10, %10 : vector<64x32xf32>
    %cst_12 = arith.constant dense<0.000000e+00> : vector<32xf32>
    %16 = vector.multi_reduction <add>, %15, %cst_12 [0] : vector<64x32xf32> to vector<32xf32>
    %17 = vector.shape_cast %16 : vector<32xf32> to vector<1x32xf32>
    %18 = tpu.concatenate %14, %17 in 0 : vector<1x32xf32>, vector<1x32xf32> -> vector<2x32xf32>
    %c0_13 = arith.constant 0 : index
    %c0_14 = arith.constant 0 : index
    %c0_15 = arith.constant 0 : index
    %19 = vector.load %arg6[%c0_13, %c0_14, %c0_15] : memref<1x2x32xf32, #tpu.memory_space<vmem>>, vector<1x2x32xf32>
    %20 = vector.shape_cast %19 : vector<1x2x32xf32> to vector<2x32xf32>
    %21 = vector.shape_cast %18 : vector<2x32xf32> to vector<1x2x32xf32>
    tpu.vector_store %arg6[%c0_13, %c0_14, %c0_15], %21 {strides = array<i32>} : memref<1x2x32xf32, #tpu.memory_space<vmem>>, vector<1x2x32xf32>,
    return
  }
  func.func @transform_0(%arg0: i32) -> (i32, i32) {
    %c0_i32 = arith.constant 0 : i32
    %c0_i32_0 = arith.constant 0 : i32
    return %arg0, %c0_i32 : i32, i32
  }
  func.func @transform_1(%arg0: i32) -> (i32, i32) {
    %c0_i32 = arith.constant 0 : i32
    %c0_i32_0 = arith.constant 0 : i32
    %c0_i32_1 = arith.constant 0 : i32
    return %c0_i32, %c0_i32_0 : i32, i32
  }
  func.func @transform_2(%arg0: i32) -> (i32, i32) {
    %c0_i32 = arith.constant 0 : i32
    %c0_i32_0 = arith.constant 0 : i32
    %c0_i32_1 = arith.constant 0 : i32
    return %c0_i32, %c0_i32_0 : i32, i32
  }
  func.func @transform_3(%arg0: i32) -> (i32, i32) {
    %c0_i32 = arith.constant 0 : i32
    %c0_i32_0 = arith.constant 0 : i32
    %c0_i32_1 = arith.constant 0 : i32
    return %c0_i32, %c0_i32_0 : i32, i32
  }
  func.func @transform_4(%arg0: i32) -> (i32, i32) {
    %c0_i32 = arith.constant 0 : i32
    %c0_i32_0 = arith.constant 0 : i32
    return %arg0, %c0_i32 : i32, i32
  }
  func.func @transform_5(%arg0: i32) -> (i32, i32, i32) {
    %c0_i32 = arith.constant 0 : i32
    %c0_i32_0 = arith.constant 0 : i32
    %c0_i32_1 = arith.constant 0 : i32
    return %arg0, %c0_i32, %c0_i32_0 : i32, i32, i32
  }
}

module attributes {stable_mosaic.version = 11 : i64} {
  func.func @_head2_kernel(%arg0: i32, %arg1: memref<64x32xbf16, #tpu.memory_space<vmem>>, %arg2: memref<2x32xf32, #tpu.memory_space<vmem>>, %arg3: memref<1x32xf32, #tpu.memory_space<vmem>>, %arg4: memref<1x32xf32, #tpu.memory_space<vmem>>, %arg5: memref<32x10xbf16, #tpu.memory_space<vmem>>, %arg6: memref<1x10xf32, #tpu.memory_space<vmem>>, %arg7: memref<64x10xf32, #tpu.memory_space<vmem>>) attributes {dimension_semantics = [#tpu.dimension_semantics<parallel>], iteration_bounds = array<i64: 2>, scalar_prefetch = 0 : i64, scratch_operands = 0 : i64, tpu.core_type = #tpu.core_type<tc>, window_params = [{transform_indices = @transform_0, window_bounds = array<i64: 64, 32>}, {pipeline_mode = #tpu.pipeline_mode<synchronous>, transform_indices = @transform_1, window_bounds = array<i64: 2, 32>}, {pipeline_mode = #tpu.pipeline_mode<synchronous>, transform_indices = @transform_2, window_bounds = array<i64: 1, 32>}, {pipeline_mode = #tpu.pipeline_mode<synchronous>, transform_indices = @transform_3, window_bounds = array<i64: 1, 32>}, {pipeline_mode = #tpu.pipeline_mode<synchronous>, transform_indices = @transform_4, window_bounds = array<i64: 32, 10>}, {pipeline_mode = #tpu.pipeline_mode<synchronous>, transform_indices = @transform_5, window_bounds = array<i64: 1, 10>}, {transform_indices = @transform_6, window_bounds = array<i64: 64, 10>}]} {
    %c0 = arith.constant 0 : index
    %c0_0 = arith.constant 0 : index
    %0 = vector.load %arg1[%c0, %c0_0] : memref<64x32xbf16, #tpu.memory_space<vmem>>, vector<64x32xbf16>
    %1 = arith.extf %0 : vector<64x32xbf16> to vector<64x32xf32>
    %c0_1 = arith.constant 0 : index
    %c0_2 = arith.constant 0 : index
    %2 = vector.load %arg2[%c0_1, %c0_2] : memref<2x32xf32, #tpu.memory_space<vmem>>, vector<1x32xf32>
    %cst = arith.constant 7.812500e-03 : f32
    %3 = vector.broadcast %cst : f32 to vector<1x32xf32>
    %4 = arith.mulf %2, %3 : vector<1x32xf32>
    %c1 = arith.constant 1 : index
    %c0_3 = arith.constant 0 : index
    %5 = vector.load %arg2[%c1, %c0_3] : memref<2x32xf32, #tpu.memory_space<vmem>>, vector<1x32xf32>
    %cst_4 = arith.constant 7.812500e-03 : f32
    %6 = vector.broadcast %cst_4 : f32 to vector<1x32xf32>
    %7 = arith.mulf %5, %6 : vector<1x32xf32>
    %8 = arith.mulf %4, %4 : vector<1x32xf32>
    %9 = arith.subf %7, %8 : vector<1x32xf32>
    %10 = vector.broadcast %4 : vector<1x32xf32> to vector<64x32xf32>
    %11 = arith.subf %1, %10 : vector<64x32xf32>
    %cst_5 = arith.constant 9.99999974E-6 : f32
    %12 = vector.broadcast %cst_5 : f32 to vector<1x32xf32>
    %13 = arith.addf %9, %12 : vector<1x32xf32>
    %14 = math.rsqrt %13 : vector<1x32xf32>
    %15 = vector.broadcast %14 : vector<1x32xf32> to vector<64x32xf32>
    %16 = arith.mulf %11, %15 : vector<64x32xf32>
    %c0_6 = arith.constant 0 : index
    %c0_7 = arith.constant 0 : index
    %17 = vector.load %arg3[%c0_6, %c0_7] : memref<1x32xf32, #tpu.memory_space<vmem>>, vector<1x32xf32>
    %18 = vector.broadcast %17 : vector<1x32xf32> to vector<64x32xf32>
    %19 = arith.mulf %16, %18 : vector<64x32xf32>
    %c0_8 = arith.constant 0 : index
    %c0_9 = arith.constant 0 : index
    %20 = vector.load %arg4[%c0_8, %c0_9] : memref<1x32xf32, #tpu.memory_space<vmem>>, vector<1x32xf32>
    %21 = vector.broadcast %20 : vector<1x32xf32> to vector<64x32xf32>
    %22 = arith.addf %19, %21 : vector<64x32xf32>
    %23 = arith.truncf %22 : vector<64x32xf32> to vector<64x32xbf16>
    %c0_10 = arith.constant 0 : index
    %c0_11 = arith.constant 0 : index
    %24 = vector.load %arg5[%c0_10, %c0_11] : memref<32x10xbf16, #tpu.memory_space<vmem>>, vector<32x10xbf16>
    %cst_12 = arith.constant dense<0.000000e+00> : vector<64x10xf32>
    %25 = tpu.matmul %23, %24, %cst_12 {dimension_numbers = #tpu.dot_dimension_numbers<[1], [0], [0], [1], [0, 0, 1, 1], [], []>} : vector<64x32xbf16>, vector<32x10xbf16>, vector<64x10xf32> -> vector<64x10xf32>
    %c0_13 = arith.constant 0 : index
    %c0_14 = arith.constant 0 : index
    %26 = vector.load %arg6[%c0_13, %c0_14] : memref<1x10xf32, #tpu.memory_space<vmem>>, vector<1x10xf32>
    %27 = vector.broadcast %26 : vector<1x10xf32> to vector<64x10xf32>
    %28 = arith.addf %25, %27 : vector<64x10xf32>
    %c0_15 = arith.constant 0 : index
    %c0_16 = arith.constant 0 : index
    %29 = vector.load %arg7[%c0_15, %c0_16] : memref<64x10xf32, #tpu.memory_space<vmem>>, vector<64x10xf32>
    tpu.vector_store %arg7[%c0_15, %c0_16], %28 {strides = array<i32>} : memref<64x10xf32, #tpu.memory_space<vmem>>, vector<64x10xf32>,
    return
  }
  func.func @transform_0(%arg0: i32) -> (i32, i32) {
    %c0_i32 = arith.constant 0 : i32
    %c0_i32_0 = arith.constant 0 : i32
    return %arg0, %c0_i32 : i32, i32
  }
  func.func @transform_1(%arg0: i32) -> (i32, i32) {
    %c0_i32 = arith.constant 0 : i32
    %c0_i32_0 = arith.constant 0 : i32
    %c0_i32_1 = arith.constant 0 : i32
    return %c0_i32, %c0_i32_0 : i32, i32
  }
  func.func @transform_2(%arg0: i32) -> (i32, i32) {
    %c0_i32 = arith.constant 0 : i32
    %c0_i32_0 = arith.constant 0 : i32
    %c0_i32_1 = arith.constant 0 : i32
    return %c0_i32, %c0_i32_0 : i32, i32
  }
  func.func @transform_3(%arg0: i32) -> (i32, i32) {
    %c0_i32 = arith.constant 0 : i32
    %c0_i32_0 = arith.constant 0 : i32
    %c0_i32_1 = arith.constant 0 : i32
    return %c0_i32, %c0_i32_0 : i32, i32
  }
  func.func @transform_4(%arg0: i32) -> (i32, i32) {
    %c0_i32 = arith.constant 0 : i32
    %c0_i32_0 = arith.constant 0 : i32
    %c0_i32_1 = arith.constant 0 : i32
    return %c0_i32, %c0_i32_0 : i32, i32
  }
  func.func @transform_5(%arg0: i32) -> (i32, i32) {
    %c0_i32 = arith.constant 0 : i32
    %c0_i32_0 = arith.constant 0 : i32
    %c0_i32_1 = arith.constant 0 : i32
    return %c0_i32, %c0_i32_0 : i32, i32
  }
  func.func @transform_6(%arg0: i32) -> (i32, i32) {
    %c0_i32 = arith.constant 0 : i32
    %c0_i32_0 = arith.constant 0 : i32
    return %arg0, %c0_i32 : i32, i32
  }
}

</mosaic_0001>

<bundles_post_ra>
// kernel: run.8
= control target key start
LH: loop header
LB: loop body
LE: loop exit
PB: predicated region body
PF: predicated region fallthrough
CT: control target
= control target key end

     0   :  { %s640_s15 = smov 0   ;;  %s747_s0 = inlined_call_operand.vmem [shape: bf16[128,27], index: 0, kind: input, shape index: {}]   ;;  %s748_s1 = inlined_call_operand.vmem [shape: bf16[27,16], index: 1, kind: input, shape index: {}]   ;;  %s749_s2 = inlined_call_operand.vmem [shape: f32[1,16], index: 2, kind: input, shape index: {}]   ;;  %s750_s3 = inlined_call_operand.vmem [shape: f32[1,16], index: 3, kind: input, shape index: {}]   ;;  %s751_s4 = inlined_call_operand.vmem [shape: f32[128,16], index: 4, kind: output, shape index: {}]  }
   0x1 LB: > { %s530_s16 = sadd.s32 4294967295, %s612_s15   ;;  %p534_p0 = scmp.ge.s32.totalorder %s612_s15, 1  ;;  %s612_s15 = sphi %s640_s15, %s14_s15  }
   0x2   : > { %p163_p1 = scmp.lt.s32.totalorder %s612_s15, 3 }
   0x4   : > { %p164_p2 = pnand %p534_p0, %p163_p1 }
   0x5   : > { %v584_v0 = vld [vmem:[%s748_s1] sm:$0xff] (!%p164_p2)   ;;  %vm258_vm0 = vcmask (!%p164_p2), 1044480   ;;  %v585_v1 = vld [vmem:[%s748_s1 + $0x8] sm:$0x3f] (!%p164_p2)   ;;  %vm259_vm1 = vcmask (!%p164_p2), 1045504   ;;  %s535_s21 = sshll.u32 (!%p164_p2), %s530_s16, 3 }
   0x6   : > { %167 = sbr.rel (%p164_p2) target bundleno = 561 (0x231), region = 36  ;;  %559 = vmatprep.subr.bf16.mxu0 (!%p164_p2), %v584_v0  ;;  %571 = vmatprep.subr.bf16.mxu1 (!%p164_p2), %v584_v0  ;;  %v614_v2 = vmov (!%p164_p2), 65535   ;;  %p190_p3 = scmp.lt.s32.totalorder (!%p164_p2), %s535_s21, 15  ;;  %vm245_vm2 = vcmask (!%p164_p2), 220160   ;;  %vm332_vm3 = vcmask (!%p164_p2), 130048  }
   0x7   : > { %560 = vmatpush3.bf16.msra.mxu0 (!%p164_p2), %v584_v0  ;;  %573 = vmatpush3.bf16.msra.mxu1 (!%p164_p2), %v584_v0  ;;  %v260_v3 = vsel (!%p164_p2), %vm258_vm0, 4294967295, %v614_v2 }
   0x8   : > { %v261_v4 = vsel (!%p164_p2), %vm259_vm1, %v260_v3, 0 }
   0x9   : > { %v263_v5 = vand.u32 (!%p164_p2), %v585_v1, %v261_v4 }
   0xb   : > { %561 = vmatprep.subr.bf16.mxu0 (!%p164_p2), %v263_v5  ;;  %572 = vmatprep.subr.bf16.mxu1 (!%p164_p2), %v263_v5 }
   0xc   : > { %562 = vmatpush3.bf16.msra.mxu0 (!%p164_p2), %v263_v5  ;;  %574 = vmatpush3.bf16.msra.mxu1 (!%p164_p2), %v263_v5 }
   0xd   : > { %s753_s21 = smov (!%p190_p3, %s535_s21), 15 }
   0xe   : > { %s536_s22 = sshll.u32 %s753_s21, 2  ;;  %s538_s28 = sshll.u32 %s753_s21, 3 }
   0xf   : > { %s193_s25 = scalar_lea.vmem %s747_s0, %s536_s22  ;;  %s719_s7 = scalar_lea.vmem %s751_s4, %s538_s28 }
  0x10   : > { %v586_v6 = vld [vmem:[%s193_s25] sm:$0xff]   ;;  %v587_v7 = vld [vmem:[%s193_s25 + $0x8] sm:$0xff]   ;;  %v588_v8 = vld [vmem:[%s193_s25 + $0x10] sm:$0xff]  }
  0x11   : > { %563 = vmatprep.mubr.msk.bf16.mxu0 %vm245_vm2, %v586_v6  ;;  %v589_v9 = vld [vmem:[%s193_s25 + $0x18] sm:$0xff]   ;;  %567 = vmatprep.mubr.msk.bf16.mxu1 %vm245_vm2, %v588_v8 }
  0x12   : > { %564 = vmatmul.mubr.msk.bf16.vlgmr.msra.gmra.mrb[0].mxu0 %vm245_vm2, %v587_v7  ;;  %568 = vmatmul.mubr.msk.bf16.vlgmr.msra.gmra.mrb[0].mxu1 %vm245_vm2, %v589_v9 }
  0xe5   : > { %v565_v10 = vpop.f32.mrb[0].mxu0  ;;  %v569_v13 = vpop.f32.mrb[0].mxu1 }
  0xe6   : > { %v299_v11 = vpop.f32.mrb[1].mxu0  ;;  %v339_v12 = vsel %vm332_vm3, %v565_v10, 0.0  ;;  %v315_v16 = vpop.f32.mrb[1].mxu1  ;;  %v351_v25 = vsel %vm332_vm3, %v569_v13, 0.0 }
  0xe7   : > { %340 = vadd.xlane.f32.xlu1 %v339_v12  ;;  %v566_v14 = vpop.f32.mrb[2].mxu0  ;;  %v333_v15 = vsel %vm332_vm3, %v299_v11, 0.0  ;;  %v570_v18 = vpop.f32.mrb[2].mxu1  ;;  %v345_v19 = vsel %vm332_vm3, %v315_v16, 0.0 }
  0xe8   : > { %334 = vadd.xlane.f32.xlu0 %v333_v15  ;;  %v302_v17 = vpop.f32.mrb[3].mxu0  ;;  %v318_v20 = vpop.f32.mrb[3].mxu1  ;;  %v342_v21 = vsel %vm332_vm3, %v566_v14, 0.0  ;;  %v354_v24 = vsel %vm332_vm3, %v570_v18, 0.0 }
  0xe9   : > { %v348_v22 = vsel %vm332_vm3, %v318_v20, 0.0  ;;  %v336_v23 = vsel %vm332_vm3, %v302_v17, 0.0 }
  0xeb   : > { %343 = vadd.xlane.f32.xlu1 %v342_v21 }
  0xec   : > { %346 = vadd.xlane.f32.xlu0 %v345_v19 }
  0xef   : > { %349 = vadd.xlane.f32.xlu1 %v348_v22  ;;  %v549_v22 = vld [vmem:[%s749_s2] ss:$0 sm:$0xff] }
  0xf0   : > { %337 = vadd.xlane.f32.xlu0 %v336_v23 }
  0xf3   : > { %355 = vadd.xlane.f32.xlu1 %v354_v24 }
  0xf4   : > { %352 = vadd.xlane.f32.xlu0 %v351_v25 }
 0x174   : > { %v341_v26 = vpop.xlane.xlu1 %340 }
 0x175   : > { %v360_v27 = vmul.f32 0.0625, %v341_v26  ;;  %v335_v28 = vpop.xlane.xlu0 %334  ;;  %v550_v26 = vld [vmem:[%s750_s3] ss:$0 sm:$0xff] }
 0x176   : > { %v358_v29 = vmul.f32 0.0625, %v335_v28 }
 0x177   : > { %v668_v30 = vsub.f32 %v565_v10, %v360_v27 }
 0x178   : > { %v670_v31 = vsub.f32 %v299_v11, %v358_v29  ;;  %v344_v32 = vpop.xlane.xlu1 %343 }
 0x179   : > { %v361_v33 = vmul.f32 0.0625, %v344_v32  ;;  %v347_v34 = vpop.xlane.xlu0 %346  ;;  %v376_v35 = vmul.f32 %v668_v30, %v668_v30 }
 0x17a   : > { %v362_v36 = vmul.f32 0.0625, %v347_v34  ;;  %v374_v39 = vmul.f32 %v670_v31, %v670_v31 }
 0x17b   : > { %v674_v37 = vsub.f32 %v566_v14, %v361_v33  ;;  %v388_v38 = vsel %vm332_vm3, %v376_v35, 0.0 }
 0x17c   : > { %v679_v40 = vsub.f32 %v315_v16, %v362_v36  ;;  %v350_v41 = vpop.xlane.xlu1 %349  ;;  %389 = vadd.xlane.f32.xlu0 %v388_v38  ;;  %v382_v47 = vsel %vm332_vm3, %v374_v39, 0.0 }
 0x17d   : > { %v363_v42 = vmul.f32 0.0625, %v350_v41  ;;  %v338_v43 = vpop.xlane.xlu0 %337  ;;  %v377_v44 = vmul.f32 %v674_v37, %v674_v37 }
 0x17e   : > { %v359_v45 = vmul.f32 0.0625, %v338_v43  ;;  %v378_v48 = vmul.f32 %v679_v40, %v679_v40 }
 0x17f   : > { %v391_v46 = vsel %vm332_vm3, %v377_v44, 0.0  ;;  %v687_v49 = vsub.f32 %v318_v20, %v363_v42 }
 0x180   : > { %v689_v50 = vsub.f32 %v302_v17, %v359_v45  ;;  %392 = vadd.xlane.f32.xlu1 %v391_v46  ;;  %v356_v51 = vpop.xlane.xlu1 %355  ;;  %383 = vadd.xlane.f32.xlu0 %v382_v47  ;;  %v394_v56 = vsel %vm332_vm3, %v378_v48, 0.0 }
 0x181   : > { %v365_v52 = vmul.f32 0.0625, %v356_v51  ;;  %v353_v53 = vpop.xlane.xlu0 %352  ;;  %v379_v60 = vmul.f32 %v687_v49, %v687_v49 }
 0x182   : > { %v364_v54 = vmul.f32 0.0625, %v353_v53  ;;  %v375_v55 = vmul.f32 %v689_v50, %v689_v50 }
 0x183   : > { %v694_v57 = vsub.f32 %v570_v18, %v365_v52  ;;  %v397_v62 = vsel %vm332_vm3, %v379_v60, 0.0 }
 0x184   : > { %v696_v58 = vsub.f32 %v569_v13, %v364_v54  ;;  %395 = vadd.xlane.f32.xlu0 %v394_v56  ;;  %v385_v59 = vsel %vm332_vm3, %v375_v55, 0.0 }
 0x185   : > { %386 = vadd.xlane.f32.xlu1 %v385_v59  ;;  %v381_v0 = vmul.f32 %v694_v57, %v694_v57 }
 0x186   : > { %v380_v61 = vmul.f32 %v696_v58, %v696_v58 }
 0x187   : > { %v403_v1 = vsel %vm332_vm3, %v381_v0, 0.0 }
 0x188   : > { %v400_v63 = vsel %vm332_vm3, %v380_v61, 0.0 }
 0x189   : > { %398 = vadd.xlane.f32.xlu1 %v397_v62  ;;  %401 = vadd.xlane.f32.xlu0 %v400_v63 }
 0x18d   : > { %404 = vadd.xlane.f32.xlu1 %v403_v1 }
 0x209   : > { %v390_v2 = vpop.xlane.xlu0 %389 }
 0x20a   : > { %v408_v3 = vmul.f32 0.0625, %v390_v2 }
 0x20c   : > { %v416_v4 = vadd.f32 1e-05, %v408_v3 }
 0x20d   : > { %v393_v5 = vpop.xlane.xlu1 %392  ;;  %v384_v6 = vpop.xlane.xlu0 %383 }
 0x20e   : > { %590 = vrsqrt.f32 %v416_v4  ;;  %v409_v7 = vmul.f32 0.0625, %v393_v5  ;;  %v406_v8 = vmul.f32 0.0625, %v384_v6 }
 0x210   : > { %v417_v9 = vadd.f32 1e-05, %v409_v7  ;;  %v414_v10 = vadd.f32 1e-05, %v406_v8 }
 0x211   : > { %v396_v11 = vpop.xlane.xlu0 %395 }
 0x212   : > { %592 = vrsqrt.f32 %v417_v9  ;;  %v410_v12 = vmul.f32 0.0625, %v396_v11  ;;  %v387_v13 = vpop.xlane.xlu1 %386 }
 0x213   : > { %594 = vrsqrt.f32 %v414_v10  ;;  %v407_v14 = vmul.f32 0.0625, %v387_v13 }
 0x214   : > { %v418_v15 = vadd.f32 1e-05, %v410_v12 }
 0x215   : > { %v415_v16 = vadd.f32 1e-05, %v407_v14 }
 0x216   : > { %596 = vrsqrt.f32 %v418_v15  ;;  %v399_v17 = vpop.xlane.xlu1 %398  ;;  %v402_v18 = vpop.xlane.xlu0 %401 }
 0x217   : > { %598 = vrsqrt.f32 %v415_v16  ;;  %v411_v19 = vmul.f32 0.0625, %v399_v17  ;;  %v412_v20 = vmul.f32 0.0625, %v402_v18 }
 0x218   : > { %v591_v21 = vpop.eup %590 }
 0x219   : > { %v432_v23 = vmul.f32 %v591_v21, %v668_v30  ;;  %v419_v24 = vadd.f32 1e-05, %v411_v19  ;;  %v420_v25 = vadd.f32 1e-05, %v412_v20 }
 0x21a   : > { %v405_v27 = vpop.xlane.xlu1 %404 }
 0x21b   : > { %v446_v28 = vmul.f32 %v549_v22, %v432_v23  ;;  %600 = vrsqrt.f32 %v419_v24  ;;  %v413_v29 = vmul.f32 0.0625, %v405_v27 }
 0x21c   : > { %v593_v32 = vpop.eup %592  ;;  %602 = vrsqrt.f32 %v420_v25 }
 0x21d   : > { %v595_v30 = vpop.eup %594  ;;  %v460_v33 = vadd.f32 %v550_v26, %v446_v28  ;;  %v433_v34 = vmul.f32 %v593_v32, %v674_v37  ;;  %v421_v35 = vadd.f32 1e-05, %v413_v29 }
 0x21e   : > { %v430_v36 = vmul.f32 %v595_v30, %v670_v31 }
 0x21f   : > { %468 = vst.msk [vmem:[%s719_s7 + $0x10] sm:$0xff] %vm332_vm3, %v460_v33  ;;  %v447_v38 = vmul.f32 %v549_v22, %v433_v34  ;;  %604 = vrsqrt.f32 %v421_v35 }
 0x220   : > { %v597_v39 = vpop.eup %596  ;;  %v444_v41 = vmul.f32 %v549_v22, %v430_v36 }
 0x221   : > { %v599_v42 = vpop.eup %598  ;;  %v461_v43 = vadd.f32 %v550_v26, %v447_v38  ;;  %v434_v44 = vmul.f32 %v597_v39, %v679_v40 }
 0x222   : > { %v458_v45 = vadd.f32 %v550_v26, %v444_v41  ;;  %v431_v46 = vmul.f32 %v599_v42, %v689_v50 }
 0x223   : > { %469 = vst.msk [vmem:[%s719_s7 + $0x18] sm:$0xff] %vm332_vm3, %v461_v43  ;;  %v448_v37 = vmul.f32 %v549_v22, %v434_v44 }
 0x224   : > { %466 = vst.msk [vmem:[%s719_s7] sm:$0xff] %vm332_vm3, %v458_v45  ;;  %v445_v31 = vmul.f32 %v549_v22, %v431_v46 }
 0x225   : > { %v601_v47 = vpop.eup %600  ;;  %v462_v48 = vadd.f32 %v550_v26, %v448_v37 }
 0x226   : > { %v603_v51 = vpop.eup %602  ;;  %v459_v52 = vadd.f32 %v550_v26, %v445_v31  ;;  %v435_v53 = vmul.f32 %v601_v47, %v687_v49 }
 0x227   : > { %470 = vst.msk [vmem:[%s719_s7 + $0x20] sm:$0xff] %vm332_vm3, %v462_v48  ;;  %v436_v40 = vmul.f32 %v603_v51, %v696_v58 }
 0x228   : > { %467 = vst.msk [vmem:[%s719_s7 + $0x8] sm:$0xff] %vm332_vm3, %v459_v52  ;;  %v449_v50 = vmul.f32 %v549_v22, %v435_v53 }
 0x229   : > { %v605_v54 = vpop.eup %604  ;;  %v450_v55 = vmul.f32 %v549_v22, %v436_v40 }
 0x22a   : > { %v463_v56 = vadd.f32 %v550_v26, %v449_v50  ;;  %v437_v59 = vmul.f32 %v605_v54, %v694_v57 }
 0x22b   : > { %v464_v60 = vadd.f32 %v550_v26, %v450_v55 }
 0x22c   : > { %471 = vst.msk [vmem:[%s719_s7 + $0x28] sm:$0xff] %vm332_vm3, %v463_v56  ;;  %v451_v61 = vmul.f32 %v549_v22, %v437_v59 }
 0x22d   : > { %472 = vst.msk [vmem:[%s719_s7 + $0x30] sm:$0xff] %vm332_vm3, %v464_v60 }
 0x22e   : > { %v465_v62 = vadd.f32 %v550_v26, %v451_v61 }
 0x230   : > { %473 = vst.msk [vmem:[%s719_s7 + $0x38] sm:$0xff] %vm332_vm3, %v465_v62 }
 0x231 PF: > { %s14_s15 = sadd.s32 1, %s612_s15  }
 0x232   : > { %p11_p4 = scmp.ge.s32.totalorder %s14_s15, 4  }
 0x234   :  { %13 = sbr.rel (!%p11_p4) target bundleno = 1 (0x1), region = 66 }

// kernel: run.9
= control target key start
LH: loop header
LB: loop body
LE: loop exit
PB: predicated region body
PF: predicated region fallthrough
CT: control target
= control target key end

     0   :  { %s5285_s0 = inlined_call_operand.vmem [shape: f32[2,64,16], index: 0, kind: input, shape index: {}]   ;;  %s5286_s1 = inlined_call_operand.vmem [shape: f32[1,16], index: 1, kind: input, shape index: {}]   ;;  %s5287_s2 = inlined_call_operand.vmem [shape: f32[1,16], index: 2, kind: input, shape index: {}]   ;;  %s5288_s3 = inlined_call_operand.vmem [shape: bf16[16,16], index: 3, kind: input, shape index: {}]   ;;  %s5289_s4 = inlined_call_operand.vmem [shape: bf16[64,16], index: 4, kind: input, shape index: {}]   ;;  %s5290_s5 = inlined_call_operand.vmem [shape: f32[1,16], index: 5, kind: input, shape index: {}]   ;;  %s5291_s6 = inlined_call_operand.vmem [shape: f32[1,16], index: 6, kind: input, shape index: {}]   ;;  %s5292_s7 = inlined_call_operand.vmem [shape: bf16[16,32], index: 7, kind: input, shape index: {}]   ;;  %s5293_s8 = inlined_call_operand.vmem [shape: bf16[16,16], index: 8, kind: input, shape index: {}]   ;;  %s5294_s9 = inlined_call_operand.vmem [shape: f32[1,16], index: 9, kind: input, shape index: {}]   ;;  %s5295_s10 = inlined_call_operand.vmem [shape: f32[1,16], index: 10, kind: input, shape index: {}]   ;;  %s5296_s11 = inlined_call_operand.vmem [shape: f32[1,16], index: 11, kind: input, shape index: {}]   ;;  %s5297_s12 = inlined_call_operand.vmem [shape: bf16[16,16], index: 12, kind: input, shape index: {}]   ;;  %s5298_s13 = inlined_call_operand.vmem [shape: f32[1,16], index: 13, kind: input, shape index: {}]   ;;  %s5299_s14 = inlined_call_operand.vmem [shape: f32[18,16], index: 14, kind: input, shape index: {}]   ;;  %s5300_s15 = inlined_call_operand.vmem [shape: f32[2,16], index: 15, kind: input, shape index: {}]   ;;  %s5301_s16 = inlined_call_operand.vmem [shape: bf16[32,16], index: 16, kind: input, shape index: {}]   ;;  %s5302_s17 = inlined_call_operand.vmem [shape: f32[1,16], index: 17, kind: input, shape index: {}]   ;;  %s5303_s18 = inlined_call_operand.vmem [shape: bf16[4,16,64], index: 18, kind: input, shape index: {}]   ;;  %s5304_s19 = inlined_call_operand.vmem [shape: f32[1,16], index: 19, kind: input, shape index: {}]   ;;  %s5305_s20 = inlined_call_operand.vmem [shape: f32[1,16], index: 20, kind: input, shape index: {}]   ;;  %s5306_s21 = inlined_call_operand.vmem [shape: f32[2,64,16], index: 21, kind: output, shape index: {}]  }
   0x1   :  { %5350 = sst [smem:[#allocation70_spill]] %s5285_s0 }
   0x2   :  { %5351 = sst [smem:[#allocation71_spill]] %s5286_s1 }
   0x3   :  { %5352 = sst [smem:[#allocation72_spill]] %s5287_s2  ;;  %s3882_s2 = smov 0  }
   0x4   :  { %5353 = sst [smem:[#allocation73_spill]] %s5288_s3 }
   0x5   :  { %5354 = sst [smem:[#allocation74_spill]] %s5289_s4 }
   0x6   :  { %5355 = sst [smem:[#allocation75_spill]] %s5290_s5 }
   0x7 LB: > { %s3269_s25 = sadd.s32 4294967295, %s3767_s2   ;;  %p3273_p0 = scmp.ge.s32.totalorder %s3767_s2, 1  ;;  %s3767_s2 = sphi %s3882_s2, %s31_s2  }
   0x8   : > { %p587_p1 = scmp.lt.s32.totalorder %s3767_s2, 3 }
   0xa   : > { %p588_p2 = pnand %p3273_p0, %p587_p1 }
   0xc   : > { %591 = sbr.rel (%p588_p2) target bundleno = 3590 (0xe06), region = 104 }
  0x13   : > { %p647_p3 = scmp.lt.s32.totalorder %s3269_s25, 1  ;;  %vm668_vm0 = vcmask 130048   ;;  %s5356_s28 = sld [smem:[#allocation70_spill]]  ;;  %v3769_v57 = vmov 0.0   ;;  %vm3770_vm1 = vmmov 0   ;;  %vm898_vm2 = vcmask 523264  }
  0x14   : > { %s5357_s30 = sld [smem:[#allocation73_spill]]  ;;  %3461 = vmatprep.subr.bf16.mxu1 %v3769_v57  ;;  %3469 = vmatprep.mubr.msk.bf16.mxu1 %vm3770_vm1, %v3769_v57  ;;  %s5358_s23 = sld [smem:[#allocation71_spill]]  ;;  %vm2124_vm7 = vcmask 1040384   ;;  %vm2287_vm9 = vcmask 1046528  }
  0x15   : > { %s5526_s25 = smov (!%p647_p3, %s3269_s25), 1  ;;  %s5359_s27 = sld [smem:[#allocation72_spill]] }
  0x16   : > { %s3384_s26 = sshll.u32 %s5526_s25, 6  ;;  %s5360_s24 = sld [smem:[#allocation74_spill]] }
  0x17   : > { %s5361_s1 = sld [smem:[#allocation75_spill]]  ;;  %s5258_s3 = scalar_lea.vmem %s5306_s21, %s3384_s26 }
  0x19   : > { %s651_s29 = scalar_lea.vmem %s5356_s28, %s3384_s26  ;;  %s3771_s28 = smov 112  }
  0x1a   : > { %v3898_v0 = vld [vmem:[%s651_s29] sm:$0xff]  ;;  %v3900_v1 = vld [vmem:[%s651_s29 + $0x10] sm:$0xff]  ;;  %v3902_v2 = vld [vmem:[%s651_s29 + $0x8] sm:$0xff] }
  0x1b   : > { %v669_v3 = vsel %vm668_vm0, %v3898_v0, 0.0  ;;  %v675_v4 = vsel %vm668_vm0, %v3900_v1, 0.0  ;;  %v3908_v5 = vld [vmem:[%s651_s29 + $0x18] sm:$0xff]  ;;  %v672_v6 = vsel %vm668_vm0, %v3902_v2, 0.0  ;;  %v3912_v7 = vld [vmem:[%s651_s29 + $0x20] sm:$0xff]  ;;  %v3916_v9 = vld [vmem:[%s651_s29 + $0x28] sm:$0xff] }
  0x1c   : > { %670 = vadd.xlane.f32.xlu0 %v669_v3  ;;  %676 = vadd.xlane.f32.xlu1 %v675_v4  ;;  %v678_v8 = vsel %vm668_vm0, %v3908_v5, 0.0  ;;  %v681_v10 = vsel %vm668_vm0, %v3912_v7, 0.0  ;;  %v684_v11 = vsel %vm668_vm0, %v3916_v9, 0.0  ;;  %v3922_v12 = vld [vmem:[%s651_s29 + $0x30] sm:$0xff]  ;;  %v3924_v13 = vld [vmem:[%s651_s29 + $0x38] sm:$0xff]  ;;  %v3631_v56 = vld [vmem:[%s5357_s30] sm:$0xff]  }
  0x1d   : > { %v687_v14 = vsel %vm668_vm0, %v3922_v12, 0.0  ;;  %v690_v15 = vsel %vm668_vm0, %v3924_v13, 0.0  ;;  %3451 = vmatprep.subr.bf16.mxu0 %v3631_v56 }
  0x1e   : > { %3452 = vmatpush3.bf16.msra.mxu0 %v3631_v56 }
  0x1f   : > { %3497 = vmatprep.subr.bf16.mxu0 %v3769_v57 }
  0x20   : > { %673 = vadd.xlane.f32.xlu0 %v672_v6  ;;  %679 = vadd.xlane.f32.xlu1 %v678_v8 }
  0x24   : > { %682 = vadd.xlane.f32.xlu0 %v681_v10  ;;  %685 = vadd.xlane.f32.xlu1 %v684_v11 }
  0x28   : > { %688 = vadd.xlane.f32.xlu0 %v687_v14  ;;  %691 = vadd.xlane.f32.xlu1 %v690_v15 }
  0xa9   : > { %v671_v16 = vpop.xlane.xlu0 %670  ;;  %v677_v17 = vpop.xlane.xlu1 %676 }
  0xaa   : > { %v694_v18 = vmul.f32 0.0625, %v671_v16  ;;  %v696_v19 = vmul.f32 0.0625, %v677_v17 }
  0xac   : > { %v3931_v20 = vsub.f32 %v3898_v0, %v694_v18  ;;  %v3934_v21 = vsub.f32 %v3900_v1, %v696_v19 }
  0xad   : > { %v674_v22 = vpop.xlane.xlu0 %673  ;;  %v680_v23 = vpop.xlane.xlu1 %679 }
  0xae   : > { %v695_v24 = vmul.f32 0.0625, %v674_v22  ;;  %v697_v25 = vmul.f32 0.0625, %v680_v23  ;;  %v710_v26 = vmul.f32 %v3931_v20, %v3931_v20  ;;  %v712_v27 = vmul.f32 %v3934_v21, %v3934_v21 }
  0xb0   : > { %v3941_v28 = vsub.f32 %v3902_v2, %v695_v24  ;;  %v3944_v29 = vsub.f32 %v3908_v5, %v697_v25  ;;  %v718_v30 = vsel %vm668_vm0, %v710_v26, 0.0  ;;  %v724_v33 = vsel %vm668_vm0, %v712_v27, 0.0 }
  0xb1   : > { %719 = vadd.xlane.f32.xlu0 %v718_v30  ;;  %v683_v31 = vpop.xlane.xlu0 %682  ;;  %v686_v32 = vpop.xlane.xlu1 %685  ;;  %v3278_v30 = vld [vmem:[%s5358_s23] ss:$0 sm:$0xff] }
  0xb2   : > { %v698_v34 = vmul.f32 0.0625, %v683_v31  ;;  %v699_v35 = vmul.f32 0.0625, %v686_v32  ;;  %v711_v36 = vmul.f32 %v3941_v28, %v3941_v28  ;;  %v713_v37 = vmul.f32 %v3944_v29, %v3944_v29 }
  0xb4   : > { %v3953_v38 = vsub.f32 %v3912_v7, %v698_v34  ;;  %v3956_v39 = vsub.f32 %v3916_v9, %v699_v35  ;;  %v721_v40 = vsel %vm668_vm0, %v711_v36, 0.0  ;;  %v727_v43 = vsel %vm668_vm0, %v713_v37, 0.0 }
  0xb5   : > { %725 = vadd.xlane.f32.xlu0 %v724_v33  ;;  %722 = vadd.xlane.f32.xlu1 %v721_v40  ;;  %v689_v41 = vpop.xlane.xlu0 %688  ;;  %v692_v42 = vpop.xlane.xlu1 %691 }
  0xb6   : > { %v700_v44 = vmul.f32 0.0625, %v689_v41  ;;  %v701_v45 = vmul.f32 0.0625, %v692_v42  ;;  %v714_v46 = vmul.f32 %v3953_v38, %v3953_v38  ;;  %v715_v47 = vmul.f32 %v3956_v39, %v3956_v39 }
  0xb8   : > { %v3965_v48 = vsub.f32 %v3922_v12, %v700_v44  ;;  %v3968_v49 = vsub.f32 %v3924_v13, %v701_v45  ;;  %v730_v50 = vsel %vm668_vm0, %v714_v46, 0.0  ;;  %v733_v51 = vsel %vm668_vm0, %v715_v47, 0.0 }
  0xb9   : > { %728 = vadd.xlane.f32.xlu1 %v727_v43  ;;  %731 = vadd.xlane.f32.xlu0 %v730_v50 }
  0xba   : > { %v716_v52 = vmul.f32 %v3965_v48, %v3965_v48  ;;  %v717_v53 = vmul.f32 %v3968_v49, %v3968_v49 }
  0xbc   : > { %v736_v54 = vsel %vm668_vm0, %v716_v52, 0.0  ;;  %v739_v55 = vsel %vm668_vm0, %v717_v53, 0.0 }
  0xbd   : > { %734 = vadd.xlane.f32.xlu1 %v733_v51  ;;  %737 = vadd.xlane.f32.xlu0 %v736_v54 }
  0xc1   : > { %740 = vadd.xlane.f32.xlu1 %v739_v55 }
 0x13e   : > { %v720_v58 = vpop.xlane.xlu0 %719 }
 0x13f   : > { %v742_v59 = vmul.f32 0.0625, %v720_v58 }
 0x141   : > { %v750_v60 = vadd.f32 1e-05, %v742_v59 }
 0x142   : > { %v723_v61 = vpop.xlane.xlu1 %722  ;;  %v726_v62 = vpop.xlane.xlu0 %725 }
 0x143   : > { %3645 = vrsqrt.f32 %v750_v60  ;;  %v743_v63 = vmul.f32 0.0625, %v723_v61  ;;  %v744_v3 = vmul.f32 0.0625, %v726_v62 }
 0x145   : > { %v751_v4 = vadd.f32 1e-05, %v743_v63  ;;  %v752_v6 = vadd.f32 1e-05, %v744_v3 }
 0x146   : > { %v729_v8 = vpop.xlane.xlu1 %728  ;;  %v732_v10 = vpop.xlane.xlu0 %731 }
 0x147   : > { %3647 = vrsqrt.f32 %v751_v4  ;;  %v745_v11 = vmul.f32 0.0625, %v729_v8  ;;  %v746_v14 = vmul.f32 0.0625, %v732_v10  ;;  %v3632_v4 = vld [vmem:[%s5303_s18] sm:$0xff]   ;;  %v3634_v8 = vld [vmem:[%s5303_s18 + $0x8] sm:$0xff]   ;;  %v3635_v10 = vld [vmem:[%s5303_s18 + $0x18] sm:$0xff]  }
 0x148   : > { %3649 = vrsqrt.f32 %v752_v6  ;;  %v3633_v6 = vld [vmem:[%s5303_s18 + $0x10] sm:$0xff]  }
 0x149   : > { %v753_v15 = vadd.f32 1e-05, %v745_v11  ;;  %v754_v16 = vadd.f32 1e-05, %v746_v14  ;;  %v3636_v11 = vld [vmem:[%s5360_s24 + $0x8] sm:$0xff]  }
 0x14a   : > { %v735_v17 = vpop.xlane.xlu1 %734  ;;  %v738_v18 = vpop.xlane.xlu0 %737 }
 0x14b   : > { %3651 = vrsqrt.f32 %v753_v15  ;;  %v747_v19 = vmul.f32 0.0625, %v735_v17  ;;  %v748_v22 = vmul.f32 0.0625, %v738_v18 }
 0x14c   : > { %3653 = vrsqrt.f32 %v754_v16 }
 0x14d   : > { %v3646_v23 = vpop.eup %3645  ;;  %v755_v24 = vadd.f32 1e-05, %v747_v19  ;;  %v756_v25 = vadd.f32 1e-05, %v748_v22 }
 0x14e   : > { %v766_v26 = vmul.f32 %v3646_v23, %v3931_v20  ;;  %v741_v27 = vpop.xlane.xlu1 %740  ;;  %v3279_v20 = vld [vmem:[%s5359_s27] ss:$0 sm:$0xff] }
 0x14f   : > { %3655 = vrsqrt.f32 %v755_v24  ;;  %v749_v31 = vmul.f32 0.0625, %v741_v27 }
 0x150   : > { %3657 = vrsqrt.f32 %v756_v25  ;;  %v780_v35 = vmul.f32 %v3278_v30, %v766_v26 }
 0x151   : > { %v3648_v32 = vpop.eup %3647  ;;  %v757_v33 = vadd.f32 1e-05, %v749_v31 }
 0x152   : > { %v3650_v34 = vpop.eup %3649  ;;  %v767_v36 = vmul.f32 %v3648_v32, %v3941_v28  ;;  %v794_v45 = vadd.f32 %v3279_v20, %v780_v35 }
 0x153   : > { %v768_v37 = vmul.f32 %v3650_v34, %v3934_v21  ;;  %3659 = vrsqrt.f32 %v757_v33 }
 0x154   : > { %v781_v40 = vmul.f32 %v3278_v30, %v767_v36 }
 0x155   : > { %v3652_v41 = vpop.eup %3651  ;;  %v782_v43 = vmul.f32 %v3278_v30, %v768_v37 }
 0x156   : > { %v3654_v42 = vpop.eup %3653  ;;  %v769_v44 = vmul.f32 %v3652_v41, %v3944_v29  ;;  %v795_v46 = vadd.f32 %v3279_v20, %v781_v40 }
 0x157   : > { %v770_v47 = vmul.f32 %v3654_v42, %v3953_v38  ;;  %v796_v54 = vadd.f32 %v3279_v20, %v782_v43 }
 0x158   : > { %v783_v50 = vmul.f32 %v3278_v30, %v769_v44  ;;  %v802_v51 = vpack.c.bf16 %v795_v46, %v794_v45  ;;  %v3637_v44 = vld [vmem:[%s5360_s24] sm:$0xff]  }
 0x159   : > { %v3656_v28 = vpop.eup %3655  ;;  %v784_v52 = vmul.f32 %v3278_v30, %v770_v47 }
 0x15a   : > { %v3658_v21 = vpop.eup %3657  ;;  %v771_v53 = vmul.f32 %v3656_v28, %v3956_v39  ;;  %3453 = vmatprep.mubr.msk.bf16.mxu0 %vm668_vm0, %v802_v51  ;;  %3462 = vmatpush3.bf16.msra.mxu1 %v802_v51  ;;  %v797_v55 = vadd.f32 %v3279_v20, %v783_v50 }
 0x15b   : > { %v772_v56 = vmul.f32 %v3658_v21, %v3965_v48  ;;  %3463 = vmatprep.subr.bf16.mxu1 %v3769_v57  ;;  %v798_v38 = vadd.f32 %v3279_v20, %v784_v52  ;;  %v3638_v21 = vld [vmem:[%s5360_s24 + $0x10] sm:$0xff]  }
 0x15c   : > { %v785_v29 = vmul.f32 %v3278_v30, %v771_v53  ;;  %v803_v58 = vpack.c.bf16 %v797_v55, %v796_v54  ;;  %v3639_v53 = vld [vmem:[%s5360_s24 + $0x18] sm:$0xff]  }
 0x15d   : > { %v3660_v59 = vpop.eup %3659  ;;  %v786_v60 = vmul.f32 %v3278_v30, %v772_v56 }
 0x15e   : > { %v773_v61 = vmul.f32 %v3660_v59, %v3968_v49  ;;  %3454 = vmatmul.mubr.msk.bf16.vlgmr.msra.gmra.mrb[0].mxu0 %vm668_vm0, %v803_v58  ;;  %3464 = vmatpush3.bf16.msra.mxu1 %v803_v58  ;;  %v799_v39 = vadd.f32 %v3279_v20, %v785_v29 }
 0x15f   : > { %3498 = vmatpush3.bf16.msra.mxu0 %v802_v51  ;;  %3465 = vmatprep.subr.bf16.mxu1 %v3769_v57  ;;  %v800_v63 = vadd.f32 %v3279_v20, %v786_v60 }
 0x160   : > { %v787_v62 = vmul.f32 %v3278_v30, %v773_v61  ;;  %3499 = vmatprep.subr.bf16.mxu0 %v3769_v57  ;;  %v804_v48 = vpack.c.bf16 %v799_v39, %v798_v38 }
 0x162   : > { %3457 = vmatprep.mubr.msk.bf16.mxu0 %vm668_vm0, %v804_v48  ;;  %3466 = vmatpush3.bf16.msra.mxu1 %v804_v48  ;;  %v801_v3 = vadd.f32 %v3279_v20, %v787_v62 }
 0x163   : > { %3500 = vmatpush3.bf16.msra.mxu0 %v803_v58  ;;  %3467 = vmatprep.subr.bf16.mxu1 %v3769_v57 }
 0x164   : > { %3501 = vmatprep.subr.bf16.mxu0 %v3769_v57  ;;  %v805_v49 = vpack.c.bf16 %v801_v3, %v800_v63 }
 0x166   : > { %3458 = vmatmul.mubr.msk.bf16.gmra.mrb[4].mxu0 %vm668_vm0, %v805_v49  ;;  %3468 = vmatpush3.bf16.msra.mxu1 %v805_v49 }
 0x167   : > { %3502 = vmatpush3.bf16.msra.mxu0 %v804_v48  ;;  %3473 = vmatprep.subr.bf16.mxu1 %v3769_v57 }
 0x168   : > { %3503 = vmatprep.subr.bf16.mxu0 %v3769_v57  ;;  %3505 = vmatprep.mubr.msk.bf16.mxu0 %vm3770_vm1, %v3769_v57 }
 0x169   : > { %3470 = vmatmul.mubr.msk.bf16.vlgmr.msra.gmra.mrb[0].mxu1 %vm898_vm2, %v3632_v4 }
 0x16a   : > { %3474 = vmatpush3.bf16.msra.mxu1 %v802_v51  ;;  %3481 = vmatprep.mubr.msk.bf16.mxu1 %vm3770_vm1, %v3769_v57 }
 0x16b   : > { %3504 = vmatpush3.bf16.msra.mxu0 %v805_v49  ;;  %3475 = vmatprep.subr.bf16.mxu1 %v3769_v57 }
 0x16c   : > { %3515 = vmatprep.subr.bf16.mxu0 %v3769_v57 }
 0x16e   : > { %3476 = vmatpush3.bf16.msra.mxu1 %v803_v58  ;;  %3506 = vmatmul.mubr.msk.bf16.vlgmr.msra.gmra.mrb[8].mxu0 %vm898_vm2, %v3633_v6  ;;  %v3640_v6 = vld [vmem:[%s5292_s7] sm:$0xff]  }
 0x16f   : > { %3516 = vmatpush3.bf16.msra.mxu0 %v802_v51  ;;  %3477 = vmatprep.subr.bf16.mxu1 %v3769_v57 }
 0x170   : > { %3517 = vmatprep.subr.bf16.mxu0 %v3769_v57  ;;  %3523 = vmatprep.mubr.msk.bf16.mxu0 %vm3770_vm1, %v3769_v57 }
 0x172   : > { %3478 = vmatpush3.bf16.msra.mxu1 %v804_v48 }
 0x173   : > { %3518 = vmatpush3.bf16.msra.mxu0 %v803_v58  ;;  %3479 = vmatprep.subr.bf16.mxu1 %v3769_v57 }
 0x174   : > { %3519 = vmatprep.subr.bf16.mxu0 %v3769_v57 }
 0x176   : > { %3480 = vmatpush3.bf16.msra.mxu1 %v805_v49 }
 0x177   : > { %3520 = vmatpush3.bf16.msra.mxu0 %v804_v48  ;;  %3485 = vmatprep.subr.bf16.mxu1 %v3769_v57 }
 0x178   : > { %3521 = vmatprep.subr.bf16.mxu0 %v3769_v57 }
 0x179   : > { %3482 = vmatmul.mubr.msk.bf16.vlgmr.msra.gmra.mrb[4].mxu1 %vm898_vm2, %v3634_v8 }
 0x17a   : > { %3487 = vmatprep.mubr.msk.bf16.mxu1 %vm3770_vm1, %v3769_v57  ;;  %3486 = vmatpush3.bf16.msra.mxu1 %v3636_v11 }
 0x17b   : > { %3522 = vmatpush3.bf16.msra.mxu0 %v805_v49  ;;  %3491 = vmatprep.subr.bf16.mxu1 %v3769_v57 }
 0x17e   : > { %3524 = vmatmul.mubr.msk.bf16.vlgmr.msra.gmra.mrb[12].mxu0 %vm898_vm2, %v3635_v10 }
 0x231   : > { %v4046_v14 = vpop.f32.mrb[0].mxu0 }
 0x232   : > { %v860_v15 = vpop.f32.mrb[1].mxu0 }
 0x233   : > { %v4048_v16 = vpop.f32.mrb[2].mxu0 }
 0x234   : > { %v1413_v17 = vpack.c.bf16 %v4048_v16, %v4046_v14  ;;  %v863_v18 = vpop.f32.mrb[3].mxu0 }
 0x235   : > { %v1412_v19 = vpack.c.bf16 %v863_v18, %v860_v15 }
 0x237   : > { %3541 = vmatprep.mubr.msk.bf16.mxu0 %vm668_vm0, %v1412_v19 }
 0x239   : > { %v4053_v22 = vpop.f32.mrb[4].mxu0 }
 0x23a   : > { %v4055_v23 = vpop.f32.mrb[5].mxu0 }
 0x23b   : > { %v4057_v24 = vpop.f32.mrb[6].mxu0 }
 0x23c   : > { %v1415_v25 = vpack.c.bf16 %v4057_v24, %v4053_v22  ;;  %v4061_v26 = vpop.f32.mrb[7].mxu0  ;;  %v936_v27 = vpop.f32.mrb[0].mxu1 }
 0x23d   : > { %v1414_v30 = vpack.c.bf16 %v4061_v26, %v4055_v23  ;;  %v3471_v31 = vpop.f32.mrb[1].mxu1 }
 0x23e   : > { %v939_v32 = vpop.f32.mrb[2].mxu1  ;;  %v3307_v31 = vld [vmem:[%s5361_s1] ss:$0 sm:$0xff] }
 0x23f   : > { %v943_v33 = vpack.c.bf16 %v939_v32, %v936_v27  ;;  %v3472_v34 = vpop.f32.mrb[3].mxu1 }
 0x241   : > { %v1146_v35 = vpop.f32.mrb[8].mxu0 }
 0x242   : > { %v3507_v36 = vpop.f32.mrb[9].mxu0 }
 0x243   : > { %v1149_v37 = vpop.f32.mrb[10].mxu0  ;;  %v3308_v36 = vld [vmem:[%s5291_s6] ss:$0 sm:$0xff] }
 0x244   : > { %v1153_v20 = vpack.c.bf16 %v1149_v37, %v1146_v35  ;;  %v3508_v40 = vpop.f32.mrb[11].mxu0 }
 0x24c   : > { %v991_v41 = vpop.f32.mrb[4].mxu1 }
 0x24d   : > { %v3483_v42 = vpop.f32.mrb[5].mxu1 }
 0x24e   : > { %v994_v43 = vpop.f32.mrb[6].mxu1 }
 0x24f   : > { %v998_v45 = vpack.c.bf16 %v994_v43, %v991_v41  ;;  %v3484_v46 = vpop.f32.mrb[7].mxu1 }
 0x251   : > { %3488 = vmatmul.mubr.msk.bf16.vlgmr.msra.gmra.mrb[8].mxu1 %vm668_vm0, %v998_v45  ;;  %v1253_v47 = vpop.f32.mrb[12].mxu0 }
 0x252   : > { %3492 = vmatpush3.bf16.msra.mxu1 %v3637_v44  ;;  %3493 = vmatprep.mubr.msk.bf16.mxu1 %vm3770_vm1, %v3769_v57  ;;  %v3525_v50 = vpop.f32.mrb[13].mxu0 }
 0x253   : > { %3509 = vmatprep.subr.bf16.mxu1 %v3769_v57  ;;  %v1256_v51 = vpop.f32.mrb[14].mxu0 }
 0x254   : > { %v1260_v28 = vpack.c.bf16 %v1256_v51, %v1253_v47  ;;  %v3526_v52 = vpop.f32.mrb[15].mxu0 }
 0x25d   : > { %3494 = vmatmul.mubr.msk.bf16.vlgmr.msra.gmra.mrb[8].mxu1 %vm668_vm0, %v943_v33 }
 0x25e   : > { %3510 = vmatpush3.bf16.msra.mxu1 %v3638_v21  ;;  %3511 = vmatprep.mubr.msk.bf16.mxu1 %vm3770_vm1, %v3769_v57 }
 0x25f   : > { %3527 = vmatprep.subr.bf16.mxu1 %v3769_v57 }
 0x269   : > { %3512 = vmatmul.mubr.msk.bf16.vlgmr.msra.gmra.mrb[8].mxu1 %vm668_vm0, %v1153_v20 }
 0x26a   : > { %3528 = vmatpush3.bf16.msra.mxu1 %v3639_v53  ;;  %3529 = vmatprep.mubr.msk.bf16.mxu1 %vm3770_vm1, %v3769_v57 }
 0x26b   : > { %3533 = vmatprep.subr.bf16.mxu1 %v3769_v57 }
 0x275   : > { %3530 = vmatmul.mubr.msk.bf16.vlgmr.msra.gmra.mrb[8].mxu1 %vm668_vm0, %v1260_v28 }
 0x276   : > { %3535 = vmatprep.mubr.msk.bf16.mxu1 %vm3770_vm1, %v3769_v57  ;;  %3534 = vmatpush3.bf16.msra.mxu1 %v3640_v6 }
 0x348   : > { %v1306_v54 = vpop.f32.mrb[8].mxu1 }
 0x349   : > { %v3531_v55 = vpop.f32.mrb[9].mxu1  ;;  %v1317_v56 = vsel %vm668_vm0, %v1306_v54, 0.0 }
 0x34a   : > { %1318 = vadd.xlane.f32.xlu0 %v1317_v56  ;;  %v1309_v29 = vpop.f32.mrb[10].mxu1 }
 0x34b   : > { %v3532_v58 = vpop.f32.mrb[11].mxu1  ;;  %v1320_v59 = vsel %vm668_vm0, %v1309_v29, 0.0 }
 0x34c   : > { %1321 = vadd.xlane.f32.xlu1 %v1320_v59 }
 0x3d7   : > { %v1319_v38 = vpop.xlane.xlu0 %1318 }
 0x3d8   : > { %v1323_v60 = vmul.f32 0.0625, %v1319_v38 }
 0x3d9   : > { %v1322_v61 = vpop.xlane.xlu1 %1321 }
 0x3da   : > { %v1325_v39 = vsub.f32 %v1306_v54, %v1323_v60  ;;  %v1324_v62 = vmul.f32 0.0625, %v1322_v61 }
 0x3dc   : > { %v1326_v48 = vsub.f32 %v1309_v29, %v1324_v62  ;;  %v1327_v63 = vmul.f32 %v1325_v39, %v1325_v39 }
 0x3de   : > { %v1329_v3 = vsel %vm668_vm0, %v1327_v63, 0.0  ;;  %v1328_v49 = vmul.f32 %v1326_v48, %v1326_v48 }
 0x3df   : > { %1330 = vadd.xlane.f32.xlu0 %v1329_v3 }
 0x3e0   : > { %v1332_v4 = vsel %vm668_vm0, %v1328_v49, 0.0 }
 0x3e1   : > { %1333 = vadd.xlane.f32.xlu1 %v1332_v4 }
 0x46c   : > { %v1331_v8 = vpop.xlane.xlu0 %1330 }
 0x46d   : > { %v1335_v10 = vmul.f32 0.0625, %v1331_v8 }
 0x46e   : > { %v1334_v11 = vpop.xlane.xlu1 %1333 }
 0x46f   : > { %v1337_v15 = vadd.f32 1e-05, %v1335_v10  ;;  %v1336_v18 = vmul.f32 0.0625, %v1334_v11 }
 0x471   : > { %3661 = vrsqrt.f32 %v1337_v15  ;;  %v1338_v19 = vadd.f32 1e-05, %v1336_v18 }
 0x473   : > { %3663 = vrsqrt.f32 %v1338_v19 }
 0x47b   : > { %v3662_v27 = vpop.eup %3661 }
 0x47c   : > { %v1341_v32 = vmul.f32 %v3662_v27, %v1325_v39 }
 0x47d   : > { %v3664_v33 = vpop.eup %3663 }
 0x47e   : > { %v1349_v34 = vmul.f32 %v3307_v31, %v1341_v32  ;;  %v1342_v35 = vmul.f32 %v3664_v33, %v1326_v48 }
 0x480   : > { %v1350_v37 = vmul.f32 %v3307_v31, %v1342_v35  ;;  %v1357_v20 = vadd.f32 %v3308_v36, %v1349_v34 }
 0x482   : > { %v1358_v40 = vadd.f32 %v3308_v36, %v1350_v37 }
 0x484   : > { %v1359_v41 = vpack.c.bf16 %v1358_v40, %v1357_v20 }
 0x486   : > { %3536 = vmatmul.mubr.msk.bf16.vlgmr.msra.gmra.mrb[12].mxu1 %vm668_vm0, %v1359_v41 }
 0x559   : > { %v1405_v42 = vpop.f32.mrb[12].mxu1 }
 0x55a   : > { %v3537_v43 = vpop.f32.mrb[13].mxu1 }
 0x55b   : > { %v1408_v44 = vpop.f32.mrb[14].mxu1 }
 0x55c   : > { %v4103_v45 = vpack.c.bf16 %v1408_v44, %v1405_v42  ;;  %v3538_v46 = vpop.f32.mrb[15].mxu1 }
 0x55e   : > { %3619 = vmatprep.subr.msk.bf16.mxu0 %vm668_vm0, %v4103_v45  ;;  %v1430_v47 = vsel %vm668_vm0, %v4103_v45, 0 }
 0x55f   : > { %3540 = vmatpush3.bf16.xpose.msra.mxu0 %v1430_v47 }
 0x566   : > { %3542 = vmatmul.mubr.msk.bf16.vlgmr.msra.gmra.mrb[16].mxu0 %vm668_vm0, %v1413_v17 }
 0x567   : > { %3545 = vmatprep.mubr.msk.bf16.mxu0 %vm668_vm0, %v1414_v30 }
 0x56e   : > { %3546 = vmatmul.mubr.msk.bf16.gmra.mrb[20].mxu0 %vm668_vm0, %v1415_v25 }
 0x639   : > { %v3543_v50 = vpop.f32.mrb[16].mxu0 }
 0x63a   : > { %v1466_v51 = vpop.f32.mrb[17].mxu0  ;;  %v1503_v16 = vsel %vm668_vm0, %v3543_v50, -inf }
 0x63b   : > { %v3544_v28 = vpop.f32.mrb[18].mxu0  ;;  %v1497_v52 = vsel %vm668_vm0, %v1466_v51, -inf }
 0x63c   : > { %1498 = vmax.xlane.f32.xlu0 %v1497_v52  ;;  %v1469_v21 = vpop.f32.mrb[19].mxu0  ;;  %v1506_v23 = vsel %vm668_vm0, %v3544_v28, -inf }
 0x63d   : > { %v1500_v14 = vsel %vm668_vm0, %v1469_v21, -inf }
 0x63e   : > { %1501 = vmax.xlane.f32.xlu1 %v1500_v14 }
 0x640   : > { %1504 = vmax.xlane.f32.xlu0 %v1503_v16 }
 0x641   : > { %v3547_v17 = vpop.f32.mrb[20].mxu0 }
 0x642   : > { %1507 = vmax.xlane.f32.xlu1 %v1506_v23  ;;  %v1482_v22 = vpop.f32.mrb[21].mxu0  ;;  %v1515_v53 = vsel %vm668_vm0, %v3547_v17, -inf }
 0x643   : > { %v3548_v24 = vpop.f32.mrb[22].mxu0  ;;  %v1509_v25 = vsel %vm668_vm0, %v1482_v22, -inf }
 0x644   : > { %1510 = vmax.xlane.f32.xlu0 %v1509_v25  ;;  %v1485_v26 = vpop.f32.mrb[23].mxu0  ;;  %v1518_v54 = vsel %vm668_vm0, %v3548_v24, -inf }
 0x645   : > { %v1512_v30 = vsel %vm668_vm0, %v1485_v26, -inf }
 0x646   : > { %1513 = vmax.xlane.f32.xlu1 %v1512_v30 }
 0x648   : > { %1516 = vmax.xlane.f32.xlu0 %v1515_v53 }
 0x64a   : > { %1519 = vmax.xlane.f32.xlu1 %v1518_v54 }
 0x6c9   : > { %v1499_v55 = vpop.xlane.xlu0 %1498 }
 0x6ca   : > { %v1521_v56 = vsub.f32 %v1466_v51, %v1499_v55 }
 0x6cb   : > { %v1502_v29 = vpop.xlane.xlu1 %1501 }
 0x6cc   : > { %v1522_v58 = vsub.f32 %v1469_v21, %v1502_v29  ;;  %v1529_v61 = vmul.f32 1.442695, %v1521_v56 }
 0x6cd   : > { %v1505_v59 = vpop.xlane.xlu0 %1504 }
 0x6ce   : > { %v1531_v38 = vmul.f32 1.442695, %v1522_v58  ;;  %v1523_v60 = vsub.f32 %v3543_v50, %v1505_v59 }
 0x6cf   : > { %v1508_v39 = vpop.xlane.xlu1 %1507 }
 0x6d0   : > { %3665 = vpow2.f32 %v1531_v38  ;;  %v1533_v62 = vmul.f32 1.442695, %v1523_v60  ;;  %v1524_v48 = vsub.f32 %v3544_v28, %v1508_v39  ;;  %v3641_v28 = vld [vmem:[%s5293_s8] sm:$0xff]  }
 0x6d1   : > { %v1511_v63 = vpop.xlane.xlu0 %1510  ;;  %3559 = vmatprep.subr.bf16.mxu0 %v3641_v28 }
 0x6d2   : > { %3667 = vpow2.f32 %v1533_v62  ;;  %v1535_v3 = vmul.f32 1.442695, %v1524_v48  ;;  %v1525_v49 = vsub.f32 %v1482_v22, %v1511_v63  ;;  %3560 = vmatpush3.bf16.msra.mxu0 %v3641_v28 }
 0x6d3   : > { %3669 = vpow2.f32 %v1529_v61  ;;  %v1514_v4 = vpop.xlane.xlu1 %1513 }
 0x6d4   : > { %3671 = vpow2.f32 %v1535_v3  ;;  %v1526_v6 = vsub.f32 %v1485_v26, %v1514_v4  ;;  %v1537_v15 = vmul.f32 1.442695, %v1525_v49 }
 0x6d5   : > { %v1517_v8 = vpop.xlane.xlu0 %1516 }
 0x6d6   : > { %v1539_v10 = vmul.f32 1.442695, %v1526_v6  ;;  %v1527_v11 = vsub.f32 %v3547_v17, %v1517_v8 }
 0x6d7   : > { %v1520_v18 = vpop.xlane.xlu1 %1519 }
 0x6d8   : > { %3673 = vpow2.f32 %v1539_v10  ;;  %v1541_v19 = vmul.f32 1.442695, %v1527_v11  ;;  %v1528_v27 = vsub.f32 %v3548_v24, %v1520_v18 }
 0x6da   : > { %v3666_v31 = vpop.eup %3665  ;;  %3675 = vpow2.f32 %v1541_v19  ;;  %v1543_v32 = vmul.f32 1.442695, %v1528_v27 }
 0x6db   : > { %3677 = vpow2.f32 %v1537_v15  ;;  %v1548_v33 = vsel %vm668_vm0, %v3666_v31, 0.0 }
 0x6dc   : > { %v3668_v34 = vpop.eup %3667  ;;  %3679 = vpow2.f32 %v1543_v32  ;;  %1549 = vadd.xlane.f32.xlu1 %v1548_v33 }
 0x6dd   : > { %v3670_v35 = vpop.eup %3669  ;;  %v1551_v36 = vsel %vm668_vm0, %v3668_v34, 0.0 }
 0x6de   : > { %v3672_v37 = vpop.eup %3671  ;;  %1552 = vadd.xlane.f32.xlu0 %v1551_v36  ;;  %v1545_v40 = vsel %vm668_vm0, %v3670_v35, 0.0  ;;  %v3324_v36 = vld [vmem:[%s5294_s9] ss:$0 sm:$0xff] }
 0x6df   : > { %v1554_v20 = vsel %vm668_vm0, %v3672_v37, 0.0 }
 0x6e0   : > { %1555 = vadd.xlane.f32.xlu1 %v1554_v20 }
 0x6e2   : > { %v3674_v41 = vpop.eup %3673  ;;  %1546 = vadd.xlane.f32.xlu0 %v1545_v40 }
 0x6e3   : > { %v1560_v42 = vsel %vm668_vm0, %v3674_v41, 0.0 }
 0x6e4   : > { %v3676_v43 = vpop.eup %3675  ;;  %1561 = vadd.xlane.f32.xlu1 %v1560_v42 }
 0x6e5   : > { %v3678_v44 = vpop.eup %3677  ;;  %v1563_v46 = vsel %vm668_vm0, %v3676_v43, 0.0 }
 0x6e6   : > { %v3680_v47 = vpop.eup %3679  ;;  %1564 = vadd.xlane.f32.xlu0 %v1563_v46  ;;  %v1557_v51 = vsel %vm668_vm0, %v3678_v44, 0.0 }
 0x6e7   : > { %v1566_v50 = vsel %vm668_vm0, %v3680_v47, 0.0 }
 0x6e8   : > { %1567 = vadd.xlane.f32.xlu1 %v1566_v50 }
 0x6ea   : > { %1558 = vadd.xlane.f32.xlu0 %v1557_v51 }
 0x700   : > { %1590 = vrot.lane.b32.xlu0 %v4103_v45, %s3771_s28 }
 0x769   : > { %v1550_v52 = vpop.xlane.xlu1 %1549 }
 0x76a   : > { %3681 = vrcp.f32 %v1550_v52 }
 0x76b   : > { %v1553_v21 = vpop.xlane.xlu0 %1552 }
 0x76d   : > { %v1556_v14 = vpop.xlane.xlu1 %1555 }
 0x76e   : > { %3683 = vrcp.f32 %v1556_v14 }
 0x76f   : > { %3685 = vrcp.f32 %v1553_v21  ;;  %v1547_v16 = vpop.xlane.xlu0 %1546 }
 0x770   : > { %3687 = vrcp.f32 %v1547_v16 }
 0x771   : > { %v1562_v17 = vpop.xlane.xlu1 %1561 }
 0x772   : > { %3689 = vrcp.f32 %v1562_v17 }
 0x773   : > { %v1565_v23 = vpop.xlane.xlu0 %1564 }
 0x774   : > { %v3682_v45 = vpop.eup %3681 }
 0x775   : > { %v1568_v22 = vpop.xlane.xlu1 %1567  ;;  %v1578_v56 = vmul.f32 %v3682_v45, %v3666_v31 }
 0x776   : > { %3691 = vrcp.f32 %v1568_v22 }
 0x777   : > { %3693 = vrcp.f32 %v1565_v23  ;;  %v1559_v24 = vpop.xlane.xlu0 %1558 }
 0x778   : > { %v3684_v25 = vpop.eup %3683  ;;  %3695 = vrcp.f32 %v1559_v24 }
 0x779   : > { %v3686_v26 = vpop.eup %3685  ;;  %v1580_v53 = vmul.f32 %v3684_v25, %v3672_v37 }
 0x77a   : > { %v3688_v30 = vpop.eup %3687  ;;  %v1579_v29 = vmul.f32 %v3686_v26, %v3668_v34 }
 0x77b   : > { %v1591_v54 = vpop.permute.xlu0 %1590  ;;  %v1577_v55 = vmul.f32 %v3688_v30, %v3670_v35 }
 0x77c   : > { %3549 = vmatprep.subr.bf16.mxu1 %v1591_v54  ;;  %v1586_v59 = vpack.c.bf16 %v1580_v53, %v1579_v29  ;;  %v3690_v38 = vpop.eup %3689 }
 0x77d   : > { %3550 = vmatpush3.bf16.msra.mxu1 %v1591_v54  ;;  %v1585_v58 = vpack.c.bf16 %v1578_v56, %v1577_v55  ;;  %v1582_v63 = vmul.f32 %v3690_v38, %v3674_v41 }
 0x77f   : > { %3551 = vmatprep.mubr.msk.bf16.mxu1 %vm668_vm0, %v1585_v58 }
 0x780   : > { %v3692_v60 = vpop.eup %3691  ;;  %3552 = vmatmul.mubr.msk.bf16.vlgmr.msra.gmra.mrb[16].mxu1 %vm668_vm0, %v1586_v59 }
 0x781   : > { %v3694_v61 = vpop.eup %3693  ;;  %v1584_v62 = vmul.f32 %v3692_v60, %v3680_v47 }
 0x782   : > { %v3696_v39 = vpop.eup %3695  ;;  %v1583_v3 = vmul.f32 %v3694_v61, %v3676_v43 }
 0x783   : > { %v1581_v48 = vmul.f32 %v3696_v39, %v3678_v44 }
 0x784   : > { %v1588_v4 = vpack.c.bf16 %v1584_v62, %v1583_v3 }
 0x785   : > { %v1587_v49 = vpack.c.bf16 %v1582_v63, %v1581_v48 }
 0x787   : > { %3555 = vmatprep.mubr.msk.bf16.mxu1 %vm668_vm0, %v1587_v49 }
 0x788   : > { %3556 = vmatmul.mubr.msk.bf16.gmra.mrb[20].mxu1 %vm668_vm0, %v1588_v4 }
 0x853   : > { %v3553_v6 = vpop.f32.mrb[16].mxu1 }
 0x854   : > { %v1639_v8 = vpop.f32.mrb[17].mxu1 }
 0x855   : > { %v3554_v10 = vpop.f32.mrb[18].mxu1 }
 0x856   : > { %v1671_v11 = vpack.c.bf16 %v3554_v10, %v3553_v6  ;;  %v1642_v15 = vpop.f32.mrb[19].mxu1 }
 0x857   : > { %v1670_v18 = vpack.c.bf16 %v1642_v15, %v1639_v8 }
 0x859   : > { %3561 = vmatprep.mubr.msk.bf16.mxu0 %vm668_vm0, %v1670_v18 }
 0x85a   : > { %3562 = vmatmul.mubr.msk.bf16.vlgmr.msra.gmra.mrb[24].mxu0 %vm668_vm0, %v1671_v11 }
 0x85b   : > { %v3557_v19 = vpop.f32.mrb[20].mxu1 }
 0x85c   : > { %v1655_v27 = vpop.f32.mrb[21].mxu1 }
 0x85d   : > { %v3558_v31 = vpop.f32.mrb[22].mxu1 }
 0x85e   : > { %v1673_v32 = vpack.c.bf16 %v3558_v31, %v3557_v19  ;;  %v1658_v33 = vpop.f32.mrb[23].mxu1 }
 0x85f   : > { %v1672_v34 = vpack.c.bf16 %v1658_v33, %v1655_v27 }
 0x861   : > { %3565 = vmatprep.mubr.msk.bf16.mxu0 %vm668_vm0, %v1672_v34 }
 0x862   : > { %3566 = vmatmul.mubr.msk.bf16.gmra.mrb[28].mxu0 %vm668_vm0, %v1673_v32 }
 0x92d   : > { %v3563_v35 = vpop.f32.mrb[24].mxu0 }
 0x92e   : > { %v1761_v37 = vadd.f32 %v3563_v35, %v3900_v1  ;;  %v1728_v20 = vpop.f32.mrb[25].mxu0 }
 0x92f   : > { %v1759_v40 = vadd.f32 %v1728_v20, %v3898_v0  ;;  %v3564_v41 = vpop.f32.mrb[26].mxu0 }
 0x930   : > { %v4154_v42 = vadd.f32 %v3324_v36, %v1761_v37  ;;  %v1731_v43 = vpop.f32.mrb[27].mxu0  ;;  %v1762_v46 = vadd.f32 %v3564_v41, %v3908_v5 }
 0x931   : > { %v4156_v44 = vadd.f32 %v3324_v36, %v1759_v40  ;;  %v1760_v1 = vadd.f32 %v1731_v43, %v3902_v2 }
 0x932   : > { %5362 = vst [vmem:[#allocation2_spill] sm:$0xff] %v4154_v42  ;;  %v1790_v47 = vsel %vm668_vm0, %v4154_v42, 0.0  ;;  %v4161_v51 = vadd.f32 %v3324_v36, %v1762_v46 }
 0x933   : > { %5363 = vst [vmem:[#allocation3_spill] sm:$0xff] %v4156_v44  ;;  %1791 = vadd.xlane.f32.xlu1 %v1790_v47  ;;  %v1784_v52 = vsel %vm668_vm0, %v4156_v44, 0.0  ;;  %v4169_v16 = vadd.f32 %v3324_v36, %v1760_v1  ;;  %v3642_v1 = vld [vmem:[%s5297_s12] sm:$0xff]  }
 0x934   : > { %5364 = vst [vmem:[#allocation4_spill] sm:$0xff] %v4161_v51  ;;  %v1793_v23 = vsel %vm668_vm0, %v4161_v51, 0.0  ;;  %3569 = vmatprep.subr.bf16.mxu1 %v3642_v1 }
 0x935   : > { %v3567_v50 = vpop.f32.mrb[28].mxu0  ;;  %5366 = vst [vmem:[#allocation6_spill] sm:$0xff] %v4169_v16  ;;  %v1787_v45 = vsel %vm668_vm0, %v4169_v16, 0.0  ;;  %3570 = vmatpush3.bf16.msra.mxu1 %v3642_v1 }
 0x936   : > { %v1765_v28 = vadd.f32 %v3567_v50, %v3922_v12  ;;  %v1744_v0 = vpop.f32.mrb[29].mxu0 }
 0x937   : > { %1785 = vadd.xlane.f32.xlu1 %v1784_v52  ;;  %v3568_v21 = vpop.f32.mrb[30].mxu0  ;;  %v1763_v17 = vadd.f32 %v1744_v0, %v3912_v7 }
 0x938   : > { %v4167_v14 = vadd.f32 %v3324_v36, %v1765_v28  ;;  %v1747_v5 = vpop.f32.mrb[31].mxu0  ;;  %v1766_v24 = vadd.f32 %v3568_v21, %v3924_v13 }
 0x939   : > { %v4176_v12 = vadd.f32 %v3324_v36, %v1763_v17  ;;  %v1764_v22 = vadd.f32 %v1747_v5, %v3916_v9 }
 0x93a   : > { %5365 = vst [vmem:[#allocation5_spill] sm:$0xff] %v4167_v14  ;;  %v1802_v2 = vsel %vm668_vm0, %v4167_v14, 0.0  ;;  %v4186_v26 = vadd.f32 %v3324_v36, %v1766_v24 }
 0x93b   : > { %1794 = vadd.xlane.f32.xlu1 %v1793_v23  ;;  %1803 = vadd.xlane.f32.xlu0 %v1802_v2  ;;  %5367 = vst [vmem:[#allocation7_spill] sm:$0xff] %v4176_v12  ;;  %v4182_v25 = vadd.f32 %v3324_v36, %v1764_v22  ;;  %v1796_v7 = vsel %vm668_vm0, %v4176_v12, 0.0 }
 0x93c   : > { %5369 = vst [vmem:[#allocation9_spill] sm:$0xff] %v4186_v26  ;;  %v1805_v9 = vsel %vm668_vm0, %v4186_v26, 0.0 }
 0x93d   : > { %5368 = vst [vmem:[#allocation8_spill] sm:$0xff] %v4182_v25  ;;  %v1799_v30 = vsel %vm668_vm0, %v4182_v25, 0.0 }
 0x93f   : > { %1788 = vadd.xlane.f32.xlu1 %v1787_v45 }
 0x943   : > { %1797 = vadd.xlane.f32.xlu1 %v1796_v7 }
 0x947   : > { %1800 = vadd.xlane.f32.xlu1 %v1799_v30 }
 0x94b   : > { %1806 = vadd.xlane.f32.xlu1 %v1805_v9 }
 0x9c0   : > { %v1792_v53 = vpop.xlane.xlu1 %1791 }
 0x9c1   : > { %v1810_v54 = vmul.f32 0.0625, %v1792_v53 }
 0x9c3   : > { %v4193_v13 = vsub.f32 %v4154_v42, %v1810_v54 }
 0x9c4   : > { %v1786_v55 = vpop.xlane.xlu1 %1785 }
 0x9c5   : > { %v1808_v56 = vmul.f32 0.0625, %v1786_v55  ;;  %v1826_v29 = vmul.f32 %v4193_v13, %v4193_v13 }
 0x9c7   : > { %v4198_v58 = vsub.f32 %v4156_v44, %v1808_v56  ;;  %v1838_v59 = vsel %vm668_vm0, %v1826_v29, 0.0 }
 0x9c8   : > { %1839 = vadd.xlane.f32.xlu1 %v1838_v59  ;;  %v1795_v38 = vpop.xlane.xlu1 %1794  ;;  %v1804_v6 = vpop.xlane.xlu0 %1803 }
 0x9c9   : > { %v1811_v60 = vmul.f32 0.0625, %v1795_v38  ;;  %v1824_v61 = vmul.f32 %v4198_v58, %v4198_v58  ;;  %v1814_v15 = vmul.f32 0.0625, %v1804_v6  ;;  %v3325_v6 = vld [vmem:[%s5295_s10] ss:$0 sm:$0xff] }
 0x9cb   : > { %v4204_v39 = vsub.f32 %v4161_v51, %v1811_v60  ;;  %v1832_v62 = vsel %vm668_vm0, %v1824_v61, 0.0  ;;  %v4222_v33 = vsub.f32 %v4167_v14, %v1814_v15 }
 0x9cc   : > { %1833 = vadd.xlane.f32.xlu1 %v1832_v62  ;;  %v1789_v48 = vpop.xlane.xlu1 %1788 }
 0x9cd   : > { %v1809_v63 = vmul.f32 0.0625, %v1789_v48  ;;  %v1827_v3 = vmul.f32 %v4204_v39, %v4204_v39  ;;  %v1830_v43 = vmul.f32 %v4222_v33, %v4222_v33 }
 0x9cf   : > { %v4210_v49 = vsub.f32 %v4169_v16, %v1809_v63  ;;  %v1841_v4 = vsel %vm668_vm0, %v1827_v3, 0.0  ;;  %v1850_v47 = vsel %vm668_vm0, %v1830_v43, 0.0 }
 0x9d0   : > { %1842 = vadd.xlane.f32.xlu1 %v1841_v4  ;;  %v1798_v8 = vpop.xlane.xlu1 %1797 }
 0x9d1   : > { %v1812_v10 = vmul.f32 0.0625, %v1798_v8  ;;  %v1825_v11 = vmul.f32 %v4210_v49, %v4210_v49 }
 0x9d3   : > { %v4216_v18 = vsub.f32 %v4176_v12, %v1812_v10  ;;  %v1835_v19 = vsel %vm668_vm0, %v1825_v11, 0.0  ;;  %v4475_v12 = vld [vmem:[%s5299_s14 + $0xc] ss:$0 sm:$0xff] }
 0x9d4   : > { %1836 = vadd.xlane.f32.xlu1 %v1835_v19  ;;  %v1801_v27 = vpop.xlane.xlu1 %1800 }
 0x9d5   : > { %v1813_v31 = vmul.f32 0.0625, %v1801_v27  ;;  %v1828_v32 = vmul.f32 %v4216_v18, %v4216_v18 }
 0x9d7   : > { %v4225_v34 = vsub.f32 %v4182_v25, %v1813_v31  ;;  %v1844_v35 = vsel %vm668_vm0, %v1828_v32, 0.0 }
 0x9d8   : > { %1845 = vadd.xlane.f32.xlu1 %v1844_v35  ;;  %v1807_v36 = vpop.xlane.xlu1 %1806 }
 0x9d9   : > { %v1815_v37 = vmul.f32 0.0625, %v1807_v36  ;;  %v1829_v20 = vmul.f32 %v4225_v34, %v4225_v34 }
 0x9db   : > { %v4231_v40 = vsub.f32 %v4186_v26, %v1815_v37  ;;  %v1847_v41 = vsel %vm668_vm0, %v1829_v20, 0.0  ;;  %v4470_v26 = vld [vmem:[%s5299_s14 + $0x3] ss:$0 sm:$0xff] }
 0x9dc   : > { %1848 = vadd.xlane.f32.xlu1 %v1847_v41 }
 0x9dd   : > { %v1831_v46 = vmul.f32 %v4231_v40, %v4231_v40 }
 0x9df   : > { %v1853_v50 = vsel %vm668_vm0, %v1831_v46, 0.0 }
 0x9e0   : > { %1851 = vadd.xlane.f32.xlu1 %v1850_v47  ;;  %1854 = vadd.xlane.f32.xlu0 %v1853_v50 }
 0xa55   : > { %v1840_v28 = vpop.xlane.xlu1 %1839 }
 0xa56   : > { %v1858_v0 = vmul.f32 0.0625, %v1840_v28 }
 0xa58   : > { %v1866_v17 = vadd.f32 1e-05, %v1858_v0 }
 0xa59   : > { %v1834_v52 = vpop.xlane.xlu1 %1833 }
 0xa5a   : > { %v1856_v21 = vmul.f32 0.0625, %v1834_v52 }
 0xa5c   : > { %v1864_v5 = vadd.f32 1e-05, %v1856_v21 }
 0xa5d   : > { %v1843_v23 = vpop.xlane.xlu1 %1842 }
 0xa5e   : > { %v1859_v2 = vmul.f32 0.0625, %v1843_v23  ;;  %3697 = vrsqrt.f32 %v1864_v5 }
 0xa5f   : > { %3699 = vrsqrt.f32 %v1866_v17 }
 0xa60   : > { %v1867_v22 = vadd.f32 1e-05, %v1859_v2 }
 0xa61   : > { %v1837_v45 = vpop.xlane.xlu1 %1836 }
 0xa62   : > { %3701 = vrsqrt.f32 %v1867_v22  ;;  %v1857_v24 = vmul.f32 0.0625, %v1837_v45  ;;  %v3643_v45 = vld [vmem:[%s5301_s16 + $0x8] sm:$0xff]  }
 0xa63   : > { %3579 = vmatprep.subr.bf16.mxu0 %v3643_v45 }
 0xa64   : > { %v1865_v7 = vadd.f32 1e-05, %v1857_v24  ;;  %3580 = vmatpush3.bf16.msra.mxu0 %v3643_v45 }
 0xa65   : > { %v1846_v30 = vpop.xlane.xlu1 %1845 }
 0xa66   : > { %3703 = vrsqrt.f32 %v1865_v7  ;;  %v1860_v9 = vmul.f32 0.0625, %v1846_v30 }
 0xa68   : > { %v1868_v53 = vadd.f32 1e-05, %v1860_v9  ;;  %v3698_v55 = vpop.eup %3697 }
 0xa69   : > { %v1849_v54 = vpop.xlane.xlu1 %1848  ;;  %v3700_v29 = vpop.eup %3699  ;;  %v1880_v60 = vmul.f32 %v3698_v55, %v4198_v58 }
 0xa6a   : > { %3705 = vrsqrt.f32 %v1868_v53  ;;  %v1861_v56 = vmul.f32 0.0625, %v1849_v54  ;;  %v1882_v63 = vmul.f32 %v3700_v29, %v4193_v13  ;;  %v3326_v13 = vld [vmem:[%s5296_s11] ss:$0 sm:$0xff] }
 0xa6b   : > { %v1894_v58 = vmul.f32 %v3325_v6, %v1880_v60 }
 0xa6c   : > { %v3702_v59 = vpop.eup %3701  ;;  %v1869_v38 = vadd.f32 1e-05, %v1861_v56  ;;  %v1896_v27 = vmul.f32 %v3325_v6, %v1882_v63 }
 0xa6d   : > { %v1883_v61 = vmul.f32 %v3702_v59, %v4204_v39  ;;  %v1855_v62 = vpop.xlane.xlu0 %1854  ;;  %v1852_v48 = vpop.xlane.xlu1 %1851  ;;  %v1908_v36 = vadd.f32 %v3326_v13, %v1894_v58 }
 0xa6e   : > { %3707 = vrsqrt.f32 %v1869_v38  ;;  %v1863_v3 = vmul.f32 0.0625, %v1855_v62  ;;  %v1862_v4 = vmul.f32 0.0625, %v1852_v48  ;;  %v1910_v20 = vadd.f32 %v3326_v13, %v1896_v27  ;;  %v4287_v27 = vld [vmem:[%s5299_s14 + $0x1] ss:$0 sm:$0xff] }
 0xa6f   : > { %v1897_v10 = vmul.f32 %v3325_v6, %v1883_v61 }
 0xa70   : > { %v3704_v8 = vpop.eup %3703  ;;  %v1871_v11 = vadd.f32 1e-05, %v1863_v3  ;;  %v1870_v15 = vadd.f32 1e-05, %v1862_v4 }
 0xa71   : > { %v1881_v19 = vmul.f32 %v3704_v8, %v4210_v49  ;;  %v1911_v32 = vadd.f32 %v3326_v13, %v1897_v10  ;;  %v4277_v8 = vld [vmem:[%s5299_s14] ss:$0 sm:$0xff]  ;;  %v4282_v10 = vld [vmem:[%s5299_s14 + $0x9] ss:$0 sm:$0xff] }
 0xa72   : > { %3709 = vrsqrt.f32 %v1871_v11 }
 0xa73   : > { %3711 = vrsqrt.f32 %v1870_v15  ;;  %v1895_v39 = vmul.f32 %v3325_v6, %v1881_v19  ;;  %v1917_v46 = vpack.c.bf16 %v1911_v32, %v1910_v20 }
 0xa74   : > { %v3706_v31 = vpop.eup %3705 }
 0xa75   : > { %v1884_v35 = vmul.f32 %v3706_v31, %v4216_v18  ;;  %v1909_v37 = vadd.f32 %v3326_v13, %v1895_v39  ;;  %v4292_v39 = vld [vmem:[%s5299_s14 + $0xa] ss:$0 sm:$0xff] }
 0xa76   : > { %v2270_v20 = vmul.f32 0.0, %v4292_v39 }
 0xa77   : > { %v1916_v41 = vpack.c.bf16 %v1909_v37, %v1908_v36  ;;  %v1898_v47 = vmul.f32 %v3325_v6, %v1884_v35  ;;  %v2249_v37 = vmul.f32 0.0, %v4287_v27 }
 0xa78   : > { %v3708_v43 = vpop.eup %3707 }
 0xa79   : > { %v1885_v49 = vmul.f32 %v3708_v43, %v4225_v34  ;;  %3571 = vmatprep.mubr.msk.bf16.mxu1 %vm668_vm0, %v1916_v41  ;;  %v1912_v52 = vadd.f32 %v3326_v13, %v1898_v47 }
 0xa7a   : > { %3572 = vmatmul.mubr.msk.bf16.vlgmr.msra.gmra.mrb[24].mxu1 %vm668_vm0, %v1917_v46 }
 0xa7b   : > { %v1899_v50 = vmul.f32 %v3325_v6, %v1885_v49 }
 0xa7c   : > { %v3710_v1 = vpop.eup %3709 }
 0xa7d   : > { %v3712_v28 = vpop.eup %3711  ;;  %v1887_v0 = vmul.f32 %v3710_v1, %v4231_v40  ;;  %v1913_v18 = vadd.f32 %v3326_v13, %v1899_v50  ;;  %v2012_v40 = vlaneseq }
 0xa7e   : > { %v1886_v21 = vmul.f32 %v3712_v28, %v4222_v33  ;;  %v4267_v33 = vld [vmem:[%s5301_s16] sm:$0xff]  }
 0xa7f   : > { %v1918_v5 = vpack.c.bf16 %v1913_v18, %v1912_v52  ;;  %v1901_v17 = vmul.f32 %v3325_v6, %v1887_v0  ;;  %5370 = vst [vmem:[#allocation10_spill] sm:$0xff] %v4267_v33  ;;  %3589 = vmatprep.subr.bf16.mxu0 %v4267_v33  ;;  %v2013_v24 = vshrl.u32 %v2012_v40, 7 }
 0xa80   : > { %v1900_v23 = vmul.f32 %v3325_v6, %v1886_v21 }
 0xa81   : > { %3575 = vmatprep.mubr.msk.bf16.mxu1 %vm668_vm0, %v1918_v5  ;;  %v1915_v34 = vadd.f32 %v3326_v13, %v1901_v17  ;;  %v2025_v7 = vand.u32 7, %v2013_v24  ;;  %v2014_v30 = vadd.s32 8, %v2013_v24  ;;  %v2015_v54 = vadd.s32 16, %v2013_v24 }
 0xa82   : > { %v1914_v2 = vadd.f32 %v3326_v13, %v1900_v23  ;;  %v2016_v55 = vadd.s32 24, %v2013_v24  ;;  %v2020_v56 = vadd.s32 56, %v2013_v24  ;;  %v2017_v60 = vadd.s32 32, %v2013_v24  ;;  %v4319_v23 = vld [vmem:[%s5298_s13] ss:$0 sm:$0xff] }
 0xa83   : > { %v2146_v9 = vadd.s32 4294967295, %v2025_v7  ;;  %v2032_v53 = vand.u32 7, %v2014_v30  ;;  %v2312_v38 = vadd.s32 1, %v2025_v7  ;;  %v2039_v61 = vand.u32 7, %v2015_v54  ;;  %v4349_v54 = vld [vmem:[%s5299_s14 + $0x10] ss:$0 sm:$0xff] }
 0xa84   : > { %v1919_v22 = vpack.c.bf16 %v1915_v34, %v1914_v2  ;;  %v2018_v62 = vadd.s32 40, %v2013_v24  ;;  %v2019_v48 = vadd.s32 48, %v2013_v24  ;;  %v2046_v63 = vand.u32 7, %v2016_v55 }
 0xa85   : > { %vm2154_vm3 = vcmp.ge.s32.totalorder %v2146_v9, 0  ;;  %v2147_v29 = vadd.s32 4294967295, %v2032_v53  ;;  %v2313_v4 = vadd.s32 1, %v2032_v53  ;;  %v2074_v6 = vand.u32 7, %v2020_v56  ;;  %v4344_v53 = vld [vmem:[%s5299_s14 + $0x7] ss:$0 sm:$0xff] }
 0xa86   : > { %3576 = vmatmul.mubr.msk.bf16.gmra.mrb[28].mxu1 %vm668_vm0, %v1919_v22  ;;  %v4271_v59 = vsel %vm2154_vm3, 1.0, %v3769_v57  ;;  %vm2328_vm5 = vcmp.lt.s32.totalorder %v2312_v38, 8  ;;  %v2053_v11 = vand.u32 7, %v2017_v60  ;;  %v2148_v15 = vadd.s32 4294967295, %v2039_v61  ;;  %5375 = vst [vmem:[#allocation15_spill] sm:$0xff] %v4344_v53 }
 0xa87   : > { %5371 = vst [vmem:[#allocation11_spill] sm:$0xff] %v4271_v59  ;;  %v2194_v3 = vmul.f32 0.0, %v4271_v59  ;;  %vm2155_vm4 = vcmp.ge.s32.totalorder %v2147_v29, 0  ;;  %v2060_v19 = vand.u32 7, %v2018_v62  ;;  %v2067_v58 = vand.u32 7, %v2019_v48 }
 0xa88   : > { %v2149_v13 = vadd.s32 4294967295, %v2046_v63  ;;  %v4295_v31 = vsel %vm2155_vm4, 1.0, %v3769_v57  ;;  %vm2329_vm6 = vcmp.lt.s32.totalorder %v2313_v4, 8  ;;  %v2319_v35 = vadd.s32 1, %v2074_v6  ;;  %v4358_v56 = vld [vmem:[%s5299_s14 + $0x4] ss:$0 sm:$0xff] }
 0xa89   : > { %5372 = vst [vmem:[#allocation12_spill] sm:$0xff] %v4295_v31  ;;  %v2207_v32 = vmul.f32 %v4277_v8, %v2194_v3  ;;  %v2228_v36 = vmul.f32 %v4282_v10, %v2194_v3  ;;  %v4303_v41 = vsel %vm2328_vm5, 1.0, %v3769_v57  ;;  %v2150_v43 = vadd.s32 4294967295, %v2053_v11 }
 0xa8a   : > { %vm2156_vm8 = vcmp.ge.s32.totalorder %v2148_v15, 0  ;;  %v2151_v46 = vadd.s32 4294967295, %v2060_v19  ;;  %v2152_v49 = vadd.s32 4294967295, %v2067_v58  ;;  %vm2157_vm10 = vcmp.ge.s32.totalorder %v2149_v13, 0 }
 0xa8b   : > { %v2153_v47 = vadd.s32 4294967295, %v2074_v6  ;;  %v2317_v50 = vadd.s32 1, %v2060_v19  ;;  %v2318_v1 = vadd.s32 1, %v2067_v58  ;;  %vm2335_vm11 = vcmp.lt.s32.totalorder %v2319_v35, 8 }
 0xa8c   : > { %v2314_v28 = vadd.s32 1, %v2039_v61  ;;  %v2315_v0 = vadd.s32 1, %v2046_v63  ;;  %v2316_v52 = vadd.s32 1, %v2053_v11  ;;  %v4305_v18 = vadd.f32 %v2249_v37, %v2207_v32  ;;  %v4380_v63 = vld [vmem:[%s5299_s14 + $0x11] ss:$0 sm:$0xff] }
 0xa8d   : > { %v4307_v21 = vadd.f32 %v2270_v20, %v2228_v36  ;;  %v4311_v5 = vsel %vm2329_vm6, 1.0, %v3769_v57  ;;  %v4314_v17 = vsel %vm2156_vm8, 1.0, %v3769_v57  ;;  %vm2158_vm12 = vcmp.ge.s32.totalorder %v2150_v43, 0  ;;  %v4397_v11 = vld [vmem:[%s5299_s14 + $0xd] ss:$0 sm:$0xff] }
 0xa8e   : > { %v4322_v34 = vsel %vm2157_vm10, 1.0, %v3769_v57  ;;  %vm2159_vm13 = vcmp.ge.s32.totalorder %v2151_v46, 0  ;;  %vm2160_vm14 = vcmp.ge.s32.totalorder %v2152_v49, 0  ;;  %vm2161_vm15 = vcmp.ge.s32.totalorder %v2153_v47, 0  ;;  %v4433_v49 = vld [vmem:[%s5299_s14 + $0x2] ss:$0 sm:$0xff] }
 0xa8f   : > { %vm2333_vm1 = vcmp.lt.s32.totalorder %v2317_v50, 8  ;;  %vm2334_vm2 = vcmp.lt.s32.totalorder %v2318_v1, 8  ;;  %v4326_v22 = vsel %vm2335_vm11, 1.0, %v3769_v57  ;;  %vm2330_vm3 = vcmp.lt.s32.totalorder %v2314_v28, 8  ;;  %v4438_v47 = vld [vmem:[%s5299_s14 + $0xb] ss:$0 sm:$0xff] }
 0xa90   : > { %v4329_v40 = vmul.f32 0.0, %v4326_v22  ;;  %vm2331_vm4 = vcmp.lt.s32.totalorder %v2315_v0, 8  ;;  %vm2332_vm5 = vcmp.lt.s32.totalorder %v2316_v52, 8  ;;  %v4339_v9 = vsel %vm2158_vm12, 1.0, %v3769_v57 }
 0xa91   : > { %5374 = vst [vmem:[#allocation14_spill] sm:$0xff] %v4339_v9  ;;  %v4353_v55 = vsel %vm2159_vm13, 1.0, %v3769_v57  ;;  %v4362_v38 = vsel %vm2160_vm14, 1.0, %v3769_v57  ;;  %v4366_v60 = vsel %vm2161_vm15, 1.0, %v3769_v57  ;;  %v4370_v61 = vsel %vm2333_vm1, 1.0, %v3769_v57 }
 0xa92   : > { %5373 = vst [vmem:[#allocation13_spill] sm:$0xff] %v4329_v40  ;;  %5376 = vst [vmem:[#allocation16_spill] sm:$0xff] %v4362_v38  ;;  %v4374_v62 = vsel %vm2334_vm2, 1.0, %v3769_v57  ;;  %v4384_v3 = vsel %vm2330_vm3, 1.0, %v3769_v57  ;;  %v4388_v4 = vsel %vm2331_vm4, 1.0, %v3769_v57  ;;  %v4392_v6 = vsel %vm2332_vm5, 1.0, %v3769_v57 }
 0xa93   : > { %5377 = vst [vmem:[#allocation17_spill] sm:$0xff] %v4392_v6  ;;  %v4401_v19 = vmul.f32 0.0, %v4349_v54  ;;  %v4405_v58 = vmul.f32 %v4380_v63, %v4329_v40  ;;  %v4408_v13 = vmul.f32 0.0, %v4344_v53 }
 0xa95   : > { %5378 = vst [vmem:[#allocation18_spill] sm:$0xff] %v4401_v19  ;;  %5379 = vst [vmem:[#allocation19_spill] sm:$0xff] %v4405_v58 }
 0xa96   : > { %5380 = vst [vmem:[#allocation20_spill] sm:$0xff] %v4408_v13 }
 0xb4d   : > { %v3573_v2 = vpop.f32.mrb[24].mxu1 }
 0xb4e   : > { %v1981_v45 = vpop.f32.mrb[25].mxu1  ;;  %v4332_v24 = vadd.f32 %v3573_v2, %v4319_v23 }
 0xb4f   : > { %v4335_v7 = vadd.f32 %v4319_v23, %v1981_v45  ;;  %v3574_v30 = vpop.f32.mrb[26].mxu1 }
 0xb50   : > { %v1984_v29 = vpop.f32.mrb[27].mxu1  ;;  %v5314_v57 = vrot.slane %v4332_v24, 7  ;;  %v4413_v32 = vmul.f32 %v4287_v27, %v4332_v24  ;;  %v4419_v36 = vadd.f32 %v3574_v30, %v4319_v23  ;;  %v4423_v37 = vmul.f32 %v4292_v39, %v4332_v24 }
 0xb51   : > { %v5309_v48 = vrot.slane %v4335_v7, 7  ;;  %v5308_v15 = vrot.slane %v4335_v7, 1  ;;  %v4442_v50 = vmul.f32 %v4358_v56, %v4332_v24  ;;  %v4446_v1 = vmul.f32 %v4397_v11, %v4332_v24 }
 0xb52   : > { %v5313_v0 = vrot.slane %v4419_v36, 7  ;;  %v2250_v52 = vmul.f32 %v4287_v27, %v4335_v7  ;;  %v2271_v2 = vmul.f32 %v4292_v39, %v4335_v7  ;;  %v2468_v45 = vmul.f32 %v4358_v56, %v4335_v7 }
 0xb53   : > { %v2145_v35 = vsel %vm2124_vm7, 0.0, %v5309_v48  ;;  %v2311_v46 = vsel %vm2287_vm9, 0.0, %v5308_v15  ;;  %5381 = vst [vmem:[#allocation21_spill] sm:$0xff] %v4446_v1  ;;  %v2489_v30 = vmul.f32 %v4397_v11, %v4335_v7  ;;  %v2253_v14 = vmul.f32 %v4287_v27, %v4419_v36 }
 0xb54   : > { %v2195_v43 = vmul.f32 %v4295_v31, %v2145_v35  ;;  %v2360_v28 = vmul.f32 %v4303_v41, %v2311_v46  ;;  %v2413_v46 = vmul.f32 %v4271_v59, %v2145_v35  ;;  %v2131_v48 = vsel %vm2124_vm7, %v5314_v57, %v5313_v0 }
 0xb55   : > { %v2198_v35 = vmul.f32 %v4339_v9, %v2131_v48  ;;  %v4483_v0 = vmul.f32 %v4349_v54, %v4332_v24  ;;  %v2416_v16 = vmul.f32 %v4322_v34, %v2131_v48  ;;  %v4491_v44 = vmul.f32 %v4344_v53, %v4332_v24 }
 0xb56   : > { %v2373_v20 = vmul.f32 %v4433_v49, %v2360_v28  ;;  %v2394_v15 = vmul.f32 %v4438_v47, %v2360_v28  ;;  %v2208_v25 = vmul.f32 %v4277_v8, %v2195_v43  ;;  %v4479_v28 = vadd.f32 %v4319_v23, %v1984_v29 }
 0xb57   : > { %5382 = vst [vmem:[#allocation22_spill] sm:$0xff] %v4483_v0  ;;  %v2229_v57 = vmul.f32 %v4282_v10, %v2195_v43  ;;  %5383 = vst [vmem:[#allocation23_spill] sm:$0xff] %v4491_v44  ;;  %v2211_v29 = vmul.f32 %v4277_v8, %v2198_v35  ;;  %v2232_v13 = vmul.f32 %v4282_v10, %v2198_v35 }
 0xb58   : > { %v2381_v42 = vadd.f32 %v2373_v20, %v4305_v18  ;;  %v2274_v40 = vmul.f32 %v4292_v39, %v4419_v36  ;;  %v2402_v33 = vadd.f32 %v2394_v15, %v4307_v21  ;;  %v2426_v58 = vmul.f32 %v4470_v26, %v2413_v46 }
 0xb59   : > { %v3577_v51 = vpop.f32.mrb[28].mxu1  ;;  %v2447_v19 = vmul.f32 %v4475_v12, %v2413_v46  ;;  %v4502_v44 = vadd.f32 %v2250_v52, %v2208_v25  ;;  %v4504_v18 = vadd.f32 %v2253_v14, %v2211_v29  ;;  %v2126_v35 = vrot.slane %v4479_v28, 7 }
 0xb5a   : > { %v1997_v43 = vpop.f32.mrb[29].mxu1  ;;  %v4506_v20 = vadd.f32 %v2274_v40, %v2232_v13  ;;  %v4509_v1 = vadd.f32 %v2271_v2, %v2229_v57  ;;  %v4512_v21 = vmul.f32 %v4470_v26, %v2416_v16  ;;  %v4516_v15 = vmul.f32 %v4358_v56, %v4419_v36 }
 0xb5b   : > { %v3578_v0 = vpop.f32.mrb[30].mxu1  ;;  %5384 = vst [vmem:[#allocation24_spill] sm:$0xff] %v4502_v44  ;;  %5385 = vst [vmem:[#allocation25_spill] sm:$0xff] %v4504_v18  ;;  %v4520_v25 = vmul.f32 %v4397_v11, %v4419_v36  ;;  %v2434_v14 = vadd.f32 %v2426_v58, %v2381_v42  ;;  %v4523_v40 = vmul.f32 %v4475_v12, %v2416_v16  ;;  %v5387_v13 = vrot.slane %v4335_v7, 7 }
 0xb5c   : > { %5386 = vst [vmem:[#allocation26_spill] sm:$0xff] %v4506_v20  ;;  %v2000_v59 = vpop.f32.mrb[31].mxu1  ;;  %v5324_v52 = vrot.slane %v4479_v28, 1  ;;  %v2455_v2 = vadd.f32 %v2447_v19, %v2402_v33  ;;  %v4532_v46 = vmul.f32 %v4314_v17, %v2131_v48  ;;  %v4537_v6 = vadd.f32 %v4319_v23, %v1997_v43 }
 0xb5d   : > { %v4528_v57 = vsel %vm2124_vm7, %v5387_v13, %v2126_v35  ;;  %v4541_v42 = vmul.f32 %v4344_v53, %v4419_v36  ;;  %v2251_v16 = vmul.f32 %v4287_v27, %v4479_v28  ;;  %v5391_v58 = vrot.slane %v4332_v24, 7 }
 0xb5e   : > { %5388 = vst [vmem:[#allocation27_spill] sm:$0xff] %v4528_v57  ;;  %5389 = vst [vmem:[#allocation28_spill] sm:$0xff] %v4532_v46  ;;  %v2196_v29 = vmul.f32 %v4314_v17, %v4528_v57  ;;  %v5392_v48 = vrot.slane %v4335_v7, 1  ;;  %v2272_v18 = vmul.f32 %v4292_v39, %v4479_v28  ;;  %v4564_v44 = vadd.f32 %v2468_v45, %v2434_v14 }
 0xb5f   : > { %5390 = vst [vmem:[#allocation29_spill] sm:$0xff] %v4541_v42  ;;  %v4548_v33 = vsel %vm2124_vm7, %v2126_v35, %v5391_v58  ;;  %v4562_v42 = vadd.f32 %v3577_v51, %v4319_v23  ;;  %v4568_v35 = vmul.f32 %v4349_v54, %v4419_v36  ;;  %v2132_v7 = vrot.slane %v4537_v6, 7 }
 0xb60   : > { %v4555_v19 = vsel %vm2287_vm9, %v5392_v48, %v5324_v52  ;;  %v2209_v43 = vmul.f32 %v4277_v8, %v2196_v29  ;;  %v2230_v13 = vmul.f32 %v4282_v10, %v2196_v29  ;;  %5394 = vst [vmem:[#allocation31_spill] sm:$0xff] %v4564_v44  ;;  %v4572_v58 = vadd.f32 %v3578_v0, %v4319_v23 }
 0xb61   : > { %5393 = vst [vmem:[#allocation30_spill] sm:$0xff] %v4562_v42  ;;  %5395 = vst [vmem:[#allocation32_spill] sm:$0xff] %v4568_v35  ;;  %v4574_v48 = vadd.f32 %v2489_v30, %v2455_v2  ;;  %v2295_v51 = vrot.slane %v4537_v6, 1  ;;  %v4583_v45 = vmul.f32 %v4295_v31, %v4528_v57  ;;  %v4587_v14 = vmul.f32 %v4358_v56, %v4479_v28 }
 0xb62   : > { %5396 = vst [vmem:[#allocation33_spill] sm:$0xff] %v4572_v58  ;;  %v4576_v29 = vadd.f32 %v2251_v16, %v2209_v43  ;;  %v4578_v52 = vadd.f32 %v2272_v18, %v2230_v13  ;;  %v4591_v0 = vmul.f32 %v4397_v11, %v4479_v28  ;;  %v5398_v30 = vrot.slane %v4419_v36, 7 }
 0xb63   : > { %5397 = vst [vmem:[#allocation34_spill] sm:$0xff] %v4587_v14  ;;  %v4598_v18 = vmul.f32 %v4287_v27, %v4562_v42  ;;  %v4602_v16 = vmul.f32 %v4292_v39, %v4562_v42  ;;  %v5401_v43 = vrot.slane %v4419_v36, 1  ;;  %v4610_v14 = vadd.f32 %v4319_v23, %v2000_v59 }
 0xb64   : > { %v2133_v2 = vsel %vm2124_vm7, %v5398_v30, %v2132_v7  ;;  %v4614_v44 = vmul.f32 %v4358_v56, %v4562_v42  ;;  %v4618_v30 = vmul.f32 %v4397_v11, %v4562_v42  ;;  %v4624_v20 = vmul.f32 %v4287_v27, %v4537_v6 }
 0xb65   : > { %5399 = vst [vmem:[#allocation35_spill] sm:$0xff] %v4598_v18  ;;  %5400 = vst [vmem:[#allocation36_spill] sm:$0xff] %v4602_v16  ;;  %v4607_v13 = vsel %vm2287_vm9, %v5401_v43, %v2295_v51  ;;  %v2301_v16 = vrot.slane %v4572_v58, 1  ;;  %v4628_v59 = vmul.f32 %v4292_v39, %v4537_v6  ;;  %v2410_v43 = vrot.slane %v4572_v58, 7 }
 0xb66   : > { %5402 = vst [vmem:[#allocation37_spill] sm:$0xff] %v4614_v44  ;;  %5403 = vst [vmem:[#allocation38_spill] sm:$0xff] %v4618_v30  ;;  %v4634_v44 = vmul.f32 %v4358_v56, %v4537_v6  ;;  %v2199_v18 = vmul.f32 %v4353_v55, %v2133_v2  ;;  %v5407_v30 = vrot.slane %v4562_v42, 1  ;;  %v4643_v46 = vmul.f32 %v4397_v11, %v4537_v6 }
 0xb67   : > { %5404 = vst [vmem:[#allocation39_spill] sm:$0xff] %v4624_v20  ;;  %5405 = vst [vmem:[#allocation40_spill] sm:$0xff] %v4628_v59  ;;  %v2506_v20 = vsel %vm2287_vm9, %v2301_v16, 0.0  ;;  %v4647_v23 = vmul.f32 %v4344_v53, %v4537_v6  ;;  %v4654_v57 = vmul.f32 %v4339_v9, %v2133_v2  ;;  %v4663_v53 = vmul.f32 %v4349_v54, %v4537_v6 }
 0xb68   : > { %5406 = vst [vmem:[#allocation41_spill] sm:$0xff] %v4634_v44  ;;  %v2302_v35 = vsel %vm2287_vm9, %v5407_v30, %v2301_v16  ;;  %5408 = vst [vmem:[#allocation42_spill] sm:$0xff] %v4643_v46  ;;  %v5410_v44 = vrot.slane %v4562_v42, 7  ;;  %v4657_v30 = vmul.f32 %v4322_v34, %v2133_v2  ;;  %v2558_v46 = vsel %vm2124_vm7, %v2410_v43, 0.0 }
 0xb69   : > { %5409 = vst [vmem:[#allocation43_spill] sm:$0xff] %v4647_v23  ;;  %v2367_v59 = vmul.f32 %v4326_v22, %v2302_v35  ;;  %5411 = vst [vmem:[#allocation44_spill] sm:$0xff] %v4654_v57  ;;  %v4666_v23 = vmul.f32 %v4374_v62, %v2302_v35  ;;  %v4669_v42 = vmul.f32 %v4326_v22, %v2506_v20 }
 0xb6a   : > { %v2411_v31 = vsel %vm2124_vm7, %v5410_v44, %v2410_v43  ;;  %5412 = vst [vmem:[#allocation45_spill] sm:$0xff] %v4657_v30  ;;  %v4675_v2 = vmul.f32 %v4277_v8, %v2199_v18  ;;  %v4678_v9 = vmul.f32 %v4282_v10, %v2199_v18  ;;  %v4682_v43 = vmul.f32 %v4358_v56, %v4572_v58 }
 0xb6b   : > { %v2420_v16 = vmul.f32 %v4366_v60, %v2411_v31  ;;  %5413 = vst [vmem:[#allocation46_spill] sm:$0xff] %v4666_v23  ;;  %5414 = vst [vmem:[#allocation47_spill] sm:$0xff] %v4669_v42  ;;  %v4672_v44 = vmul.f32 %v4362_v38, %v2411_v31  ;;  %v4686_v6 = vmul.f32 %v4397_v11, %v4572_v58 }
 0xb6c   : > { %5416 = vst [vmem:[#allocation49_spill] sm:$0xff] %v4675_v2  ;;  %5417 = vst [vmem:[#allocation50_spill] sm:$0xff] %v4682_v43  ;;  %v4689_v22 = vmul.f32 %v4433_v49, %v2367_v59  ;;  %v4692_v31 = vmul.f32 %v4366_v60, %v2558_v46  ;;  %v4696_v2 = vmul.f32 %v4349_v54, %v4572_v58  ;;  %v4711_v46 = vld [vmem:[%s5299_s14 + $0xe] ss:$0 sm:$0xff]  ;;  %v4716_v58 = vld [vmem:[%s5299_s14 + $0xf] ss:$0 sm:$0xff] }
 0xb6d   : > { %5415 = vst [vmem:[#allocation48_spill] sm:$0xff] %v4672_v44  ;;  %5418 = vst [vmem:[#allocation51_spill] sm:$0xff] %v4686_v6  ;;  %v2656_v18 = vmul.f32 %v4370_v61, %v2302_v35  ;;  %v4700_v57 = vmul.f32 %v4438_v47, %v2367_v59  ;;  %v4703_v43 = vmul.f32 %v4470_v26, %v2420_v16  ;;  %v5338_v35 = vrot.slane %v4610_v14, 7 }
 0xb6e   : > { %5419 = vst [vmem:[#allocation52_spill] sm:$0xff] %v4689_v22  ;;  %5420 = vst [vmem:[#allocation53_spill] sm:$0xff] %v4692_v31  ;;  %v4706_v6 = vmul.f32 %v4475_v12, %v2420_v16  ;;  %v4721_v59 = vmul.f32 %v4711_v46, %v4666_v23  ;;  %v4725_v16 = vmul.f32 %v4711_v46, %v4669_v42 }
 0xb6f   : > { %5421 = vst [vmem:[#allocation54_spill] sm:$0xff] %v4696_v2  ;;  %5422 = vst [vmem:[#allocation55_spill] sm:$0xff] %v4700_v57  ;;  %v4732_v22 = vmul.f32 %v4374_v62, %v2506_v20  ;;  %v4737_v2 = vld [vmem:[%s5299_s14 + $0x8] ss:$0 sm:$0xff]  ;;  %v4742_v23 = vsel %vm2124_vm7, %v2132_v7, %v5338_v35  ;;  %v2255_v42 = vmul.f32 %v4287_v27, %v4610_v14  ;;  %v5433_v35 = vrot.slane %v4332_v24, 1 }
 0xb70   : > { %5423 = vst [vmem:[#allocation56_spill] sm:$0xff] %v4703_v43  ;;  %5424 = vst [vmem:[#allocation57_spill] sm:$0xff] %v4706_v6  ;;  %v4729_v43 = vmul.f32 %v4716_v58, %v4672_v44  ;;  %v2276_v44 = vmul.f32 %v4292_v39, %v4610_v14  ;;  %v4751_v20 = vmul.f32 %v4716_v58, %v4692_v31  ;;  %v5434_v31 = vrot.slane %v4479_v28, 1 }
 0xb71   : > { %5425 = vst [vmem:[#allocation58_spill] sm:$0xff] %v4721_v59  ;;  %5426 = vst [vmem:[#allocation59_spill] sm:$0xff] %v4725_v16  ;;  %v4754_v16 = vmul.f32 %v4737_v2, %v2656_v18  ;;  %v4757_v59 = vmul.f32 %v4380_v63, %v2656_v18  ;;  %v2200_v7 = vmul.f32 %v4362_v38, %v4742_v23  ;;  %v5435_v18 = vrot.slane %v4419_v36, 1 }
 0xb72   : > { %5427 = vst [vmem:[#allocation60_spill] sm:$0xff] %v4729_v43  ;;  %5428 = vst [vmem:[#allocation61_spill] sm:$0xff] %v4732_v22  ;;  %v5342_v43 = vrot.slane %v4610_v14, 1  ;;  %v2197_v39 = vmul.f32 %v4322_v34, %v4548_v33 }
 0xb73   : > { %5429 = vst [vmem:[#allocation62_spill] sm:$0xff] %v4737_v2  ;;  %5430 = vst [vmem:[#allocation63_spill] sm:$0xff] %v4751_v20  ;;  %v5436_v20 = vmov %v5433_v35  ;;  %v2234_v34 = vmul.f32 %v4282_v10, %v2200_v7 }
 0xb74   : > { %5431 = vst [vmem:[#allocation64_spill] sm:$0xff] %v4754_v16  ;;  %5432 = vst [vmem:[#allocation65_spill] sm:$0xff] %v4757_v59  ;;  %v4764_v27 = vsel %vm2287_vm9, %v2295_v51, %v5342_v43  ;;  %v2292_v16 = vsel %vm2287_vm9, %v5434_v31, %v5433_v35  ;;  %v2294_v2 = vsel %vm2287_vm9, %v5436_v20, %v5435_v18 }
 0xb75   : > { %v4780_v59 = vmul.f32 %v4380_v63, %v4732_v22  ;;  %v2213_v51 = vmul.f32 %v4277_v8, %v2200_v7  ;;  %v4786_v43 = vmul.f32 %v4311_v5, %v4555_v19  ;;  %v2210_v31 = vmul.f32 %v4277_v8, %v2197_v39 }
 0xb76   : > { %v2231_v36 = vmul.f32 %v4282_v10, %v2197_v39  ;;  %v2362_v24 = vmul.f32 %v4384_v3, %v2292_v16  ;;  %v2363_v35 = vmul.f32 %v4388_v4, %v2294_v2  ;;  %v4794_v18 = vadd.f32 %v2276_v44, %v2234_v34 }
 0xb77   : > { %5437 = vst [vmem:[#allocation66_spill] sm:$0xff] %v4780_v59  ;;  %v4792_v20 = vadd.f32 %v2255_v42, %v2213_v51  ;;  %v2395_v22 = vmul.f32 %v4438_v47, %v4786_v43  ;;  %v2415_v7 = vmul.f32 %v4314_v17, %v4548_v33  ;;  %v2260_v59 = vadd.f32 %v4413_v32, %v2210_v31 }
 0xb78   : > { %v2281_v6 = vadd.f32 %v4423_v37, %v2231_v36  ;;  %v2375_v39 = vmul.f32 %v4433_v49, %v2362_v24  ;;  %v2376_v57 = vmul.f32 %v4433_v49, %v2363_v35  ;;  %v2396_v38 = vmul.f32 %v4438_v47, %v2362_v24  ;;  %v4815_v37 = vld [vmem:[%s5299_s14 + $0x5] ss:$0 sm:$0xff] }
 0xb79   : > { %5438 = vst [vmem:[#allocation67_spill] sm:$0xff] %v4792_v20  ;;  %v2397_v42 = vmul.f32 %v4438_v47, %v2363_v35  ;;  %v2403_v44 = vadd.f32 %v2395_v22, %v4509_v1  ;;  %v2428_v51 = vmul.f32 %v4470_v26, %v2415_v7  ;;  %v2448_v17 = vmul.f32 %v4475_v12, %v4583_v45 }
 0xb7a   : > { %v2383_v34 = vadd.f32 %v2375_v39, %v4576_v29  ;;  %v2384_v20 = vadd.f32 %v2376_v57, %v2260_v59  ;;  %v2449_v32 = vmul.f32 %v4475_v12, %v2415_v7  ;;  %v2404_v31 = vadd.f32 %v2396_v38, %v4578_v52 }
 0xb7b   : > { %v2405_v36 = vadd.f32 %v2397_v42, %v2281_v6  ;;  %v4820_v1 = vmul.f32 %v4303_v41, %v4555_v19  ;;  %v4823_v29 = vmul.f32 %v4311_v5, %v2292_v16  ;;  %v2456_v59 = vadd.f32 %v2448_v17, %v2403_v44 }
 0xb7c   : > { %v2436_v57 = vadd.f32 %v2428_v51, %v2383_v34  ;;  %v2437_v22 = vadd.f32 %v4512_v21, %v2384_v20  ;;  %v2509_v24 = vmul.f32 %v4384_v3, %v2294_v2  ;;  %v2457_v35 = vadd.f32 %v2449_v32, %v2404_v31  ;;  %v5443_v31 = vld [vmem:[#allocation27_spill] sm:$0xff] }
 0xb7d   : > { %v2458_v7 = vadd.f32 %v4523_v40, %v2405_v36  ;;  %v2510_v38 = vmul.f32 %v4388_v4, %v4607_v13  ;;  %v2541_v52 = vmul.f32 %v4711_v46, %v4820_v1  ;;  %v2498_v39 = vadd.f32 %v4591_v0, %v2456_v59  ;;  %v5440_v40 = vld [vmem:[#allocation21_spill] sm:$0xff]  ;;  %v5444_v36 = vld [vmem:[#allocation11_spill] sm:$0xff] }
 0xb7e   : > { %v2478_v19 = vadd.f32 %v4442_v50, %v2436_v57  ;;  %v4834_v6 = vadd.f32 %v4516_v15, %v2437_v22  ;;  %v2522_v21 = vmul.f32 %v4815_v37, %v2509_v24  ;;  %v4840_v20 = vmul.f32 %v4353_v55, %v4742_v23 }
 0xb7f   : > { %v2499_v42 = vadd.f32 %v5440_v40, %v2457_v35  ;;  %v2500_v44 = vadd.f32 %v4520_v25, %v2458_v7  ;;  %v2542_v51 = vmul.f32 %v4711_v46, %v4823_v29  ;;  %v2543_v50 = vmul.f32 %v4711_v46, %v2509_v24  ;;  %v5445_v25 = vld [vmem:[#allocation12_spill] sm:$0xff] }
 0xb80   : > { %5439 = vst [vmem:[#allocation68_spill] sm:$0xff] %v4840_v20  ;;  %v4846_v34 = vadd.f32 %v2522_v21, %v2478_v19  ;;  %v2544_v15 = vmul.f32 %v4711_v46, %v2510_v38  ;;  %v2549_v0 = vadd.f32 %v2541_v52, %v4574_v48  ;;  %v4853_v17 = vmul.f32 %v4370_v61, %v4764_v27 }
 0xb81   : > { %v2550_v32 = vadd.f32 %v2542_v51, %v2498_v39  ;;  %v4857_v57 = vmul.f32 %v5444_v36, %v5443_v31  ;;  %v4861_v22 = vmul.f32 %v5445_v25, %v4548_v33  ;;  %v2551_v59 = vadd.f32 %v2543_v50, %v2499_v42  ;;  %v5449_v51 = vld [vmem:[#allocation30_spill] sm:$0xff]  ;;  %v5452_v36 = vld [vmem:[#allocation40_spill] sm:$0xff] }
 0xb82   : > { %5441 = vst [vmem:[#allocation21_spill] sm:$0xff] %v4846_v34  ;;  %5442 = vst [vmem:[#allocation69_spill] sm:$0xff] %v4853_v17  ;;  %v4864_v24 = vmul.f32 %v4303_v41, %v2292_v16  ;;  %v4867_v35 = vmul.f32 %v4311_v5, %v2294_v2  ;;  %v4871_v48 = vmul.f32 %v4384_v3, %v4607_v13  ;;  %v5448_v2 = vld [vmem:[#allocation28_spill] sm:$0xff]  ;;  %v5450_v50 = vrot.slane %v5449_v51, 7 }
 0xb83   : > { %v2593_v7 = vmul.f32 %v4716_v58, %v4857_v57  ;;  %v2594_v52 = vmul.f32 %v4716_v58, %v4861_v22  ;;  %v4879_v33 = vmul.f32 %v4388_v4, %v4764_v27  ;;  %v2552_v19 = vadd.f32 %v2544_v15, %v2500_v44 }
 0xb84   : > { %5446 = vst [vmem:[#allocation27_spill] sm:$0xff] %v4871_v48  ;;  %v2635_v41 = vmul.f32 %v4349_v54, %v4479_v28  ;;  %v2685_v5 = vmul.f32 %v4380_v63, %v4864_v24  ;;  %v2595_v3 = vmul.f32 %v4716_v58, %v5448_v2  ;;  %v2596_v16 = vmul.f32 %v4716_v58, %v4657_v30 }
 0xb85   : > { %5447 = vst [vmem:[#allocation11_spill] sm:$0xff] %v4879_v33  ;;  %v2601_v39 = vadd.f32 %v2593_v7, %v2549_v0  ;;  %v2602_v21 = vadd.f32 %v2594_v52, %v2550_v32  ;;  %v2686_v40 = vmul.f32 %v4380_v63, %v4867_v35  ;;  %v2687_v4 = vmul.f32 %v4380_v63, %v4871_v48  ;;  %v5453_v0 = vld [vmem:[#allocation22_spill] sm:$0xff] }
 0xb86   : > { %v2603_v42 = vadd.f32 %v2595_v3, %v2551_v59  ;;  %v2604_v44 = vadd.f32 %v2596_v16, %v2552_v19  ;;  %v5451_v15 = vrot.slane %v4610_v14, 7  ;;  %v2283_v25 = vadd.f32 %v5452_v36, %v4678_v9  ;;  %v4913_v3 = vld [vmem:[%s5300_s15 + $0x1] ss:$0 sm:$0xff]  ;;  %v5456_v16 = vld [vmem:[#allocation32_spill] sm:$0xff] }
 0xb87   : > { %v2643_v34 = vadd.f32 %v2635_v41, %v2601_v39  ;;  %v2644_v32 = vadd.f32 %v5453_v0, %v2602_v21  ;;  %v2688_v7 = vmul.f32 %v4380_v63, %v4879_v33  ;;  %v5454_v52 = vrot.slane %v5449_v51, 1  ;;  %v5457_v21 = vld [vmem:[#allocation17_spill] sm:$0xff] }
 0xb88   : > { %v2137_v31 = vsel %vm2124_vm7, %v5451_v15, %v5450_v50  ;;  %v5455_v59 = vrot.slane %v4610_v14, 1  ;;  %v2645_v9 = vadd.f32 %v5456_v16, %v2603_v42  ;;  %v2646_v41 = vadd.f32 %v4663_v53, %v2604_v44 }
 0xb89   : > { %v2201_v39 = vmul.f32 %v4366_v60, %v2137_v31  ;;  %v4920_v50 = vmul.f32 %v5457_v21, %v4607_v13  ;;  %v4924_v15 = vmul.f32 %v4358_v56, %v4610_v14  ;;  %v2693_v36 = vadd.f32 %v2685_v5, %v2643_v34 }
 0xb8a   : > { %v4908_v19 = vsel %vm2287_vm9, %v5455_v59, %v5454_v52  ;;  %v2694_v0 = vadd.f32 %v2686_v40, %v2644_v32  ;;  %v2494_v42 = vmul.f32 %v4397_v11, %v4610_v14  ;;  %v4933_v53 = vmul.f32 %v4815_v37, %v2510_v38 }
 0xb8b   : > { %5458 = vst [vmem:[#allocation12_spill] sm:$0xff] %v4924_v15  ;;  %v4928_v52 = vmul.f32 %v4374_v62, %v4908_v19  ;;  %v2695_v60 = vadd.f32 %v2687_v4, %v2645_v9  ;;  %v2696_v44 = vadd.f32 %v2688_v7, %v2646_v41  ;;  %v2797_v13 = vadd.f32 %v4913_v3, %v2693_v36  ;;  %v5460_v7 = vld [vmem:[#allocation16_spill] sm:$0xff] }
 0xb8c   : > { %v2798_v59 = vadd.f32 %v4913_v3, %v2694_v0  ;;  %v2398_v56 = vmul.f32 %v4438_v47, %v4920_v50  ;;  %v2399_v34 = vmul.f32 %v4438_v47, %v4853_v17  ;;  %v4946_v11 = vmul.f32 %v4277_v8, %v2201_v39  ;;  %v5462_v17 = vld [vmem:[#allocation44_spill] sm:$0xff] }
 0xb8d   : > { %v2799_v62 = vadd.f32 %v4913_v3, %v2695_v60  ;;  %v4943_v5 = vadd.f32 %v4913_v3, %v2696_v44  ;;  %v2235_v38 = vmul.f32 %v4282_v10, %v2201_v39  ;;  %v2813_v40 = vmul.f32 0.044715, %v2797_v13  ;;  %v5461_v44 = vld [vmem:[#allocation26_spill] sm:$0xff] }
 0xb8e   : > { %5459 = vst [vmem:[#allocation30_spill] sm:$0xff] %v4946_v11  ;;  %v2814_v4 = vmul.f32 0.044715, %v2798_v59  ;;  %v2400_v32 = vmul.f32 %v4438_v47, %v4928_v52  ;;  %v4952_v16 = vmul.f32 %v5460_v7, %v2137_v31  ;;  %v4954_v9 = vmul.f32 0.5, %v2797_v13 }
 0xb8f   : > { %v4956_v41 = vmul.f32 0.5, %v2798_v59  ;;  %v2815_v36 = vmul.f32 0.044715, %v2799_v62  ;;  %v2816_v0 = vmul.f32 0.044715, %v4943_v5  ;;  %v2821_v60 = vmul.f32 %v2813_v40, %v2797_v13 }
 0xb90   : > { %v2822_v8 = vmul.f32 %v2814_v4, %v2798_v59  ;;  %v2406_v11 = vadd.f32 %v2398_v56, %v5461_v44  ;;  %v2407_v10 = vadd.f32 %v2399_v34, %v2283_v25  ;;  %v2451_v47 = vmul.f32 %v4475_v12, %v5462_v17 }
 0xb91   : > { %v2823_v39 = vmul.f32 %v2815_v36, %v2799_v62  ;;  %v2824_v15 = vmul.f32 %v2816_v0, %v4943_v5  ;;  %v2452_v7 = vmul.f32 %v4475_v12, %v4840_v20  ;;  %v2829_v33 = vmul.f32 %v2821_v60, %v2797_v13  ;;  %v5463_v20 = vld [vmem:[#allocation42_spill] sm:$0xff] }
 0xb92   : > { %v2830_v48 = vmul.f32 %v2822_v8, %v2798_v59  ;;  %v4967_v30 = vmul.f32 %v5457_v21, %v4764_v27  ;;  %v4971_v40 = vmul.f32 %v4370_v61, %v4908_v19  ;;  %v2459_v34 = vadd.f32 %v2451_v47, %v2406_v11 }
 0xb93   : > { %v2831_v25 = vmul.f32 %v2823_v39, %v2799_v62  ;;  %v2832_v56 = vmul.f32 %v2824_v15, %v4943_v5  ;;  %v2460_v4 = vadd.f32 %v2452_v7, %v2407_v10  ;;  %v2837_v36 = vadd.f32 %v2829_v33, %v2797_v13  ;;  %v5464_v15 = vld [vmem:[#allocation14_spill] sm:$0xff] }
 0xb94   : > { %v2838_v0 = vadd.f32 %v2830_v48, %v2798_v59  ;;  %v2545_v44 = vmul.f32 %v4711_v46, %v4967_v30  ;;  %v2546_v60 = vmul.f32 %v4711_v46, %v4971_v40  ;;  %v2501_v17 = vadd.f32 %v5463_v20, %v2459_v34 }
 0xb95   : > { %v2839_v8 = vadd.f32 %v2831_v25, %v2799_v62  ;;  %v2840_v27 = vadd.f32 %v2832_v56, %v4943_v5  ;;  %v2502_v61 = vadd.f32 %v2494_v42, %v2460_v4  ;;  %v2845_v2 = vmul.f32 0.7978846, %v2837_v36  ;;  %v5467_v4 = vld [vmem:[#allocation57_spill] sm:$0xff] }
 0xb96   : > { %v2846_v39 = vmul.f32 0.7978846, %v2838_v0  ;;  %v4982_v11 = vmul.f32 %v5464_v15, %v4742_v23  ;;  %v4985_v48 = vmul.f32 %v4353_v55, %v2137_v31  ;;  %v2553_v59 = vadd.f32 %v2545_v44, %v2501_v17  ;;  %v5465_v17 = vld [vmem:[#allocation36_spill] sm:$0xff]  ;;  %v5468_v44 = vld [vmem:[#allocation65_spill] sm:$0xff]  ;;  %v5471_v15 = vld [vmem:[#allocation51_spill] sm:$0xff] }
 0xb97   : > { %v2847_v33 = vmul.f32 0.7978846, %v2839_v8  ;;  %v2848_v13 = vmul.f32 0.7978846, %v2840_v27  ;;  %v2554_v10 = vadd.f32 %v2546_v60, %v2502_v61  ;;  %3713 = vtanh.f32 %v2845_v2  ;;  %v5469_v8 = vld [vmem:[#allocation24_spill] sm:$0xff] }
 0xb98   : > { %v2597_v46 = vmul.f32 %v4716_v58, %v4982_v11  ;;  %v2598_v20 = vmul.f32 %v4716_v58, %v4985_v48  ;;  %v2639_v42 = vmul.f32 %v4349_v54, %v4610_v14  ;;  %3715 = vtanh.f32 %v2846_v39  ;;  %v5466_v58 = vld [vmem:[#allocation55_spill] sm:$0xff] }
 0xb99   : > { %v2640_v23 = vmul.f32 %v4349_v54, %v5449_v51  ;;  %v4997_v55 = vmul.f32 %v5457_v21, %v4908_v19  ;;  %v2285_v31 = vadd.f32 %v5465_v17, %v2235_v38  ;;  %3717 = vtanh.f32 %v2847_v33  ;;  %v5007_v54 = vld [vmem:[%s5299_s14 + $0x6] ss:$0 sm:$0xff]  ;;  %v5472_v33 = vld [vmem:[#allocation31_spill] sm:$0xff] }
 0xb9a   : > { %v2605_v2 = vadd.f32 %v2597_v46, %v2553_v59  ;;  %v2606_v47 = vadd.f32 %v2598_v20, %v2554_v10  ;;  %v2408_v7 = vadd.f32 %v2400_v32, %v4794_v18  ;;  %v2807_v25 = vmul.f32 0.5, %v2799_v62 }
 0xb9b   : > { %3719 = vtanh.f32 %v2848_v13  ;;  %v2409_v56 = vadd.f32 %v5466_v58, %v2285_v31  ;;  %v2453_v34 = vmul.f32 %v4475_v12, %v4952_v16  ;;  %v2689_v38 = vmul.f32 %v4380_v63, %v4997_v55  ;;  %v5470_v63 = vld [vmem:[#allocation38_spill] sm:$0xff] }
 0xb9c   : > { %v2647_v19 = vadd.f32 %v2639_v42, %v2605_v2  ;;  %v2648_v21 = vadd.f32 %v2640_v23, %v2606_v47  ;;  %v2374_v18 = vmul.f32 %v4433_v49, %v4786_v43  ;;  %v2808_v62 = vmul.f32 0.5, %v4943_v5  ;;  %v5474_v42 = vld [vmem:[#allocation59_spill] sm:$0xff] }
 0xb9d   : > { %v2461_v32 = vadd.f32 %v2453_v34, %v2408_v7  ;;  %v2462_v36 = vadd.f32 %v5467_v4, %v2409_v56  ;;  %v2520_v12 = vmul.f32 %v4815_v37, %v4820_v1  ;;  %v2427_v61 = vmul.f32 %v4470_v26, %v4583_v45  ;;  %v5473_v45 = vld [vmem:[#allocation58_spill] sm:$0xff]  ;;  %v5475_v7 = vld [vmem:[#allocation15_spill] sm:$0xff] }
 0xb9e   : > { %v2697_v0 = vadd.f32 %v2689_v38, %v2647_v19  ;;  %v2698_v60 = vadd.f32 %v5468_v44, %v2648_v21  ;;  %v2382_v27 = vadd.f32 %v2374_v18, %v5469_v8  ;;  %v2572_v13 = vmul.f32 %v5007_v54, %v4857_v57  ;;  %v5476_v56 = vld [vmem:[#allocation62_spill] sm:$0xff]  ;;  %v5477_v21 = vld [vmem:[#allocation60_spill] sm:$0xff]  ;;  %v5478_v18 = vld [vmem:[#allocation63_spill] sm:$0xff] }
 0xb9f   : > { %v2503_v39 = vadd.f32 %v5470_v63, %v2461_v32  ;;  %v2504_v43 = vadd.f32 %v5471_v15, %v2462_v36  ;;  %v2528_v5 = vadd.f32 %v2520_v12, %v5472_v33  ;;  %v2521_v46 = vmul.f32 %v4815_v37, %v4823_v29  ;;  %v5479_v4 = vld [vmem:[#allocation34_spill] sm:$0xff] }
 0xba0   : > { %v5027_v59 = vadd.f32 %v4913_v3, %v2697_v0  ;;  %v5030_v1 = vadd.f32 %v4913_v3, %v2698_v60  ;;  %v2435_v10 = vadd.f32 %v2427_v61, %v2382_v27  ;;  %v2573_v17 = vmul.f32 %v5007_v54, %v4861_v22  ;;  %v5481_v63 = vld [vmem:[#allocation18_spill] sm:$0xff] }
 0xba1   : > { %v2555_v20 = vadd.f32 %v5473_v45, %v2503_v39  ;;  %v2556_v23 = vadd.f32 %v5474_v42, %v2504_v43  ;;  %v2580_v31 = vadd.f32 %v2572_v13, %v2528_v5  ;;  %v3714_v2 = vpop.eup %3713  ;;  %v2614_v58 = vmul.f32 %v5475_v7, %v4479_v28 }
 0xba2   : > { %v2817_v57 = vmul.f32 0.044715, %v5027_v59  ;;  %v2818_v47 = vmul.f32 0.044715, %v5030_v1  ;;  %v2664_v34 = vmul.f32 %v5476_v56, %v4864_v24  ;;  %v3716_v29 = vpop.eup %3715  ;;  %v2861_v19 = vadd.f32 1.0, %v3714_v2  ;;  %v5480_v24 = vld [vmem:[#allocation54_spill] sm:$0xff] }
 0xba3   : > { %v2607_v38 = vadd.f32 %v5477_v21, %v2555_v20  ;;  %v2608_v32 = vadd.f32 %v5478_v18, %v2556_v23  ;;  %v2477_v22 = vadd.f32 %v5479_v4, %v2435_v10  ;;  %v3718_v36 = vpop.eup %3717  ;;  %v2862_v12 = vadd.f32 1.0, %v3716_v29  ;;  %v5482_v10 = vld [vmem:[#allocation66_spill] sm:$0xff]  ;;  %v5483_v20 = vld [vmem:[#allocation19_spill] sm:$0xff] }
 0xba4   : > { %v2825_v0 = vmul.f32 %v2817_v57, %v5027_v59  ;;  %v2826_v44 = vmul.f32 %v2818_v47, %v5030_v1  ;;  %v2622_v60 = vadd.f32 %v2614_v58, %v2580_v31  ;;  %v2869_v28 = vmul.f32 %v2861_v19, %v4954_v9 }
 0xba5   : > { %v3720_v8 = vpop.eup %3719  ;;  %v2863_v27 = vadd.f32 1.0, %v3718_v36  ;;  %v2649_v61 = vadd.f32 %v5480_v24, %v2607_v38  ;;  %v2650_v39 = vadd.f32 %v5481_v63, %v2608_v32  ;;  %v2870_v15 = vmul.f32 %v2862_v12, %v4956_v41  ;;  %v5486_v12 = vld [vmem:[#allocation28_spill] sm:$0xff] }
 0xba6   : > { %v2864_v43 = vadd.f32 1.0, %v3720_v8  ;;  %v2833_v33 = vmul.f32 %v2825_v0, %v5027_v59  ;;  %v2834_v5 = vmul.f32 %v2826_v44, %v5030_v1  ;;  %v2529_v23 = vadd.f32 %v2521_v46, %v2477_v22  ;;  %v5485_v22 = vld [vmem:[#allocation10_spill] sm:$0xff]  ;;  %v5487_v8 = vld [vmem:[#allocation45_spill] sm:$0xff] }
 0xba7   : > { %v2871_v13 = vmul.f32 %v2863_v27, %v2807_v25  ;;  %v2699_v45 = vadd.f32 %v5482_v10, %v2649_v61  ;;  %v2700_v42 = vadd.f32 %v5483_v20, %v2650_v39  ;;  %v2877_v31 = vpack.c.bf16 %v2870_v15, %v2869_v28  ;;  %v5066_v25 = vld [vmem:[%s5300_s15] ss:$0 sm:$0xff]  ;;  %v5492_v20 = vld [vmem:[#allocation39_spill] sm:$0xff] }
 0xba8   : > { %v2872_v9 = vmul.f32 %v2864_v43, %v2808_v62  ;;  %v2841_v2 = vadd.f32 %v2833_v33, %v5027_v59  ;;  %v2842_v57 = vadd.f32 %v2834_v5, %v5030_v1  ;;  %v2377_v41 = vmul.f32 %v4433_v49, %v4920_v50  ;;  %v5489_v43 = vld [vmem:[#allocation27_spill] sm:$0xff] }
 0xba9   : > { %v2803_v47 = vadd.f32 %v4913_v3, %v2699_v45  ;;  %v2804_v58 = vadd.f32 %v4913_v3, %v2700_v42  ;;  %v2581_v29 = vadd.f32 %v2573_v17, %v2529_v23  ;;  %3581 = vmatprep.mubr.msk.bf16.mxu0 %vm668_vm0, %v2877_v31  ;;  %v2672_v21 = vadd.f32 %v2664_v34, %v2622_v60  ;;  %v5484_v17 = vld [vmem:[#allocation23_spill] sm:$0xff]  ;;  %v5491_v45 = vld [vmem:[#allocation49_spill] sm:$0xff] }
 0xbaa   : > { %v2878_v62 = vpack.c.bf16 %v2872_v9, %v2871_v13  ;;  %v2849_v46 = vmul.f32 0.7978846, %v2841_v2  ;;  %v2850_v19 = vmul.f32 0.7978846, %v2842_v57  ;;  %v5071_v38 = vmul.f32 %v4433_v49, %v4928_v52  ;;  %v5490_v13 = vld [vmem:[#allocation29_spill] sm:$0xff]  ;;  %v5493_v31 = vld [vmem:[#allocation43_spill] sm:$0xff] }
 0xbab   : > { %v2819_v50 = vmul.f32 0.044715, %v2803_v47  ;;  %v2820_v18 = vmul.f32 0.044715, %v2804_v58  ;;  %v2665_v3 = vmul.f32 %v5476_v56, %v4867_v35  ;;  %v2623_v32 = vadd.f32 %v5484_v17, %v2581_v29  ;;  %v5494_v2 = vld [vmem:[#allocation11_spill] sm:$0xff]  ;;  %v5496_v17 = vld [vmem:[#allocation25_spill] sm:$0xff] }
 0xbac   : > { %3582 = vmatmul.mubr.msk.bf16.vlgmr.msra.gmra.mrb[32].mxu0 %vm668_vm0, %v2878_v62  ;;  %3721 = vtanh.f32 %v2849_v46  ;;  %v5078_v4 = vadd.f32 %v5066_v25, %v2672_v21  ;;  %v2531_v34 = vadd.f32 %v4933_v53, %v4834_v6  ;;  %v2574_v0 = vmul.f32 %v5007_v54, %v5486_v12  ;;  %v5488_v53 = vld [vmem:[#allocation21_spill] sm:$0xff] }
 0xbad   : > { %3590 = vmatpush3.bf16.msra.mxu0 %v5485_v22  ;;  %3723 = vtanh.f32 %v2850_v19  ;;  %v2827_v52 = vmul.f32 %v2819_v50, %v2803_v47  ;;  %v2828_v36 = vmul.f32 %v2820_v18, %v2804_v58  ;;  %v2809_v35 = vmul.f32 0.5, %v5027_v59  ;;  %v5495_v19 = vld [vmem:[#allocation69_spill] sm:$0xff] }
 0xbae   : > { %v2673_v44 = vadd.f32 %v2665_v3, %v2623_v32  ;;  %v2722_v60 = vmul.f32 0.044715, %v5078_v4  ;;  %v2575_v28 = vmul.f32 %v5007_v54, %v5487_v8  ;;  %v2810_v27 = vmul.f32 0.5, %v5030_v1 }
 0xbaf   : > { %v2835_v24 = vmul.f32 %v2827_v52, %v2803_v47  ;;  %v2836_v6 = vmul.f32 %v2828_v36, %v2804_v58  ;;  %v2582_v61 = vadd.f32 %v2574_v0, %v5488_v53  ;;  %v2666_v59 = vmul.f32 %v5476_v56, %v5489_v43  ;;  %v5498_v53 = vld [vmem:[#allocation68_spill] sm:$0xff] }
 0xbb0   : > { %v5092_v63 = vadd.f32 %v5066_v25, %v2673_v44  ;;  %v2730_v39 = vmul.f32 %v2722_v60, %v5078_v4  ;;  %v2583_v15 = vadd.f32 %v2575_v28, %v2531_v34  ;;  %v2262_v1 = vadd.f32 %v5492_v20, %v5491_v45  ;;  %v5499_v20 = vld [vmem:[#allocation41_spill] sm:$0xff] }
 0xbb1   : > { %v2843_v33 = vadd.f32 %v2835_v24, %v2803_v47  ;;  %v2844_v5 = vadd.f32 %v2836_v6, %v2804_v58  ;;  %v2624_v10 = vadd.f32 %v5490_v13, %v2582_v61  ;;  %v2667_v57 = vmul.f32 %v5476_v56, %v5494_v2 }
 0xbb2   : > { %v2723_v42 = vmul.f32 0.044715, %v5092_v63  ;;  %v2738_v23 = vmul.f32 %v2730_v39, %v5078_v4  ;;  %v2625_v9 = vadd.f32 %v5493_v31, %v2583_v15  ;;  %v2378_v21 = vmul.f32 %v4433_v49, %v5495_v19 }
 0xbb3   : > { %v2851_v29 = vmul.f32 0.7978846, %v2843_v33  ;;  %v2852_v62 = vmul.f32 0.7978846, %v2844_v5  ;;  %v2674_v46 = vadd.f32 %v2666_v59, %v2624_v10  ;;  %v2385_v32 = vadd.f32 %v2377_v41, %v5496_v17  ;;  %v5497_v41 = vld [vmem:[#allocation44_spill] sm:$0xff] }
 0xbb4   : > { %v2731_v50 = vmul.f32 %v2723_v42, %v5092_v63  ;;  %v2746_v18 = vadd.f32 %v2738_v23, %v5078_v4  ;;  %v2675_v3 = vadd.f32 %v2667_v57, %v2625_v9  ;;  %v2811_v34 = vmul.f32 0.5, %v2803_v47  ;;  %v5500_v23 = vld [vmem:[#allocation12_spill] sm:$0xff] }
 0xbb5   : > { %3725 = vtanh.f32 %v2851_v29  ;;  %v5111_v22 = vadd.f32 %v5066_v25, %v2674_v46  ;;  %v2386_v52 = vadd.f32 %v2378_v21, %v2262_v1  ;;  %v2812_v8 = vmul.f32 0.5, %v2804_v58 }
 0xbb6   : > { %v3722_v36 = vpop.eup %3721  ;;  %3727 = vtanh.f32 %v2852_v62  ;;  %v2739_v12 = vmul.f32 %v2731_v50, %v5092_v63  ;;  %v2754_v0 = vmul.f32 0.7978846, %v2746_v18  ;;  %v5115_v49 = vadd.f32 %v5066_v25, %v2675_v3  ;;  %v5501_v18 = vld [vmem:[#allocation30_spill] sm:$0xff]  ;;  %v5502_v3 = vld [vmem:[#allocation35_spill] sm:$0xff] }
 0xbb7   : > { %v3724_v44 = vpop.eup %3723  ;;  %v2865_v60 = vadd.f32 1.0, %v3722_v36  ;;  %v2724_v28 = vmul.f32 0.044715, %v5111_v22  ;;  %v2430_v47 = vmul.f32 %v4470_v26, %v5497_v41  ;;  %v2431_v61 = vmul.f32 %v4470_v26, %v5498_v53  ;;  %v5503_v36 = vld [vmem:[#allocation67_spill] sm:$0xff]  ;;  %v5504_v41 = vld [vmem:[#allocation52_spill] sm:$0xff] }
 0xbb8   : > { %v2866_v24 = vadd.f32 1.0, %v3724_v44  ;;  %v2747_v6 = vadd.f32 %v2739_v12, %v5092_v63  ;;  %3729 = vtanh.f32 %v2754_v0  ;;  %v2725_v15 = vmul.f32 0.044715, %v5115_v49 }
 0xbb9   : > { %v2873_v39 = vmul.f32 %v2865_v60, %v2809_v35  ;;  %v2732_v43 = vmul.f32 %v2724_v28, %v5111_v22  ;;  %v2438_v59 = vadd.f32 %v2430_v47, %v2385_v32  ;;  %v2439_v5 = vadd.f32 %v2431_v61, %v2386_v52 }
 0xbba   : > { %v2874_v33 = vmul.f32 %v2866_v24, %v2810_v27  ;;  %v2755_v58 = vmul.f32 0.7978846, %v2747_v6  ;;  %v2524_v13 = vmul.f32 %v4815_v37, %v4967_v30  ;;  %v2733_v10 = vmul.f32 %v2725_v15, %v5115_v49  ;;  %v5505_v6 = vld [vmem:[#allocation33_spill] sm:$0xff] }
 0xbbb   : > { %v2740_v45 = vmul.f32 %v2732_v43, %v5111_v22  ;;  %v2480_v1 = vadd.f32 %v5499_v20, %v2438_v59  ;;  %v2525_v35 = vmul.f32 %v4815_v37, %v4971_v40  ;;  %v2481_v31 = vadd.f32 %v5500_v23, %v2439_v5  ;;  %v5508_v43 = vld [vmem:[#allocation56_spill] sm:$0xff] }
 0xbbc   : > { %v2879_v42 = vpack.c.bf16 %v2874_v33, %v2873_v39  ;;  %3731 = vtanh.f32 %v2755_v58  ;;  %v2576_v27 = vmul.f32 %v5007_v54, %v4982_v11  ;;  %v2741_v9 = vmul.f32 %v2733_v10, %v5115_v49  ;;  %v5509_v33 = vld [vmem:[#allocation37_spill] sm:$0xff] }
 0xbbd   : > { %v2748_v30 = vadd.f32 %v2740_v45, %v5111_v22  ;;  %v2532_v2 = vadd.f32 %v2524_v13, %v2480_v1  ;;  %v2577_v57 = vmul.f32 %v5007_v54, %v4985_v48  ;;  %v2533_v29 = vadd.f32 %v2525_v35, %v2481_v31  ;;  %v5512_v35 = vld [vmem:[#allocation50_spill] sm:$0xff] }
 0xbbe   : > { %3585 = vmatprep.mubr.msk.bf16.mxu0 %vm668_vm0, %v2879_v42  ;;  %v2618_v40 = vmul.f32 %v5475_v7, %v4610_v14  ;;  %v2619_v62 = vmul.f32 %v5475_v7, %v5449_v51  ;;  %v2668_v11 = vmul.f32 %v5476_v56, %v4997_v55  ;;  %v2749_v19 = vadd.f32 %v2741_v9, %v5115_v49 }
 0xbbf   : > { %v3726_v46 = vpop.eup %3725  ;;  %v2756_v21 = vmul.f32 0.7978846, %v2748_v30  ;;  %v2584_v50 = vadd.f32 %v2576_v27, %v2532_v2  ;;  %v2264_v48 = vadd.f32 %v5502_v3, %v5501_v18  ;;  %v2585_v52 = vadd.f32 %v2577_v57, %v2533_v29  ;;  %v5513_v30 = vld [vmem:[#allocation53_spill] sm:$0xff] }
 0xbc0   : > { %v3728_v17 = vpop.eup %3727  ;;  %v2867_v32 = vadd.f32 1.0, %v3726_v46  ;;  %v2387_v14 = vadd.f32 %v5071_v38, %v5503_v36  ;;  %v2432_v51 = vmul.f32 %v4470_v26, %v4952_v16  ;;  %v2757_v0 = vmul.f32 0.7978846, %v2749_v19  ;;  %v5506_v38 = vld [vmem:[#allocation46_spill] sm:$0xff]  ;;  %v5507_v26 = vld [vmem:[#allocation64_spill] sm:$0xff] }
 0xbc1   : > { %v2868_v12 = vadd.f32 1.0, %v3728_v17  ;;  %3733 = vtanh.f32 %v2756_v21  ;;  %v2626_v55 = vadd.f32 %v2618_v40, %v2584_v50  ;;  %v2627_v28 = vadd.f32 %v2619_v62, %v2585_v52  ;;  %v5514_v62 = vld [vmem:[#allocation61_spill] sm:$0xff] }
 0xbc2   : > { %v3730_v44 = vpop.eup %3729  ;;  %v2875_v60 = vmul.f32 %v2867_v32, %v2811_v34  ;;  %v2388_v47 = vadd.f32 %v5504_v41, %v2264_v48  ;;  %v2440_v24 = vadd.f32 %v2432_v51, %v2387_v14  ;;  %v2620_v53 = vmul.f32 %v5475_v7, %v5505_v6  ;;  %v5510_v34 = vld [vmem:[#allocation47_spill] sm:$0xff]  ;;  %v5516_v14 = vld [vmem:[#allocation20_spill] sm:$0xff] }
 0xbc3   : > { %v2876_v61 = vmul.f32 %v2868_v12, %v2812_v8  ;;  %3735 = vtanh.f32 %v2757_v0  ;;  %v2676_v39 = vadd.f32 %v2668_v11, %v2626_v55  ;;  %v2526_v15 = vmul.f32 %v4815_v37, %v5506_v38  ;;  %v5511_v8 = vld [vmem:[#allocation48_spill] sm:$0xff] }
 0xbc4   : > { %v2677_v16 = vadd.f32 %v5507_v26, %v2627_v28  ;;  %v2441_v59 = vadd.f32 %v5508_v43, %v2388_v47  ;;  %v2482_v58 = vadd.f32 %v5509_v33, %v2440_v24  ;;  %v2527_v5 = vmul.f32 %v4815_v37, %v5510_v34 }
 0xbc5   : > { %v2880_v13 = vpack.c.bf16 %v2876_v61, %v2875_v60  ;;  %v2770_v10 = vadd.f32 1.0, %v3730_v44  ;;  %v2710_v45 = vadd.f32 %v5066_v25, %v2676_v39  ;;  %v2578_v20 = vmul.f32 %v5007_v54, %v5511_v8 }
 0xbc6   : > { %v3732_v7 = vpop.eup %3731  ;;  %v2711_v1 = vadd.f32 %v5066_v25, %v2677_v16  ;;  %v2483_v42 = vadd.f32 %v5512_v35, %v2441_v59  ;;  %v2534_v23 = vadd.f32 %v2526_v15, %v2482_v58  ;;  %v2714_v31 = vmul.f32 0.5, %v5078_v4  ;;  %v5515_v4 = vld [vmem:[#allocation13_spill] sm:$0xff] }
 0xbc7   : > { %3586 = vmatmul.mubr.msk.bf16.gmra.mrb[36].mxu0 %vm668_vm0, %v2880_v13  ;;  %v2715_v27 = vmul.f32 0.5, %v5092_v63  ;;  %v2771_v37 = vadd.f32 1.0, %v3732_v7  ;;  %v2726_v9 = vmul.f32 0.044715, %v2710_v45  ;;  %v2579_v2 = vmul.f32 %v5007_v54, %v5513_v30 }
 0xbc8   : > { %v2727_v57 = vmul.f32 0.044715, %v2711_v1  ;;  %v2535_v29 = vadd.f32 %v2527_v5, %v2483_v42  ;;  %v2586_v40 = vadd.f32 %v2578_v20, %v2534_v23  ;;  %v2670_v11 = vmul.f32 %v5476_v56, %v5514_v62 }
 0xbc9   : > { %v2778_v46 = vmul.f32 %v2770_v10, %v2714_v31  ;;  %v2779_v19 = vmul.f32 %v2771_v37, %v2715_v27  ;;  %v2734_v21 = vmul.f32 %v2726_v9, %v2710_v45  ;;  %v2671_v63 = vmul.f32 %v5476_v56, %v5515_v4  ;;  %v5520_v4 = vld [vmem:[#allocation6_spill] sm:$0xff] }
 0xbca   : > { %v2735_v50 = vmul.f32 %v2727_v57, %v2711_v1  ;;  %v2587_v18 = vadd.f32 %v2579_v2, %v2535_v29  ;;  %v2628_v3 = vadd.f32 %v2620_v53, %v2586_v40  ;;  %v2716_v32 = vmul.f32 0.5, %v5111_v22 }
 0xbcb   : > { %v3734_v48 = vpop.eup %3733  ;;  %v2786_v17 = vpack.c.bf16 %v2779_v19, %v2778_v46  ;;  %v2742_v54 = vmul.f32 %v2734_v21, %v2710_v45  ;;  %v2717_v55 = vmul.f32 0.5, %v5115_v49  ;;  %v2719_v10 = vmul.f32 0.5, %v2711_v1  ;;  %v5519_v21 = vld [vmem:[#allocation4_spill] sm:$0xff] }
 0xbcc   : > { %v2772_v52 = vadd.f32 1.0, %v3734_v48  ;;  %v2743_v36 = vmul.f32 %v2735_v50, %v2711_v1  ;;  %v2629_v51 = vadd.f32 %v5516_v14, %v2587_v18  ;;  %v2678_v12 = vadd.f32 %v2670_v11, %v2628_v3  ;;  %v5518_v11 = vld [vmem:[#allocation3_spill] sm:$0xff] }
 0xbcd   : > { %v3736_v0 = vpop.eup %3735  ;;  %3591 = vmatprep.mubr.msk.bf16.mxu0 %vm668_vm0, %v2786_v17  ;;  %v2750_v44 = vadd.f32 %v2742_v54, %v2710_v45 }
 0xbce   : > { %v2773_v60 = vadd.f32 1.0, %v3736_v0  ;;  %v2780_v28 = vmul.f32 %v2772_v52, %v2716_v32  ;;  %v2751_v41 = vadd.f32 %v2743_v36, %v2711_v1  ;;  %v2679_v56 = vadd.f32 %v2671_v63, %v2629_v51  ;;  %v5517_v1 = vld [vmem:[#allocation2_spill] sm:$0xff]  ;;  %v5521_v0 = vld [vmem:[#allocation5_spill] sm:$0xff] }
 0xbcf   : > { %v2758_v47 = vmul.f32 0.7978846, %v2750_v44  ;;  %v2712_v24 = vadd.f32 %v5066_v25, %v2678_v12  ;;  %v5522_v44 = vld [vmem:[#allocation7_spill] sm:$0xff] }
 0xbd0   : > { %v2781_v22 = vmul.f32 %v2773_v60, %v2717_v55  ;;  %v2759_v6 = vmul.f32 0.7978846, %v2751_v41  ;;  %v2713_v53 = vadd.f32 %v5066_v25, %v2679_v56  ;;  %v2718_v25 = vmul.f32 0.5, %v2710_v45  ;;  %v3379_v45 = vld [vmem:[%s5302_s17] ss:$0 sm:$0xff]  ;;  %v5523_v56 = vld [vmem:[#allocation9_spill] sm:$0xff] }
 0xbd1   : > { %3737 = vtanh.f32 %v2758_v47  ;;  %v2728_v61 = vmul.f32 0.044715, %v2712_v24  ;;  %v2720_v31 = vmul.f32 0.5, %v2712_v24 }
 0xbd2   : > { %v2787_v39 = vpack.c.bf16 %v2781_v22, %v2780_v28  ;;  %3739 = vtanh.f32 %v2759_v6  ;;  %v2729_v38 = vmul.f32 0.044715, %v2713_v53  ;;  %v2721_v37 = vmul.f32 0.5, %v2713_v53 }
 0xbd3   : > { %v2736_v15 = vmul.f32 %v2728_v61, %v2712_v24 }
 0xbd4   : > { %3592 = vmatmul.mubr.msk.bf16.vlgmr.msra.gmra.mrb[32].mxu0 %vm668_vm0, %v2787_v39  ;;  %v2737_v49 = vmul.f32 %v2729_v38, %v2713_v53 }
 0xbd5   : > { %v2744_v26 = vmul.f32 %v2736_v15, %v2712_v24 }
 0xbd6   : > { %v2745_v16 = vmul.f32 %v2737_v49, %v2713_v53 }
 0xbd7   : > { %v2752_v43 = vadd.f32 %v2744_v26, %v2712_v24  ;;  %v5524_v24 = vld [vmem:[#allocation8_spill] sm:$0xff] }
 0xbd8   : > { %v2753_v59 = vadd.f32 %v2745_v16, %v2713_v53 }
 0xbd9   : > { %v2760_v33 = vmul.f32 0.7978846, %v2752_v43 }
 0xbda   : > { %v2761_v58 = vmul.f32 0.7978846, %v2753_v59 }
 0xbdb   : > { %v3738_v34 = vpop.eup %3737  ;;  %3741 = vtanh.f32 %v2760_v33 }
 0xbdc   : > { %v3740_v5 = vpop.eup %3739  ;;  %v2774_v13 = vadd.f32 1.0, %v3738_v34  ;;  %3743 = vtanh.f32 %v2761_v58 }
 0xbdd   : > { %v2775_v7 = vadd.f32 1.0, %v3740_v5 }
 0xbde   : > { %v2782_v8 = vmul.f32 %v2774_v13, %v2718_v25 }
 0xbdf   : > { %v2783_v20 = vmul.f32 %v2775_v7, %v2719_v10 }
 0xbe1   : > { %v2788_v35 = vpack.c.bf16 %v2783_v20, %v2782_v8 }
 0xbe3   : > { %3595 = vmatprep.mubr.msk.bf16.mxu0 %vm668_vm0, %v2788_v35 }
 0xbe5   : > { %v3742_v42 = vpop.eup %3741 }
 0xbe6   : > { %v3744_v23 = vpop.eup %3743  ;;  %v2776_v27 = vadd.f32 1.0, %v3742_v42 }
 0xbe7   : > { %v2777_v9 = vadd.f32 1.0, %v3744_v23 }
 0xbe8   : > { %v2784_v30 = vmul.f32 %v2776_v27, %v2720_v31 }
 0xbe9   : > { %v2785_v2 = vmul.f32 %v2777_v9, %v2721_v37 }
 0xbeb   : > { %v2789_v57 = vpack.c.bf16 %v2785_v2, %v2784_v30 }
 0xbed   : > { %3596 = vmatmul.mubr.msk.bf16.gmra.mrb[36].mxu0 %vm668_vm0, %v2789_v57 }
 0xca7   : > { %v3593_v29 = vpop.f32.mrb[32].mxu0 }
 0xca8   : > { %v3051_v40 = vadd.f32 %v3593_v29, %v5517_v1  ;;  %v3018_v62 = vpop.f32.mrb[33].mxu0 }
 0xca9   : > { %v3049_v46 = vadd.f32 %v3018_v62, %v5518_v11  ;;  %v3594_v19 = vpop.f32.mrb[34].mxu0 }
 0xcaa   : > { %v3052_v50 = vadd.f32 %v3594_v19, %v5519_v21  ;;  %v3021_v18 = vpop.f32.mrb[35].mxu0  ;;  %v3066_v3 = vadd.f32 %v3379_v45, %v3051_v40 }
 0xcab   : > { %v3050_v63 = vadd.f32 %v3021_v18, %v5520_v4  ;;  %v3064_v32 = vadd.f32 %v3379_v45, %v3049_v46 }
 0xcac   : > { %v3080_v48 = vsel %vm668_vm0, %v3066_v3, 0.0  ;;  %v3067_v17 = vadd.f32 %v3379_v45, %v3052_v50 }
 0xcad   : > { %3081 = vadd.xlane.f32.xlu1 %v3080_v48  ;;  %v3065_v52 = vadd.f32 %v3379_v45, %v3050_v63  ;;  %v3074_v36 = vsel %vm668_vm0, %v3064_v32, 0.0 }
 0xcae   : > { %v3083_v54 = vsel %vm668_vm0, %v3067_v17, 0.0 }
 0xcaf   : > { %3084 = vadd.xlane.f32.xlu0 %v3083_v54  ;;  %v3077_v14 = vsel %vm668_vm0, %v3065_v52, 0.0 }
 0xcb1   : > { %3075 = vadd.xlane.f32.xlu1 %v3074_v36 }
 0xcb3   : > { %3078 = vadd.xlane.f32.xlu0 %v3077_v14 }
 0xcc0   : > { %v3597_v51 = vpop.f32.mrb[36].mxu0 }
 0xcc1   : > { %v3034_v12 = vpop.f32.mrb[37].mxu0  ;;  %v3055_v55 = vadd.f32 %v3597_v51, %v5521_v0 }
 0xcc2   : > { %v3053_v60 = vadd.f32 %v3034_v12, %v5522_v44  ;;  %v3598_v28 = vpop.f32.mrb[38].mxu0 }
 0xcc3   : > { %v3037_v41 = vpop.f32.mrb[39].mxu0  ;;  %v3056_v47 = vadd.f32 %v3598_v28, %v5523_v56  ;;  %v3070_v39 = vadd.f32 %v3379_v45, %v3055_v55 }
 0xcc4   : > { %v3054_v22 = vadd.f32 %v3037_v41, %v5524_v24  ;;  %v3068_v6 = vadd.f32 %v3379_v45, %v3053_v60 }
 0xcc5   : > { %v3071_v15 = vadd.f32 %v3379_v45, %v3056_v47  ;;  %v3092_v49 = vsel %vm668_vm0, %v3070_v39, 0.0  ;;  %v3380_v47 = vld [vmem:[%s5304_s19] ss:$0 sm:$0xff] }
 0xcc6   : > { %v3086_v53 = vsel %vm668_vm0, %v3068_v6, 0.0  ;;  %v3069_v61 = vadd.f32 %v3379_v45, %v3054_v22 }
 0xcc7   : > { %3087 = vadd.xlane.f32.xlu1 %v3086_v53  ;;  %v3095_v26 = vsel %vm668_vm0, %v3071_v15, 0.0 }
 0xcc8   : > { %v3089_v38 = vsel %vm668_vm0, %v3069_v61, 0.0 }
 0xcc9   : > { %3090 = vadd.xlane.f32.xlu0 %v3089_v38 }
 0xccb   : > { %3093 = vadd.xlane.f32.xlu1 %v3092_v49 }
 0xccd   : > { %3096 = vadd.xlane.f32.xlu0 %v3095_v26 }
 0xd3a   : > { %v3082_v16 = vpop.xlane.xlu1 %3081 }
 0xd3b   : > { %v3100_v43 = vmul.f32 0.0625, %v3082_v16 }
 0xd3c   : > { %v3085_v59 = vpop.xlane.xlu0 %3084 }
 0xd3d   : > { %v5205_v33 = vsub.f32 %v3066_v3, %v3100_v43  ;;  %v3101_v58 = vmul.f32 0.0625, %v3085_v59 }
 0xd3e   : > { %v3076_v34 = vpop.xlane.xlu1 %3075 }
 0xd3f   : > { %v5207_v5 = vsub.f32 %v3067_v17, %v3101_v58  ;;  %v3098_v13 = vmul.f32 0.0625, %v3076_v34  ;;  %v3116_v25 = vmul.f32 %v5205_v33, %v5205_v33 }
 0xd40   : > { %v3079_v10 = vpop.xlane.xlu0 %3078 }
 0xd41   : > { %v5211_v7 = vsub.f32 %v3064_v32, %v3098_v13  ;;  %v3099_v8 = vmul.f32 0.0625, %v3079_v10  ;;  %v3128_v20 = vsel %vm668_vm0, %v3116_v25, 0.0  ;;  %v3117_v35 = vmul.f32 %v5207_v5, %v5207_v5 }
 0xd42   : > { %3129 = vadd.xlane.f32.xlu1 %v3128_v20 }
 0xd43   : > { %v5216_v42 = vsub.f32 %v3065_v52, %v3099_v8  ;;  %v3131_v23 = vsel %vm668_vm0, %v3117_v35, 0.0  ;;  %v3114_v31 = vmul.f32 %v5211_v7, %v5211_v7 }
 0xd44   : > { %3132 = vadd.xlane.f32.xlu0 %v3131_v23 }
 0xd45   : > { %v3122_v27 = vsel %vm668_vm0, %v3114_v31, 0.0  ;;  %v3115_v37 = vmul.f32 %v5216_v42, %v5216_v42 }
 0xd46   : > { %3123 = vadd.xlane.f32.xlu1 %v3122_v27 }
 0xd47   : > { %v3125_v9 = vsel %vm668_vm0, %v3115_v37, 0.0 }
 0xd48   : > { %3126 = vadd.xlane.f32.xlu0 %v3125_v9 }
 0xd54   : > { %v3088_v30 = vpop.xlane.xlu1 %3087 }
 0xd55   : > { %v3102_v2 = vmul.f32 0.0625, %v3088_v30 }
 0xd56   : > { %v3091_v57 = vpop.xlane.xlu0 %3090 }
 0xd57   : > { %v5225_v29 = vsub.f32 %v3068_v6, %v3102_v2  ;;  %v3103_v45 = vmul.f32 0.0625, %v3091_v57  ;;  %v3381_v6 = vld [vmem:[%s5305_s20] ss:$0 sm:$0xff] }
 0xd58   : > { %v3094_v1 = vpop.xlane.xlu1 %3093 }
 0xd59   : > { %v5227_v40 = vsub.f32 %v3069_v61, %v3103_v45  ;;  %v3104_v62 = vmul.f32 0.0625, %v3094_v1  ;;  %v3118_v11 = vmul.f32 %v5225_v29, %v5225_v29 }
 0xd5a   : > { %v3097_v46 = vpop.xlane.xlu0 %3096 }
 0xd5b   : > { %v5231_v19 = vsub.f32 %v3070_v39, %v3104_v62  ;;  %v3105_v21 = vmul.f32 0.0625, %v3097_v46  ;;  %v3134_v50 = vsel %vm668_vm0, %v3118_v11, 0.0  ;;  %v3119_v18 = vmul.f32 %v5227_v40, %v5227_v40 }
 0xd5c   : > { %3135 = vadd.xlane.f32.xlu1 %v3134_v50 }
 0xd5d   : > { %v5236_v3 = vsub.f32 %v3071_v15, %v3105_v21  ;;  %v3137_v4 = vsel %vm668_vm0, %v3119_v18, 0.0  ;;  %v3120_v63 = vmul.f32 %v5231_v19, %v5231_v19 }
 0xd5e   : > { %3138 = vadd.xlane.f32.xlu0 %v3137_v4 }
 0xd5f   : > { %v3140_v48 = vsel %vm668_vm0, %v3120_v63, 0.0  ;;  %v3121_v17 = vmul.f32 %v5236_v3, %v5236_v3 }
 0xd60   : > { %3141 = vadd.xlane.f32.xlu1 %v3140_v48 }
 0xd61   : > { %v3143_v32 = vsel %vm668_vm0, %v3121_v17, 0.0 }
 0xd62   : > { %3144 = vadd.xlane.f32.xlu0 %v3143_v32 }
 0xdcf   : > { %v3130_v54 = vpop.xlane.xlu1 %3129 }
 0xdd0   : > { %v3148_v52 = vmul.f32 0.0625, %v3130_v54 }
 0xdd1   : > { %v3133_v36 = vpop.xlane.xlu0 %3132 }
 0xdd2   : > { %v3156_v14 = vadd.f32 1e-05, %v3148_v52  ;;  %v3149_v51 = vmul.f32 0.0625, %v3133_v36 }
 0xdd3   : > { %v3124_v12 = vpop.xlane.xlu1 %3123 }
 0xdd4   : > { %3745 = vrsqrt.f32 %v3156_v14  ;;  %v3157_v0 = vadd.f32 1e-05, %v3149_v51  ;;  %v3146_v55 = vmul.f32 0.0625, %v3124_v12 }
 0xdd5   : > { %v3127_v44 = vpop.xlane.xlu0 %3126 }
 0xdd6   : > { %3747 = vrsqrt.f32 %v3157_v0  ;;  %v3154_v60 = vadd.f32 1e-05, %v3146_v55  ;;  %v3147_v28 = vmul.f32 0.0625, %v3127_v44 }
 0xdd8   : > { %3749 = vrsqrt.f32 %v3154_v60  ;;  %v3155_v41 = vadd.f32 1e-05, %v3147_v28 }
 0xdda   : > { %3751 = vrsqrt.f32 %v3155_v41 }
 0xdde   : > { %v3746_v56 = vpop.eup %3745 }
 0xddf   : > { %v3172_v24 = vmul.f32 %v3746_v56, %v5205_v33 }
 0xde0   : > { %v3748_v22 = vpop.eup %3747 }
 0xde1   : > { %v3186_v53 = vmul.f32 %v3380_v47, %v3172_v24  ;;  %v3173_v61 = vmul.f32 %v3748_v22, %v5207_v5 }
 0xde2   : > { %v3750_v39 = vpop.eup %3749 }
 0xde3   : > { %v3200_v38 = vadd.f32 %v3381_v6, %v3186_v53  ;;  %v3187_v15 = vmul.f32 %v3380_v47, %v3173_v61  ;;  %v3170_v49 = vmul.f32 %v3750_v39, %v5211_v7 }
 0xde4   : > { %v3752_v26 = vpop.eup %3751 }
 0xde5   : > { %3208 = vst.msk [vmem:[%s5258_s3 + $0x10] sm:$0xff] %vm668_vm0, %v3200_v38  ;;  %v3201_v16 = vadd.f32 %v3381_v6, %v3187_v15  ;;  %v3184_v43 = vmul.f32 %v3380_v47, %v3170_v49  ;;  %v3171_v59 = vmul.f32 %v3752_v26, %v5216_v42 }
 0xde7   : > { %3209 = vst.msk [vmem:[%s5258_s3 + $0x18] sm:$0xff] %vm668_vm0, %v3201_v16  ;;  %v3198_v33 = vadd.f32 %v3381_v6, %v3184_v43  ;;  %v3185_v58 = vmul.f32 %v3380_v47, %v3171_v59 }
 0xde9   : > { %3206 = vst.msk [vmem:[%s5258_s3] sm:$0xff] %vm668_vm0, %v3198_v33  ;;  %v3199_v34 = vadd.f32 %v3381_v6, %v3185_v58  ;;  %v3136_v5 = vpop.xlane.xlu1 %3135 }
 0xdea   : > { %v3150_v13 = vmul.f32 0.0625, %v3136_v5 }
 0xdeb   : > { %3207 = vst.msk [vmem:[%s5258_s3 + $0x8] sm:$0xff] %vm668_vm0, %v3199_v34  ;;  %v3139_v25 = vpop.xlane.xlu0 %3138 }
 0xdec   : > { %v3158_v10 = vadd.f32 1e-05, %v3150_v13  ;;  %v3151_v7 = vmul.f32 0.0625, %v3139_v25 }
 0xded   : > { %v3142_v8 = vpop.xlane.xlu1 %3141 }
 0xdee   : > { %3753 = vrsqrt.f32 %v3158_v10  ;;  %v3159_v20 = vadd.f32 1e-05, %v3151_v7  ;;  %v3152_v35 = vmul.f32 0.0625, %v3142_v8 }
 0xdef   : > { %v3145_v23 = vpop.xlane.xlu0 %3144 }
 0xdf0   : > { %3755 = vrsqrt.f32 %v3159_v20  ;;  %v3160_v42 = vadd.f32 1e-05, %v3152_v35  ;;  %v3153_v31 = vmul.f32 0.0625, %v3145_v23 }
 0xdf2   : > { %3757 = vrsqrt.f32 %v3160_v42  ;;  %v3161_v27 = vadd.f32 1e-05, %v3153_v31 }
 0xdf4   : > { %3759 = vrsqrt.f32 %v3161_v27 }
 0xdf8   : > { %v3754_v37 = vpop.eup %3753 }
 0xdf9   : > { %v3174_v9 = vmul.f32 %v3754_v37, %v5225_v29 }
 0xdfa   : > { %v3756_v30 = vpop.eup %3755 }
 0xdfb   : > { %v3188_v2 = vmul.f32 %v3380_v47, %v3174_v9  ;;  %v3175_v57 = vmul.f32 %v3756_v30, %v5227_v40 }
 0xdfc   : > { %v3758_v45 = vpop.eup %3757 }
 0xdfd   : > { %v3202_v1 = vadd.f32 %v3381_v6, %v3188_v2  ;;  %v3189_v62 = vmul.f32 %v3380_v47, %v3175_v57  ;;  %v3176_v11 = vmul.f32 %v3758_v45, %v5231_v19 }
 0xdfe   : > { %v3760_v46 = vpop.eup %3759 }
 0xdff   : > { %3210 = vst.msk [vmem:[%s5258_s3 + $0x20] sm:$0xff] %vm668_vm0, %v3202_v1  ;;  %v3203_v21 = vadd.f32 %v3381_v6, %v3189_v62  ;;  %v3190_v50 = vmul.f32 %v3380_v47, %v3176_v11  ;;  %v3177_v18 = vmul.f32 %v3760_v46, %v5236_v3 }
 0xe01   : > { %3211 = vst.msk [vmem:[%s5258_s3 + $0x28] sm:$0xff] %vm668_vm0, %v3203_v21  ;;  %v3204_v29 = vadd.f32 %v3381_v6, %v3190_v50  ;;  %v3191_v4 = vmul.f32 %v3380_v47, %v3177_v18 }
 0xe03   : > { %3212 = vst.msk [vmem:[%s5258_s3 + $0x30] sm:$0xff] %vm668_vm0, %v3204_v29  ;;  %v3205_v63 = vadd.f32 %v3381_v6, %v3191_v4 }
 0xe05   : > { %3213 = vst.msk [vmem:[%s5258_s3 + $0x38] sm:$0xff] %vm668_vm0, %v3205_v63 }
 0xe06 PF: > { %s31_s2 = sadd.s32 1, %s3767_s2  }
 0xe07   : > { %p28_p4 = scmp.ge.s32.totalorder %s31_s2, 4  }
 0xe09   :  { %30 = sbr.rel (!%p28_p4) target bundleno = 7 (0x7), region = 137 }

// kernel: run.10
= control target key start
LH: loop header
LB: loop body
LE: loop exit
PB: predicated region body
PF: predicated region fallthrough
CT: control target
= control target key end

     0   :  { %s523_s15 = smov 0   ;;  %s586_s0 = inlined_call_operand.vmem [shape: bf16[32,144], index: 0, kind: input, shape index: {}]   ;;  %s587_s1 = inlined_call_operand.vmem [shape: bf16[144,32], index: 1, kind: input, shape index: {}]   ;;  %s588_s2 = inlined_call_operand.vmem [shape: f32[1,32], index: 2, kind: input, shape index: {}]   ;;  %s589_s3 = inlined_call_operand.vmem [shape: f32[1,32], index: 3, kind: input, shape index: {}]   ;;  %s590_s4 = inlined_call_operand.vmem [shape: f32[32,32], index: 4, kind: output, shape index: {}]  }
   0x1 LB: > { %s437_s16 = sadd.s32 4294967295, %s495_s15   ;;  %p441_p0 = scmp.ge.s32.totalorder %s495_s15, 1  ;;  %s495_s15 = sphi %s523_s15, %s14_s15  }
   0x2   : > { %p164_p1 = scmp.lt.s32.totalorder %s495_s15, 3 }
   0x4   : > { %p165_p2 = pnand %p441_p0, %p164_p1 }
   0x5   : > { %v473_v0 = vld [vmem:[%s587_s1] sm:$0xff] (!%p165_p2)   ;;  %v497_v1 = vmov (!%p165_p2), 0   ;;  %s442_s19 = sshll.u32 (!%p165_p2), %s437_s16, 1  ;;  %v474_v2 = vld [vmem:[%s587_s1 + $0x8] sm:$0xff] (!%p165_p2)   ;;  %v475_v3 = vld [vmem:[%s587_s1 + $0x10] sm:$0xff] (!%p165_p2)   ;;  %vm288_vm0 = vcmask (!%p165_p2), 130048  }
   0x6   : > { %168 = sbr.rel (%p165_p2) target bundleno = 572 (0x23c), region = 36  ;;  %292 = vmatprep.subr.bf16.mxu0 (!%p165_p2), %v497_v1  ;;  %p192_p3 = scmp.lt.s32.totalorder (!%p165_p2), %s442_s19, 3  ;;  %v476_v4 = vld [vmem:[%s587_s1 + $0x18] sm:$0xff] (!%p165_p2)   ;;  %v477_v6 = vld [vmem:[%s587_s1 + $0x20] sm:$0xff] (!%p165_p2)   ;;  %v478_v7 = vld [vmem:[%s587_s1 + $0x28] sm:$0xff] (!%p165_p2)   ;;  %vm335_vm1 = vcmask (!%p165_p2), 261120  }
   0x7   : > { %293 = vmatpush1.bf16.msra.mxu0 (!%p165_p2), %v473_v0  ;;  %v479_v8 = vld [vmem:[%s587_s1 + $0x30] sm:$0xff] (!%p165_p2)   ;;  %v480_v9 = vld [vmem:[%s587_s1 + $0x38] sm:$0xff] (!%p165_p2)   ;;  %v481_v10 = vld [vmem:[%s587_s1 + $0x40] sm:$0xff] (!%p165_p2)  }
   0x8   : > { %294 = vmatprep.subr.bf16.mxu0 (!%p165_p2), %v497_v1  ;;  %v459_v35 = vld [vmem:[%s588_s2] ss:$0 sm:$0xff] (!%p165_p2) }
   0x9   : > { %v460_v37 = vld [vmem:[%s589_s3] ss:$0 sm:$0xff] (!%p165_p2) }
   0xb   : > { %295 = vmatpush1.bf16.msra.mxu0 (!%p165_p2), %v474_v2 }
   0xc   : > { %296 = vmatprep.subr.bf16.mxu0 (!%p165_p2), %v497_v1 }
   0xd   : > { %s592_s19 = smov (!%p192_p3, %s442_s19), 3 }
   0xe   : > { %s463_s24 = sshll.u32 %s592_s19, 3 }
   0xf   : > { %s196_s27 = scalar_lea.vmem %s586_s0, %s463_s24  ;;  %297 = vmatpush1.bf16.msra.mxu0 %v475_v3  ;;  %s202_s22 = scalar_lea.vmem %s590_s4, %s463_s24 }
  0x10   : > { %v484_v5 = vld [vmem:[%s196_s27 + $0x4] ss:$8 sps:$4 sm:$0xff]   ;;  %298 = vmatprep.subr.bf16.mxu0 %v497_v1  ;;  %v482_v11 = vld [vmem:[%s196_s27] ss:$8 sps:$4 sm:$0xff]  }
  0x11   : > { %458 = vmatprep.mubr.msk.bf16.mxu0 %vm288_vm0, %v484_v5 }
  0x13   : > { %299 = vmatpush1.bf16.msra.mxu0 %v476_v4 }
  0x14   : > { %300 = vmatprep.subr.bf16.mxu0 %v497_v1 }
  0x17   : > { %301 = vmatpush1.bf16.msra.mxu0 %v477_v6 }
  0x18   : > { %302 = vmatprep.subr.bf16.mxu0 %v497_v1 }
  0x1b   : > { %303 = vmatpush1.bf16.msra.mxu0 %v478_v7 }
  0x1c   : > { %304 = vmatprep.subr.bf16.mxu0 %v497_v1 }
  0x1f   : > { %305 = vmatpush1.bf16.msra.mxu0 %v479_v8 }
  0x20   : > { %306 = vmatprep.subr.bf16.mxu0 %v497_v1 }
  0x23   : > { %307 = vmatpush1.bf16.msra.mxu0 %v480_v9 }
  0x24   : > { %308 = vmatprep.subr.bf16.mxu0 %v497_v1 }
  0x27   : > { %309 = vmatpush1.bf16.msra.mxu0 %v481_v10 }
  0x2a   : > { %325 = vmatmul.mubr.bf16.vlgmr.msra.gmra.mrb[0].mxu0 %v482_v11 }
  0xfd   : > { %v326_v12 = vpop.f32.mrb[0].mxu0 }
  0xfe   : > { %v328_v13 = vpop.f32.mrb[1].mxu0  ;;  %v336_v14 = vsel %vm335_vm1, %v326_v12, 0.0 }
  0xff   : > { %337 = vadd.xlane.f32.xlu0 %v336_v14  ;;  %v329_v15 = vpop.f32.mrb[2].mxu0 }
 0x100   : > { %v331_v16 = vpop.f32.mrb[3].mxu0  ;;  %v339_v17 = vsel %vm335_vm1, %v329_v15, 0.0 }
 0x103   : > { %340 = vadd.xlane.f32.xlu0 %v339_v17 }
 0x18c   : > { %v338_v18 = vpop.xlane.xlu0 %337 }
 0x18d   : > { %v343_v19 = vmul.f32 0.03125, %v338_v18 }
 0x18f   : > { %v345_v20 = vsub.f32 %v326_v12, %v343_v19 }
 0x190   : > { %v341_v21 = vpop.xlane.xlu0 %340 }
 0x191   : > { %v344_v22 = vmul.f32 0.03125, %v341_v21  ;;  %v347_v23 = vmul.f32 %v345_v20, %v345_v20 }
 0x193   : > { %v346_v24 = vsub.f32 %v329_v15, %v344_v22  ;;  %v349_v25 = vsel %vm335_vm1, %v347_v23, 0.0 }
 0x194   : > { %350 = vadd.xlane.f32.xlu1 %v349_v25 }
 0x195   : > { %v348_v26 = vmul.f32 %v346_v24, %v346_v24 }
 0x197   : > { %v352_v27 = vsel %vm335_vm1, %v348_v26, 0.0 }
 0x198   : > { %353 = vadd.xlane.f32.xlu1 %v352_v27 }
 0x221   : > { %v351_v28 = vpop.xlane.xlu1 %350 }
 0x222   : > { %v355_v29 = vmul.f32 0.03125, %v351_v28 }
 0x224   : > { %v357_v30 = vadd.f32 1e-05, %v355_v29 }
 0x225   : > { %v354_v31 = vpop.xlane.xlu1 %353 }
 0x226   : > { %485 = vrsqrt.f32 %v357_v30  ;;  %v356_v32 = vmul.f32 0.03125, %v354_v31 }
 0x228   : > { %v358_v33 = vadd.f32 1e-05, %v356_v32 }
 0x22a   : > { %487 = vrsqrt.f32 %v358_v33 }
 0x230   : > { %v486_v34 = vpop.eup %485 }
 0x231   : > { %v361_v36 = vmul.f32 %v486_v34, %v345_v20 }
 0x233   : > { %v369_v38 = vmul.f32 %v459_v35, %v361_v36 }
 0x234   : > { %v488_v39 = vpop.eup %487 }
 0x235   : > { %v377_v40 = vadd.f32 %v460_v37, %v369_v38  ;;  %v362_v41 = vmul.f32 %v488_v39, %v346_v24 }
 0x237   : > { %379 = vst.msk [vmem:[%s202_s22] sm:$0xff] %vm335_vm1, %v377_v40  ;;  %v370_v42 = vmul.f32 %v459_v35, %v362_v41 }
 0x239   : > { %v378_v43 = vadd.f32 %v460_v37, %v370_v42 }
 0x23b   : > { %380 = vst.msk [vmem:[%s202_s22 + $0x8] sm:$0xff] %vm335_vm1, %v378_v43 }
 0x23c PF: > { %s14_s15 = sadd.s32 1, %s495_s15  }
 0x23d   : > { %p11_p4 = scmp.ge.s32.totalorder %s14_s15, 4  }
 0x23f   :  { %13 = sbr.rel (!%p11_p4) target bundleno = 1 (0x1), region = 66 }

// kernel: run.11
= control target key start
LH: loop header
LB: loop body
LE: loop exit
PB: predicated region body
PF: predicated region fallthrough
CT: control target
= control target key end

     0   :  { %s3188_s0 = inlined_call_operand.vmem [shape: f32[2,16,32], index: 0, kind: input, shape index: {}]   ;;  %s3189_s1 = inlined_call_operand.vmem [shape: f32[1,32], index: 1, kind: input, shape index: {}]   ;;  %s3190_s2 = inlined_call_operand.vmem [shape: f32[1,32], index: 2, kind: input, shape index: {}]   ;;  %s3191_s3 = inlined_call_operand.vmem [shape: bf16[32,32], index: 3, kind: input, shape index: {}]   ;;  %s3192_s4 = inlined_call_operand.vmem [shape: bf16[128,32], index: 4, kind: input, shape index: {}]   ;;  %s3193_s5 = inlined_call_operand.vmem [shape: f32[1,32], index: 5, kind: input, shape index: {}]   ;;  %s3194_s6 = inlined_call_operand.vmem [shape: f32[1,32], index: 6, kind: input, shape index: {}]   ;;  %s3195_s7 = inlined_call_operand.vmem [shape: bf16[32,64], index: 7, kind: input, shape index: {}]   ;;  %s3196_s8 = inlined_call_operand.vmem [shape: bf16[32,32], index: 8, kind: input, shape index: {}]   ;;  %s3197_s9 = inlined_call_operand.vmem [shape: f32[1,32], index: 9, kind: input, shape index: {}]   ;;  %s3198_s10 = inlined_call_operand.vmem [shape: f32[1,32], index: 10, kind: input, shape index: {}]   ;;  %s3199_s11 = inlined_call_operand.vmem [shape: f32[1,32], index: 11, kind: input, shape index: {}]   ;;  %s3200_s12 = inlined_call_operand.vmem [shape: bf16[32,32], index: 12, kind: input, shape index: {}]   ;;  %s3201_s13 = inlined_call_operand.vmem [shape: f32[1,32], index: 13, kind: input, shape index: {}]   ;;  %s3202_s14 = inlined_call_operand.vmem [shape: f32[18,32], index: 14, kind: input, shape index: {}]   ;;  %s3203_s15 = inlined_call_operand.vmem [shape: f32[2,32], index: 15, kind: input, shape index: {}]   ;;  %s3204_s16 = inlined_call_operand.vmem [shape: bf16[64,32], index: 16, kind: input, shape index: {}]   ;;  %s3205_s17 = inlined_call_operand.vmem [shape: f32[1,32], index: 17, kind: input, shape index: {}]   ;;  %s3206_s18 = inlined_call_operand.vmem [shape: bf16[4,4,16], index: 18, kind: input, shape index: {}]   ;;  %s3207_s19 = inlined_call_operand.vmem [shape: f32[1,32], index: 19, kind: input, shape index: {}]   ;;  %s3208_s20 = inlined_call_operand.vmem [shape: f32[1,32], index: 20, kind: input, shape index: {}]   ;;  %s3209_s21 = inlined_call_operand.vmem [shape: f32[2,16,32], index: 21, kind: output, shape index: {}]  }
   0x1   :  { %3212 = sst [smem:[#allocation2_spill]] %s3188_s0 }
   0x2   :  { %3213 = sst [smem:[#allocation3_spill]] %s3189_s1 }
   0x3   :  { %3214 = sst [smem:[#allocation4_spill]] %s3190_s2  ;;  %s2783_s2 = smov 0  }
   0x4   :  { %3215 = sst [smem:[#allocation5_spill]] %s3191_s3 }
   0x5   :  { %3216 = sst [smem:[#allocation6_spill]] %s3192_s4 }
   0x6   :  { %3217 = sst [smem:[#allocation7_spill]] %s3193_s5 }
   0x7 LB: > { %s2308_s25 = sadd.s32 4294967295, %s2666_s2   ;;  %p2312_p0 = scmp.ge.s32.totalorder %s2666_s2, 1  ;;  %s2666_s2 = sphi %s2783_s2, %s31_s2  }
   0x8   : > { %p587_p1 = scmp.lt.s32.totalorder %s2666_s2, 3 }
   0xa   : > { %p588_p2 = pnand %p2312_p0, %p587_p1 }
   0xb   : > { %p647_p3 = scmp.lt.s32.totalorder (!%p588_p2), %s2308_s25, 1  ;;  %vm662_vm0 = vcmask (!%p588_p2), 261120   ;;  %s3218_s28 = sld [smem:[#allocation2_spill]] (!%p588_p2)  ;;  %v2668_v15 = vmov (!%p588_p2), 0.0   ;;  %vm2669_vm1 = vmmov (!%p588_p2), 0   ;;  %vm768_vm2 = vcmask (!%p588_p2), 130048  }
   0xc   : > { %591 = sbr.rel (%p588_p2) target bundleno = 3556 (0xde4), region = 104  ;;  %s3219_s30 = sld [smem:[#allocation5_spill]] (!%p588_p2)  ;;  %2445 = vmatprep.subr.bf16.mxu0 (!%p588_p2), %v2668_v15  ;;  %2453 = vmatprep.subr.bf16.mxu1 (!%p588_p2), %v2668_v15  ;;  %v767_v34 = vld [vmem:[%s3206_s18] sm:$0x3] (!%p588_p2)  ;;  %v2323_v35 = vld [vmem:[%s3206_s18 + $0x2] sm:$0x3] (!%p588_p2) }
   0xd   : > { %2449 = vmatprep.mubr.msk.bf16.mxu0 (!%p588_p2), %vm2669_vm1, %v2668_v15  ;;  %2455 = vmatprep.mubr.msk.bf16.mxu1 (!%p588_p2), %vm2669_vm1, %v2668_v15  ;;  %s3220_s24 = sld [smem:[#allocation3_spill]] (!%p588_p2)  ;;  %v2331_v36 = vld [vmem:[%s3206_s18 + $0x4] sm:$0x3] (!%p588_p2)  ;;  %v2336_v37 = vld [vmem:[%s3206_s18 + $0x6] sm:$0x3] (!%p588_p2)  ;;  %vm1191_vm3 = vcmask (!%p588_p2), 257024  }
   0xe   : > { %s2670_s22 = smov (!%p588_p2), 112   ;;  %s3223_s0 = sld [smem:[#allocation7_spill]] (!%p588_p2)  ;;  %vm1328_vm4 = vcmask (!%p588_p2), 31744   ;;  %vm1358_vm5 = vcmask (!%p588_p2), 1041408   ;;  %vm1785_vm8 = vcmask (!%p588_p2), 1044480   ;;  %vm1824_vm11 = vcmask (!%p588_p2), 1043456  }
   0xf   : > { %s2672_s23 = smov (!%p588_p2), 96   ;;  %vm1849_vm12 = vcmask (!%p588_p2), 1042432   ;;  %vm1888_vm13 = vcmask (!%p588_p2), 1040384   ;;  %vm1933_vm14 = vcmask (!%p588_p2), 1046528  }
  0x12   : > { %v2602_v14 = vld [vmem:[%s3219_s30] sm:$0xff] (!%p588_p2)   ;;  %v2603_v16 = vld [vmem:[%s3219_s30 + $0x8] sm:$0xff] (!%p588_p2)  }
  0x13   : > { %s3225_s25 = smov (!%p647_p3, %s2308_s25), 1  ;;  %2446 = vmatpush3.bf16.msra.mxu0 %v2602_v14  ;;  %v2317_v25 = vld [vmem:[%s3220_s24] ss:$0 sm:$0xff] }
  0x14   : > { %s2396_s26 = sshll.u32 %s3225_s25, 4  ;;  %2447 = vmatprep.subr.bf16.mxu0 %v2668_v15 }
  0x15   : > { %s651_s29 = scalar_lea.vmem %s3218_s28, %s2396_s26  ;;  %s3221_s28 = sld [smem:[#allocation4_spill]] }
  0x16   : > { %v2799_v0 = vld [vmem:[%s651_s29] sm:$0xff]  ;;  %v2801_v1 = vld [vmem:[%s651_s29 + $0x8] sm:$0xff]  ;;  %s656_s27 = scalar_lea.vmem %s3209_s21, %s2396_s26 }
  0x17   : > { %v663_v2 = vsel %vm662_vm0, %v2799_v0, 0.0  ;;  %v666_v3 = vsel %vm662_vm0, %v2801_v1, 0.0  ;;  %2448 = vmatpush3.bf16.msra.mxu0 %v2603_v16 }
  0x18   : > { %664 = vadd.xlane.f32.xlu0 %v663_v2  ;;  %2465 = vmatprep.subr.bf16.mxu0 %v2668_v15 }
  0x1b   : > { %v2318_v29 = vld [vmem:[%s3221_s28] ss:$0 sm:$0xff]  ;;  %s3222_s28 = sld [smem:[#allocation6_spill]] }
  0x1c   : > { %667 = vadd.xlane.f32.xlu0 %v666_v3 }
  0x21   : > { %v2604_v38 = vld [vmem:[%s3222_s28 + $0x10] sm:$0xff]   ;;  %v2605_v39 = vld [vmem:[%s3222_s28 + $0x18] sm:$0xff]   ;;  %v2606_v50 = vld [vmem:[%s3222_s28] sm:$0xff]  }
  0x22   : > { %v2607_v55 = vld [vmem:[%s3222_s28 + $0x8] sm:$0xff]   ;;  %v2608_v60 = vld [vmem:[%s3222_s28 + $0x20] sm:$0xff]  }
  0x23   : > { %v2609_v62 = vld [vmem:[%s3222_s28 + $0x28] sm:$0xff]  }
  0xa5   : > { %v665_v4 = vpop.xlane.xlu0 %664 }
  0xa6   : > { %v670_v5 = vmul.f32 0.03125, %v665_v4 }
  0xa8   : > { %v672_v6 = vsub.f32 %v2799_v0, %v670_v5 }
  0xa9   : > { %v668_v7 = vpop.xlane.xlu0 %667 }
  0xaa   : > { %v671_v8 = vmul.f32 0.03125, %v668_v7  ;;  %v674_v9 = vmul.f32 %v672_v6, %v672_v6  ;;  %v2611_v7 = vld [vmem:[%s3222_s28 + $0x38] sm:$0xff]  }
  0xac   : > { %v673_v10 = vsub.f32 %v2801_v1, %v671_v8  ;;  %v676_v11 = vsel %vm662_vm0, %v674_v9, 0.0 }
  0xad   : > { %677 = vadd.xlane.f32.xlu1 %v676_v11 }
  0xae   : > { %v675_v12 = vmul.f32 %v673_v10, %v673_v10 }
  0xb0   : > { %v679_v13 = vsel %vm662_vm0, %v675_v12, 0.0 }
  0xb1   : > { %680 = vadd.xlane.f32.xlu1 %v679_v13 }
 0x13a   : > { %v678_v17 = vpop.xlane.xlu1 %677 }
 0x13b   : > { %v682_v18 = vmul.f32 0.03125, %v678_v17 }
 0x13d   : > { %v684_v19 = vadd.f32 1e-05, %v682_v18 }
 0x13e   : > { %v681_v20 = vpop.xlane.xlu1 %680 }
 0x13f   : > { %2622 = vrsqrt.f32 %v684_v19  ;;  %v683_v21 = vmul.f32 0.03125, %v681_v20  ;;  %v2612_v20 = vld [vmem:[%s3195_s7] sm:$0xff]  }
 0x141   : > { %v685_v22 = vadd.f32 1e-05, %v683_v21  ;;  %v2613_v21 = vld [vmem:[%s3195_s7 + $0x8] sm:$0xff]  }
 0x143   : > { %2624 = vrsqrt.f32 %v685_v22 }
 0x149   : > { %v2623_v23 = vpop.eup %2622 }
 0x14a   : > { %v688_v24 = vmul.f32 %v2623_v23, %v672_v6  ;;  %v2610_v6 = vld [vmem:[%s3222_s28 + $0x30] sm:$0xff]  }
 0x14c   : > { %v696_v27 = vmul.f32 %v2317_v25, %v688_v24 }
 0x14d   : > { %v2625_v26 = vpop.eup %2624 }
 0x14e   : > { %v689_v28 = vmul.f32 %v2625_v26, %v673_v10  ;;  %v704_v31 = vadd.f32 %v2318_v29, %v696_v27  ;;  %v2341_v26 = vld [vmem:[%s3223_s0] ss:$0 sm:$0xff] }
 0x150   : > { %v697_v30 = vmul.f32 %v2317_v25, %v689_v28  ;;  %v2342_v28 = vld [vmem:[%s3194_s6] ss:$0 sm:$0xff] }
 0x152   : > { %v705_v32 = vadd.f32 %v2318_v29, %v697_v30 }
 0x154   : > { %v706_v33 = vpack.c.bf16 %v705_v32, %v704_v31 }
 0x156   : > { %2450 = vmatmul.mubr.msk.bf16.vlgmr.msra.gmra.mrb[0].mxu0 %vm662_vm0, %v706_v33  ;;  %2454 = vmatpush3.bf16.msra.mxu1 %v706_v33 }
 0x157   : > { %2459 = vmatprep.subr.bf16.mxu1 %v2668_v15  ;;  %2469 = vmatprep.mubr.msk.bf16.mxu0 %vm2669_vm1, %v2668_v15 }
 0x158   : > { %2466 = vmatpush3.bf16.msra.mxu0 %v2604_v38 }
 0x159   : > { %2456 = vmatmul.mubr.msk.bf16.vlgmr.msra.gmra.mrb[0].mxu1 %vm768_vm2, %v767_v34  ;;  %2467 = vmatprep.subr.bf16.mxu0 %v2668_v15 }
 0x15a   : > { %2460 = vmatpush3.bf16.msra.mxu1 %v706_v33  ;;  %2461 = vmatprep.mubr.msk.bf16.mxu1 %vm2669_vm1, %v2668_v15 }
 0x15b   : > { %2481 = vmatprep.subr.bf16.mxu1 %v2668_v15 }
 0x15c   : > { %2468 = vmatpush3.bf16.msra.mxu0 %v2605_v39 }
 0x15d   : > { %2473 = vmatprep.subr.bf16.mxu0 %v2668_v15 }
 0x161   : > { %2462 = vmatmul.mubr.msk.bf16.vlgmr.msra.gmra.mrb[4].mxu1 %vm768_vm2, %v2323_v35 }
 0x162   : > { %2482 = vmatpush3.bf16.msra.mxu1 %v706_v33  ;;  %2483 = vmatprep.mubr.msk.bf16.mxu1 %vm2669_vm1, %v2668_v15 }
 0x163   : > { %2495 = vmatprep.subr.bf16.mxu1 %v2668_v15 }
 0x169   : > { %2484 = vmatmul.mubr.msk.bf16.vlgmr.msra.gmra.mrb[8].mxu1 %vm768_vm2, %v2331_v36 }
 0x16a   : > { %2496 = vmatpush3.bf16.msra.mxu1 %v706_v33  ;;  %2497 = vmatprep.mubr.msk.bf16.mxu1 %vm2669_vm1, %v2668_v15 }
 0x16b   : > { %2509 = vmatprep.subr.bf16.mxu1 %v2668_v15 }
 0x171   : > { %2498 = vmatmul.mubr.msk.bf16.vlgmr.msra.gmra.mrb[12].mxu1 %vm768_vm2, %v2336_v37 }
 0x172   : > { %2513 = vmatprep.mubr.msk.bf16.mxu1 %vm2669_vm1, %v2668_v15  ;;  %2510 = vmatpush3.bf16.msra.mxu1 %v2612_v20 }
 0x173   : > { %2511 = vmatprep.subr.bf16.mxu1 %v2668_v15 }
 0x176   : > { %2512 = vmatpush3.bf16.msra.mxu1 %v2613_v21 }
 0x177   : > { %2517 = vmatprep.subr.bf16.mxu1 %v2668_v15 }
 0x229   : > { %v760_v40 = vpop.f32.mrb[0].mxu0 }
 0x22a   : > { %v2451_v41 = vpop.f32.mrb[1].mxu0 }
 0x22b   : > { %v763_v42 = vpop.f32.mrb[2].mxu0 }
 0x22c   : > { %v2870_v43 = vpack.c.bf16 %v763_v42, %v760_v40  ;;  %v2452_v44 = vpop.f32.mrb[3].mxu0  ;;  %v806_v45 = vpop.f32.mrb[0].mxu1 }
 0x22d   : > { %v2457_v46 = vpop.f32.mrb[1].mxu1  ;;  %v812_v61 = vpack.c.bf16 %v806_v45, %v806_v45 }
 0x22e   : > { %v809_v47 = vpop.f32.mrb[2].mxu1 }
 0x22f   : > { %v2458_v48 = vpop.f32.mrb[3].mxu1 }
 0x234   : > { %v856_v49 = vpop.f32.mrb[4].mxu1 }
 0x235   : > { %v862_v51 = vpack.c.bf16 %v856_v49, %v856_v49  ;;  %v2463_v52 = vpop.f32.mrb[5].mxu1 }
 0x236   : > { %v859_v53 = vpop.f32.mrb[6].mxu1 }
 0x237   : > { %v2464_v54 = vpop.f32.mrb[7].mxu1  ;;  %2470 = vmatmul.mubr.msk.bf16.vlgmr.msra.gmra.mrb[4].mxu0 %vm662_vm0, %v862_v51 }
 0x238   : > { %2474 = vmatpush3.bf16.msra.mxu0 %v2606_v50  ;;  %2477 = vmatprep.mubr.msk.bf16.mxu0 %vm2669_vm1, %v2668_v15 }
 0x239   : > { %2475 = vmatprep.subr.bf16.mxu0 %v2668_v15 }
 0x23c   : > { %2476 = vmatpush3.bf16.msra.mxu0 %v2607_v55  ;;  %v1016_v56 = vpop.f32.mrb[8].mxu1 }
 0x23d   : > { %2487 = vmatprep.subr.bf16.mxu0 %v2668_v15  ;;  %v2485_v57 = vpop.f32.mrb[9].mxu1  ;;  %v1022_v5 = vpack.c.bf16 %v1016_v56, %v1016_v56 }
 0x23e   : > { %v1019_v58 = vpop.f32.mrb[10].mxu1 }
 0x23f   : > { %v2486_v59 = vpop.f32.mrb[11].mxu1 }
 0x243   : > { %2478 = vmatmul.mubr.msk.bf16.vlgmr.msra.gmra.mrb[4].mxu0 %vm662_vm0, %v812_v61 }
 0x244   : > { %2488 = vmatpush3.bf16.msra.mxu0 %v2608_v60  ;;  %2491 = vmatprep.mubr.msk.bf16.mxu0 %vm2669_vm1, %v2668_v15  ;;  %v1122_v63 = vpop.f32.mrb[12].mxu1 }
 0x245   : > { %2489 = vmatprep.subr.bf16.mxu0 %v2668_v15  ;;  %v2499_v2 = vpop.f32.mrb[13].mxu1  ;;  %v1128_v8 = vpack.c.bf16 %v1122_v63, %v1122_v63 }
 0x246   : > { %v1125_v3 = vpop.f32.mrb[14].mxu1 }
 0x247   : > { %v2500_v4 = vpop.f32.mrb[15].mxu1 }
 0x248   : > { %2490 = vmatpush3.bf16.msra.mxu0 %v2609_v62 }
 0x249   : > { %2501 = vmatprep.subr.bf16.mxu0 %v2668_v15 }
 0x24f   : > { %2492 = vmatmul.mubr.msk.bf16.vlgmr.msra.gmra.mrb[4].mxu0 %vm662_vm0, %v1022_v5 }
 0x250   : > { %2502 = vmatpush3.bf16.msra.mxu0 %v2610_v6  ;;  %2505 = vmatprep.mubr.msk.bf16.mxu0 %vm2669_vm1, %v2668_v15 }
 0x251   : > { %2503 = vmatprep.subr.bf16.mxu0 %v2668_v15 }
 0x254   : > { %2504 = vmatpush3.bf16.msra.mxu0 %v2611_v7 }
 0x255   : > { %2523 = vmatprep.subr.bf16.mxu0 %v2668_v15 }
 0x25b   : > { %2506 = vmatmul.mubr.msk.bf16.vlgmr.msra.gmra.mrb[4].mxu0 %vm662_vm0, %v1128_v8 }
 0x25c   : > { %2525 = vmatprep.mubr.msk.bf16.mxu0 %vm2669_vm1, %v2668_v15 }
 0x32e   : > { %v1182_v9 = vpop.f32.mrb[4].mxu0 }
 0x32f   : > { %v2507_v10 = vpop.f32.mrb[5].mxu0  ;;  %v1192_v11 = vsel %vm1191_vm3, %v1182_v9, 0.0 }
 0x330   : > { %1193 = vadd.xlane.f32.xlu0 %v1192_v11  ;;  %v1185_v12 = vpop.f32.mrb[6].mxu0 }
 0x331   : > { %v2508_v13 = vpop.f32.mrb[7].mxu0 }
 0x3bd   : > { %v1194_v14 = vpop.xlane.xlu0 %1193 }
 0x3be   : > { %v1195_v16 = vmul.f32 0.03125, %v1194_v14 }
 0x3c0   : > { %v1196_v17 = vsub.f32 %v1182_v9, %v1195_v16 }
 0x3c2   : > { %v1197_v18 = vmul.f32 %v1196_v17, %v1196_v17 }
 0x3c4   : > { %v1198_v19 = vsel %vm1191_vm3, %v1197_v18, 0.0 }
 0x3c5   : > { %1199 = vadd.xlane.f32.xlu1 %v1198_v19 }
 0x3d6   : > { %1407 = vrot.lane.b32.xlu1 %v2870_v43, %s2670_s22 }
 0x452   : > { %v1200_v22 = vpop.xlane.xlu1 %1199 }
 0x453   : > { %v1201_v23 = vmul.f32 0.03125, %v1200_v22 }
 0x455   : > { %v1202_v24 = vadd.f32 1e-05, %v1201_v23 }
 0x456   : > { %v1408_v40 = vpop.permute.xlu1 %1407 }
 0x457   : > { %2626 = vrsqrt.f32 %v1202_v24 }
 0x461   : > { %v2627_v25 = vpop.eup %2626 }
 0x462   : > { %v1204_v27 = vmul.f32 %v2627_v25, %v1196_v17 }
 0x464   : > { %v1211_v29 = vmul.f32 %v2341_v26, %v1204_v27 }
 0x466   : > { %v1218_v30 = vadd.f32 %v2342_v28, %v1211_v29 }
 0x468   : > { %v1219_v31 = vpack.c.bf16 %v1218_v30, %v1218_v30  ;;  %v2614_v30 = vld [vmem:[%s3196_s8] sm:$0xff]  }
 0x46a   : > { %2514 = vmatmul.mubr.msk.bf16.vlgmr.msra.gmra.mrb[16].mxu1 %vm662_vm0, %v1219_v31  ;;  %v2615_v31 = vld [vmem:[%s3196_s8 + $0x8] sm:$0xff]  }
 0x46b   : > { %2519 = vmatprep.mubr.msk.bf16.mxu1 %vm2669_vm1, %v2668_v15 }
 0x53d   : > { %v1273_v32 = vpop.f32.mrb[16].mxu1 }
 0x53e   : > { %v2926_v33 = vpack.c.bf16 %v1273_v32, %v1273_v32  ;;  %v2515_v34 = vpop.f32.mrb[17].mxu1 }
 0x53f   : > { %v1276_v35 = vpop.f32.mrb[18].mxu1 }
 0x540   : > { %1409 = vrot.lane.b32.xlu0 %v2926_v33, %s2670_s22  ;;  %v2516_v36 = vpop.f32.mrb[19].mxu1  ;;  %v1285_v37 = vsel %vm768_vm2, %v2926_v33, 0  ;;  %s2671_s22 = smov 80  }
 0x541   : > { %2518 = vmatpush3.bf16.xpose.msra.mxu1 %v1285_v37 }
 0x542   : > { %2529 = vmatprep.subr.bf16.mxu1 %v2668_v15 }
 0x548   : > { %2520 = vmatmul.mubr.msk.bf16.vlgmr.msra.gmra.mrb[20].mxu1 %vm768_vm2, %v2870_v43 }
 0x549   : > { %2531 = vmatprep.mubr.msk.bf16.mxu1 %vm2669_vm1, %v2668_v15 }
 0x5b2   : > { %v1410_v38 = vpop.permute.xlu0 %1409 }
 0x5b3   : > { %v1415_v39 = vsel %vm768_vm2, %v1410_v38, 0 }
 0x5b4   : > { %2530 = vmatpush3.bf16.xpose.msra.mxu1 %v1415_v39 }
 0x5b5   : > { %2541 = vmatprep.subr.bf16.mxu1 %v2668_v15 }
 0x5bb   : > { %2532 = vmatmul.mubr.msk.bf16.vlgmr.msra.gmra.mrb[24].mxu1 %vm768_vm2, %v1408_v40 }
 0x5bc   : > { %2543 = vmatprep.mubr.msk.bf16.mxu1 %vm2669_vm1, %v2668_v15  ;;  %2542 = vmatpush3.bf16.msra.mxu1 %v2615_v31 }
 0x5bd   : > { %2553 = vmatprep.subr.bf16.mxu1 %v2668_v15 }
 0x61b   : > { %v1321_v41 = vpop.f32.mrb[20].mxu1 }
 0x61c   : > { %v2521_v42 = vpop.f32.mrb[21].mxu1  ;;  %v1329_v43 = vsel %vm1328_vm4, %v1321_v41, -inf }
 0x61d   : > { %1330 = vmax.xlane.f32.xlu1 %v1329_v43  ;;  %v1324_v44 = vpop.f32.mrb[22].mxu1 }
 0x61e   : > { %v2522_v45 = vpop.f32.mrb[23].mxu1  ;;  %v1332_v46 = vsel %vm1328_vm4, %v1324_v44, -inf }
 0x61f   : > { %1333 = vmax.xlane.f32.xlu0 %v1332_v46 }
 0x68e   : > { %v1451_v47 = vpop.f32.mrb[24].mxu1 }
 0x68f   : > { %v2533_v48 = vpop.f32.mrb[25].mxu1  ;;  %v1458_v49 = vsel %vm1328_vm4, %v1451_v47, -inf }
 0x690   : > { %1459 = vmax.xlane.f32.xlu0 %v1458_v49  ;;  %v1454_v50 = vpop.f32.mrb[26].mxu1  ;;  %v2354_v49 = vld [vmem:[%s3197_s9] ss:$0 sm:$0xff] }
 0x691   : > { %v2534_v51 = vpop.f32.mrb[27].mxu1  ;;  %v1461_v52 = vsel %vm1328_vm4, %v1454_v50, -inf }
 0x692   : > { %1462 = vmax.xlane.f32.xlu1 %v1461_v52 }
 0x6aa   : > { %v1331_v53 = vpop.xlane.xlu1 %1330 }
 0x6ab   : > { %v1335_v54 = vsub.f32 %v1321_v41, %v1331_v53 }
 0x6ac   : > { %v1334_v55 = vpop.xlane.xlu0 %1333 }
 0x6ad   : > { %v1337_v56 = vmul.f32 1.442695, %v1335_v54  ;;  %v1336_v57 = vsub.f32 %v1324_v44, %v1334_v55 }
 0x6af   : > { %2628 = vpow2.f32 %v1337_v56  ;;  %v1339_v58 = vmul.f32 1.442695, %v1336_v57 }
 0x6b1   : > { %2630 = vpow2.f32 %v1339_v58 }
 0x6b9   : > { %v2629_v59 = vpop.eup %2628 }
 0x6ba   : > { %v1341_v60 = vsel %vm1328_vm4, %v2629_v59, 0.0 }
 0x6bb   : > { %v2631_v61 = vpop.eup %2630  ;;  %1342 = vadd.xlane.f32.xlu0 %v1341_v60 }
 0x6bc   : > { %v1344_v62 = vsel %vm1328_vm4, %v2631_v61, 0.0 }
 0x6bd   : > { %1345 = vadd.xlane.f32.xlu1 %v1344_v62 }
 0x71d   : > { %v1460_v63 = vpop.xlane.xlu0 %1459 }
 0x71e   : > { %v1464_v2 = vsub.f32 %v1451_v47, %v1460_v63 }
 0x71f   : > { %v1463_v3 = vpop.xlane.xlu1 %1462 }
 0x720   : > { %v1466_v4 = vmul.f32 1.442695, %v1464_v2  ;;  %v1465_v5 = vsub.f32 %v1454_v50, %v1463_v3 }
 0x722   : > { %2632 = vpow2.f32 %v1466_v4  ;;  %v1468_v6 = vmul.f32 1.442695, %v1465_v5  ;;  %v2616_v5 = vld [vmem:[%s3200_s12] sm:$0xff]  }
 0x724   : > { %2634 = vpow2.f32 %v1468_v6  ;;  %v2617_v6 = vld [vmem:[%s3200_s12 + $0x8] sm:$0xff]  }
 0x72c   : > { %v2633_v7 = vpop.eup %2632 }
 0x72d   : > { %v1470_v8 = vsel %vm1328_vm4, %v2633_v7, 0.0 }
 0x72e   : > { %v2635_v9 = vpop.eup %2634  ;;  %1471 = vadd.xlane.f32.xlu0 %v1470_v8 }
 0x72f   : > { %v1473_v10 = vsel %vm1328_vm4, %v2635_v9, 0.0 }
 0x730   : > { %1474 = vadd.xlane.f32.xlu1 %v1473_v10 }
 0x741   : > { %1481 = vrot.lane.b32.xlu1 %v2926_v33, %s2671_s22 }
 0x744   : > { %1353 = vrot.lane.b32.xlu0 %v2926_v33, %s2672_s23 }
 0x748   : > { %v1343_v12 = vpop.xlane.xlu0 %1342 }
 0x74a   : > { %v1346_v11 = vpop.xlane.xlu1 %1345 }
 0x74b   : > { %2636 = vrcp.f32 %v1346_v11 }
 0x74c   : > { %2638 = vrcp.f32 %v1343_v12 }
 0x755   : > { %v2637_v13 = vpop.eup %2636 }
 0x756   : > { %v2639_v16 = vpop.eup %2638  ;;  %v1350_v18 = vmul.f32 %v2637_v13, %v2631_v61 }
 0x757   : > { %v1349_v20 = vmul.f32 %v2639_v16, %v2629_v59 }
 0x759   : > { %v1351_v23 = vpack.c.bf16 %v1350_v18, %v1349_v20  ;;  %v2356_v20 = vld [vmem:[%s3199_s11] ss:$0 sm:$0xff] }
 0x7bb   : > { %v1472_v14 = vpop.xlane.xlu0 %1471 }
 0x7bc   : > { %2640 = vrcp.f32 %v1472_v14  ;;  %v2355_v14 = vld [vmem:[%s3198_s10] ss:$0 sm:$0xff] }
 0x7bd   : > { %v1475_v17 = vpop.xlane.xlu1 %1474 }
 0x7be   : > { %2642 = vrcp.f32 %v1475_v17 }
 0x7bf   : > { %v1354_v19 = vpop.permute.xlu0 %1353 }
 0x7c0   : > { %v1360_v21 = vsel %vm1358_vm5, %v1354_v19, 0 }
 0x7c1   : > { %2524 = vmatpush3.bf16.msra.mxu0 %v1360_v21  ;;  %v1482_v22 = vpop.permute.xlu1 %1481 }
 0x7c2   : > { %2535 = vmatprep.subr.bf16.mxu0 %v2668_v15  ;;  %v1487_v24 = vsel %vm1358_vm5, %v1482_v22, 0 }
 0x7c4   : > { %2526 = vmatmul.mubr.msk.bf16.vlgmr.msra.gmra.mrb[8].mxu0 %vm1328_vm4, %v1351_v23 }
 0x7c5   : > { %2536 = vmatpush3.bf16.msra.mxu0 %v1487_v24  ;;  %2537 = vmatprep.mubr.msk.bf16.mxu0 %vm2669_vm1, %v2668_v15 }
 0x7c6   : > { %v2641_v25 = vpop.eup %2640  ;;  %2547 = vmatprep.subr.bf16.mxu0 %v2668_v15 }
 0x7c7   : > { %v1478_v27 = vmul.f32 %v2641_v25, %v2633_v7  ;;  %v2618_v25 = vld [vmem:[%s3204_s16 + $0x10] sm:$0xff]  }
 0x7c8   : > { %v2643_v26 = vpop.eup %2642 }
 0x7c9   : > { %v1479_v28 = vmul.f32 %v2643_v26, %v2635_v9  ;;  %v2619_v26 = vld [vmem:[%s3204_s16] sm:$0xff]  }
 0x7cb   : > { %v1480_v29 = vpack.c.bf16 %v1479_v28, %v1478_v27  ;;  %v2620_v27 = vld [vmem:[%s3204_s16 + $0x18] sm:$0xff]   ;;  %v2621_v28 = vld [vmem:[%s3204_s16 + $0x8] sm:$0xff]  }
 0x7cd   : > { %2538 = vmatmul.mubr.msk.bf16.vlgmr.msra.gmra.mrb[12].mxu0 %vm1328_vm4, %v1480_v29  ;;  %v1756_v29 = vlaneseq }
 0x7ce   : > { %2549 = vmatprep.mubr.msk.bf16.mxu0 %vm2669_vm1, %v2668_v15  ;;  %2548 = vmatpush3.bf16.msra.mxu0 %v2614_v30 }
 0x7cf   : > { %2561 = vmatprep.subr.bf16.mxu0 %v2668_v15  ;;  %v1757_v30 = vshrl.u32 %v1756_v29, 7 }
 0x7d1   : > { %v1758_v31 = vadd.s32 8, %v1757_v30 }
 0x897   : > { %v1396_v32 = vpop.f32.mrb[8].mxu0 }
 0x898   : > { %v2527_v33 = vpop.f32.mrb[9].mxu0 }
 0x899   : > { %v1399_v34 = vpop.f32.mrb[10].mxu0  ;;  %v1770_v33 = vand.u32 3, %v1758_v31 }
 0x89a   : > { %v1403_v35 = vpack.c.bf16 %v1399_v34, %v1396_v32  ;;  %v2528_v36 = vpop.f32.mrb[11].mxu0  ;;  %v1763_v32 = vand.u32 3, %v1757_v30 }
 0x89b   : > { %v1793_v36 = vadd.s32 4294967295, %v1770_v33 }
 0x89c   : > { %2550 = vmatmul.mubr.msk.bf16.vlgmr.msra.gmra.mrb[16].mxu0 %vm768_vm2, %v1403_v35  ;;  %v1792_v34 = vadd.s32 4294967295, %v1763_v32  ;;  %v1856_v35 = vadd.s32 1, %v1763_v32 }
 0x89d   : > { %2565 = vmatprep.mubr.msk.bf16.mxu0 %vm2669_vm1, %v2668_v15  ;;  %2562 = vmatpush3.bf16.msra.mxu0 %v2618_v25  ;;  %vm1795_vm9 = vcmp.ge.s32.totalorder %v1793_v36, 0 }
 0x89e   : > { %2563 = vmatprep.subr.bf16.mxu0 %v2668_v15  ;;  %vm1794_vm6 = vcmp.ge.s32.totalorder %v1792_v34, 0  ;;  %vm1860_vm7 = vcmp.lt.s32.totalorder %v1856_v35, 4 }
 0x8a0   : > { %v1523_v37 = vpop.f32.mrb[12].mxu0 }
 0x8a1   : > { %v2539_v38 = vpop.f32.mrb[13].mxu0  ;;  %2564 = vmatpush3.bf16.msra.mxu0 %v2620_v27 }
 0x8a2   : > { %v1526_v39 = vpop.f32.mrb[14].mxu0  ;;  %v2357_v38 = vld [vmem:[%s3201_s13] ss:$0 sm:$0xff] }
 0x8a3   : > { %v1530_v40 = vpack.c.bf16 %v1526_v39, %v1523_v37  ;;  %v2540_v41 = vpop.f32.mrb[15].mxu0  ;;  %v1857_v37 = vadd.s32 1, %v1770_v33 }
 0x8a4   : > { %v3030_v41 = vld [vmem:[%s3202_s14 + $0xd] ss:$0 sm:$0xff] }
 0x8a5   : > { %2544 = vmatmul.mubr.msk.bf16.vlgmr.msra.gmra.mrb[28].mxu1 %vm768_vm2, %v1530_v40  ;;  %vm1861_vm10 = vcmp.lt.s32.totalorder %v1857_v37, 4  ;;  %v2373_v40 = vld [vmem:[%s3202_s14 + $0x4] ss:$0 sm:$0xff] }
 0x8a6   : > { %2557 = vmatprep.mubr.msk.bf16.mxu1 %vm2669_vm1, %v2668_v15  ;;  %2554 = vmatpush3.bf16.msra.mxu1 %v2616_v5 }
 0x8a7   : > { %2555 = vmatprep.subr.bf16.mxu1 %v2668_v15 }
 0x8aa   : > { %2556 = vmatpush3.bf16.msra.mxu1 %v2617_v6 }
 0x8ab   : > { %2569 = vmatprep.subr.bf16.mxu1 %v2668_v15 }
 0x96f   : > { %v1626_v42 = vpop.f32.mrb[16].mxu0 }
 0x970   : > { %v2551_v43 = vpop.f32.mrb[17].mxu0 }
 0x971   : > { %v1629_v44 = vpop.f32.mrb[18].mxu0  ;;  %v3035_v43 = vsel %vm1794_vm6, 1.0, %v2668_v15 }
 0x972   : > { %v2552_v45 = vpop.f32.mrb[19].mxu0 }
 0x973   : > { %v3041_v45 = vsel %vm1860_vm7, 1.0, %v2668_v15 }
 0x978   : > { %v1576_v46 = vpop.f32.mrb[28].mxu1 }
 0x979   : > { %v1627_v47 = vadd.f32 %v1626_v42, %v1576_v46  ;;  %v2545_v48 = vpop.f32.mrb[29].mxu1 }
 0x97a   : > { %v1579_v50 = vpop.f32.mrb[30].mxu1 }
 0x97b   : > { %v1633_v51 = vadd.f32 %v1627_v47, %v2799_v0  ;;  %v1630_v52 = vadd.f32 %v1629_v44, %v1579_v50  ;;  %v2546_v53 = vpop.f32.mrb[31].mxu1  ;;  %v2365_v44 = vld [vmem:[%s3202_s14 + $0x1] ss:$0 sm:$0xff]  ;;  %v2366_v47 = vld [vmem:[%s3202_s14 + $0xa] ss:$0 sm:$0xff]  ;;  %v3050_v50 = vsel %vm1861_vm10, 1.0, %v2668_v15 }
 0x97d   : > { %v2977_v54 = vadd.f32 %v2354_v49, %v1633_v51  ;;  %v1634_v55 = vadd.f32 %v1630_v52, %v2801_v1  ;;  %v2363_v52 = vld [vmem:[%s3202_s14] ss:$0 sm:$0xff] }
 0x97f   : > { %v2980_v56 = vadd.f32 %v2354_v49, %v1634_v55  ;;  %v1646_v57 = vsel %vm662_vm0, %v2977_v54, 0.0  ;;  %v3047_v49 = vsel %vm1795_vm9, 1.0, %v2668_v15 }
 0x980   : > { %1647 = vadd.xlane.f32.xlu1 %v1646_v57 }
 0x981   : > { %v1649_v58 = vsel %vm662_vm0, %v2980_v56, 0.0 }
 0x982   : > { %1650 = vadd.xlane.f32.xlu0 %v1649_v58 }
 0xa0d   : > { %v1648_v59 = vpop.xlane.xlu1 %1647 }
 0xa0e   : > { %v1652_v60 = vmul.f32 0.03125, %v1648_v59  ;;  %v2364_v59 = vld [vmem:[%s3202_s14 + $0x9] ss:$0 sm:$0xff] }
 0xa0f   : > { %v1651_v61 = vpop.xlane.xlu0 %1650 }
 0xa10   : > { %v1654_v0 = vsub.f32 %v2977_v54, %v1652_v60  ;;  %v1653_v62 = vmul.f32 0.03125, %v1651_v61 }
 0xa12   : > { %v1655_v63 = vsub.f32 %v2980_v56, %v1653_v62  ;;  %v1656_v2 = vmul.f32 %v1654_v0, %v1654_v0 }
 0xa14   : > { %v1658_v1 = vsel %vm662_vm0, %v1656_v2, 0.0  ;;  %v1657_v3 = vmul.f32 %v1655_v63, %v1655_v63 }
 0xa15   : > { %1659 = vadd.xlane.f32.xlu0 %v1658_v1 }
 0xa16   : > { %v1661_v4 = vsel %vm662_vm0, %v1657_v3, 0.0  ;;  %v2370_v3 = vld [vmem:[%s3202_s14 + $0xb] ss:$0 sm:$0xff] }
 0xa17   : > { %1662 = vadd.xlane.f32.xlu1 %v1661_v4 }
 0xaa2   : > { %v1660_v7 = vpop.xlane.xlu0 %1659 }
 0xaa3   : > { %v1664_v8 = vmul.f32 0.03125, %v1660_v7 }
 0xaa4   : > { %v1663_v9 = vpop.xlane.xlu1 %1662 }
 0xaa5   : > { %v1666_v10 = vadd.f32 1e-05, %v1664_v8  ;;  %v1665_v11 = vmul.f32 0.03125, %v1663_v9  ;;  %v2371_v9 = vld [vmem:[%s3202_s14 + $0x3] ss:$0 sm:$0xff] }
 0xaa7   : > { %2644 = vrsqrt.f32 %v1666_v10  ;;  %v1667_v12 = vadd.f32 1e-05, %v1665_v11  ;;  %v2372_v10 = vld [vmem:[%s3202_s14 + $0xc] ss:$0 sm:$0xff] }
 0xaa9   : > { %2646 = vrsqrt.f32 %v1667_v12 }
 0xab1   : > { %v2645_v13 = vpop.eup %2644 }
 0xab2   : > { %v1670_v16 = vmul.f32 %v2645_v13, %v1654_v0 }
 0xab3   : > { %v2647_v17 = vpop.eup %2646 }
 0xab4   : > { %v1678_v18 = vmul.f32 %v2355_v14, %v1670_v16  ;;  %v1671_v19 = vmul.f32 %v2647_v17, %v1655_v63 }
 0xab6   : > { %v1679_v21 = vmul.f32 %v2355_v14, %v1671_v19  ;;  %v1686_v22 = vadd.f32 %v2356_v20, %v1678_v18 }
 0xab8   : > { %v1687_v23 = vadd.f32 %v2356_v20, %v1679_v21 }
 0xaba   : > { %v1688_v24 = vpack.c.bf16 %v1687_v23, %v1686_v22 }
 0xabc   : > { %2558 = vmatmul.mubr.msk.bf16.vlgmr.msra.gmra.mrb[32].mxu1 %vm662_vm0, %v1688_v24 }
 0xabd   : > { %2573 = vmatprep.mubr.msk.bf16.mxu1 %vm2669_vm1, %v2668_v15  ;;  %2570 = vmatpush3.bf16.msra.mxu1 %v2619_v26 }
 0xabe   : > { %2571 = vmatprep.subr.bf16.mxu1 %v2668_v15  ;;  %v2369_v15 = vld [vmem:[%s3202_s14 + $0x2] ss:$0 sm:$0xff] }
 0xac1   : > { %2572 = vmatpush3.bf16.msra.mxu1 %v2621_v28 }
 0xb8f   : > { %v1749_v39 = vpop.f32.mrb[32].mxu1 }
 0xb90   : > { %v3032_v42 = vadd.f32 %v2357_v38, %v1749_v39  ;;  %v2559_v46 = vpop.f32.mrb[33].mxu1 }
 0xb91   : > { %v1752_v48 = vpop.f32.mrb[34].mxu1 }
 0xb92   : > { %v1786_v51 = vrot.slane %v3032_v42, 3  ;;  %v1825_v53 = vrot.slane %v3032_v42, 4  ;;  %v1850_v55 = vrot.slane %v3032_v42, 5  ;;  %v1889_v57 = vrot.slane %v3032_v42, 7  ;;  %v2560_v58 = vpop.f32.mrb[35].mxu1 }
 0xb93   : > { %v1920_v60 = vmul.f32 %v2373_v40, %v3032_v42  ;;  %v1929_v61 = vmul.f32 %v3030_v41, %v3032_v42  ;;  %v1934_v0 = vrot.slane %v3032_v42, 1  ;;  %v3069_v62 = vadd.f32 %v2357_v38, %v1752_v48 }
 0xb94   : > { %v1791_v63 = vsel %vm1785_vm8, 0.0, %v1786_v51  ;;  %v1830_v2 = vsel %vm1824_vm11, 0.0, %v1825_v53  ;;  %v1855_v1 = vsel %vm1849_vm12, 0.0, %v1850_v55  ;;  %v1894_v4 = vsel %vm1888_vm13, 0.0, %v1889_v57 }
 0xb95   : > { %v1804_v5 = vmul.f32 %v3035_v43, %v1791_v63  ;;  %v1836_v6 = vmul.f32 %v2365_v44, %v1830_v2  ;;  %v1845_v7 = vmul.f32 %v2366_v47, %v1830_v2  ;;  %v1868_v8 = vmul.f32 %v3041_v45, %v1855_v1 }
 0xb96   : > { %v1895_v11 = vmul.f32 %v3035_v43, %v1894_v4  ;;  %v1787_v12 = vrot.slane %v3069_v62, 3  ;;  %v1826_v13 = vrot.slane %v3069_v62, 4  ;;  %v1851_v14 = vrot.slane %v3069_v62, 5 }
 0xb97   : > { %v1811_v16 = vmul.f32 %v2363_v52, %v1804_v5  ;;  %v1820_v17 = vmul.f32 %v2364_v59, %v1804_v5  ;;  %v1875_v18 = vmul.f32 %v2369_v15, %v1868_v8  ;;  %v1884_v19 = vmul.f32 %v2370_v3, %v1868_v8 }
 0xb98   : > { %v1902_v20 = vmul.f32 %v2371_v9, %v1895_v11  ;;  %v1911_v21 = vmul.f32 %v2372_v10, %v1895_v11  ;;  %v1788_v22 = vsel %vm1785_vm8, %v1786_v51, %v1787_v12  ;;  %v3094_v23 = vsel %vm1824_vm11, %v1825_v53, %v1826_v13  ;;  %v2375_v53 = vld [vmem:[%s3202_s14 + $0x5] ss:$0 sm:$0xff] }
 0xb99   : > { %v1838_v24 = vadd.f32 %v1836_v6, %v1811_v16  ;;  %v1847_v25 = vadd.f32 %v1845_v7, %v1820_v17  ;;  %v1805_v26 = vmul.f32 %v3047_v49, %v1788_v22  ;;  %v1837_v27 = vmul.f32 %v2365_v44, %v3094_v23  ;;  %v2377_v6 = vld [vmem:[%s3202_s14 + $0x6] ss:$0 sm:$0xff] }
 0xb9a   : > { %v1846_v28 = vmul.f32 %v2366_v47, %v3094_v23  ;;  %v3102_v29 = vsel %vm1849_vm12, %v1850_v55, %v1851_v14  ;;  %v1890_v30 = vrot.slane %v3069_v62, 7  ;;  %v1921_v31 = vmul.f32 %v2373_v40, %v3069_v62 }
 0xb9b   : > { %v1877_v32 = vadd.f32 %v1875_v18, %v1838_v24  ;;  %v1886_v33 = vadd.f32 %v1884_v19, %v1847_v25  ;;  %v1812_v34 = vmul.f32 %v2363_v52, %v1805_v26  ;;  %v1821_v35 = vmul.f32 %v2364_v59, %v1805_v26 }
 0xb9c   : > { %v1869_v36 = vmul.f32 %v3050_v50, %v3102_v29  ;;  %v1891_v37 = vsel %vm1888_vm13, %v1889_v57, %v1890_v30  ;;  %v1930_v38 = vmul.f32 %v3030_v41, %v3069_v62  ;;  %v1935_v39 = vrot.slane %v3069_v62, 1  ;;  %v2376_v41 = vld [vmem:[%s3202_s14 + $0xe] ss:$0 sm:$0xff] }
 0xb9d   : > { %v1904_v42 = vadd.f32 %v1902_v20, %v1877_v32  ;;  %v1913_v44 = vadd.f32 %v1911_v21, %v1886_v33  ;;  %v1839_v46 = vadd.f32 %v1837_v27, %v1812_v34  ;;  %v1848_v47 = vadd.f32 %v1846_v28, %v1821_v35  ;;  %v2381_v35 = vld [vmem:[%s3202_s14 + $0x8] ss:$0 sm:$0xff] }
 0xb9e   : > { %v1876_v48 = vmul.f32 %v2369_v15, %v1869_v36  ;;  %v1885_v40 = vmul.f32 %v2370_v3, %v1869_v36  ;;  %v1896_v51 = vmul.f32 %v3047_v49, %v1891_v37  ;;  %v1936_v52 = vsel %vm1933_vm14, %v1934_v0, %v1935_v39 }
 0xb9f   : > { %v1922_v55 = vadd.f32 %v1920_v60, %v1904_v42  ;;  %v1931_v57 = vadd.f32 %v1929_v61, %v1913_v44  ;;  %v1939_v58 = vsel %vm1933_vm14, %v1935_v39, 0.0  ;;  %v1940_v59 = vmul.f32 %v3041_v45, %v1936_v52 }
 0xba0   : > { %v1878_v15 = vadd.f32 %v1876_v48, %v1839_v46  ;;  %v1887_v63 = vadd.f32 %v1885_v40, %v1848_v47  ;;  %v1903_v2 = vmul.f32 %v2371_v9, %v1896_v51  ;;  %v1912_v1 = vmul.f32 %v2372_v10, %v1896_v51  ;;  %v2378_v9 = vld [vmem:[%s3202_s14 + $0xf] ss:$0 sm:$0xff]  ;;  %v2379_v10 = vld [vmem:[%s3202_s14 + $0x7] ss:$0 sm:$0xff]  ;;  %v2384_v40 = vld [vmem:[%s3203_s15 + $0x1] ss:$0 sm:$0xff] }
 0xba1   : > { %v1941_v0 = vmul.f32 %v3050_v50, %v1939_v58  ;;  %v1947_v3 = vmul.f32 %v2375_v53, %v1940_v59  ;;  %v1956_v4 = vmul.f32 %v2376_v41, %v1940_v59  ;;  %v1961_v5 = vsel %vm1785_vm8, %v1787_v12, 0.0  ;;  %v2383_v51 = vld [vmem:[%s3203_s15] ss:$0 sm:$0xff] }
 0xba2   : > { %v1905_v60 = vadd.f32 %v1903_v2, %v1878_v15  ;;  %v1914_v61 = vadd.f32 %v1912_v1, %v1887_v63  ;;  %v1962_v7 = vmul.f32 %v3035_v43, %v1788_v22  ;;  %v1963_v8 = vmul.f32 %v3047_v49, %v1961_v5  ;;  %v2380_v43 = vld [vmem:[%s3202_s14 + $0x10] ss:$0 sm:$0xff] }
 0xba3   : > { %v1948_v11 = vmul.f32 %v2375_v53, %v1941_v0  ;;  %v1949_v12 = vadd.f32 %v1947_v3, %v1922_v55  ;;  %v1957_v16 = vmul.f32 %v2376_v41, %v1941_v0  ;;  %v1958_v17 = vadd.f32 %v1956_v4, %v1931_v57 }
 0xba4   : > { %v1923_v18 = vadd.f32 %v1921_v31, %v1905_v60  ;;  %v1932_v19 = vadd.f32 %v1930_v38, %v1914_v61  ;;  %v1969_v20 = vmul.f32 %v2377_v6, %v1962_v7  ;;  %v1970_v21 = vmul.f32 %v2377_v6, %v1963_v8 }
 0xba5   : > { %v1978_v49 = vmul.f32 %v2378_v9, %v1962_v7  ;;  %v1979_v22 = vmul.f32 %v2378_v9, %v1963_v8  ;;  %v1983_v24 = vsel %vm1824_vm11, %v1826_v13, 0.0  ;;  %v1989_v25 = vmul.f32 %v2379_v10, %v3094_v23  ;;  %v2382_v13 = vld [vmem:[%s3202_s14 + $0x11] ss:$0 sm:$0xff] }
 0xba6   : > { %v1950_v26 = vadd.f32 %v1948_v11, %v1923_v18  ;;  %v1959_v27 = vadd.f32 %v1957_v16, %v1932_v19  ;;  %v1971_v28 = vadd.f32 %v1969_v20, %v1949_v12  ;;  %v1990_v30 = vmul.f32 %v2379_v10, %v1983_v24 }
 0xba7   : > { %v1980_v31 = vadd.f32 %v1978_v49, %v1958_v17  ;;  %v1998_v32 = vmul.f32 %v2380_v43, %v3094_v23  ;;  %v1999_v33 = vmul.f32 %v2380_v43, %v1983_v24  ;;  %v2003_v34 = vsel %vm1849_vm12, %v1851_v14, 0.0 }
 0xba8   : > { %v1972_v36 = vadd.f32 %v1970_v21, %v1950_v26  ;;  %v1981_v37 = vadd.f32 %v1979_v22, %v1959_v27  ;;  %v1991_v38 = vadd.f32 %v1989_v25, %v1971_v28  ;;  %v2004_v39 = vmul.f32 %v3041_v45, %v3102_v29 }
 0xba9   : > { %v2000_v23 = vadd.f32 %v1998_v32, %v1980_v31  ;;  %v2005_v42 = vmul.f32 %v3050_v50, %v2003_v34 }
 0xbaa   : > { %v1992_v62 = vadd.f32 %v1990_v30, %v1972_v36  ;;  %v2001_v44 = vadd.f32 %v1999_v33, %v1981_v37  ;;  %v2011_v14 = vmul.f32 %v2381_v35, %v2004_v39  ;;  %v2020_v46 = vmul.f32 %v2382_v13, %v2004_v39 }
 0xbab   : > { %v2012_v47 = vmul.f32 %v2381_v35, %v2005_v42  ;;  %v2021_v48 = vmul.f32 %v2382_v13, %v2005_v42 }
 0xbac   : > { %v2022_v52 = vadd.f32 %v2020_v46, %v2000_v23  ;;  %v2013_v53 = vadd.f32 %v2011_v14, %v1991_v38 }
 0xbad   : > { %v2023_v45 = vadd.f32 %v2021_v48, %v2001_v44  ;;  %v2014_v29 = vadd.f32 %v2012_v47, %v1992_v62  ;;  %v2391_v62 = vld [vmem:[%s3205_s17] ss:$0 sm:$0xff] }
 0xbae   : > { %v2059_v41 = vadd.f32 %v2384_v40, %v2022_v52  ;;  %v2029_v50 = vadd.f32 %v2383_v51, %v2013_v53 }
 0xbaf   : > { %v2060_v55 = vadd.f32 %v2384_v40, %v2023_v45  ;;  %v2030_v57 = vadd.f32 %v2383_v51, %v2014_v29 }
 0xbb0   : > { %v2063_v58 = vmul.f32 0.044715, %v2059_v41  ;;  %v2033_v59 = vmul.f32 0.044715, %v2029_v50  ;;  %v2061_v21 = vmul.f32 0.5, %v2059_v41  ;;  %v2031_v24 = vmul.f32 0.5, %v2029_v50 }
 0xbb1   : > { %v2064_v15 = vmul.f32 0.044715, %v2060_v55  ;;  %v2034_v63 = vmul.f32 0.044715, %v2030_v57  ;;  %v2062_v43 = vmul.f32 0.5, %v2060_v55  ;;  %v2032_v28 = vmul.f32 0.5, %v2030_v57 }
 0xbb2   : > { %v2065_v2 = vmul.f32 %v2063_v58, %v2059_v41  ;;  %v2035_v1 = vmul.f32 %v2033_v59, %v2029_v50 }
 0xbb3   : > { %v2066_v0 = vmul.f32 %v2064_v15, %v2060_v55  ;;  %v2036_v3 = vmul.f32 %v2034_v63, %v2030_v57 }
 0xbb4   : > { %v2067_v4 = vmul.f32 %v2065_v2, %v2059_v41  ;;  %v2037_v5 = vmul.f32 %v2035_v1, %v2029_v50 }
 0xbb5   : > { %v2068_v6 = vmul.f32 %v2066_v0, %v2060_v55  ;;  %v2038_v60 = vmul.f32 %v2036_v3, %v2030_v57 }
 0xbb6   : > { %v2069_v61 = vadd.f32 %v2067_v4, %v2059_v41  ;;  %v2039_v7 = vadd.f32 %v2037_v5, %v2029_v50  ;;  %v2392_v4 = vld [vmem:[%s3207_s19] ss:$0 sm:$0xff] }
 0xbb7   : > { %v2070_v8 = vadd.f32 %v2068_v6, %v2060_v55  ;;  %v2040_v9 = vadd.f32 %v2038_v60, %v2030_v57  ;;  %v2393_v60 = vld [vmem:[%s3208_s20] ss:$0 sm:$0xff] }
 0xbb8   : > { %v2071_v10 = vmul.f32 0.7978846, %v2069_v61  ;;  %v2041_v11 = vmul.f32 0.7978846, %v2039_v7 }
 0xbb9   : > { %v2072_v12 = vmul.f32 0.7978846, %v2070_v8  ;;  %v2042_v16 = vmul.f32 0.7978846, %v2040_v9 }
 0xbba   : > { %2648 = vtanh.f32 %v2071_v10 }
 0xbbb   : > { %2650 = vtanh.f32 %v2072_v12 }
 0xbbc   : > { %2652 = vtanh.f32 %v2041_v11 }
 0xbbd   : > { %2654 = vtanh.f32 %v2042_v16 }
 0xbc4   : > { %v2649_v17 = vpop.eup %2648 }
 0xbc5   : > { %v2651_v18 = vpop.eup %2650  ;;  %v2075_v19 = vadd.f32 1.0, %v2649_v17 }
 0xbc6   : > { %v2653_v20 = vpop.eup %2652  ;;  %v2076_v49 = vadd.f32 1.0, %v2651_v18 }
 0xbc7   : > { %v2655_v22 = vpop.eup %2654  ;;  %v2045_v25 = vadd.f32 1.0, %v2653_v20  ;;  %v2077_v26 = vmul.f32 %v2075_v19, %v2061_v21 }
 0xbc8   : > { %v2078_v27 = vmul.f32 %v2076_v49, %v2062_v43  ;;  %v2046_v30 = vadd.f32 1.0, %v2655_v22 }
 0xbc9   : > { %v2047_v32 = vmul.f32 %v2045_v25, %v2031_v24 }
 0xbca   : > { %v2079_v31 = vpack.c.bf16 %v2078_v27, %v2077_v26  ;;  %v2048_v33 = vmul.f32 %v2046_v30, %v2032_v28 }
 0xbcc   : > { %2566 = vmatmul.mubr.msk.bf16.vlgmr.msra.gmra.mrb[20].mxu0 %vm662_vm0, %v2079_v31  ;;  %v2049_v34 = vpack.c.bf16 %v2048_v33, %v2047_v32 }
 0xbce   : > { %2574 = vmatmul.mubr.msk.bf16.vlgmr.msra.gmra.mrb[36].mxu1 %vm662_vm0, %v2049_v34 }
 0xc9f   : > { %v2133_v35 = vpop.f32.mrb[20].mxu0 }
 0xca0   : > { %v2567_v13 = vpop.f32.mrb[21].mxu0 }
 0xca1   : > { %v2189_v36 = vpop.f32.mrb[36].mxu1  ;;  %v2136_v37 = vpop.f32.mrb[22].mxu0 }
 0xca2   : > { %v2190_v38 = vadd.f32 %v2189_v36, %v2133_v35  ;;  %v2575_v39 = vpop.f32.mrb[37].mxu1  ;;  %v2568_v23 = vpop.f32.mrb[23].mxu0 }
 0xca3   : > { %v2192_v42 = vpop.f32.mrb[38].mxu1 }
 0xca4   : > { %v2196_v44 = vadd.f32 %v2190_v38, %v2977_v54  ;;  %v2193_v14 = vadd.f32 %v2192_v42, %v2136_v37  ;;  %v2576_v46 = vpop.f32.mrb[39].mxu1 }
 0xca6   : > { %v2197_v47 = vadd.f32 %v2193_v14, %v2980_v56  ;;  %v2205_v48 = vadd.f32 %v2391_v62, %v2196_v44 }
 0xca8   : > { %v2209_v40 = vsel %vm662_vm0, %v2205_v48, 0.0  ;;  %v2206_v51 = vadd.f32 %v2391_v62, %v2197_v47 }
 0xca9   : > { %2210 = vadd.xlane.f32.xlu0 %v2209_v40 }
 0xcaa   : > { %v2212_v52 = vsel %vm662_vm0, %v2206_v51, 0.0 }
 0xcab   : > { %2213 = vadd.xlane.f32.xlu1 %v2212_v52 }
 0xd36   : > { %v2211_v53 = vpop.xlane.xlu0 %2210 }
 0xd37   : > { %v2215_v45 = vmul.f32 0.03125, %v2211_v53 }
 0xd38   : > { %v2214_v29 = vpop.xlane.xlu1 %2213 }
 0xd39   : > { %v2217_v41 = vsub.f32 %v2205_v48, %v2215_v45  ;;  %v2216_v50 = vmul.f32 0.03125, %v2214_v29 }
 0xd3b   : > { %v2218_v55 = vsub.f32 %v2206_v51, %v2216_v50  ;;  %v2219_v57 = vmul.f32 %v2217_v41, %v2217_v41 }
 0xd3d   : > { %v2221_v54 = vsel %vm662_vm0, %v2219_v57, 0.0  ;;  %v2220_v58 = vmul.f32 %v2218_v55, %v2218_v55 }
 0xd3e   : > { %2222 = vadd.xlane.f32.xlu0 %v2221_v54 }
 0xd3f   : > { %v2224_v56 = vsel %vm662_vm0, %v2220_v58, 0.0 }
 0xd40   : > { %2225 = vadd.xlane.f32.xlu1 %v2224_v56 }
 0xdcb   : > { %v2223_v59 = vpop.xlane.xlu0 %2222 }
 0xdcc   : > { %v2227_v15 = vmul.f32 0.03125, %v2223_v59 }
 0xdcd   : > { %v2226_v63 = vpop.xlane.xlu1 %2225 }
 0xdce   : > { %v2229_v2 = vadd.f32 1e-05, %v2227_v15  ;;  %v2228_v1 = vmul.f32 0.03125, %v2226_v63 }
 0xdd0   : > { %2656 = vrsqrt.f32 %v2229_v2  ;;  %v2230_v0 = vadd.f32 1e-05, %v2228_v1 }
 0xdd2   : > { %2658 = vrsqrt.f32 %v2230_v0 }
 0xdda   : > { %v2657_v3 = vpop.eup %2656 }
 0xddb   : > { %v2233_v5 = vmul.f32 %v2657_v3, %v2217_v41 }
 0xddc   : > { %v2659_v6 = vpop.eup %2658 }
 0xddd   : > { %v2241_v61 = vmul.f32 %v2392_v4, %v2233_v5  ;;  %v2234_v7 = vmul.f32 %v2659_v6, %v2218_v55 }
 0xddf   : > { %v2249_v8 = vadd.f32 %v2393_v60, %v2241_v61  ;;  %v2242_v9 = vmul.f32 %v2392_v4, %v2234_v7 }
 0xde1   : > { %2251 = vst.msk [vmem:[%s656_s27] sm:$0xff] %vm662_vm0, %v2249_v8  ;;  %v2250_v10 = vadd.f32 %v2393_v60, %v2242_v9 }
 0xde3   : > { %2252 = vst.msk [vmem:[%s656_s27 + $0x8] sm:$0xff] %vm662_vm0, %v2250_v10 }
 0xde4 PF: > { %s31_s2 = sadd.s32 1, %s2666_s2  }
 0xde5   : > { %p28_p4 = scmp.ge.s32.totalorder %s31_s2, 4  }
 0xde7   :  { %30 = sbr.rel (!%p28_p4) target bundleno = 7 (0x7), region = 137 }

// kernel: run.12
= control target key start
LH: loop header
LB: loop body
LE: loop exit
PB: predicated region body
PF: predicated region fallthrough
CT: control target
= control target key end

     0   :  { %v376_v1 = vmov 0.0   ;;  %vm377_vm0 = vmmov 0   ;;  %vm174_vm1 = vcmask 261120   ;;  %vm260_vm2 = vcmask 523264   ;;  %s475_s1 = inlined_call_operand.vmem [shape: bf16[288,64], index: 1, kind: input, shape index: {}]   ;;  %s476_s0 = inlined_call_operand.vmem [shape: bf16[8,288], index: 0, kind: input, shape index: {}]   ;;  %s477_s2 = inlined_call_operand.vmem [shape: f32[1,64], index: 2, kind: input, shape index: {}]   ;;  %s478_s3 = inlined_call_operand.vmem [shape: f32[1,64], index: 3, kind: input, shape index: {}]   ;;  %s479_s4 = inlined_call_operand.vmem [shape: f32[8,64], index: 4, kind: output, shape index: {}]  }
   0x1   :  { %v353_v0 = vld [vmem:[%s475_s1 + $0x40] sm:$0xff]   ;;  %343 = vmatprep.subr.bf16.mxu1 %v376_v1  ;;  %347 = vmatprep.mubr.msk.bf16.mxu1 %vm377_vm0, %v376_v1  ;;  %v355_v3 = vld [vmem:[%s475_s1 + $0x48] sm:$0xff]   ;;  %v357_v5 = vld [vmem:[%s475_s1 + $0x50] sm:$0xff]  }
   0x2   :  { %v354_v2 = vld [vmem:[%s475_s1] sm:$0xff]   ;;  %318 = vmatprep.subr.bf16.mxu0 %v353_v0  ;;  %v356_v4 = vld [vmem:[%s475_s1 + $0x8] sm:$0xff]   ;;  %v358_v6 = vld [vmem:[%s475_s1 + $0x10] sm:$0xff]  }
   0x3   :  { %319 = vmatpush3.bf16.msra.mxu0 %v354_v2  ;;  %v359_v7 = vld [vmem:[%s475_s1 + $0x58] sm:$0xff]   ;;  %v361_v9 = vld [vmem:[%s475_s1 + $0x60] sm:$0xff]   ;;  %v363_v12 = vld [vmem:[%s475_s1 + $0x68] sm:$0xff]  }
   0x4   :  { %320 = vmatprep.subr.bf16.mxu0 %v355_v3  ;;  %v360_v8 = vld [vmem:[%s475_s1 + $0x18] sm:$0xff]   ;;  %v367_v10 = vld [vmem:[%s475_s1 + $0x80] sm:$0xff]   ;;  %v370_v13 = vld [vmem:[%s475_s1 + $0x88] sm:$0xff]  }
   0x5   :  { %v362_v11 = vld [vmem:[%s475_s1 + $0x20] sm:$0xff]   ;;  %344 = vmatpush3.bf16.msra.mxu1 %v367_v10  ;;  %v364_v15 = vld [vmem:[%s475_s1 + $0x28] sm:$0xff]   ;;  %v365_v18 = vld [vmem:[%s475_s1 + $0x70] sm:$0xff]  }
   0x6   :  { %345 = vmatprep.subr.bf16.mxu1 %v376_v1  ;;  %v18_v14 = vld [vmem:[%s476_s0] sm:$0xff]  ;;  %v373_v17 = vld [vmem:[%s476_s0 + $0x8] ss:$0 sps:$4 sm:$0xff]   ;;  %v366_v19 = vld [vmem:[%s475_s1 + $0x30] sm:$0xff]  }
   0x7   :  { %321 = vmatpush3.bf16.msra.mxu0 %v356_v4  ;;  %v295_v16 = vcombine.high %v18_v14, %v18_v14  ;;  %v368_v20 = vld [vmem:[%s475_s1 + $0x78] sm:$0xff]   ;;  %v294_v22 = vcombine.low %v18_v14, %v18_v14  ;;  %v316_v43 = vld [vmem:[%s477_s2] ss:$0 sm:$0xff] }
   0x8   :  { %322 = vmatprep.subr.bf16.mxu0 %v357_v5  ;;  %v369_v21 = vld [vmem:[%s475_s1 + $0x38] sm:$0xff]   ;;  %v317_v45 = vld [vmem:[%s478_s3] ss:$0 sm:$0xff] }
   0x9   :  { %346 = vmatpush3.bf16.msra.mxu1 %v370_v13  ;;  %210 = vmatprep.mubr.bf16.mxu0 %v295_v16 }
   0xb   :  { %323 = vmatpush3.bf16.msra.mxu0 %v358_v6 }
   0xc   :  { %324 = vmatprep.subr.bf16.mxu0 %v359_v7  ;;  %348 = vmatmul.mubr.msk.bf16.vlgmr.msra.gmra.mrb[0].mxu1 %vm174_vm1, %v373_v17 }
   0xf   :  { %325 = vmatpush3.bf16.msra.mxu0 %v360_v8 }
  0x10   :  { %326 = vmatprep.subr.bf16.mxu0 %v361_v9 }
  0x13   :  { %327 = vmatpush3.bf16.msra.mxu0 %v362_v11 }
  0x14   :  { %328 = vmatprep.subr.bf16.mxu0 %v363_v12 }
  0x17   :  { %329 = vmatpush3.bf16.msra.mxu0 %v364_v15 }
  0x18   :  { %330 = vmatprep.subr.bf16.mxu0 %v365_v18 }
  0x1b   :  { %331 = vmatpush3.bf16.msra.mxu0 %v366_v19 }
  0x1c   :  { %332 = vmatprep.subr.bf16.mxu0 %v368_v20 }
  0x1f   :  { %333 = vmatpush3.bf16.msra.mxu0 %v369_v21 }
  0x22   :  { %211 = vmatmul.mubr.bf16.vlgmr.msra.gmra.mrb[0].mxu0 %v294_v22 }
  0xdf   :  { %v252_v23 = vpop.f32.mrb[0].mxu1 }
  0xe0   :  { %v349_v24 = vpop.f32.mrb[1].mxu1 }
  0xe1   :  { %v255_v25 = vpop.f32.mrb[2].mxu1 }
  0xe2   :  { %v350_v26 = vpop.f32.mrb[3].mxu1 }
  0xf5   :  { %v334_v27 = vpop.f32.mrb[0].mxu0 }
  0xf6   :  { %v335_v28 = vpop.f32.mrb[1].mxu0 }
  0xf7   :  { %v336_v29 = vadd.f32 %v335_v28, %v334_v27  ;;  %v337_v30 = vpop.f32.mrb[2].mxu0 }
  0xf8   :  { %v338_v31 = vpop.f32.mrb[3].mxu0 }
  0xf9   :  { %v253_v32 = vadd.f32 %v336_v29, %v252_v23 }
  0xfb   :  { %v261_v33 = vsel %vm260_vm2, %v253_v32, 0.0 }
  0xfc   :  { %262 = vadd.xlane.f32.xlu0 %v261_v33 }
 0x189   :  { %v263_v34 = vpop.xlane.xlu0 %262 }
 0x18a   :  { %v265_v35 = vmul.f32 0.015625, %v263_v34 }
 0x18c   :  { %v266_v36 = vsub.f32 %v253_v32, %v265_v35 }
 0x18e   :  { %v267_v37 = vmul.f32 %v266_v36, %v266_v36 }
 0x190   :  { %v268_v38 = vsel %vm260_vm2, %v267_v37, 0.0 }
 0x191   :  { %269 = vadd.xlane.f32.xlu0 %v268_v38 }
 0x21e   :  { %v270_v39 = vpop.xlane.xlu0 %269 }
 0x21f   :  { %v271_v40 = vmul.f32 0.015625, %v270_v39 }
 0x221   :  { %v272_v41 = vadd.f32 1e-05, %v271_v40 }
 0x223   :  { %374 = vrsqrt.f32 %v272_v41 }
 0x22d   :  { %v375_v42 = vpop.eup %374 }
 0x22e   :  { %v274_v44 = vmul.f32 %v375_v42, %v266_v36 }
 0x230   :  { %v281_v46 = vmul.f32 %v316_v43, %v274_v44 }
 0x232   :  { %v288_v47 = vadd.f32 %v317_v45, %v281_v46 }
 0x234   :  { %289 = vst.msk [vmem:[%s479_s4] sm:$0xff] %vm260_vm2, %v288_v47 }

// kernel: run.14
= control target key start
LH: loop header
LB: loop body
LE: loop exit
PB: predicated region body
PF: predicated region fallthrough
CT: control target
= control target key end

     0   :  { %s910_s18 = smov 0   ;;  %s1028_s0 = inlined_call_operand.vmem [shape: bf16[128,112], index: 0, kind: input, shape index: {}]   ;;  %s1029_s1 = inlined_call_operand.vmem [shape: bf16[112,96], index: 1, kind: input, shape index: {}]   ;;  %s1030_s2 = inlined_call_operand.vmem [shape: f32[1,96], index: 2, kind: input, shape index: {}]   ;;  %s1031_s3 = inlined_call_operand.vmem [shape: bf16[96,32], index: 3, kind: input, shape index: {}]   ;;  %s1032_s4 = inlined_call_operand.vmem [shape: bf16[128,32], index: 4, kind: output, shape index: {0}]   ;;  %s1033_s5 = inlined_call_operand.vmem [shape: f32[2,2,32], index: 5, kind: output, shape index: {1}]  }
   0x1 LB: > { %s916_s19 = sadd.s32 4294967295, %s878_s18   ;;  %p734_p0 = scmp.ge.s32.totalorder %s878_s18, 1  ;;  %s878_s18 = sphi %s910_s18, %s16_s18  }
   0x2   : > { %p191_p1 = scmp.lt.s32.totalorder %s878_s18, 3 }
   0x4   : > { %p192_p2 = pnand %p734_p0, %p191_p1 }
   0x5   : > { %v855_v0 = vld [vmem:[%s1029_s1] sm:$0xff] (!%p192_p2)   ;;  %s735_s22 = sshll.u32 (!%p192_p2), %s916_s19, 3  ;;  %v856_v1 = vld [vmem:[%s1029_s1 + $0x8] sm:$0xff] (!%p192_p2)   ;;  %v857_v2 = vld [vmem:[%s1029_s1 + $0x10] sm:$0xff] (!%p192_p2)   ;;  %vm331_vm0 = vcmask (!%p192_p2), 916480   ;;  %vm461_vm1 = vcmask (!%p192_p2), 785408  }
   0x6   : > { %195 = sbr.rel (%p192_p2) target bundleno = 502 (0x1f6), region = 36  ;;  %p224_p3 = scmp.lt.s32.totalorder (!%p192_p2), %s735_s22, 15  ;;  %805 = vmatprep.subr.bf16.mxu0 (!%p192_p2), %v855_v0  ;;  %v858_v4 = vld [vmem:[%s1029_s1 + $0x18] sm:$0xff] (!%p192_p2)   ;;  %v859_v5 = vld [vmem:[%s1029_s1 + $0x20] sm:$0xff] (!%p192_p2)   ;;  %v867_v7 = vld [vmem:[%s1031_s3 + $0x8] sm:$0xff] (!%p192_p2)   ;;  %vm579_vm2 = vcmask (!%p192_p2), 257024  }
   0x7   : > { %806 = vmatpush3.bf16.msra.mxu0 (!%p192_p2), %v855_v0  ;;  %v866_v6 = vld [vmem:[%s1031_s3] sm:$0xff] (!%p192_p2)   ;;  %v868_v8 = vld [vmem:[%s1031_s3 + $0x10] sm:$0xff] (!%p192_p2)   ;;  %v860_v9 = vld [vmem:[%s1029_s1 + $0x28] sm:$0xff] (!%p192_p2)   ;;  %vm588_vm3 = vcmask (!%p192_p2), 261120   ;;  %p235_p4 = scmp.lt.s32.totalorder (!%p192_p2), %s916_s19, 1  ;;  %vm639_vm4 = vcmask (!%p192_p2), 1040384  }
   0x8   : > { %807 = vmatprep.subr.bf16.mxu0 (!%p192_p2), %v856_v1  ;;  %827 = vmatprep.subr.bf16.mxu1 (!%p192_p2), %v866_v6  ;;  %v869_v10 = vld [vmem:[%s1031_s3 + $0x18] sm:$0xff] (!%p192_p2)   ;;  %v861_v11 = vld [vmem:[%s1029_s1 + $0x30] sm:$0xff] (!%p192_p2)   ;;  %v870_v15 = vld [vmem:[%s1031_s3 + $0x20] sm:$0xff] (!%p192_p2)   ;;  %vm641_vm5 = vcmask (!%p192_p2), 254976  }
   0x9   : > { %828 = vmatpush3.bf16.msra.mxu1 (!%p192_p2), %v866_v6  ;;  %v871_v16 = vld [vmem:[%s1031_s3 + $0x28] sm:$0xff] (!%p192_p2)   ;;  %v740_v18 = vld [vmem:[%s1030_s2] ss:$0 sm:$0xff] (!%p192_p2) }
   0xa   : > { %829 = vmatprep.subr.bf16.mxu1 (!%p192_p2), %v867_v7 }
   0xb   : > { %808 = vmatpush3.bf16.msra.mxu0 (!%p192_p2), %v856_v1 }
   0xc   : > { %809 = vmatprep.subr.bf16.mxu0 (!%p192_p2), %v857_v2 }
   0xd   : > { %s1035_s22 = smov (!%p224_p3, %s735_s22), 15  ;;  %830 = vmatpush3.bf16.msra.mxu1 %v867_v7  ;;  %s1037_s19 = smov (!%p235_p4, %s916_s19), 1 }
   0xe   : > { %s736_s27 = sshll.u32 %s1035_s22, 2  ;;  %831 = vmatprep.subr.bf16.mxu1 %v868_v8  ;;  %s739_s22 = sshll.u32 %s1037_s19, 1 }
   0xf   : > { %s938_s30 = scalar_lea.vmem %s1028_s0, %s736_s27  ;;  %810 = vmatpush3.bf16.msra.mxu0 %v857_v2  ;;  %s986_s9 = scalar_lea.vmem %s1032_s4, %s736_s27 }
  0x10   : > { %v862_v3 = vld [vmem:[%s938_s30] sm:$0xff]   ;;  %811 = vmatprep.subr.bf16.mxu0 %v858_v4  ;;  %v863_v12 = vld [vmem:[%s938_s30 + $0x8] sm:$0xff]   ;;  %v864_v13 = vld [vmem:[%s938_s30 + $0x10] sm:$0xff]   ;;  %s238_s11 = scalar_lea.vmem %s1033_s5, %s739_s22 }
  0x11   : > { %819 = vmatprep.mubr.msk.bf16.mxu0 %vm331_vm0, %v862_v3  ;;  %832 = vmatpush3.bf16.msra.mxu1 %v868_v8  ;;  %v865_v14 = vld [vmem:[%s938_s30 + $0x18] sm:$0xff]  }
  0x12   : > { %833 = vmatprep.subr.bf16.mxu1 %v869_v10 }
  0x13   : > { %812 = vmatpush3.bf16.msra.mxu0 %v858_v4 }
  0x14   : > { %813 = vmatprep.subr.bf16.mxu0 %v859_v5 }
  0x15   : > { %834 = vmatpush3.bf16.msra.mxu1 %v869_v10 }
  0x16   : > { %835 = vmatprep.subr.bf16.mxu1 %v870_v15 }
  0x17   : > { %814 = vmatpush3.bf16.msra.mxu0 %v859_v5 }
  0x18   : > { %815 = vmatprep.subr.bf16.mxu0 %v860_v9 }
  0x19   : > { %836 = vmatpush3.bf16.msra.mxu1 %v870_v15 }
  0x1a   : > { %837 = vmatprep.subr.bf16.mxu1 %v871_v16 }
  0x1b   : > { %816 = vmatpush3.bf16.msra.mxu0 %v860_v9 }
  0x1c   : > { %817 = vmatprep.subr.bf16.mxu0 %v861_v11 }
  0x1d   : > { %838 = vmatpush3.bf16.msra.mxu1 %v871_v16 }
  0x1f   : > { %818 = vmatpush3.bf16.msra.mxu0 %v861_v11 }
  0x22   : > { %820 = vmatmul.mubr.msk.bf16.vlgmr.msra.gmra.mrb[0].mxu0 %vm331_vm0, %v863_v12 }
  0x23   : > { %823 = vmatprep.mubr.msk.bf16.mxu0 %vm331_vm0, %v864_v13 }
  0x2a   : > { %824 = vmatmul.mubr.msk.bf16.gmra.mrb[4].mxu0 %vm331_vm0, %v865_v14 }
  0xf5   : > { %v821_v17 = vpop.f32.mrb[0].mxu0 }
  0xf6   : > { %v378_v19 = vpop.f32.mrb[1].mxu0  ;;  %v387_v21 = vadd.f32 %v821_v17, %v740_v18 }
  0xf7   : > { %v822_v20 = vpop.f32.mrb[2].mxu0  ;;  %v379_v24 = vadd.f32 %v740_v18, %v378_v19 }
  0xf8   : > { %v390_v22 = vadd.f32 %v822_v20, %v740_v18  ;;  %v381_v23 = vpop.f32.mrb[3].mxu0 }
  0xf9   : > { %v382_v25 = vadd.f32 %v740_v18, %v381_v23 }
  0xfa   : > { %v410_v26 = vpack.c.bf16 %v390_v22, %v387_v21 }
  0xfb   : > { %v409_v27 = vpack.c.bf16 %v382_v25, %v379_v24 }
  0xfd   : > { %v825_v28 = vpop.f32.mrb[4].mxu0  ;;  %839 = vmatprep.mubr.msk.bf16.mxu1 %vm461_vm1, %v409_v27 }
  0xfe   : > { %v394_v29 = vpop.f32.mrb[5].mxu0  ;;  %840 = vmatmul.mubr.msk.bf16.vlgmr.msra.gmra.mrb[0].mxu1 %vm461_vm1, %v410_v26  ;;  %v403_v31 = vadd.f32 %v825_v28, %v740_v18 }
  0xff   : > { %v826_v30 = vpop.f32.mrb[6].mxu0  ;;  %v395_v34 = vadd.f32 %v740_v18, %v394_v29 }
 0x100   : > { %v406_v32 = vadd.f32 %v826_v30, %v740_v18  ;;  %v397_v33 = vpop.f32.mrb[7].mxu0 }
 0x101   : > { %v398_v35 = vadd.f32 %v740_v18, %v397_v33 }
 0x102   : > { %v412_v36 = vpack.c.bf16 %v406_v32, %v403_v31 }
 0x103   : > { %v411_v37 = vpack.c.bf16 %v398_v35, %v395_v34 }
 0x105   : > { %843 = vmatprep.mubr.msk.bf16.mxu1 %vm461_vm1, %v411_v37 }
 0x106   : > { %844 = vmatmul.mubr.msk.bf16.gmra.mrb[4].mxu1 %vm461_vm1, %v412_v36 }
 0x1d1   : > { %v841_v38 = vpop.f32.mrb[0].mxu1 }
 0x1d2   : > { %v541_v39 = vmax.f32 %v841_v38, 0.0  ;;  %v508_v40 = vpop.f32.mrb[1].mxu1 }
 0x1d3   : > { %v539_v41 = vmax.f32 %v508_v40, 0.0  ;;  %v842_v42 = vpop.f32.mrb[2].mxu1 }
 0x1d4   : > { %v778_v43 = vpack.c.bf16 %v541_v39, %v541_v39  ;;  %v542_v44 = vmax.f32 %v842_v42, 0.0  ;;  %v511_v45 = vpop.f32.mrb[3].mxu1  ;;  %v612_v49 = vmul.f32 %v541_v39, %v541_v39  ;;  %v592_v57 = vsel %vm588_vm3, %v541_v39, 0.0 }
 0x1d5   : > { %v776_v46 = vpack.c.bf16 %v539_v41, %v539_v41  ;;  %v610_v47 = vmul.f32 %v539_v41, %v539_v41  ;;  %v540_v48 = vmax.f32 %v511_v45, 0.0  ;;  %v589_v51 = vsel %vm588_vm3, %v539_v41, 0.0 }
 0x1d6   : > { %582 = vst.msk [vmem:[%s986_s9 + $0x8] sm:$0xf] %vm579_vm2, %v778_v43  ;;  %v779_v50 = vpack.c.bf16 %v542_v44, %v542_v44  ;;  %v613_v55 = vmul.f32 %v542_v44, %v542_v44  ;;  %v621_v1 = vsel %vm588_vm3, %v612_v49, 0.0  ;;  %v594_v4 = vsel %vm588_vm3, %v542_v44, 0.0 }
 0x1d7   : > { %580 = vst.msk [vmem:[%s986_s9] sm:$0xf] %vm579_vm2, %v776_v46  ;;  %v777_v52 = vpack.c.bf16 %v540_v48, %v540_v48  ;;  %v590_v53 = vsel %vm588_vm3, %v540_v48, 0.0  ;;  %v611_v54 = vmul.f32 %v540_v48, %v540_v48  ;;  %v618_v58 = vsel %vm588_vm3, %v610_v47, 0.0 }
 0x1d8   : > { %583 = vst.msk [vmem:[%s986_s9 + $0xc] sm:$0xf] %vm579_vm2, %v779_v50  ;;  %v591_v56 = vadd.f32 %v590_v53, %v589_v51  ;;  %v623_v5 = vsel %vm588_vm3, %v613_v55, 0.0 }
 0x1d9   : > { %581 = vst.msk [vmem:[%s986_s9 + $0x4] sm:$0xf] %vm579_vm2, %v777_v52  ;;  %v619_v59 = vsel %vm588_vm3, %v611_v54, 0.0  ;;  %v845_v60 = vpop.f32.mrb[4].mxu1 }
 0x1da   : > { %v593_v61 = vadd.f32 %v592_v57, %v591_v56  ;;  %v620_v62 = vadd.f32 %v619_v59, %v618_v58  ;;  %v545_v63 = vmax.f32 %v845_v60, 0.0  ;;  %v524_v0 = vpop.f32.mrb[5].mxu1 }
 0x1db   : > { %v543_v2 = vmax.f32 %v524_v0, 0.0  ;;  %v846_v3 = vpop.f32.mrb[6].mxu1 }
 0x1dc   : > { %v622_v6 = vadd.f32 %v621_v1, %v620_v62  ;;  %v782_v7 = vpack.c.bf16 %v545_v63, %v545_v63  ;;  %v527_v8 = vpop.f32.mrb[7].mxu1  ;;  %v595_v10 = vadd.f32 %v594_v4, %v593_v61  ;;  %v546_v14 = vmax.f32 %v846_v3, 0.0 }
 0x1dd   : > { %v780_v9 = vpack.c.bf16 %v543_v2, %v543_v2  ;;  %v596_v11 = vsel %vm588_vm3, %v543_v2, 0.0  ;;  %v614_v12 = vmul.f32 %v543_v2, %v543_v2  ;;  %v544_v15 = vmax.f32 %v527_v8, 0.0 }
 0x1de   : > { %586 = vst.msk [vmem:[%s986_s9 + $0x18] sm:$0xf] %vm579_vm2, %v782_v7  ;;  %v624_v13 = vadd.f32 %v623_v5, %v622_v6  ;;  %v597_v16 = vadd.f32 %v596_v11, %v595_v10  ;;  %v783_v19 = vpack.c.bf16 %v546_v14, %v546_v14  ;;  %v616_v20 = vmul.f32 %v545_v63, %v545_v63 }
 0x1df   : > { %584 = vst.msk [vmem:[%s986_s9 + $0x10] sm:$0xf] %vm579_vm2, %v780_v9  ;;  %v625_v17 = vsel %vm588_vm3, %v614_v12, 0.0  ;;  %v781_v21 = vpack.c.bf16 %v544_v15, %v544_v15  ;;  %v598_v22 = vsel %vm588_vm3, %v544_v15, 0.0  ;;  %v615_v23 = vmul.f32 %v544_v15, %v544_v15 }
 0x1e0   : > { %v626_v18 = vadd.f32 %v625_v17, %v624_v13  ;;  %587 = vst.msk [vmem:[%s986_s9 + $0x1c] sm:$0xf] %vm579_vm2, %v783_v19  ;;  %v599_v24 = vadd.f32 %v598_v22, %v597_v16  ;;  %v600_v25 = vsel %vm588_vm3, %v545_v63, 0.0  ;;  %v617_v26 = vmul.f32 %v546_v14, %v546_v14 }
 0x1e1   : > { %585 = vst.msk [vmem:[%s986_s9 + $0x14] sm:$0xf] %vm579_vm2, %v781_v21  ;;  %v627_v27 = vsel %vm588_vm3, %v615_v23, 0.0  ;;  %v629_v30 = vsel %vm588_vm3, %v616_v20, 0.0  ;;  %v602_v31 = vsel %vm588_vm3, %v546_v14, 0.0 }
 0x1e2   : > { %v601_v28 = vadd.f32 %v600_v25, %v599_v24  ;;  %v628_v29 = vadd.f32 %v627_v27, %v626_v18  ;;  %v631_v34 = vsel %vm588_vm3, %v617_v26, 0.0 }
 0x1e4   : > { %v603_v32 = vadd.f32 %v602_v31, %v601_v28  ;;  %v630_v33 = vadd.f32 %v629_v30, %v628_v29 }
 0x1e6   : > { %v604_v35 = vrot.slane %v603_v32, 4  ;;  %v632_v36 = vadd.f32 %v631_v34, %v630_v33 }
 0x1e8   : > { %v605_v37 = vadd.f32 %v604_v35, %v603_v32  ;;  %v633_v38 = vrot.slane %v632_v36, 4 }
 0x1ea   : > { %v606_v39 = vrot.slane %v605_v37, 2  ;;  %v634_v40 = vadd.f32 %v633_v38, %v632_v36 }
 0x1ec   : > { %v607_v41 = vadd.f32 %v606_v39, %v605_v37  ;;  %v635_v42 = vrot.slane %v634_v40, 2 }
 0x1ee   : > { %v608_v43 = vrot.slane %v607_v41, 1  ;;  %v636_v44 = vadd.f32 %v635_v42, %v634_v40 }
 0x1f0   : > { %v637_v45 = vrot.slane %v636_v44, 1  ;;  %v609_v46 = vadd.f32 %v608_v43, %v607_v41 }
 0x1f2   : > { %v638_v47 = vadd.f32 %v637_v45, %v636_v44 }
 0x1f4   : > { %v640_v48 = vsel %vm639_vm4, %v609_v46, %v638_v47 }
 0x1f5   : > { %642 = vst.msk [vmem:[%s238_s11] sm:$0x3] %vm641_vm5, %v640_v48 }
 0x1f6 PF: > { %s16_s18 = sadd.s32 1, %s878_s18  }
 0x1f7   : > { %p13_p5 = scmp.ge.s32.totalorder %s16_s18, 4  }
 0x1f9   :  { %15 = sbr.rel (!%p13_p5) target bundleno = 1 (0x1), region = 78 }

// kernel: run.13
= control target key start
LH: loop header
LB: loop body
LE: loop exit
PB: predicated region body
PF: predicated region fallthrough
CT: control target
= control target key end

     0   :  { %s2974_s0 = inlined_call_operand.vmem [shape: f32[2,4,64], index: 0, kind: input, shape index: {}]   ;;  %s2975_s1 = inlined_call_operand.vmem [shape: f32[1,64], index: 1, kind: input, shape index: {}]   ;;  %s2976_s2 = inlined_call_operand.vmem [shape: f32[1,64], index: 2, kind: input, shape index: {}]   ;;  %s2977_s3 = inlined_call_operand.vmem [shape: bf16[64,64], index: 3, kind: input, shape index: {}]   ;;  %s2978_s4 = inlined_call_operand.vmem [shape: bf16[64,64], index: 4, kind: input, shape index: {}]   ;;  %s2979_s5 = inlined_call_operand.vmem [shape: f32[1,64], index: 5, kind: input, shape index: {}]   ;;  %s2980_s6 = inlined_call_operand.vmem [shape: f32[1,64], index: 6, kind: input, shape index: {}]   ;;  %s2981_s7 = inlined_call_operand.vmem [shape: bf16[64,128], index: 7, kind: input, shape index: {}]   ;;  %s2982_s8 = inlined_call_operand.vmem [shape: bf16[64,64], index: 8, kind: input, shape index: {}]   ;;  %s2983_s9 = inlined_call_operand.vmem [shape: f32[1,64], index: 9, kind: input, shape index: {}]   ;;  %s2984_s10 = inlined_call_operand.vmem [shape: f32[1,64], index: 10, kind: input, shape index: {}]   ;;  %s2985_s11 = inlined_call_operand.vmem [shape: f32[1,64], index: 11, kind: input, shape index: {}]   ;;  %s2986_s12 = inlined_call_operand.vmem [shape: bf16[64,64], index: 12, kind: input, shape index: {}]   ;;  %s2987_s13 = inlined_call_operand.vmem [shape: f32[1,64], index: 13, kind: input, shape index: {}]   ;;  %s2988_s14 = inlined_call_operand.vmem [shape: f32[18,64], index: 14, kind: input, shape index: {}]   ;;  %s2989_s15 = inlined_call_operand.vmem [shape: f32[2,64], index: 15, kind: input, shape index: {}]   ;;  %s2990_s16 = inlined_call_operand.vmem [shape: bf16[128,64], index: 16, kind: input, shape index: {}]   ;;  %s2991_s17 = inlined_call_operand.vmem [shape: f32[1,64], index: 17, kind: input, shape index: {}]   ;;  %s2992_s18 = inlined_call_operand.vmem [shape: f32[1,64], index: 18, kind: input, shape index: {}]   ;;  %s2993_s19 = inlined_call_operand.vmem [shape: f32[1,64], index: 19, kind: input, shape index: {}]   ;;  %s2994_s20 = inlined_call_operand.vmem [shape: f32[2,4,64], index: 20, kind: output, shape index: {}]  }
   0x1   :  { %2997 = sst [smem:[#allocation2_spill]] %s2974_s0 }
   0x2   :  { %2998 = sst [smem:[#allocation3_spill]] %s2975_s1  ;;  %s2621_s1 = smov 0  }
   0x3   :  { %2999 = sst [smem:[#allocation4_spill]] %s2976_s2 }
   0x4   :  { %3000 = sst [smem:[#allocation5_spill]] %s2977_s3 }
   0x5   :  { %3001 = sst [smem:[#allocation6_spill]] %s2978_s4 }
   0x6 LB: > { %s2140_s22 = sadd.s32 4294967295, %s2505_s1   ;;  %p2144_p0 = scmp.ge.s32.totalorder %s2505_s1, 1  ;;  %s2505_s1 = sphi %s2621_s1, %s30_s1  }
   0x7   : > { %p561_p1 = scmp.lt.s32.totalorder %s2505_s1, 3 }
   0x9   : > { %p562_p2 = pnand %p2144_p0, %p561_p1 }
   0xa   : > { %p617_p3 = scmp.lt.s32.totalorder (!%p562_p2), %s2140_s22, 1  ;;  %vm629_vm0 = vcmask (!%p562_p2), 519168   ;;  %s3002_s25 = sld [smem:[#allocation2_spill]] (!%p562_p2)  ;;  %v2507_v9 = vmov (!%p562_p2), 0.0   ;;  %vm2508_vm1 = vmmov (!%p562_p2), 0   ;;  %vm691_vm2 = vcmask (!%p562_p2), 523264  }
   0xb   : > { %565 = sbr.rel (%p562_p2) target bundleno = 4982 (0x1376), region = 100  ;;  %s3003_s28 = sld [smem:[#allocation5_spill]] (!%p562_p2)  ;;  %2282 = vmatprep.subr.bf16.mxu0 (!%p562_p2), %v2507_v9  ;;  %2294 = vmatprep.subr.bf16.mxu1 (!%p562_p2), %v2507_v9  ;;  %v2451_v40 = vld [vmem:[%s2981_s7] sm:$0xff] (!%p562_p2)   ;;  %v2452_v41 = vld [vmem:[%s2981_s7 + $0x8] sm:$0xff] (!%p562_p2)   ;;  %v2453_v42 = vld [vmem:[%s2981_s7 + $0x10] sm:$0xff] (!%p562_p2)   ;;  %vm914_vm3 = vcmask (!%p562_p2), 130048  }
   0xc   : > { %s3004_s30 = sld [smem:[#allocation6_spill]] (!%p562_p2)  ;;  %2290 = vmatprep.mubr.msk.bf16.mxu0 (!%p562_p2), %vm2508_vm1, %v2507_v9  ;;  %2302 = vmatprep.mubr.msk.bf16.mxu1 (!%p562_p2), %vm2508_vm1, %v2507_v9  ;;  %s3006_s27 = sld [smem:[#allocation4_spill]] (!%p562_p2)  ;;  %v2454_v43 = vld [vmem:[%s2981_s7 + $0x18] sm:$0xff] (!%p562_p2)   ;;  %v2159_v48 = vld [vmem:[%s2979_s5] ss:$0 sm:$0xff] (!%p562_p2)  ;;  %vm961_vm4 = vcmask (!%p562_p2), 27648  }
   0xd   : > { %v2160_v50 = vld [vmem:[%s2980_s6] ss:$0 sm:$0xff] (!%p562_p2)  ;;  %s2509_s0 = smov (!%p562_p2), 64   ;;  %vm981_vm5 = vcmask (!%p562_p2), 1041408   ;;  %s2510_s21 = smov (!%p562_p2), 112   ;;  %vm977_vm6 = vcmask (!%p562_p2), 31744  }
   0xe   : > { %s2511_s24 = smov (!%p562_p2), 96   ;;  %s2512_s2 = smov (!%p562_p2), 48   ;;  %vm1704_vm9 = vcmask (!%p562_p2), 1042432   ;;  %vm1746_vm10 = vcmask (!%p562_p2), 1040384  }
   0xf   : > { %s2513_s4 = smov (!%p562_p2), 32   ;;  %s2514_s29 = smov (!%p562_p2), 80  }
  0x11   : > { %v2443_v7 = vld [vmem:[%s3003_s28] sm:$0xff] (!%p562_p2)   ;;  %v2445_v10 = vld [vmem:[%s3003_s28 + $0x8] sm:$0xff] (!%p562_p2)   ;;  %v2447_v12 = vld [vmem:[%s3003_s28 + $0x10] sm:$0xff] (!%p562_p2)  }
  0x12   : > { %s3008_s22 = smov (!%p617_p3, %s2140_s22), 1  ;;  %v2444_v8 = vld [vmem:[%s3004_s30] sm:$0xff]   ;;  %2283 = vmatpush3.bf16.msra.mxu0 %v2443_v7  ;;  %v2446_v11 = vld [vmem:[%s3004_s30 + $0x8] sm:$0xff]   ;;  %v2448_v13 = vld [vmem:[%s3004_s30 + $0x10] sm:$0xff]  }
  0x13   : > { %s2145_s23 = sshll.u32 %s3008_s22, 2  ;;  %2295 = vmatpush3.bf16.msra.mxu1 %v2444_v8  ;;  %2284 = vmatprep.subr.bf16.mxu0 %v2507_v9  ;;  %v2449_v14 = vld [vmem:[%s3003_s28 + $0x18] sm:$0xff]   ;;  %v2148_v22 = vld [vmem:[%s3006_s27] ss:$0 sm:$0xff] }
  0x14   : > { %s620_s3 = scalar_lea.vmem %s3002_s25, %s2145_s23  ;;  %2296 = vmatprep.subr.bf16.mxu1 %v2507_v9  ;;  %v2450_v15 = vld [vmem:[%s3004_s30 + $0x18] sm:$0xff]   ;;  %s3005_s25 = sld [smem:[#allocation3_spill]] }
  0x15   : > { %v2637_v0 = vld [vmem:[%s620_s3] sm:$0xf]  ;;  %s624_s3 = scalar_lea.vmem %s2994_s20, %s2145_s23 }
  0x16   : > { %v630_v1 = vsel %vm629_vm0, %v2637_v0, 0.0  ;;  %2285 = vmatpush3.bf16.msra.mxu0 %v2445_v10 }
  0x17   : > { %631 = vadd.xlane.f32.xlu0 %v630_v1  ;;  %2297 = vmatpush3.bf16.msra.mxu1 %v2446_v11 }
  0x18   : > { %2286 = vmatprep.subr.bf16.mxu0 %v2507_v9  ;;  %2298 = vmatprep.subr.bf16.mxu1 %v2507_v9 }
  0x1a   : > { %2287 = vmatpush3.bf16.msra.mxu0 %v2447_v12  ;;  %v2147_v20 = vld [vmem:[%s3005_s25] ss:$0 sm:$0xff] }
  0x1b   : > { %2299 = vmatpush3.bf16.msra.mxu1 %v2448_v13  ;;  %2288 = vmatprep.subr.bf16.mxu0 %v2507_v9 }
  0x1c   : > { %2300 = vmatprep.subr.bf16.mxu1 %v2507_v9 }
  0x1e   : > { %2289 = vmatpush3.bf16.msra.mxu0 %v2449_v14 }
  0x1f   : > { %2301 = vmatpush3.bf16.msra.mxu1 %v2450_v15  ;;  %2306 = vmatprep.subr.bf16.mxu0 %v2507_v9 }
  0x20   : > { %2318 = vmatprep.subr.bf16.mxu1 %v2507_v9 }
  0xa4   : > { %v632_v2 = vpop.xlane.xlu0 %631 }
  0xa5   : > { %v634_v3 = vmul.f32 0.015625, %v632_v2 }
  0xa7   : > { %v635_v4 = vsub.f32 %v2637_v0, %v634_v3 }
  0xa9   : > { %v636_v5 = vmul.f32 %v635_v4, %v635_v4 }
  0xab   : > { %v637_v6 = vsel %vm629_vm0, %v636_v5, 0.0 }
  0xac   : > { %638 = vadd.xlane.f32.xlu0 %v637_v6 }
 0x139   : > { %v639_v16 = vpop.xlane.xlu0 %638 }
 0x13a   : > { %v640_v17 = vmul.f32 0.015625, %v639_v16 }
 0x13c   : > { %v641_v18 = vadd.f32 1e-05, %v640_v17 }
 0x13e   : > { %2471 = vrsqrt.f32 %v641_v18 }
 0x148   : > { %v2472_v19 = vpop.eup %2471 }
 0x149   : > { %v643_v21 = vmul.f32 %v2472_v19, %v635_v4 }
 0x14b   : > { %v650_v23 = vmul.f32 %v2147_v20, %v643_v21 }
 0x14d   : > { %v657_v24 = vadd.f32 %v2148_v22, %v650_v23 }
 0x14f   : > { %v658_v25 = vpack.c.bf16 %v657_v24, %v657_v24 }
 0x151   : > { %2291 = vmatmul.mubr.msk.bf16.vlgmr.msra.gmra.mrb[0].mxu0 %vm691_vm2, %v658_v25  ;;  %2303 = vmatmul.mubr.msk.bf16.vlgmr.msra.gmra.mrb[0].mxu1 %vm691_vm2, %v658_v25 }
 0x152   : > { %2314 = vmatprep.mubr.msk.bf16.mxu0 %vm2508_vm1, %v2507_v9  ;;  %2320 = vmatprep.mubr.msk.bf16.mxu1 %vm2508_vm1, %v2507_v9 }
 0x153   : > { %2307 = vmatpush3.bf16.msra.mxu0 %v2451_v40 }
 0x154   : > { %2308 = vmatprep.subr.bf16.mxu0 %v2507_v9 }
 0x157   : > { %2309 = vmatpush3.bf16.msra.mxu0 %v2452_v41 }
 0x158   : > { %2310 = vmatprep.subr.bf16.mxu0 %v2507_v9 }
 0x15b   : > { %2311 = vmatpush3.bf16.msra.mxu0 %v2453_v42 }
 0x15c   : > { %2312 = vmatprep.subr.bf16.mxu0 %v2507_v9 }
 0x15f   : > { %2313 = vmatpush3.bf16.msra.mxu0 %v2454_v43 }
 0x160   : > { %2342 = vmatprep.subr.bf16.mxu0 %v2507_v9 }
 0x224   : > { %v729_v26 = vpop.f32.mrb[0].mxu0  ;;  %v801_v27 = vpop.f32.mrb[0].mxu1 }
 0x225   : > { %v2292_v28 = vpop.f32.mrb[1].mxu0  ;;  %v2304_v29 = vpop.f32.mrb[1].mxu1  ;;  %v809_v30 = vsel %vm629_vm0, %v801_v27, 0.0  ;;  %v2725_v60 = vpack.c.bf16 %v729_v26, %v729_v26 }
 0x226   : > { %810 = vadd.xlane.f32.xlu1 %v809_v30  ;;  %v732_v31 = vpop.f32.mrb[2].mxu0  ;;  %v804_v32 = vpop.f32.mrb[2].mxu1 }
 0x227   : > { %v2293_v33 = vpop.f32.mrb[3].mxu0  ;;  %v2305_v34 = vpop.f32.mrb[3].mxu1  ;;  %v2456_v32 = vld [vmem:[%s2982_s8 + $0x8] sm:$0xff]  }
 0x2b3   : > { %v811_v35 = vpop.xlane.xlu1 %810 }
 0x2b4   : > { %v812_v36 = vmul.f32 0.015625, %v811_v35 }
 0x2b6   : > { %v813_v37 = vsub.f32 %v801_v27, %v812_v36 }
 0x2b8   : > { %v814_v38 = vmul.f32 %v813_v37, %v813_v37 }
 0x2ba   : > { %v815_v39 = vsel %vm629_vm0, %v814_v38, 0.0  ;;  %v2455_v38 = vld [vmem:[%s2982_s8] sm:$0xff]  }
 0x2bb   : > { %816 = vadd.xlane.f32.xlu1 %v815_v39 }
 0x348   : > { %v817_v44 = vpop.xlane.xlu1 %816 }
 0x349   : > { %v818_v45 = vmul.f32 0.015625, %v817_v44 }
 0x34b   : > { %v819_v46 = vadd.f32 1e-05, %v818_v45 }
 0x34d   : > { %2473 = vrsqrt.f32 %v819_v46 }
 0x357   : > { %v2474_v47 = vpop.eup %2473 }
 0x358   : > { %v821_v49 = vmul.f32 %v2474_v47, %v813_v37 }
 0x35a   : > { %v828_v51 = vmul.f32 %v2159_v48, %v821_v49 }
 0x35c   : > { %v835_v52 = vadd.f32 %v2160_v50, %v828_v51 }
 0x35e   : > { %v836_v53 = vpack.c.bf16 %v835_v52, %v835_v52 }
 0x360   : > { %2315 = vmatmul.mubr.msk.bf16.vlgmr.msra.gmra.mrb[4].mxu0 %vm691_vm2, %v836_v53 }
 0x361   : > { %2344 = vmatprep.mubr.msk.bf16.mxu0 %vm2508_vm1, %v2507_v9  ;;  %2343 = vmatpush3.bf16.msra.mxu0 %v2456_v32  ;;  %v2458_v32 = vld [vmem:[%s2982_s8 + $0x18] sm:$0xff]  }
 0x362   : > { %2354 = vmatprep.subr.bf16.mxu0 %v2507_v9 }
 0x433   : > { %v906_v54 = vpop.f32.mrb[4].mxu0 }
 0x434   : > { %v2720_v55 = vpack.c.bf16 %v906_v54, %v906_v54  ;;  %v2316_v56 = vpop.f32.mrb[5].mxu0 }
 0x435   : > { %v909_v57 = vpop.f32.mrb[6].mxu0 }
 0x436   : > { %v2317_v58 = vpop.f32.mrb[7].mxu0  ;;  %v919_v59 = vsel %vm914_vm3, %v2720_v55, 0 }
 0x437   : > { %2319 = vmatpush3.bf16.xpose.msra.mxu1 %v919_v59 }
 0x438   : > { %2324 = vmatprep.subr.bf16.mxu1 %v2507_v9 }
 0x43e   : > { %2321 = vmatmul.mubr.msk.bf16.vlgmr.msra.gmra.mrb[4].mxu1 %vm914_vm3, %v2725_v60 }
 0x43f   : > { %2326 = vmatprep.mubr.msk.bf16.mxu1 %vm2508_vm1, %v2507_v9 }
 0x511   : > { %v955_v61 = vpop.f32.mrb[4].mxu1 }
 0x512   : > { %v2322_v62 = vpop.f32.mrb[5].mxu1  ;;  %v962_v63 = vsel %vm961_vm4, %v955_v61, -inf }
 0x513   : > { %963 = vmax.xlane.f32.xlu0 %v962_v63  ;;  %v958_v1 = vpop.f32.mrb[6].mxu1 }
 0x514   : > { %v2323_v2 = vpop.f32.mrb[7].mxu1 }
 0x529   : > { %975 = vrot.lane.b32.xlu0 %v2720_v55, %s2509_s0 }
 0x5a0   : > { %v964_v3 = vpop.xlane.xlu0 %963 }
 0x5a1   : > { %v965_v4 = vsub.f32 %v955_v61, %v964_v3 }
 0x5a3   : > { %v966_v5 = vmul.f32 1.442695, %v965_v4 }
 0x5a4   : > { %v976_v6 = vpop.permute.xlu0 %975 }
 0x5a5   : > { %2475 = vpow2.f32 %v966_v5  ;;  %v983_v7 = vsel %vm981_vm5, %v976_v6, 0 }
 0x5a6   : > { %2325 = vmatpush3.bf16.msra.mxu1 %v983_v7 }
 0x5a7   : > { %2330 = vmatprep.subr.bf16.mxu1 %v2507_v9 }
 0x5af   : > { %v2476_v8 = vpop.eup %2475 }
 0x5b0   : > { %v968_v10 = vsel %vm961_vm4, %v2476_v8, 0.0 }
 0x5b1   : > { %969 = vadd.xlane.f32.xlu1 %v968_v10 }
 0x5c2   : > { %1031 = vrot.lane.b32.xlu1 %v2720_v55, %s2510_s21 }
 0x5c6   : > { %1029 = vrot.lane.b32.xlu1 %v2725_v60, %s2510_s21 }
 0x63e   : > { %v970_v11 = vpop.xlane.xlu1 %969 }
 0x63f   : > { %2477 = vrcp.f32 %v970_v11 }
 0x642   : > { %v1032_v14 = vpop.permute.xlu1 %1031 }
 0x643   : > { %v1037_v16 = vsel %vm914_vm3, %v1032_v14, 0 }
 0x646   : > { %v1030_v17 = vpop.permute.xlu1 %1029 }
 0x649   : > { %v2478_v12 = vpop.eup %2477 }
 0x64a   : > { %v972_v13 = vmul.f32 %v2478_v12, %v2476_v8 }
 0x64c   : > { %v973_v15 = vpack.c.bf16 %v972_v13, %v972_v13 }
 0x64e   : > { %2327 = vmatmul.mubr.msk.bf16.vlgmr.msra.gmra.mrb[8].mxu1 %vm977_vm6, %v973_v15 }
 0x64f   : > { %2331 = vmatpush3.bf16.xpose.msra.mxu1 %v1037_v16  ;;  %2332 = vmatprep.mubr.msk.bf16.mxu1 %vm2508_vm1, %v2507_v9  ;;  %v2457_v16 = vld [vmem:[%s2982_s8 + $0x10] sm:$0xff]  }
 0x650   : > { %2336 = vmatprep.subr.bf16.mxu1 %v2507_v9 }
 0x656   : > { %2333 = vmatmul.mubr.msk.bf16.vlgmr.msra.gmra.mrb[12].mxu1 %vm914_vm3, %v1030_v17 }
 0x657   : > { %2338 = vmatprep.mubr.msk.bf16.mxu1 %vm2508_vm1, %v2507_v9 }
 0x721   : > { %v1019_v18 = vpop.f32.mrb[8].mxu1 }
 0x722   : > { %v2328_v19 = vpop.f32.mrb[9].mxu1  ;;  %v1025_v40 = vpack.c.bf16 %v1019_v18, %v1019_v18 }
 0x723   : > { %v1022_v20 = vpop.f32.mrb[10].mxu1 }
 0x724   : > { %v2329_v21 = vpop.f32.mrb[11].mxu1 }
 0x729   : > { %v1073_v22 = vpop.f32.mrb[12].mxu1 }
 0x72a   : > { %v2334_v23 = vpop.f32.mrb[13].mxu1  ;;  %v1079_v24 = vsel %vm961_vm4, %v1073_v22, -inf }
 0x72b   : > { %1080 = vmax.xlane.f32.xlu1 %v1079_v24  ;;  %v1076_v25 = vpop.f32.mrb[14].mxu1 }
 0x72c   : > { %v2335_v26 = vpop.f32.mrb[15].mxu1 }
 0x73c   : > { %1242 = vrot.lane.b32.xlu1 %v2720_v55, %s2511_s24 }
 0x740   : > { %1240 = vrot.lane.b32.xlu1 %v2725_v60, %s2511_s24  ;;  %s2515_s24 = smov 16  }
 0x7b8   : > { %v1081_v27 = vpop.xlane.xlu1 %1080 }
 0x7b9   : > { %v1082_v28 = vsub.f32 %v1073_v22, %v1081_v27 }
 0x7bb   : > { %v1083_v29 = vmul.f32 1.442695, %v1082_v28 }
 0x7bc   : > { %v1243_v41 = vpop.permute.xlu1 %1242 }
 0x7bd   : > { %2479 = vpow2.f32 %v1083_v29  ;;  %v1248_v46 = vsel %vm914_vm3, %v1243_v41, 0 }
 0x7c0   : > { %v1241_v50 = vpop.permute.xlu1 %1240 }
 0x7c7   : > { %v2480_v30 = vpop.eup %2479 }
 0x7c8   : > { %v1085_v31 = vsel %vm961_vm4, %v2480_v30, 0.0 }
 0x7c9   : > { %1086 = vadd.xlane.f32.xlu0 %v1085_v31 }
 0x7df   : > { %1091 = vrot.lane.b32.xlu0 %v2720_v55, %s2512_s2 }
 0x856   : > { %v1087_v33 = vpop.xlane.xlu0 %1086 }
 0x857   : > { %2481 = vrcp.f32 %v1087_v33 }
 0x85a   : > { %v1092_v34 = vpop.permute.xlu0 %1091 }
 0x85b   : > { %v1097_v35 = vsel %vm981_vm5, %v1092_v34, 0 }
 0x85c   : > { %2337 = vmatpush3.bf16.msra.mxu1 %v1097_v35 }
 0x85d   : > { %2348 = vmatprep.subr.bf16.mxu1 %v2507_v9 }
 0x861   : > { %v2482_v36 = vpop.eup %2481 }
 0x862   : > { %v1089_v37 = vmul.f32 %v2482_v36, %v2480_v30 }
 0x864   : > { %v1090_v39 = vpack.c.bf16 %v1089_v37, %v1089_v37 }
 0x866   : > { %2339 = vmatmul.mubr.msk.bf16.vlgmr.msra.gmra.mrb[16].mxu1 %vm977_vm6, %v1090_v39 }
 0x867   : > { %2349 = vmatpush3.bf16.msra.mxu1 %v2455_v38  ;;  %2350 = vmatprep.mubr.msk.bf16.mxu1 %vm2508_vm1, %v2507_v9 }
 0x868   : > { %2360 = vmatprep.subr.bf16.mxu1 %v2507_v9 }
 0x86e   : > { %2351 = vmatmul.mubr.msk.bf16.vlgmr.msra.gmra.mrb[20].mxu1 %vm914_vm3, %v1025_v40 }
 0x86f   : > { %2362 = vmatprep.mubr.msk.bf16.mxu1 %vm2508_vm1, %v2507_v9 }
 0x939   : > { %v1133_v42 = vpop.f32.mrb[16].mxu1 }
 0x93a   : > { %v1139_v43 = vpack.c.bf16 %v1133_v42, %v1133_v42  ;;  %v2340_v44 = vpop.f32.mrb[17].mxu1 }
 0x93b   : > { %v1136_v45 = vpop.f32.mrb[18].mxu1 }
 0x93c   : > { %v2341_v47 = vpop.f32.mrb[19].mxu1  ;;  %2345 = vmatmul.mubr.msk.bf16.vlgmr.msra.gmra.mrb[8].mxu0 %vm914_vm3, %v1139_v43 }
 0x93d   : > { %2355 = vmatpush3.bf16.xpose.msra.mxu0 %v1248_v46  ;;  %2356 = vmatprep.mubr.msk.bf16.mxu0 %vm2508_vm1, %v2507_v9 }
 0x93e   : > { %2366 = vmatprep.subr.bf16.mxu0 %v2507_v9 }
 0x941   : > { %v1234_v48 = vpop.f32.mrb[20].mxu1 }
 0x942   : > { %v2352_v49 = vpop.f32.mrb[21].mxu1 }
 0x943   : > { %v1237_v51 = vpop.f32.mrb[22].mxu1 }
 0x944   : > { %v2353_v52 = vpop.f32.mrb[23].mxu1  ;;  %2357 = vmatmul.mubr.msk.bf16.vlgmr.msra.gmra.mrb[12].mxu0 %vm914_vm3, %v1241_v50  ;;  %v2182_v51 = vld [vmem:[%s2983_s9] ss:$0 sm:$0xff] }
 0x945   : > { %2368 = vmatprep.mubr.msk.bf16.mxu0 %vm2508_vm1, %v2507_v9  ;;  %2367 = vmatpush3.bf16.msra.mxu0 %v2457_v16  ;;  %v2465_v16 = vld [vmem:[%s2990_s16 + $0x28] sm:$0xff]  }
 0x946   : > { %2378 = vmatprep.subr.bf16.mxu0 %v2507_v9 }
 0xa0f   : > { %v1185_v53 = vpop.f32.mrb[8].mxu0 }
 0xa10   : > { %v2775_v54 = vadd.f32 %v1234_v48, %v1185_v53  ;;  %v2346_v56 = vpop.f32.mrb[9].mxu0 }
 0xa11   : > { %v1188_v57 = vpop.f32.mrb[10].mxu0 }
 0xa12   : > { %v2347_v58 = vpop.f32.mrb[11].mxu0 }
 0xa17   : > { %v1284_v59 = vpop.f32.mrb[12].mxu0 }
 0xa18   : > { %v2358_v61 = vpop.f32.mrb[13].mxu0  ;;  %v1290_v62 = vsel %vm961_vm4, %v1284_v59, -inf }
 0xa19   : > { %1291 = vmax.xlane.f32.xlu0 %v1290_v62  ;;  %v1287_v63 = vpop.f32.mrb[14].mxu0 }
 0xa1a   : > { %v2359_v1 = vpop.f32.mrb[15].mxu0 }
 0xa1b   : > { %v2459_v1 = vld [vmem:[%s2986_s12] sm:$0xff]  }
 0xa2f   : > { %1302 = vrot.lane.b32.xlu0 %v2720_v55, %s2513_s4 }
 0xa33   : > { %1403 = vrot.lane.b32.xlu0 %v2725_v60, %s2514_s29 }
 0xaa6   : > { %v1292_v2 = vpop.xlane.xlu0 %1291 }
 0xaa7   : > { %v1293_v3 = vsub.f32 %v1284_v59, %v1292_v2  ;;  %v2461_v2 = vld [vmem:[%s2986_s12 + $0x10] sm:$0xff]  }
 0xaa9   : > { %v1294_v4 = vmul.f32 1.442695, %v1293_v3  ;;  %v2462_v3 = vld [vmem:[%s2986_s12 + $0x18] sm:$0xff]  }
 0xaaa   : > { %v1303_v5 = vpop.permute.xlu0 %1302 }
 0xaab   : > { %2483 = vpow2.f32 %v1294_v4  ;;  %v1308_v6 = vsel %vm981_vm5, %v1303_v5, 0 }
 0xaac   : > { %2361 = vmatpush3.bf16.msra.mxu1 %v1308_v6 }
 0xaad   : > { %2372 = vmatprep.subr.bf16.mxu1 %v2507_v9 }
 0xaae   : > { %v1404_v15 = vpop.permute.xlu0 %1403 }
 0xab5   : > { %v2484_v7 = vpop.eup %2483 }
 0xab6   : > { %v1296_v8 = vsel %vm961_vm4, %v2484_v7, 0.0 }
 0xab7   : > { %1297 = vadd.xlane.f32.xlu1 %v1296_v8  ;;  %v2183_v8 = vld [vmem:[%s2984_s10] ss:$0 sm:$0xff] }
 0xac8   : > { %1405 = vrot.lane.b32.xlu1 %v2720_v55, %s2514_s29 }
 0xb44   : > { %v1298_v10 = vpop.xlane.xlu1 %1297 }
 0xb45   : > { %2485 = vrcp.f32 %v1298_v10 }
 0xb48   : > { %v1406_v12 = vpop.permute.xlu1 %1405 }
 0xb49   : > { %v1411_v14 = vsel %vm914_vm3, %v1406_v12, 0 }
 0xb4f   : > { %v2486_v11 = vpop.eup %2485 }
 0xb50   : > { %v1300_v60 = vmul.f32 %v2486_v11, %v2484_v7  ;;  %v2184_v11 = vld [vmem:[%s2985_s11] ss:$0 sm:$0xff] }
 0xb52   : > { %v1301_v13 = vpack.c.bf16 %v1300_v60, %v1300_v60 }
 0xb54   : > { %2363 = vmatmul.mubr.msk.bf16.vlgmr.msra.gmra.mrb[24].mxu1 %vm977_vm6, %v1301_v13 }
 0xb55   : > { %2373 = vmatpush3.bf16.xpose.msra.mxu1 %v1411_v14  ;;  %2374 = vmatprep.mubr.msk.bf16.mxu1 %vm2508_vm1, %v2507_v9  ;;  %v2463_v14 = vld [vmem:[%s2990_s16 + $0x20] sm:$0xff]  }
 0xb56   : > { %2384 = vmatprep.subr.bf16.mxu1 %v2507_v9 }
 0xb5c   : > { %2375 = vmatmul.mubr.msk.bf16.vlgmr.msra.gmra.mrb[28].mxu1 %vm914_vm3, %v1404_v15  ;;  %v2464_v15 = vld [vmem:[%s2990_s16] sm:$0xff]  }
 0xb5d   : > { %2386 = vmatprep.mubr.msk.bf16.mxu1 %vm2508_vm1, %v2507_v9  ;;  %2385 = vmatpush3.bf16.msra.mxu1 %v2458_v32 }
 0xb5e   : > { %2402 = vmatprep.subr.bf16.mxu1 %v2507_v9 }
 0xc27   : > { %v1344_v17 = vpop.f32.mrb[24].mxu1 }
 0xc28   : > { %v1350_v18 = vpack.c.bf16 %v1344_v17, %v1344_v17  ;;  %v2364_v19 = vpop.f32.mrb[25].mxu1  ;;  %v2466_v17 = vld [vmem:[%s2990_s16 + $0x8] sm:$0xff]  }
 0xc29   : > { %v1347_v20 = vpop.f32.mrb[26].mxu1  ;;  %v2468_v19 = vld [vmem:[%s2990_s16 + $0x10] sm:$0xff]  }
 0xc2a   : > { %v2365_v21 = vpop.f32.mrb[27].mxu1  ;;  %2369 = vmatmul.mubr.msk.bf16.vlgmr.msra.gmra.mrb[16].mxu0 %vm914_vm3, %v1350_v18  ;;  %v2467_v18 = vld [vmem:[%s2990_s16 + $0x30] sm:$0xff]   ;;  %v2469_v20 = vld [vmem:[%s2990_s16 + $0x38] sm:$0xff]  }
 0xc2b   : > { %2380 = vmatprep.mubr.msk.bf16.mxu0 %vm2508_vm1, %v2507_v9  ;;  %v2470_v21 = vld [vmem:[%s2990_s16 + $0x18] sm:$0xff]  }
 0xc2f   : > { %v1447_v22 = vpop.f32.mrb[28].mxu1 }
 0xc30   : > { %v2376_v23 = vpop.f32.mrb[29].mxu1  ;;  %v1453_v24 = vsel %vm961_vm4, %v1447_v22, -inf }
 0xc31   : > { %1454 = vmax.xlane.f32.xlu1 %v1453_v24  ;;  %v1450_v25 = vpop.f32.mrb[30].mxu1 }
 0xc32   : > { %v2377_v26 = vpop.f32.mrb[31].mxu1 }
 0xcbe   : > { %v1455_v27 = vpop.xlane.xlu1 %1454 }
 0xcbf   : > { %v1456_v28 = vsub.f32 %v1447_v22, %v1455_v27  ;;  %v1687_v22 = vlaneseq  ;;  %v2185_v27 = vld [vmem:[%s2987_s13] ss:$0 sm:$0xff] }
 0xcc1   : > { %v1457_v29 = vmul.f32 1.442695, %v1456_v28  ;;  %v1688_v23 = vshrl.u32 %v1687_v22, 7 }
 0xcc3   : > { %2487 = vpow2.f32 %v1457_v29  ;;  %v1693_v24 = vand.u32 1, %v1688_v23  ;;  %v2208_v23 = vld [vmem:[%s2988_s14 + $0x10] ss:$0 sm:$0xff] }
 0xcc5   : > { %v1706_v25 = vadd.s32 4294967295, %v1693_v24  ;;  %v1748_v26 = vadd.s32 1, %v1693_v24 }
 0xcc7   : > { %vm1707_vm7 = vcmp.ge.s32.totalorder %v1706_v25, 0  ;;  %vm1750_vm8 = vcmp.lt.s32.totalorder %v1748_v26, 2  ;;  %v2207_v25 = vld [vmem:[%s2988_s14 + $0x7] ss:$0 sm:$0xff] }
 0xccd   : > { %v2488_v30 = vpop.eup %2487 }
 0xcce   : > { %v1459_v31 = vsel %vm961_vm4, %v2488_v30, 0.0 }
 0xccf   : > { %1460 = vadd.xlane.f32.xlu0 %v1459_v31  ;;  %v2191_v31 = vsel %vm1707_vm7, 1.0, %v2507_v9 }
 0xce5   : > { %1465 = vrot.lane.b32.xlu0 %v2720_v55, %s2515_s24 }
 0xcfd   : > { %v1396_v33 = vpop.f32.mrb[16].mxu0 }
 0xcfe   : > { %v1402_v34 = vadd.f32 %v1396_v33, %v2775_v54  ;;  %v2370_v35 = vpop.f32.mrb[17].mxu0 }
 0xcff   : > { %v1399_v36 = vpop.f32.mrb[18].mxu0 }
 0xd00   : > { %v2371_v37 = vpop.f32.mrb[19].mxu0  ;;  %v2196_v36 = vsel %vm1750_vm8, 1.0, %v2507_v9 }
 0xd5c   : > { %v1461_v38 = vpop.xlane.xlu0 %1460 }
 0xd5d   : > { %2489 = vrcp.f32 %v1461_v38  ;;  %v2192_v38 = vld [vmem:[%s2988_s14] ss:$0 sm:$0xff] }
 0xd60   : > { %v1466_v39 = vpop.permute.xlu0 %1465 }
 0xd61   : > { %v1471_v40 = vsel %vm981_vm5, %v1466_v39, 0  ;;  %v2194_v39 = vld [vmem:[%s2988_s14 + $0x1] ss:$0 sm:$0xff] }
 0xd62   : > { %2379 = vmatpush3.bf16.msra.mxu0 %v1471_v40  ;;  %v2195_v40 = vld [vmem:[%s2988_s14 + $0xa] ss:$0 sm:$0xff] }
 0xd63   : > { %2390 = vmatprep.subr.bf16.mxu0 %v2507_v9 }
 0xd67   : > { %v2490_v55 = vpop.eup %2489 }
 0xd68   : > { %v1463_v41 = vmul.f32 %v2490_v55, %v2488_v30 }
 0xd6a   : > { %v1464_v42 = vpack.c.bf16 %v1463_v41, %v1463_v41  ;;  %v2193_v41 = vld [vmem:[%s2988_s14 + $0x9] ss:$0 sm:$0xff] }
 0xd6c   : > { %2381 = vmatmul.mubr.msk.bf16.vlgmr.msra.gmra.mrb[20].mxu0 %vm977_vm6, %v1464_v42 }
 0xd6d   : > { %2398 = vmatprep.mubr.msk.bf16.mxu0 %vm2508_vm1, %v2507_v9  ;;  %2391 = vmatpush3.bf16.msra.mxu0 %v2459_v1  ;;  %v2201_v1 = vld [vmem:[%s2988_s14 + $0x4] ss:$0 sm:$0xff] }
 0xd6e   : > { %2392 = vmatprep.subr.bf16.mxu0 %v2507_v9 }
 0xe3f   : > { %v1507_v43 = vpop.f32.mrb[20].mxu0 }
 0xe40   : > { %v1513_v44 = vpack.c.bf16 %v1507_v43, %v1507_v43  ;;  %v2382_v45 = vpop.f32.mrb[21].mxu0 }
 0xe41   : > { %v1510_v46 = vpop.f32.mrb[22].mxu0 }
 0xe42   : > { %v2383_v47 = vpop.f32.mrb[23].mxu0  ;;  %2387 = vmatmul.mubr.msk.bf16.vlgmr.msra.gmra.mrb[32].mxu1 %vm914_vm3, %v1513_v44  ;;  %v2197_v46 = vld [vmem:[%s2988_s14 + $0x2] ss:$0 sm:$0xff] }
 0xe43   : > { %2410 = vmatprep.mubr.msk.bf16.mxu1 %vm2508_vm1, %v2507_v9  ;;  %2403 = vmatpush3.bf16.msra.mxu1 %v2463_v14  ;;  %v2198_v47 = vld [vmem:[%s2988_s14 + $0xb] ss:$0 sm:$0xff] }
 0xe44   : > { %2404 = vmatprep.subr.bf16.mxu1 %v2507_v9 }
 0xe47   : > { %2405 = vmatpush3.bf16.msra.mxu1 %v2465_v16  ;;  %v2206_v16 = vld [vmem:[%s2988_s14 + $0xf] ss:$0 sm:$0xff] }
 0xe48   : > { %2406 = vmatprep.subr.bf16.mxu1 %v2507_v9 }
 0xe4b   : > { %2407 = vmatpush3.bf16.msra.mxu1 %v2467_v18 }
 0xe4c   : > { %2408 = vmatprep.subr.bf16.mxu1 %v2507_v9 }
 0xe4f   : > { %2409 = vmatpush3.bf16.msra.mxu1 %v2469_v20 }
 0xf15   : > { %v1559_v48 = vpop.f32.mrb[32].mxu1 }
 0xf16   : > { %v1565_v49 = vadd.f32 %v1559_v48, %v1402_v34  ;;  %v2388_v50 = vpop.f32.mrb[33].mxu1 }
 0xf17   : > { %v1562_v52 = vpop.f32.mrb[34].mxu1 }
 0xf18   : > { %v1566_v53 = vadd.f32 %v1565_v49, %v2637_v0  ;;  %v2389_v54 = vpop.f32.mrb[35].mxu1  ;;  %v2460_v0 = vld [vmem:[%s2986_s12 + $0x8] sm:$0xff]  }
 0xf19   : > { %2393 = vmatpush3.bf16.msra.mxu0 %v2460_v0  ;;  %v2200_v54 = vld [vmem:[%s2988_s14 + $0xc] ss:$0 sm:$0xff]  ;;  %v2202_v0 = vld [vmem:[%s2988_s14 + $0xd] ss:$0 sm:$0xff] }
 0xf1a   : > { %v2819_v56 = vadd.f32 %v2182_v51, %v1566_v53  ;;  %2394 = vmatprep.subr.bf16.mxu0 %v2507_v9  ;;  %v2199_v53 = vld [vmem:[%s2988_s14 + $0x3] ss:$0 sm:$0xff] }
 0xf1c   : > { %v1577_v57 = vsel %vm629_vm0, %v2819_v56, 0.0 }
 0xf1d   : > { %1578 = vadd.xlane.f32.xlu1 %v1577_v57  ;;  %2395 = vmatpush3.bf16.msra.mxu0 %v2461_v2 }
 0xf1e   : > { %2396 = vmatprep.subr.bf16.mxu0 %v2507_v9 }
 0xf21   : > { %2397 = vmatpush3.bf16.msra.mxu0 %v2462_v3 }
 0xf22   : > { %2414 = vmatprep.subr.bf16.mxu0 %v2507_v9 }
 0xfaa   : > { %v1579_v58 = vpop.xlane.xlu1 %1578 }
 0xfab   : > { %v1580_v59 = vmul.f32 0.015625, %v1579_v58 }
 0xfad   : > { %v1581_v61 = vsub.f32 %v2819_v56, %v1580_v59 }
 0xfaf   : > { %v1582_v62 = vmul.f32 %v1581_v61, %v1581_v61 }
 0xfb1   : > { %v1583_v63 = vsel %vm629_vm0, %v1582_v62, 0.0 }
 0xfb2   : > { %1584 = vadd.xlane.f32.xlu1 %v1583_v63 }
0x103f   : > { %v1585_v4 = vpop.xlane.xlu1 %1584 }
0x1040   : > { %v1586_v5 = vmul.f32 0.015625, %v1585_v4 }
0x1042   : > { %v1587_v6 = vadd.f32 1e-05, %v1586_v5 }
0x1044   : > { %2491 = vrsqrt.f32 %v1587_v6 }
0x104e   : > { %v2492_v7 = vpop.eup %2491 }
0x104f   : > { %v1589_v10 = vmul.f32 %v2492_v7, %v1581_v61 }
0x1051   : > { %v1596_v60 = vmul.f32 %v2183_v8, %v1589_v10 }
0x1053   : > { %v1603_v12 = vadd.f32 %v2184_v11, %v1596_v60  ;;  %v2204_v11 = vld [vmem:[%s2988_s14 + $0xe] ss:$0 sm:$0xff]  ;;  %v2203_v60 = vld [vmem:[%s2988_s14 + $0x5] ss:$0 sm:$0xff] }
0x1055   : > { %v1604_v13 = vpack.c.bf16 %v1603_v12, %v1603_v12 }
0x1057   : > { %2399 = vmatmul.mubr.msk.bf16.vlgmr.msra.gmra.mrb[24].mxu0 %vm691_vm2, %v1604_v13 }
0x1058   : > { %2422 = vmatprep.mubr.msk.bf16.mxu0 %vm2508_vm1, %v2507_v9  ;;  %2415 = vmatpush3.bf16.msra.mxu0 %v2464_v15 }
0x1059   : > { %2416 = vmatprep.subr.bf16.mxu0 %v2507_v9 }
0x105c   : > { %2417 = vmatpush3.bf16.msra.mxu0 %v2466_v17  ;;  %v2205_v17 = vld [vmem:[%s2988_s14 + $0x6] ss:$0 sm:$0xff] }
0x105d   : > { %2418 = vmatprep.subr.bf16.mxu0 %v2507_v9 }
0x1060   : > { %2419 = vmatpush3.bf16.msra.mxu0 %v2468_v19 }
0x1061   : > { %2420 = vmatprep.subr.bf16.mxu0 %v2507_v9 }
0x1064   : > { %2421 = vmatpush3.bf16.msra.mxu0 %v2470_v21 }
0x112a   : > { %v1681_v28 = vpop.f32.mrb[24].mxu0 }
0x112b   : > { %v1682_v29 = vadd.f32 %v2185_v27, %v1681_v28  ;;  %v2400_v30 = vpop.f32.mrb[25].mxu0 }
0x112c   : > { %v1684_v32 = vpop.f32.mrb[26].mxu0  ;;  %v2210_v30 = vld [vmem:[%s2988_s14 + $0x11] ss:$0 sm:$0xff] }
0x112d   : > { %v1702_v33 = vrot.slane %v1682_v29, 5  ;;  %v1727_v34 = vrot.slane %v1682_v29, 6  ;;  %v1744_v35 = vrot.slane %v1682_v29, 7  ;;  %v2401_v37 = vpop.f32.mrb[27].mxu0  ;;  %v1798_v43 = vrot.slane %v1682_v29, 1 }
0x112e   : > { %v1848_v58 = vrot.slane %v1682_v29, 3  ;;  %v1789_v7 = vmul.f32 %v2201_v1, %v1682_v29  ;;  %v1796_v8 = vmul.f32 %v2202_v0, %v1682_v29  ;;  %v1831_v10 = vrot.slane %v1682_v29, 2 }
0x112f   : > { %v1705_v55 = vsel %vm1704_vm9, 0.0, %v1702_v33  ;;  %v1729_v9 = vsel %vm981_vm5, 0.0, %v1727_v34  ;;  %v1747_v42 = vsel %vm1746_vm10, 0.0, %v1744_v35  ;;  %v1800_v57 = vsel %vm1704_vm9, %v1798_v43, 0.0 }
0x1130   : > { %v1712_v44 = vmul.f32 %v2191_v31, %v1705_v55  ;;  %v1754_v45 = vmul.f32 %v2196_v36, %v1747_v42  ;;  %v1769_v48 = vmul.f32 %v2191_v31, %v1747_v42  ;;  %v1735_v51 = vmul.f32 %v2194_v39, %v1729_v9  ;;  %v2211_v55 = vld [vmem:[%s2989_s15] ss:$0 sm:$0xff] }
0x1131   : > { %v1742_v52 = vmul.f32 %v2195_v40, %v1729_v9  ;;  %v1801_v6 = vmul.f32 %v2196_v36, %v1800_v57  ;;  %v1816_v14 = vmul.f32 %v2191_v31, %v1800_v57  ;;  %v1850_v15 = vsel %vm1746_vm10, %v1848_v58, 0.0  ;;  %v2209_v31 = vld [vmem:[%s2988_s14 + $0x8] ss:$0 sm:$0xff]  ;;  %v2212_v40 = vld [vmem:[%s2989_s15 + $0x1] ss:$0 sm:$0xff] }
0x1132   : > { %v1718_v49 = vmul.f32 %v2192_v38, %v1712_v44  ;;  %v1725_v50 = vmul.f32 %v2193_v41, %v1712_v44  ;;  %v1760_v62 = vmul.f32 %v2197_v46, %v1754_v45  ;;  %v1767_v63 = vmul.f32 %v2198_v47, %v1754_v45 }
0x1133   : > { %v1775_v2 = vmul.f32 %v2199_v53, %v1769_v48  ;;  %v1782_v5 = vmul.f32 %v2200_v54, %v1769_v48  ;;  %v1814_v20 = vmul.f32 %v2204_v11, %v1801_v6  ;;  %v1807_v21 = vmul.f32 %v2203_v60, %v1801_v6  ;;  %v2223_v60 = vld [vmem:[%s2991_s17] ss:$0 sm:$0xff] }
0x1134   : > { %v1736_v59 = vadd.f32 %v1735_v51, %v1718_v49  ;;  %v1743_v61 = vadd.f32 %v1742_v52, %v1725_v50  ;;  %v1833_v22 = vsel %vm981_vm5, %v1831_v10, 0.0  ;;  %v1851_v24 = vmul.f32 %v2196_v36, %v1850_v15 }
0x1135   : > { %v1829_v27 = vmul.f32 %v2206_v16, %v1816_v14  ;;  %v1822_v29 = vmul.f32 %v2205_v17, %v1816_v14  ;;  %v1846_v33 = vmul.f32 %v2208_v23, %v1833_v22  ;;  %v1839_v35 = vmul.f32 %v2207_v25, %v1833_v22 }
0x1136   : > { %v1761_v3 = vadd.f32 %v1760_v62, %v1736_v59  ;;  %v1768_v4 = vadd.f32 %v1767_v63, %v1743_v61  ;;  %v1864_v37 = vmul.f32 %v2210_v30, %v1851_v24  ;;  %v1857_v39 = vmul.f32 %v2209_v31, %v1851_v24 }
0x1138   : > { %v1776_v12 = vadd.f32 %v1775_v2, %v1761_v3  ;;  %v1783_v13 = vadd.f32 %v1782_v5, %v1768_v4 }
0x113a   : > { %v1790_v18 = vadd.f32 %v1789_v7, %v1776_v12  ;;  %v1797_v19 = vadd.f32 %v1796_v8, %v1783_v13 }
0x113c   : > { %v1815_v26 = vadd.f32 %v1814_v20, %v1797_v19  ;;  %v1808_v28 = vadd.f32 %v1807_v21, %v1790_v18 }
0x113e   : > { %v1830_v32 = vadd.f32 %v1829_v27, %v1815_v26  ;;  %v1823_v34 = vadd.f32 %v1822_v29, %v1808_v28  ;;  %v2225_v26 = vld [vmem:[%s2993_s19] ss:$0 sm:$0xff] }
0x1140   : > { %v1847_v36 = vadd.f32 %v1846_v33, %v1830_v32  ;;  %v1840_v38 = vadd.f32 %v1839_v35, %v1823_v34 }
0x1142   : > { %v1865_v41 = vadd.f32 %v1864_v37, %v1847_v36  ;;  %v1858_v9 = vadd.f32 %v1857_v39, %v1840_v38 }
0x1144   : > { %v1895_v42 = vadd.f32 %v2212_v40, %v1865_v41  ;;  %v1871_v43 = vadd.f32 %v2211_v55, %v1858_v9 }
0x1146   : > { %v1897_v44 = vmul.f32 0.044715, %v1895_v42  ;;  %v1873_v45 = vmul.f32 0.044715, %v1871_v43  ;;  %v1896_v58 = vmul.f32 0.5, %v1895_v42  ;;  %v1872_v61 = vmul.f32 0.5, %v1871_v43 }
0x1148   : > { %v1898_v46 = vmul.f32 %v1897_v44, %v1895_v42  ;;  %v1874_v47 = vmul.f32 %v1873_v45, %v1871_v43 }
0x114a   : > { %v1899_v48 = vmul.f32 %v1898_v46, %v1895_v42  ;;  %v1875_v49 = vmul.f32 %v1874_v47, %v1871_v43 }
0x114c   : > { %v1900_v50 = vadd.f32 %v1899_v48, %v1895_v42  ;;  %v1876_v51 = vadd.f32 %v1875_v49, %v1871_v43 }
0x114e   : > { %v1901_v52 = vmul.f32 0.7978846, %v1900_v50  ;;  %v1877_v53 = vmul.f32 0.7978846, %v1876_v51 }
0x1150   : > { %2493 = vtanh.f32 %v1901_v52 }
0x1151   : > { %2495 = vtanh.f32 %v1877_v53 }
0x115a   : > { %v2494_v54 = vpop.eup %2493 }
0x115b   : > { %v2496_v57 = vpop.eup %2495  ;;  %v1903_v59 = vadd.f32 1.0, %v2494_v54 }
0x115c   : > { %v1879_v62 = vadd.f32 1.0, %v2496_v57 }
0x115d   : > { %v1904_v63 = vmul.f32 %v1903_v59, %v1896_v58 }
0x115e   : > { %v1880_v1 = vmul.f32 %v1879_v62, %v1872_v61 }
0x115f   : > { %v1905_v0 = vpack.c.bf16 %v1904_v63, %v1904_v63 }
0x1160   : > { %v1881_v2 = vpack.c.bf16 %v1880_v1, %v1880_v1 }
0x1161   : > { %2411 = vmatmul.mubr.msk.bf16.vlgmr.msra.gmra.mrb[36].mxu1 %vm691_vm2, %v1905_v0 }
0x1162   : > { %2423 = vmatmul.mubr.msk.bf16.vlgmr.msra.gmra.mrb[28].mxu0 %vm691_vm2, %v1881_v2 }
0x1234   : > { %v1975_v3 = vpop.f32.mrb[36].mxu1 }
0x1235   : > { %v2042_v4 = vpop.f32.mrb[28].mxu0  ;;  %v2412_v5 = vpop.f32.mrb[37].mxu1 }
0x1236   : > { %v2043_v6 = vadd.f32 %v2042_v4, %v1975_v3  ;;  %v2424_v7 = vpop.f32.mrb[29].mxu0  ;;  %v1978_v8 = vpop.f32.mrb[38].mxu1 }
0x1237   : > { %v2045_v10 = vpop.f32.mrb[30].mxu0  ;;  %v2413_v11 = vpop.f32.mrb[39].mxu1 }
0x1238   : > { %v2048_v12 = vadd.f32 %v2043_v6, %v2819_v56  ;;  %v2425_v13 = vpop.f32.mrb[31].mxu0  ;;  %v2224_v56 = vld [vmem:[%s2992_s18] ss:$0 sm:$0xff] }
0x123a   : > { %v2056_v14 = vadd.f32 %v2223_v60, %v2048_v12 }
0x123c   : > { %v2059_v15 = vsel %vm629_vm0, %v2056_v14, 0.0 }
0x123d   : > { %2060 = vadd.xlane.f32.xlu1 %v2059_v15 }
0x12ca   : > { %v2061_v16 = vpop.xlane.xlu1 %2060 }
0x12cb   : > { %v2062_v17 = vmul.f32 0.015625, %v2061_v16 }
0x12cd   : > { %v2063_v18 = vsub.f32 %v2056_v14, %v2062_v17 }
0x12cf   : > { %v2064_v19 = vmul.f32 %v2063_v18, %v2063_v18 }
0x12d1   : > { %v2065_v20 = vsel %vm629_vm0, %v2064_v19, 0.0 }
0x12d2   : > { %2066 = vadd.xlane.f32.xlu1 %v2065_v20 }
0x135f   : > { %v2067_v21 = vpop.xlane.xlu1 %2066 }
0x1360   : > { %v2068_v22 = vmul.f32 0.015625, %v2067_v21 }
0x1362   : > { %v2069_v23 = vadd.f32 1e-05, %v2068_v22 }
0x1364   : > { %2497 = vrsqrt.f32 %v2069_v23 }
0x136e   : > { %v2498_v24 = vpop.eup %2497 }
0x136f   : > { %v2071_v25 = vmul.f32 %v2498_v24, %v2063_v18 }
0x1371   : > { %v2078_v27 = vmul.f32 %v2224_v56, %v2071_v25 }
0x1373   : > { %v2085_v28 = vadd.f32 %v2225_v26, %v2078_v27 }
0x1375   : > { %2086 = vst.msk [vmem:[%s624_s3] sm:$0xf] %vm629_vm0, %v2085_v28 }
0x1376 PF: > { %s30_s1 = sadd.s32 1, %s2505_s1  }
0x1377   : > { %p27_p4 = scmp.ge.s32.totalorder %s30_s1, 4  }
0x1379   :  { %29 = sbr.rel (!%p27_p4) target bundleno = 6 (0x6), region = 130 }

// kernel: run.15
= control target key start
LH: loop header
LB: loop body
LE: loop exit
PB: predicated region body
PF: predicated region fallthrough
CT: control target
= control target key end

     0   :  { %11 = vsyncpa [#allocation3], 0  ;;  %s871_s0 = inlined_call_operand.vmem [shape: bf16[128,32], index: 0, kind: input, shape index: {}]   ;;  %s872_s1 = inlined_call_operand.vmem [shape: f32[2,32], index: 1, kind: input, shape index: {}]   ;;  %s873_s2 = inlined_call_operand.vmem [shape: f32[1,32], index: 2, kind: input, shape index: {}]   ;;  %s874_s3 = inlined_call_operand.vmem [shape: f32[1,32], index: 3, kind: input, shape index: {}]   ;;  %s875_s4 = inlined_call_operand.vmem [shape: bf16[32,10], index: 4, kind: input, shape index: {}]   ;;  %s876_s5 = inlined_call_operand.vmem [shape: f32[1,10], index: 5, kind: input, shape index: {}]   ;;  %s877_s6 = inlined_call_operand.hbm [shape: f32[128,10], index: 6, kind: output, shape index: {}]  }
   0x1   :  { %13 = vsyncpa [#allocation3 + $0x1], 0  ;;  %s732_s21 = smov 0   ;;  %s734_s22 = smov 0  }
   0x2   :  { %s736_s23 = smov 0   ;;  %s738_s24 = smov 0  }
   0x3 LB: > { %s753_s25 = sadd.s32 4294967295, %s692_s24   ;;  %s522_s26 = sadd.s32 4294967294, %s692_s24   ;;  %s692_s24 = sphi %s738_s24, %s883_s24   ;;  %s688_s23 = sphi %s736_s23, %s882_s23   ;;  %s684_s22 = sphi %s734_s22, %s881_s22   ;;  %s680_s21 = sphi %s732_s21, %s880_s21  }
   0x4   : > { %s757_s27 = sadd.s32 1, %s692_s24   ;;  %s157_s28 = sadd.s32 1, %s688_s23 }
   0x5   : > { %s154_s29 = ssub.s32 %s692_s24, %s757_s27  ;;  %p167_p0 = scmp.ne.s32.totalorder %s688_s23, %s684_s22 }
   0x6   : > { %p155_p1 = scmp.eq.s32.totalorder %s154_s29, 0  ;;  %p168_p2 = scmp.eq.s32.totalorder %s753_s25, 1 }
   0x7   : > { %p173_p3 = scmp.ne.s32.totalorder %s684_s22, %s680_s21  ;;  %p174_p4 = scmp.eq.s32.totalorder %s522_s26, 1 }
   0x8   : > { %s768_s30 = scalar_select %p155_p1, %s688_s23, %s157_s28  }
   0x9   : > { %p770_p5 = por %p168_p2, %p167_p0  ;;  %p774_p6 = por %p174_p4, %p173_p3 }
   0xa   : > { %p525_p7 = scmp.ge.s32.totalorder %s692_s24, 1  ;;  %p216_p8 = scmp.lt.s32.totalorder %s692_s24, 3 }
   0xc   : > { %p217_p9 = pnand %p525_p7, %p216_p8 }
   0xd   : > { %v626_v0 = vld [vmem:[%s875_s4] sm:$0xff] (!%p217_p9)   ;;  %s527_s11 = sshll.u32 (!%p217_p9), %s753_s25, 3  ;;  %v627_v1 = vld [vmem:[%s875_s4 + $0x8] sm:$0xff] (!%p217_p9)   ;;  %v276_v6 = vlaneseq (!%p217_p9)  ;;  %vm359_vm0 = vcmask (!%p217_p9), 261120   ;;  %vm437_vm1 = vcmask (!%p217_p9), 80896   ;;  %s543_s15 = sshll.u32 (!%p217_p9), %s753_s25, 10 }
   0xe   : > { %220 = sbr.rel (%p217_p9) target bundleno = 277 (0x115), region = 44  ;;  %p247_p10 = scmp.lt.s32.totalorder (!%p217_p9), %s527_s11, 15  ;;  %569 = vmatprep.subr.bf16.mxu0 (!%p217_p9), %v626_v0  ;;  %581 = vmatprep.subr.bf16.mxu1 (!%p217_p9), %v626_v0  ;;  %v270_v2 = vld [vmem:[%s872_s1] sm:$0x1] (!%p217_p9)  ;;  %v272_v3 = vld [vmem:[%s872_s1 + $0x1] sm:$0x1] (!%p217_p9) }
   0xf   : > { %570 = vmatpush3.bf16.msra.mxu0 (!%p217_p9), %v626_v0  ;;  %583 = vmatpush3.bf16.msra.mxu1 (!%p217_p9), %v626_v0  ;;  %v271_v4 = vmul.f32 (!%p217_p9), 0.0078125, %v270_v2  ;;  %v273_v5 = vmul.f32 (!%p217_p9), 0.0078125, %v272_v3  ;;  %v277_v9 = vshrl.u32 (!%p217_p9), %v276_v6, 7  ;;  %v529_v35 = vld [vmem:[%s873_s2] ss:$0 sm:$0xff] (!%p217_p9)  ;;  %s818_s19 = scalar_lea.hbm (!%p217_p9), %s877_s6, %s543_s15  ;;  %s694_s28 = smov (!%p217_p9), [#allocation2]  }
  0x10   : > { %571 = vmatprep.subr.bf16.mxu0 (!%p217_p9), %v627_v1  ;;  %582 = vmatprep.subr.bf16.mxu1 (!%p217_p9), %v627_v1  ;;  %v530_v40 = vld [vmem:[%s874_s3] ss:$0 sm:$0xff] (!%p217_p9)  ;;  %s634_s29 = sshll.u32 (!%p217_p9), %s694_s28, 4  ;;  %s635_s29 = int_to_ptr.vmem [resolvable:$false] %s634_s29 }
  0x11   : > { %v274_v7 = vmul.f32 (!%p217_p9), %v271_v4, %v271_v4  ;;  %v278_v11 = vsub.s32 (!%p217_p9), 0, %v277_v9  ;;  %s636_s9 = scalar_lea.vmem (!%p217_p9), %s635_s29, 2048 }
  0x13   : > { %572 = vmatpush3.bf16.msra.mxu0 (!%p217_p9), %v627_v1  ;;  %584 = vmatpush3.bf16.msra.mxu1 (!%p217_p9), %v627_v1  ;;  %v275_v8 = vsub.f32 (!%p217_p9), %v273_v5, %v274_v7  ;;  %v279_v16 = vrot.slane (!%p217_p9), %v271_v4, %v278_v11  ;;  %v531_v1 = vld [vmem:[%s876_s5] ss:$0 sm:$0xff] (!%p217_p9) }
  0x15   : > { %s885_s11 = smov (!%p247_p10, %s527_s11), 15  ;;  %v288_v10 = vadd.f32 1e-05, %v275_v8 }
  0x16   : > { %s528_s18 = sshll.u32 %s885_s11, 2  ;;  %s243_s11 = sand.u32 1, %s684_s22  }
  0x17   : > { %s250_s26 = scalar_lea.vmem %s871_s0, %s528_s18  ;;  %628 = vrsqrt.f32 %v288_v10  ;;  %s526_s12 = sshll.u32 %s243_s11, 6 }
  0x18   : > { %v545_v12 = vld [vmem:[%s250_s26] sm:$0xff]   ;;  %v561_v13 = vld [vmem:[%s250_s26 + $0x10] sm:$0xff]   ;;  %v560_v14 = vld [vmem:[%s250_s26 + $0x8] sm:$0xff]   ;;  %s245_s16 = scalar_lea.vmem [#allocation2], %s526_s12  ;;  %s830_s20 = scalar_lea.sflag [#allocation3], %s243_s11 }
  0x19   : > { %v562_v15 = vld [vmem:[%s250_s26 + $0x18] sm:$0xff]   ;;  %v546_v17 = vunpack.c.l.bf16 %v545_v12  ;;  %v547_v18 = vunpack.c.h.bf16 %v545_v12  ;;  %v554_v19 = vunpack.c.l.bf16 %v561_v13  ;;  %v555_v20 = vunpack.c.h.bf16 %v561_v13  ;;  %s460_s17 = sshll.u32 %s245_s16, 4  ;;  %s820_s17 = int_to_ptr.vmem [resolvable:$true] %s460_s17 }
  0x1a   : > { %v550_v21 = vunpack.c.l.bf16 %v560_v14  ;;  %v551_v22 = vunpack.c.h.bf16 %v560_v14  ;;  %v558_v23 = vunpack.c.l.bf16 %v562_v15  ;;  %v559_v24 = vunpack.c.h.bf16 %v562_v15  ;;  %s630_s26 = scalar_lea.vmem %s820_s17, 1024  ;;  %p637_p0 = scmp.lt.s32.totalorder %s820_s17, %s635_s29 }
  0x1b   : > { %v280_v25 = vsub.f32 %v546_v17, %v279_v16  ;;  %v281_v26 = vsub.f32 %v547_v18, %v279_v16  ;;  %v284_v27 = vsub.f32 %v554_v19, %v279_v16  ;;  %v285_v28 = vsub.f32 %v555_v20, %v279_v16  ;;  %p631_p11 = scmp.ne.s32.totalorder %s820_s17, %s630_s26  ;;  %p638_p1 = scmp.lt.s32.totalorder %s636_s9, %s630_s26 }
  0x1c   : > { %v282_v30 = vsub.f32 %v550_v21, %v279_v16  ;;  %v283_v31 = vsub.f32 %v551_v22, %v279_v16  ;;  %v286_v32 = vsub.f32 %v558_v23, %v279_v16  ;;  %v287_v33 = vsub.f32 %v559_v24, %v279_v16 }
  0x1d   : > { %p632_p12 = pnand %p631_p11, %p770_p5  ;;  %p639_p2 = por %p638_p1, %p637_p0 }
  0x1f   : > { %p633_p13 = pneg %p632_p12 }
  0x21   : > { %v629_v29 = vpop.eup %628  ;;  %p640_p3 = pnand %p639_p2, %p633_p13 }
  0x22   : > { %v293_v34 = vrot.slane %v629_v29, %v278_v11 }
  0x24   : > { %v294_v36 = vmul.f32 %v293_v34, %v280_v25  ;;  %v295_v37 = vmul.f32 %v293_v34, %v281_v26  ;;  %v298_v38 = vmul.f32 %v293_v34, %v284_v27  ;;  %v299_v39 = vmul.f32 %v293_v34, %v285_v28 }
  0x25   : > { %v296_v41 = vmul.f32 %v293_v34, %v282_v30  ;;  %v297_v42 = vmul.f32 %v293_v34, %v283_v31  ;;  %v300_v43 = vmul.f32 %v293_v34, %v286_v32  ;;  %v301_v44 = vmul.f32 %v293_v34, %v287_v33 }
  0x26   : > { %v309_v45 = vmul.f32 %v529_v35, %v294_v36  ;;  %v310_v46 = vmul.f32 %v529_v35, %v295_v37  ;;  %v313_v47 = vmul.f32 %v529_v35, %v298_v38  ;;  %v314_v48 = vmul.f32 %v529_v35, %v299_v39 }
  0x27   : > { %v311_v49 = vmul.f32 %v529_v35, %v296_v41  ;;  %v312_v50 = vmul.f32 %v529_v35, %v297_v42  ;;  %v315_v51 = vmul.f32 %v529_v35, %v300_v43  ;;  %v316_v52 = vmul.f32 %v529_v35, %v301_v44 }
  0x28   : > { %v324_v53 = vadd.f32 %v530_v40, %v309_v45  ;;  %v325_v54 = vadd.f32 %v530_v40, %v310_v46  ;;  %v328_v55 = vadd.f32 %v530_v40, %v313_v47  ;;  %v329_v56 = vadd.f32 %v530_v40, %v314_v48 }
  0x29   : > { %v326_v57 = vadd.f32 %v530_v40, %v311_v49  ;;  %v327_v58 = vadd.f32 %v530_v40, %v312_v50  ;;  %v330_v59 = vadd.f32 %v530_v40, %v315_v51  ;;  %v331_v60 = vadd.f32 %v530_v40, %v316_v52 }
  0x2a   : > { %v332_v61 = vpack.c.bf16 %v325_v54, %v324_v53  ;;  %v334_v62 = vpack.c.bf16 %v329_v56, %v328_v55 }
  0x2b   : > { %v333_v63 = vpack.c.bf16 %v327_v58, %v326_v57  ;;  %v335_v0 = vpack.c.bf16 %v331_v60, %v330_v59 }
  0x2c   : > { %573 = vmatprep.mubr.msk.bf16.mxu0 %vm359_vm0, %v332_v61  ;;  %577 = vmatprep.mubr.msk.bf16.mxu1 %vm359_vm0, %v334_v62 }
  0x2d   : > { %574 = vmatmul.mubr.msk.bf16.vlgmr.msra.gmra.mrb[0].mxu0 %vm359_vm0, %v333_v63  ;;  %578 = vmatmul.mubr.msk.bf16.vlgmr.msra.gmra.mrb[0].mxu1 %vm359_vm0, %v335_v0 }
 0x100   : > { %v575_v2 = vpop.f32.mrb[0].mxu0  ;;  %v579_v3 = vpop.f32.mrb[0].mxu1 }
 0x101   : > { %v415_v4 = vadd.f32 %v575_v2, %v531_v1  ;;  %v431_v5 = vadd.f32 %v579_v3, %v531_v1  ;;  %v406_v6 = vpop.f32.mrb[1].mxu0  ;;  %v422_v7 = vpop.f32.mrb[1].mxu1 }
 0x102   : > { %v407_v8 = vadd.f32 %v531_v1, %v406_v6  ;;  %v423_v9 = vadd.f32 %v531_v1, %v422_v7  ;;  %v576_v10 = vpop.f32.mrb[2].mxu0  ;;  %v580_v11 = vpop.f32.mrb[2].mxu1 }
 0x103   : > { %440 = vst.msk [vmem:[%s245_s16 + $0x10] sm:$0xff] %vm437_vm1, %v415_v4  ;;  %444 = vst.msk [vmem:[%s245_s16 + $0x30] sm:$0xff] %vm437_vm1, %v431_v5  ;;  %v418_v12 = vadd.f32 %v576_v10, %v531_v1  ;;  %v434_v13 = vadd.f32 %v580_v11, %v531_v1  ;;  %v409_v14 = vpop.f32.mrb[3].mxu0  ;;  %v425_v15 = vpop.f32.mrb[3].mxu1 }
 0x104   : > { %438 = vst.msk [vmem:[%s245_s16] sm:$0xff] %vm437_vm1, %v407_v8  ;;  %442 = vst.msk [vmem:[%s245_s16 + $0x20] sm:$0xff] %vm437_vm1, %v423_v9  ;;  %v410_v16 = vadd.f32 %v531_v1, %v409_v14  ;;  %v426_v17 = vadd.f32 %v531_v1, %v425_v15 }
 0x105   : > { %441 = vst.msk [vmem:[%s245_s16 + $0x18] sm:$0xff] %vm437_vm1, %v418_v12  ;;  %445 = vst.msk [vmem:[%s245_s16 + $0x38] sm:$0xff] %vm437_vm1, %v434_v13 }
 0x106   : > { %439 = vst.msk [vmem:[%s245_s16 + $0x8] sm:$0xff] %vm437_vm1, %v410_v16  ;;  %443 = vst.msk [vmem:[%s245_s16 + $0x28] sm:$0xff] %vm437_vm1, %v426_v17 }
 0x107   : > { %643 = shalt.err (!%p640_p3)
}
 0x108   : > { %s644_s10 = scalar_lea.hbm %s818_s19, 1024  ;;  %s648_s13 = scalar_lea.hbm %s877_s6, 2048 }
 0x109   : > { %p645_p4 = scmp.ne.s32.totalorder %s818_s19, %s644_s10  ;;  %p649_p9 = scmp.lt.u32.totalorder %s818_s19, %s877_s6 }
 0x10a   : > { %p650_p10 = scmp.lt.u32.totalorder %s648_s13, %s644_s10  ;;  %p652_p12 = scmp.lt.u32.totalorder %s644_s10, %s818_s19 }
 0x10b   : > { %p646_p7 = pnand %p645_p4, %p770_p5 }
 0x10c   : > { %p651_p11 = por %p650_p10, %p649_p9 }
 0x10d   : > { %p647_p8 = pneg %p646_p7 }
 0x10e   : > { %p653_p13 = por %p652_p12, %p651_p11 }
 0x110   : > { %p654_p0 = pnand %p653_p13, %p647_p8 }
 0x112   : > { %657 = shalt.err (!%p654_p0)
}
 0x113   : > { %s695_s16 = smov 128   ;;  %s696_s25 = smov 8  }
 0x114   : > { %585 = dma.vmem_to_hbm [thread:$0]  (%p770_p5), %s820_s17, 1024, %s818_s19, %s830_s20, %s695_s16, %s695_s16, %s696_s25  }
 0x115 PF: > { %p591_p1 = scmp.ge.s32.totalorder %s692_s24, 2  ;;  %s475_s18 = sand.u32 1, %s680_s21  }
 0x116   : > { %s476_s26 = scalar_lea.sflag [#allocation3], %s475_s18 }
 0x117   : > { %p588_p2 = pnand %p591_p1, %p774_p6 }
 0x119   : > { %675 = dma.done.wait (!%p588_p2), %s476_s26, 1024  }
 0x11a   : > { %677 = vsyncadd (!%p588_p2), %s476_s26, 4294966272  ;;  %p16_p3 = scmp.ge.s32.totalorder %s757_s27, 4   ;;  %s880_s21 = smov %s684_s22 }
 0x11b   : > { %s881_s22 = smov %s688_s23  ;;  %s882_s23 = smov %s768_s30 }
 0x11c   : > { %s883_s24 = smov %s757_s27  ;;  %18 = sbr.rel (!%p16_p3) target bundleno = 3 (0x3), region = 79 }
 0x123   :  { %481 = vsyncpa [#allocation3], 1 }
 0x124   :  { %483 = vsyncpa [#allocation3 + $0x1], 1 }

</bundles_post_ra>
